<compile_context>
chip_gen: v7x
topology: tpu7x:2x2x1
jax: 0.10.0
libtpu: 0.0.40
codegen_flags: <defaults>
</compile_context>

<pallas_src>
import functools

import jax
import jax.numpy as jnp
from jax import lax
from jax.experimental import pallas as pl
from jax.experimental.pallas import tpu as pltpu


# ----------------------------------------------------------------------------- helpers
def _round_up(x, m):
    return (x + m - 1) // m * m


def _elu(x):
    # exp only on the clamped (<=0) branch so bf16 casts can never see inf.
    return jnp.where(x > 0, x, jnp.exp(jnp.minimum(x, 0.0)) - 1.0)


def _x_mask(H, W, Wp):
    """1.0 at big-grid positions that are interior of the (H+2)xWp x-grid."""
    R_m = (H + 2) * Wp
    r = jnp.arange(R_m)
    a, b = r // Wp, r % Wp
    return (((a >= 1) & (a <= H) & (b >= 1) & (b <= W))
            .astype(jnp.float32).reshape(R_m, 1))


def _o_mask(H, W, Wp):
    """1.0 at true image pixels for big-grid flat rows [2*Wp, 2*Wp + H*Wp + 8)."""
    R_ext = H * Wp + 8
    r = jnp.arange(R_ext) + 2 * Wp
    a, b = r // Wp, r % Wp
    return (((a >= 2) & (a < H + 2) & (b >= 2) & (b < W + 2))
            .astype(jnp.float32).reshape(R_ext, 1))


def _bcast_spec(shape):
    nd = len(shape)
    return pl.BlockSpec(shape, lambda n, _nd=nd: (0,) * _nd)


def _prep_big(x, H, W, Wp):
    """(N,H,W,C) -> flattened canonical big grid (N,(H+4)*Wp,C), image at (+2,+2)."""
    N, _, _, C = x.shape
    xp = jnp.pad(x, ((0, 0), (2, 2), (2, Wp - W - 2), (0, 0)))
    return xp.reshape(N, (H + 4) * Wp, C)


def _unprep_big(xb, H, W, Wp):
    N, _, C = xb.shape
    return xb.reshape(N, H + 4, Wp, C)[:, 2:2 + H, 2:2 + W, :]


# ----------------------------------------------------------------------------- kernels
def _u_block_kernel(u_ref, xmask_ref, omask_ref, w1_ref, b1_ref, w2_ref, b2_ref,
                    o_ref, ue_scr, xe_scr, *, H, C, Wp):
    """gated_resnet with down_shifted_conv2d (2x3 filter), skip_connection=0."""
    bf16, f32 = jnp.bfloat16, jnp.float32
    R_in = (H + 4) * Wp               # big-grid rows
    R_m = (H + 2) * Wp                # x (conv_input output) grid rows
    R_ext = H * Wp + 8                # gate rows: big-grid rows [2*Wp, (H+2)*Wp+8)
    shifts = [kh * Wp + kw for kh in range(2) for kw in range(3)]   # 2x3 taps

    # Stage 0: concat_elu halves of the input computed ONCE (not once per tap),
    # stored channel-concatenated so each tap below is a single K=2C matmul.
    ub = u_ref[...].astype(f32)
    ue_scr[...] = jnp.concatenate([_elu(ub), _elu(-ub)], axis=-1)

    # Stage 1: x = conv_input(concat_elu(u)) on the (H+2)xWp causal grid.
    def in_tap(k):
        s = shifts[k]
        return jnp.dot(ue_scr[s:s + R_m, :].astype(bf16), w1_ref[k],
                       preferred_element_type=f32)

    y = in_tap(0)
    for k in range(1, len(shifts)):
        y = y + in_tap(k)
    x = (y + b1_ref[...]) * xmask_ref[...]        # zero the causal border
    # TODO(synk): nn.Dropout2d(0.5) is stochastic in train mode; identity (eval) here.

    # concat_elu(x) halves stored once behind an 8-row zero halo so the gate block
    # can start at the sublane-aligned big-grid offset 2*Wp.
    xe_scr[0:8, :] = jnp.zeros((8, 2 * C), f32)
    xe_scr[8:8 + R_m, :] = jnp.concatenate([_elu(x), _elu(-x)], axis=-1)

    # Stage 2: fused gate g = conv_out(concat_elu(x)), output width 2C.
    # Gate row q is output pixel r = q - 2; xe is stored at +8 -> slice start 6+s.
    def out_tap(k):
        s = 6 + shifts[k]
        return jnp.dot(xe_scr[s:s + R_ext, :].astype(bf16), w2_ref[k],
                       preferred_element_type=f32)

    g = out_tap(0)
    for k in range(1, len(shifts)):
        g = g + out_tap(k)
    g = g + b2_ref[...]

    # Residual + gate; omask zeroes everything that is not a true image pixel so
    # the stored block keeps an exact zero border for the next resnet block.
    res0 = u_ref[2 * Wp:2 * Wp + R_ext, :].astype(f32)
    res = (res0 + g[:, :C] * jax.nn.sigmoid(g[:, C:])) * omask_ref[...]

    o_ref[0:2 * Wp, :] = jnp.zeros((2 * Wp, C), o_ref.dtype)
    o_ref[2 * Wp:2 * Wp + R_ext, :] = res.astype(o_ref.dtype)
    o_ref[2 * Wp + R_ext:R_in, :] = jnp.zeros((R_in - 2 * Wp - R_ext, C), o_ref.dtype)


def _ul_block_kernel(ul_ref, u_ref, xmask_ref, omask_ref, w1_ref, b1_ref,
                     nw_ref, nb_ref, w2_ref, b2_ref, o_ref, ue_scr, xe_scr,
                     *, H, C, Wp):
    """gated_resnet with down_right_shifted_conv2d (2x2 filter), skip_connection=1."""
    bf16, f32 = jnp.bfloat16, jnp.float32
    R_in = (H + 4) * Wp
    R_m = (H + 2) * Wp
    R_ext = H * Wp + 8
    shifts = [kh * Wp + kw for kh in range(2) for kw in range(2)]   # 2x2 taps

    ub = ul_ref[...].astype(f32)
    ue_scr[...] = jnp.concatenate([_elu(ub), _elu(-ub)], axis=-1)

    def in_tap(k):
        s = shifts[k]
        return jnp.dot(ue_scr[s:s + R_m, :].astype(bf16), w1_ref[k],
                       preferred_element_type=f32)

    y = in_tap(0)
    for k in range(1, len(shifts)):
        y = y + in_tap(k)

    # Skip connection: += nin(concat_elu(u)); u is read straight from the canonical
    # big grid at a flat offset of Wp+1 (no separately padded copy needed).
    ua = u_ref[Wp + 1:Wp + 1 + R_m, :].astype(f32)
    uac = jnp.concatenate([_elu(ua), _elu(-ua)], axis=-1).astype(bf16)
    y = y + jnp.dot(uac, nw_ref[...], preferred_element_type=f32)

    x = (y + b1_ref[...] + nb_ref[...]) * xmask_ref[...]
    # TODO(synk): nn.Dropout2d(0.5) is stochastic in train mode; identity (eval) here.

    xe_scr[0:8, :] = jnp.zeros((8, 2 * C), f32)
    xe_scr[8:8 + R_m, :] = jnp.concatenate([_elu(x), _elu(-x)], axis=-1)

    def out_tap(k):
        s = 6 + shifts[k]
        return jnp.dot(xe_scr[s:s + R_ext, :].astype(bf16), w2_ref[k],
                       preferred_element_type=f32)

    g = out_tap(0)
    for k in range(1, len(shifts)):
        g = g + out_tap(k)
    g = g + b2_ref[...]

    res0 = ul_ref[2 * Wp:2 * Wp + R_ext, :].astype(f32)
    res = (res0 + g[:, :C] * jax.nn.sigmoid(g[:, C:])) * omask_ref[...]

    o_ref[0:2 * Wp, :] = jnp.zeros((2 * Wp, C), o_ref.dtype)
    o_ref[2 * Wp:2 * Wp + R_ext, :] = res.astype(o_ref.dtype)
    o_ref[2 * Wp + R_ext:R_in, :] = jnp.zeros((R_in - 2 * Wp - R_ext, C), o_ref.dtype)


# ----------------------------------------------------------------------------- wrappers
def gated_resnet_u_big(u_big, p, *, H, W, C, Wp):
    N, R_in, _ = u_big.shape
    R_m = (H + 2) * Wp
    KH, KW = p["w1"].shape[:2]
    w1 = p["w1"].reshape(KH * KW, 2 * C, C).astype(jnp.bfloat16)
    w2 = p["w2"].reshape(KH * KW, 2 * C, 2 * C).astype(jnp.bfloat16)
    b1 = p["b1"].astype(jnp.float32)
    b2 = p["b2"].astype(jnp.float32)
    xmask = _x_mask(H, W, Wp)
    omask = _o_mask(H, W, Wp)

    kernel = functools.partial(_u_block_kernel, H=H, C=C, Wp=Wp)
    return pl.pallas_call(
        kernel,
        out_shape=jax.ShapeDtypeStruct((N, R_in, C), u_big.dtype),
        grid=(N,),
        in_specs=[
            pl.BlockSpec((None, R_in, C), lambda n: (n, 0, 0)),
            _bcast_spec(xmask.shape), _bcast_spec(omask.shape),
            _bcast_spec(w1.shape), _bcast_spec(b1.shape),
            _bcast_spec(w2.shape), _bcast_spec(b2.shape),
        ],
        out_specs=pl.BlockSpec((None, R_in, C), lambda n: (n, 0, 0)),
        scratch_shapes=[pltpu.VMEM((R_in, 2 * C), jnp.float32),
                        pltpu.VMEM((R_m + 8, 2 * C), jnp.float32)],
        compiler_params=pltpu.CompilerParams(dimension_semantics=("parallel",)),
    )(u_big, xmask, omask, w1, b1, w2, b2)


def gated_resnet_ul_big(ul_big, u_big, p, *, H, W, C, Wp):
    N, R_in, _ = ul_big.shape
    R_m = (H + 2) * Wp
    KH, KW = p["w1"].shape[:2]
    w1 = p["w1"].reshape(KH * KW, 2 * C, C).astype(jnp.bfloat16)
    w2 = p["w2"].reshape(KH * KW, 2 * C, 2 * C).astype(jnp.bfloat16)
    nw = p["nin_w"].astype(jnp.bfloat16)
    b1 = p["b1"].astype(jnp.float32)
    nb = p["nin_b"].astype(jnp.float32)
    b2 = p["b2"].astype(jnp.float32)
    xmask = _x_mask(H, W, Wp)
    omask = _o_mask(H, W, Wp)

    kernel = functools.partial(_ul_block_kernel, H=H, C=C, Wp=Wp)
    return pl.pallas_call(
        kernel,
        out_shape=jax.ShapeDtypeStruct((N, R_in, C), ul_big.dtype),
        grid=(N,),
        in_specs=[
            pl.BlockSpec((None, R_in, C), lambda n: (n, 0, 0)),
            pl.BlockSpec((None, R_in, C), lambda n: (n, 0, 0)),
            _bcast_spec(xmask.shape), _bcast_spec(omask.shape),
            _bcast_spec(w1.shape), _bcast_spec(b1.shape),
            _bcast_spec(nw.shape), _bcast_spec(nb.shape),
            _bcast_spec(w2.shape), _bcast_spec(b2.shape),
        ],
        out_specs=pl.BlockSpec((None, R_in, C), lambda n: (n, 0, 0)),
        scratch_shapes=[pltpu.VMEM((R_in, 2 * C), jnp.float32),
                        pltpu.VMEM((R_m + 8, 2 * C), jnp.float32)],
        compiler_params=pltpu.CompilerParams(dimension_semantics=("parallel",)),
    )(ul_big, u_big, xmask, omask, w1, b1, nw, nb, w2, b2)


@jax.jit
def pixelcnn_layer_up(u, ul, params):
    """Forward of PixelCNNLayer_up: returns (u_list, ul_list)."""
    N, H, W, C = u.shape
    Wp = _round_up(W + 4, 8)          # sublane-aligned row stride of the big grid
    u_b = _prep_big(u, H, W, Wp)
    ul_b = _prep_big(ul, H, W, Wp)
    u_list, ul_list = [], []
    for blk in params:
        u_b = gated_resnet_u_big(u_b, blk["u"], H=H, W=W, C=C, Wp=Wp)
        ul_b = gated_resnet_ul_big(ul_b, u_b, blk["ul"], H=H, W=W, C=C, Wp=Wp)
        u_list.append(_unprep_big(u_b, H, W, Wp))
        ul_list.append(_unprep_big(ul_b, H, W, Wp))
    return u_list, ul_list


# ----------------------------------------------------------------------------- params
def init_params(key, nr_resnet, nr_filters, scale=0.05):
    C = nr_filters
    params = []
    for i in range(nr_resnet):
        ks = jax.random.split(jax.random.fold_in(key, i), 10)
        norm = lambda k, shp: scale * jax.random.normal(k, shp, jnp.float32)
        params.append({
            "u": {                                   # down_shifted_conv2d stream
                "w1": norm(ks[0], (2, 3, 2 * C, C)),      # conv_input  (2C -> C)
                "b1": norm(ks[1], (1, C)),
                "w2": norm(ks[2], (2, 3, 2 * C, 2 * C)),  # conv_out    (2C -> 2C)
                "b2": norm(ks[3], (1, 2 * C)),
            },
            "ul": {                                  # down_right_shifted_conv2d stream
                "w1": norm(ks[4], (2, 2, 2 * C, C)),
                "b1": norm(ks[5], (1, C)),
                "nin_w": norm(ks[6], (2 * C, C)),         # nin_skip (Linear 2C -> C)
                "nin_b": norm(ks[7], (1, C)),
                "w2": norm(ks[8], (2, 2, 2 * C, 2 * C)),
                "b2": norm(ks[9], (1, 2 * C)),
            },
        })
    return params


# ----------------------------------------------------------------------------- pure-JAX reference
def _ref_concat_elu(x):
    return _elu(jnp.concatenate([x, -x], axis=-1))


def _ref_shifted_conv(x, w_hwio, b, pad_hw, op_dtype):
    (pt, pb), (pleft, pright) = pad_hw
    xp = jnp.pad(x, ((0, 0), (pt, pb), (pleft, pright), (0, 0)))
    y = lax.conv_general_dilated(xp.astype(op_dtype), w_hwio.astype(op_dtype),
                                 (1, 1), "VALID",
                                 dimension_numbers=("NHWC", "HWIO", "NHWC"),
                                 preferred_element_type=jnp.float32)
    return y + b.reshape(1, 1, 1, -1)


def _ref_gated_resnet_u(u, p, op_dtype):
    C = u.shape[-1]
    x = _ref_shifted_conv(_ref_concat_elu(u), p["w1"], p["b1"], ((1, 0), (1, 1)), op_dtype)
    x = _ref_concat_elu(x)
    x = _ref_shifted_conv(x, p["w2"], p["b2"], ((1, 0), (1, 1)), op_dtype)
    return u + x[..., :C] * jax.nn.sigmoid(x[..., C:])


def _ref_gated_resnet_ul(ul, u, p, op_dtype):
    C = ul.shape[-1]
    x = _ref_shifted_conv(_ref_concat_elu(ul), p["w1"], p["b1"], ((1, 0), (1, 0)), op_dtype)
    ue = _ref_concat_elu(u).astype(op_dtype)
    x = x + jnp.dot(ue, p["nin_w"].astype(op_dtype),
                    preferred_element_type=jnp.float32) + p["nin_b"].reshape(1, 1, 1, -1)
    x = _ref_concat_elu(x)
    x = _ref_shifted_conv(x, p["w2"], p["b2"], ((1, 0), (1, 0)), op_dtype)
    return ul + x[..., :C] * jax.nn.sigmoid(x[..., C:])


def pixelcnn_layer_up_ref(u, ul, params, op_dtype=jnp.float32):
    u_list, ul_list = [], []
    for blk in params:
        u = _ref_gated_resnet_u(u, blk["u"], op_dtype)
        ul = _ref_gated_resnet_ul(ul, u, blk["ul"], op_dtype)
        u_list.append(u)
        ul_list.append(ul)
    return u_list, ul_list


# ----------------------------------------------------------------------------- main
if __name__ == "__main__":
    nr_resnet, nr_filters = 2, 32
    N, H, W = 2, 8, 8

    key = jax.random.PRNGKey(0)
    ku, kul, kp = jax.random.split(key, 3)
    u = jax.random.normal(ku, (N, H, W, nr_filters), jnp.float32)
    ul = jax.random.normal(kul, (N, H, W, nr_filters), jnp.float32)
    params = init_params(kp, nr_resnet, nr_filters)

    u_list, ul_list = pixelcnn_layer_up(u, ul, params)
    jax.block_until_ready(u_list)
    jax.block_until_ready(ul_list)

    # Tight check against a reference using the same bf16 matmul operands
    # (f32 accumulation), i.e. matched numerics: catches any structural bug.
    u_bf, ul_bf = pixelcnn_layer_up_ref(u, ul, params, op_dtype=jnp.bfloat16)
    for got, want in zip(u_list + ul_list, u_bf + ul_bf):
        err = float(jnp.max(jnp.abs(got - want)))
        assert err < 5e-3, f"mismatch vs bf16-operand reference: max abs err {err}"

    # Loose sanity check against the full-f32 reference (kernel intentionally
    # uses bf16 MXU operands for throughput).
    u_f32, ul_f32 = pixelcnn_layer_up_ref(u, ul, params, op_dtype=jnp.float32)
    for got, want in zip(u_list + ul_list, u_f32 + ul_f32):
        err = float(jnp.max(jnp.abs(got - want)))
        assert err < 1e-1, f"mismatch vs f32 reference: max abs err {err}"

    print("KERNEL_OK")
</pallas_src>

<mosaic_0001>
module attributes {stable_mosaic.version = 11 : i64} {
  func.func @_u_block_kernel(%arg0: i32, %arg1: memref<1x192x32xf32, #tpu.memory_space<vmem>>, %arg2: memref<160x1xf32, #tpu.memory_space<vmem>>, %arg3: memref<136x1xf32, #tpu.memory_space<vmem>>, %arg4: memref<6x64x32xbf16, #tpu.memory_space<vmem>>, %arg5: memref<1x32xf32, #tpu.memory_space<vmem>>, %arg6: memref<6x64x64xbf16, #tpu.memory_space<vmem>>, %arg7: memref<1x64xf32, #tpu.memory_space<vmem>>, %arg8: memref<1x192x32xf32, #tpu.memory_space<vmem>>, %arg9: memref<192x64xf32, #tpu.memory_space<vmem>>, %arg10: memref<168x64xf32, #tpu.memory_space<vmem>>) attributes {dimension_semantics = [#tpu.dimension_semantics<parallel>], iteration_bounds = array<i64: 2>, scalar_prefetch = 0 : i64, scratch_operands = 2 : i64, tpu.core_type = #tpu.core_type<tc>, window_params = [{transform_indices = @transform_0, window_bounds = array<i64: 1, 192, 32>}, {pipeline_mode = #tpu.pipeline_mode<synchronous>, transform_indices = @transform_1, window_bounds = array<i64: 160, 1>}, {pipeline_mode = #tpu.pipeline_mode<synchronous>, transform_indices = @transform_2, window_bounds = array<i64: 136, 1>}, {pipeline_mode = #tpu.pipeline_mode<synchronous>, transform_indices = @transform_3, window_bounds = array<i64: 6, 64, 32>}, {pipeline_mode = #tpu.pipeline_mode<synchronous>, transform_indices = @transform_4, window_bounds = array<i64: 1, 32>}, {pipeline_mode = #tpu.pipeline_mode<synchronous>, transform_indices = @transform_5, window_bounds = array<i64: 6, 64, 64>}, {pipeline_mode = #tpu.pipeline_mode<synchronous>, transform_indices = @transform_6, window_bounds = array<i64: 1, 64>}, {transform_indices = @transform_7, window_bounds = array<i64: 1, 192, 32>}]} {
    %c0 = arith.constant 0 : index
    %c0_0 = arith.constant 0 : index
    %c0_1 = arith.constant 0 : index
    %0 = vector.load %arg1[%c0, %c0_0, %c0_1] : memref<1x192x32xf32, #tpu.memory_space<vmem>>, vector<1x192x32xf32>
    %1 = vector.shape_cast %0 : vector<1x192x32xf32> to vector<192x32xf32>
    %cst = arith.constant 0.000000e+00 : f32
    %2 = vector.broadcast %cst : f32 to vector<192x32xf32>
    %3 = arith.cmpf ogt, %1, %2 : vector<192x32xf32>
    %cst_2 = arith.constant 0.000000e+00 : f32
    %4 = vector.broadcast %cst_2 : f32 to vector<192x32xf32>
    %5 = arith.minimumf %1, %4 : vector<192x32xf32>
    %6 = math.exp %5 : vector<192x32xf32>
    %cst_3 = arith.constant 1.000000e+00 : f32
    %7 = vector.broadcast %cst_3 : f32 to vector<192x32xf32>
    %8 = arith.subf %6, %7 : vector<192x32xf32>
    %9 = arith.select %3, %1, %8 : vector<192x32xi1>, vector<192x32xf32>
    %cst_4 = arith.constant 0.000000e+00 : f32
    %10 = vector.broadcast %cst_4 : f32 to vector<192x32xf32>
    %11 = arith.subf %10, %1 : vector<192x32xf32>
    %cst_5 = arith.constant 0.000000e+00 : f32
    %12 = vector.broadcast %cst_5 : f32 to vector<192x32xf32>
    %13 = arith.cmpf ogt, %11, %12 : vector<192x32xf32>
    %cst_6 = arith.constant 0.000000e+00 : f32
    %14 = vector.broadcast %cst_6 : f32 to vector<192x32xf32>
    %15 = arith.minimumf %11, %14 : vector<192x32xf32>
    %16 = math.exp %15 : vector<192x32xf32>
    %cst_7 = arith.constant 1.000000e+00 : f32
    %17 = vector.broadcast %cst_7 : f32 to vector<192x32xf32>
    %18 = arith.subf %16, %17 : vector<192x32xf32>
    %19 = arith.select %13, %11, %18 : vector<192x32xi1>, vector<192x32xf32>
    %20 = tpu.concatenate %9, %19 in 1 : vector<192x32xf32>, vector<192x32xf32> -> vector<192x64xf32>
    %c0_8 = arith.constant 0 : index
    %c0_9 = arith.constant 0 : index
    %21 = vector.load %arg9[%c0_8, %c0_9] : memref<192x64xf32, #tpu.memory_space<vmem>>, vector<192x64xf32>
    tpu.vector_store %arg9[%c0_8, %c0_9], %20 {strides = array<i32>} : memref<192x64xf32, #tpu.memory_space<vmem>>, vector<192x64xf32>,
    %c0_10 = arith.constant 0 : index
    %c0_11 = arith.constant 0 : index
    %22 = vector.load %arg9[%c0_10, %c0_11] : memref<192x64xf32, #tpu.memory_space<vmem>>, vector<160x64xf32>
    %23 = arith.truncf %22 : vector<160x64xf32> to vector<160x64xbf16>
    %c0_12 = arith.constant 0 : index
    %c0_13 = arith.constant 0 : index
    %c0_14 = arith.constant 0 : index
    %24 = vector.load %arg4[%c0_12, %c0_13, %c0_14] : memref<6x64x32xbf16, #tpu.memory_space<vmem>>, vector<1x64x32xbf16>
    %25 = vector.shape_cast %24 : vector<1x64x32xbf16> to vector<64x32xbf16>
    %cst_15 = arith.constant dense<0.000000e+00> : vector<160x32xf32>
    %26 = tpu.matmul %23, %25, %cst_15 {dimension_numbers = #tpu.dot_dimension_numbers<[1], [0], [0], [1], [0, 0, 1, 1], [], []>} : vector<160x64xbf16>, vector<64x32xbf16>, vector<160x32xf32> -> vector<160x32xf32>
    %c1 = arith.constant 1 : index
    %c0_16 = arith.constant 0 : index
    %27 = vector.load %arg9[%c1, %c0_16] : memref<192x64xf32, #tpu.memory_space<vmem>>, vector<160x64xf32>
    %28 = arith.truncf %27 : vector<160x64xf32> to vector<160x64xbf16>
    %c1_17 = arith.constant 1 : index
    %c0_18 = arith.constant 0 : index
    %c0_19 = arith.constant 0 : index
    %29 = vector.load %arg4[%c1_17, %c0_18, %c0_19] : memref<6x64x32xbf16, #tpu.memory_space<vmem>>, vector<1x64x32xbf16>
    %30 = vector.shape_cast %29 : vector<1x64x32xbf16> to vector<64x32xbf16>
    %cst_20 = arith.constant dense<0.000000e+00> : vector<160x32xf32>
    %31 = tpu.matmul %28, %30, %cst_20 {dimension_numbers = #tpu.dot_dimension_numbers<[1], [0], [0], [1], [0, 0, 1, 1], [], []>} : vector<160x64xbf16>, vector<64x32xbf16>, vector<160x32xf32> -> vector<160x32xf32>
    %32 = arith.addf %26, %31 : vector<160x32xf32>
    %c2 = arith.constant 2 : index
    %c0_21 = arith.constant 0 : index
    %33 = vector.load %arg9[%c2, %c0_21] : memref<192x64xf32, #tpu.memory_space<vmem>>, vector<160x64xf32>
    %34 = arith.truncf %33 : vector<160x64xf32> to vector<160x64xbf16>
    %c2_22 = arith.constant 2 : index
    %c0_23 = arith.constant 0 : index
    %c0_24 = arith.constant 0 : index
    %35 = vector.load %arg4[%c2_22, %c0_23, %c0_24] : memref<6x64x32xbf16, #tpu.memory_space<vmem>>, vector<1x64x32xbf16>
    %36 = vector.shape_cast %35 : vector<1x64x32xbf16> to vector<64x32xbf16>
    %cst_25 = arith.constant dense<0.000000e+00> : vector<160x32xf32>
    %37 = tpu.matmul %34, %36, %cst_25 {dimension_numbers = #tpu.dot_dimension_numbers<[1], [0], [0], [1], [0, 0, 1, 1], [], []>} : vector<160x64xbf16>, vector<64x32xbf16>, vector<160x32xf32> -> vector<160x32xf32>
    %38 = arith.addf %32, %37 : vector<160x32xf32>
    %c16 = arith.constant 16 : index
    %c0_26 = arith.constant 0 : index
    %39 = vector.load %arg9[%c16, %c0_26] : memref<192x64xf32, #tpu.memory_space<vmem>>, vector<160x64xf32>
    %40 = arith.truncf %39 : vector<160x64xf32> to vector<160x64xbf16>
    %c3 = arith.constant 3 : index
    %c0_27 = arith.constant 0 : index
    %c0_28 = arith.constant 0 : index
    %41 = vector.load %arg4[%c3, %c0_27, %c0_28] : memref<6x64x32xbf16, #tpu.memory_space<vmem>>, vector<1x64x32xbf16>
    %42 = vector.shape_cast %41 : vector<1x64x32xbf16> to vector<64x32xbf16>
    %cst_29 = arith.constant dense<0.000000e+00> : vector<160x32xf32>
    %43 = tpu.matmul %40, %42, %cst_29 {dimension_numbers = #tpu.dot_dimension_numbers<[1], [0], [0], [1], [0, 0, 1, 1], [], []>} : vector<160x64xbf16>, vector<64x32xbf16>, vector<160x32xf32> -> vector<160x32xf32>
    %44 = arith.addf %38, %43 : vector<160x32xf32>
    %c17 = arith.constant 17 : index
    %c0_30 = arith.constant 0 : index
    %45 = vector.load %arg9[%c17, %c0_30] : memref<192x64xf32, #tpu.memory_space<vmem>>, vector<160x64xf32>
    %46 = arith.truncf %45 : vector<160x64xf32> to vector<160x64xbf16>
    %c4 = arith.constant 4 : index
    %c0_31 = arith.constant 0 : index
    %c0_32 = arith.constant 0 : index
    %47 = vector.load %arg4[%c4, %c0_31, %c0_32] : memref<6x64x32xbf16, #tpu.memory_space<vmem>>, vector<1x64x32xbf16>
    %48 = vector.shape_cast %47 : vector<1x64x32xbf16> to vector<64x32xbf16>
    %cst_33 = arith.constant dense<0.000000e+00> : vector<160x32xf32>
    %49 = tpu.matmul %46, %48, %cst_33 {dimension_numbers = #tpu.dot_dimension_numbers<[1], [0], [0], [1], [0, 0, 1, 1], [], []>} : vector<160x64xbf16>, vector<64x32xbf16>, vector<160x32xf32> -> vector<160x32xf32>
    %50 = arith.addf %44, %49 : vector<160x32xf32>
    %c18 = arith.constant 18 : index
    %c0_34 = arith.constant 0 : index
    %51 = vector.load %arg9[%c18, %c0_34] : memref<192x64xf32, #tpu.memory_space<vmem>>, vector<160x64xf32>
    %52 = arith.truncf %51 : vector<160x64xf32> to vector<160x64xbf16>
    %c5 = arith.constant 5 : index
    %c0_35 = arith.constant 0 : index
    %c0_36 = arith.constant 0 : index
    %53 = vector.load %arg4[%c5, %c0_35, %c0_36] : memref<6x64x32xbf16, #tpu.memory_space<vmem>>, vector<1x64x32xbf16>
    %54 = vector.shape_cast %53 : vector<1x64x32xbf16> to vector<64x32xbf16>
    %cst_37 = arith.constant dense<0.000000e+00> : vector<160x32xf32>
    %55 = tpu.matmul %52, %54, %cst_37 {dimension_numbers = #tpu.dot_dimension_numbers<[1], [0], [0], [1], [0, 0, 1, 1], [], []>} : vector<160x64xbf16>, vector<64x32xbf16>, vector<160x32xf32> -> vector<160x32xf32>
    %56 = arith.addf %50, %55 : vector<160x32xf32>
    %c0_38 = arith.constant 0 : index
    %c0_39 = arith.constant 0 : index
    %57 = vector.load %arg5[%c0_38, %c0_39] : memref<1x32xf32, #tpu.memory_space<vmem>>, vector<1x32xf32>
    %58 = vector.broadcast %57 : vector<1x32xf32> to vector<160x32xf32>
    %59 = arith.addf %56, %58 : vector<160x32xf32>
    %c0_40 = arith.constant 0 : index
    %c0_41 = arith.constant 0 : index
    %60 = vector.load %arg2[%c0_40, %c0_41] : memref<160x1xf32, #tpu.memory_space<vmem>>, vector<160x1xf32>
    %61 = vector.broadcast %60 : vector<160x1xf32> to vector<160x32xf32>
    %62 = arith.mulf %59, %61 : vector<160x32xf32>
    %cst_42 = arith.constant 0.000000e+00 : f32
    %63 = vector.broadcast %cst_42 : f32 to vector<8x64xf32>
    %c0_43 = arith.constant 0 : index
    %c0_44 = arith.constant 0 : index
    %64 = vector.load %arg10[%c0_43, %c0_44] : memref<168x64xf32, #tpu.memory_space<vmem>>, vector<8x64xf32>
    tpu.vector_store %arg10[%c0_43, %c0_44], %63 {strides = array<i32>} : memref<168x64xf32, #tpu.memory_space<vmem>>, vector<8x64xf32>,
    %cst_45 = arith.constant 0.000000e+00 : f32
    %65 = vector.broadcast %cst_45 : f32 to vector<160x32xf32>
    %66 = arith.cmpf ogt, %62, %65 : vector<160x32xf32>
    %cst_46 = arith.constant 0.000000e+00 : f32
    %67 = vector.broadcast %cst_46 : f32 to vector<160x32xf32>
    %68 = arith.minimumf %62, %67 : vector<160x32xf32>
    %69 = math.exp %68 : vector<160x32xf32>
    %cst_47 = arith.constant 1.000000e+00 : f32
    %70 = vector.broadcast %cst_47 : f32 to vector<160x32xf32>
    %71 = arith.subf %69, %70 : vector<160x32xf32>
    %72 = arith.select %66, %62, %71 : vector<160x32xi1>, vector<160x32xf32>
    %cst_48 = arith.constant 0.000000e+00 : f32
    %73 = vector.broadcast %cst_48 : f32 to vector<160x32xf32>
    %74 = arith.subf %73, %62 : vector<160x32xf32>
    %cst_49 = arith.constant 0.000000e+00 : f32
    %75 = vector.broadcast %cst_49 : f32 to vector<160x32xf32>
    %76 = arith.cmpf ogt, %74, %75 : vector<160x32xf32>
    %cst_50 = arith.constant 0.000000e+00 : f32
    %77 = vector.broadcast %cst_50 : f32 to vector<160x32xf32>
    %78 = arith.minimumf %74, %77 : vector<160x32xf32>
    %79 = math.exp %78 : vector<160x32xf32>
    %cst_51 = arith.constant 1.000000e+00 : f32
    %80 = vector.broadcast %cst_51 : f32 to vector<160x32xf32>
    %81 = arith.subf %79, %80 : vector<160x32xf32>
    %82 = arith.select %76, %74, %81 : vector<160x32xi1>, vector<160x32xf32>
    %83 = tpu.concatenate %72, %82 in 1 : vector<160x32xf32>, vector<160x32xf32> -> vector<160x64xf32>
    %c8 = arith.constant 8 : index
    %c0_52 = arith.constant 0 : index
    %84 = vector.load %arg10[%c8, %c0_52] : memref<168x64xf32, #tpu.memory_space<vmem>>, vector<160x64xf32>
    tpu.vector_store %arg10[%c8, %c0_52], %83 {strides = array<i32>} : memref<168x64xf32, #tpu.memory_space<vmem>>, vector<160x64xf32>,
    %c6 = arith.constant 6 : index
    %c0_53 = arith.constant 0 : index
    %85 = vector.load %arg10[%c6, %c0_53] : memref<168x64xf32, #tpu.memory_space<vmem>>, vector<136x64xf32>
    %86 = arith.truncf %85 : vector<136x64xf32> to vector<136x64xbf16>
    %c0_54 = arith.constant 0 : index
    %c0_55 = arith.constant 0 : index
    %c0_56 = arith.constant 0 : index
    %87 = vector.load %arg6[%c0_54, %c0_55, %c0_56] : memref<6x64x64xbf16, #tpu.memory_space<vmem>>, vector<1x64x64xbf16>
    %88 = vector.shape_cast %87 : vector<1x64x64xbf16> to vector<64x64xbf16>
    %cst_57 = arith.constant dense<0.000000e+00> : vector<136x64xf32>
    %89 = tpu.matmul %86, %88, %cst_57 {dimension_numbers = #tpu.dot_dimension_numbers<[1], [0], [0], [1], [0, 0, 1, 1], [], []>} : vector<136x64xbf16>, vector<64x64xbf16>, vector<136x64xf32> -> vector<136x64xf32>
    %c7 = arith.constant 7 : index
    %c0_58 = arith.constant 0 : index
    %90 = vector.load %arg10[%c7, %c0_58] : memref<168x64xf32, #tpu.memory_space<vmem>>, vector<136x64xf32>
    %91 = arith.truncf %90 : vector<136x64xf32> to vector<136x64xbf16>
    %c1_59 = arith.constant 1 : index
    %c0_60 = arith.constant 0 : index
    %c0_61 = arith.constant 0 : index
    %92 = vector.load %arg6[%c1_59, %c0_60, %c0_61] : memref<6x64x64xbf16, #tpu.memory_space<vmem>>, vector<1x64x64xbf16>
    %93 = vector.shape_cast %92 : vector<1x64x64xbf16> to vector<64x64xbf16>
    %cst_62 = arith.constant dense<0.000000e+00> : vector<136x64xf32>
    %94 = tpu.matmul %91, %93, %cst_62 {dimension_numbers = #tpu.dot_dimension_numbers<[1], [0], [0], [1], [0, 0, 1, 1], [], []>} : vector<136x64xbf16>, vector<64x64xbf16>, vector<136x64xf32> -> vector<136x64xf32>
    %95 = arith.addf %89, %94 : vector<136x64xf32>
    %c8_63 = arith.constant 8 : index
    %c0_64 = arith.constant 0 : index
    %96 = vector.load %arg10[%c8_63, %c0_64] : memref<168x64xf32, #tpu.memory_space<vmem>>, vector<136x64xf32>
    %97 = arith.truncf %96 : vector<136x64xf32> to vector<136x64xbf16>
    %c2_65 = arith.constant 2 : index
    %c0_66 = arith.constant 0 : index
    %c0_67 = arith.constant 0 : index
    %98 = vector.load %arg6[%c2_65, %c0_66, %c0_67] : memref<6x64x64xbf16, #tpu.memory_space<vmem>>, vector<1x64x64xbf16>
    %99 = vector.shape_cast %98 : vector<1x64x64xbf16> to vector<64x64xbf16>
    %cst_68 = arith.constant dense<0.000000e+00> : vector<136x64xf32>
    %100 = tpu.matmul %97, %99, %cst_68 {dimension_numbers = #tpu.dot_dimension_numbers<[1], [0], [0], [1], [0, 0, 1, 1], [], []>} : vector<136x64xbf16>, vector<64x64xbf16>, vector<136x64xf32> -> vector<136x64xf32>
    %101 = arith.addf %95, %100 : vector<136x64xf32>
    %c22 = arith.constant 22 : index
    %c0_69 = arith.constant 0 : index
    %102 = vector.load %arg10[%c22, %c0_69] : memref<168x64xf32, #tpu.memory_space<vmem>>, vector<136x64xf32>
    %103 = arith.truncf %102 : vector<136x64xf32> to vector<136x64xbf16>
    %c3_70 = arith.constant 3 : index
    %c0_71 = arith.constant 0 : index
    %c0_72 = arith.constant 0 : index
    %104 = vector.load %arg6[%c3_70, %c0_71, %c0_72] : memref<6x64x64xbf16, #tpu.memory_space<vmem>>, vector<1x64x64xbf16>
    %105 = vector.shape_cast %104 : vector<1x64x64xbf16> to vector<64x64xbf16>
    %cst_73 = arith.constant dense<0.000000e+00> : vector<136x64xf32>
    %106 = tpu.matmul %103, %105, %cst_73 {dimension_numbers = #tpu.dot_dimension_numbers<[1], [0], [0], [1], [0, 0, 1, 1], [], []>} : vector<136x64xbf16>, vector<64x64xbf16>, vector<136x64xf32> -> vector<136x64xf32>
    %107 = arith.addf %101, %106 : vector<136x64xf32>
    %c23 = arith.constant 23 : index
    %c0_74 = arith.constant 0 : index
    %108 = vector.load %arg10[%c23, %c0_74] : memref<168x64xf32, #tpu.memory_space<vmem>>, vector<136x64xf32>
    %109 = arith.truncf %108 : vector<136x64xf32> to vector<136x64xbf16>
    %c4_75 = arith.constant 4 : index
    %c0_76 = arith.constant 0 : index
    %c0_77 = arith.constant 0 : index
    %110 = vector.load %arg6[%c4_75, %c0_76, %c0_77] : memref<6x64x64xbf16, #tpu.memory_space<vmem>>, vector<1x64x64xbf16>
    %111 = vector.shape_cast %110 : vector<1x64x64xbf16> to vector<64x64xbf16>
    %cst_78 = arith.constant dense<0.000000e+00> : vector<136x64xf32>
    %112 = tpu.matmul %109, %111, %cst_78 {dimension_numbers = #tpu.dot_dimension_numbers<[1], [0], [0], [1], [0, 0, 1, 1], [], []>} : vector<136x64xbf16>, vector<64x64xbf16>, vector<136x64xf32> -> vector<136x64xf32>
    %113 = arith.addf %107, %112 : vector<136x64xf32>
    %c24 = arith.constant 24 : index
    %c0_79 = arith.constant 0 : index
    %114 = vector.load %arg10[%c24, %c0_79] : memref<168x64xf32, #tpu.memory_space<vmem>>, vector<136x64xf32>
    %115 = arith.truncf %114 : vector<136x64xf32> to vector<136x64xbf16>
    %c5_80 = arith.constant 5 : index
    %c0_81 = arith.constant 0 : index
    %c0_82 = arith.constant 0 : index
    %116 = vector.load %arg6[%c5_80, %c0_81, %c0_82] : memref<6x64x64xbf16, #tpu.memory_space<vmem>>, vector<1x64x64xbf16>
    %117 = vector.shape_cast %116 : vector<1x64x64xbf16> to vector<64x64xbf16>
    %cst_83 = arith.constant dense<0.000000e+00> : vector<136x64xf32>
    %118 = tpu.matmul %115, %117, %cst_83 {dimension_numbers = #tpu.dot_dimension_numbers<[1], [0], [0], [1], [0, 0, 1, 1], [], []>} : vector<136x64xbf16>, vector<64x64xbf16>, vector<136x64xf32> -> vector<136x64xf32>
    %119 = arith.addf %113, %118 : vector<136x64xf32>
    %c0_84 = arith.constant 0 : index
    %c0_85 = arith.constant 0 : index
    %120 = vector.load %arg7[%c0_84, %c0_85] : memref<1x64xf32, #tpu.memory_space<vmem>>, vector<1x64xf32>
    %121 = vector.broadcast %120 : vector<1x64xf32> to vector<136x64xf32>
    %122 = arith.addf %119, %121 : vector<136x64xf32>
    %c0_86 = arith.constant 0 : index
    %c32 = arith.constant 32 : index
    %c0_87 = arith.constant 0 : index
    %123 = vector.load %arg1[%c0_86, %c32, %c0_87] : memref<1x192x32xf32, #tpu.memory_space<vmem>>, vector<1x136x32xf32>
    %124 = vector.shape_cast %123 : vector<1x136x32xf32> to vector<136x32xf32>
    %125 = vector.extract_strided_slice %122 {offsets = [0, 0], sizes = [136, 32], strides = [1, 1]} : vector<136x64xf32> to vector<136x32xf32>
    %126 = vector.extract_strided_slice %122 {offsets = [0, 32], sizes = [136, 32], strides = [1, 1]} : vector<136x64xf32> to vector<136x32xf32>
    %127 = arith.negf %126 : vector<136x32xf32>
    %128 = math.exp %127 : vector<136x32xf32>
    %cst_88 = arith.constant 1.000000e+00 : f32
    %129 = vector.broadcast %cst_88 : f32 to vector<136x32xf32>
    %130 = arith.addf %129, %128 : vector<136x32xf32>
    %131 = arith.divf %129, %130 : vector<136x32xf32>
    %132 = arith.mulf %125, %131 : vector<136x32xf32>
    %133 = arith.addf %124, %132 : vector<136x32xf32>
    %c0_89 = arith.constant 0 : index
    %c0_90 = arith.constant 0 : index
    %134 = vector.load %arg3[%c0_89, %c0_90] : memref<136x1xf32, #tpu.memory_space<vmem>>, vector<136x1xf32>
    %135 = vector.broadcast %134 : vector<136x1xf32> to vector<136x32xf32>
    %136 = arith.mulf %133, %135 : vector<136x32xf32>
    %cst_91 = arith.constant 0.000000e+00 : f32
    %137 = vector.broadcast %cst_91 : f32 to vector<32x32xf32>
    %c0_92 = arith.constant 0 : index
    %c0_93 = arith.constant 0 : index
    %c0_94 = arith.constant 0 : index
    %138 = vector.load %arg8[%c0_92, %c0_93, %c0_94] : memref<1x192x32xf32, #tpu.memory_space<vmem>>, vector<1x32x32xf32>
    %139 = vector.shape_cast %138 : vector<1x32x32xf32> to vector<32x32xf32>
    %140 = vector.shape_cast %137 : vector<32x32xf32> to vector<1x32x32xf32>
    tpu.vector_store %arg8[%c0_92, %c0_93, %c0_94], %140 {strides = array<i32>} : memref<1x192x32xf32, #tpu.memory_space<vmem>>, vector<1x32x32xf32>,
    %c0_95 = arith.constant 0 : index
    %c32_96 = arith.constant 32 : index
    %c0_97 = arith.constant 0 : index
    %141 = vector.load %arg8[%c0_95, %c32_96, %c0_97] : memref<1x192x32xf32, #tpu.memory_space<vmem>>, vector<1x136x32xf32>
    %142 = vector.shape_cast %141 : vector<1x136x32xf32> to vector<136x32xf32>
    %143 = vector.shape_cast %136 : vector<136x32xf32> to vector<1x136x32xf32>
    tpu.vector_store %arg8[%c0_95, %c32_96, %c0_97], %143 {strides = array<i32>} : memref<1x192x32xf32, #tpu.memory_space<vmem>>, vector<1x136x32xf32>,
    %cst_98 = arith.constant 0.000000e+00 : f32
    %144 = vector.broadcast %cst_98 : f32 to vector<24x32xf32>
    %c0_99 = arith.constant 0 : index
    %c168 = arith.constant 168 : index
    %c0_100 = arith.constant 0 : index
    %145 = vector.load %arg8[%c0_99, %c168, %c0_100] : memref<1x192x32xf32, #tpu.memory_space<vmem>>, vector<1x24x32xf32>
    %146 = vector.shape_cast %145 : vector<1x24x32xf32> to vector<24x32xf32>
    %147 = vector.shape_cast %144 : vector<24x32xf32> to vector<1x24x32xf32>
    tpu.vector_store %arg8[%c0_99, %c168, %c0_100], %147 {strides = array<i32>} : memref<1x192x32xf32, #tpu.memory_space<vmem>>, vector<1x24x32xf32>,
    return
  }
  func.func @transform_0(%arg0: i32) -> (i32, i32, i32) {
    %c0_i32 = arith.constant 0 : i32
    %c0_i32_0 = arith.constant 0 : i32
    %c0_i32_1 = arith.constant 0 : i32
    return %arg0, %c0_i32, %c0_i32_0 : i32, i32, i32
  }
  func.func @transform_1(%arg0: i32) -> (i32, i32) {
    %c0_i32 = arith.constant 0 : i32
    %c0_i32_0 = arith.constant 0 : i32
    %c0_i32_1 = arith.constant 0 : i32
    return %c0_i32, %c0_i32_0 : i32, i32
  }
  func.func @transform_2(%arg0: i32) -> (i32, i32) {
    %c0_i32 = arith.constant 0 : i32
    %c0_i32_0 = arith.constant 0 : i32
    %c0_i32_1 = arith.constant 0 : i32
    return %c0_i32, %c0_i32_0 : i32, i32
  }
  func.func @transform_3(%arg0: i32) -> (i32, i32, i32) {
    %c0_i32 = arith.constant 0 : i32
    %c0_i32_0 = arith.constant 0 : i32
    %c0_i32_1 = arith.constant 0 : i32
    %c0_i32_2 = arith.constant 0 : i32
    return %c0_i32, %c0_i32_0, %c0_i32_1 : i32, i32, i32
  }
  func.func @transform_4(%arg0: i32) -> (i32, i32) {
    %c0_i32 = arith.constant 0 : i32
    %c0_i32_0 = arith.constant 0 : i32
    %c0_i32_1 = arith.constant 0 : i32
    return %c0_i32, %c0_i32_0 : i32, i32
  }
  func.func @transform_5(%arg0: i32) -> (i32, i32, i32) {
    %c0_i32 = arith.constant 0 : i32
    %c0_i32_0 = arith.constant 0 : i32
    %c0_i32_1 = arith.constant 0 : i32
    %c0_i32_2 = arith.constant 0 : i32
    return %c0_i32, %c0_i32_0, %c0_i32_1 : i32, i32, i32
  }
  func.func @transform_6(%arg0: i32) -> (i32, i32) {
    %c0_i32 = arith.constant 0 : i32
    %c0_i32_0 = arith.constant 0 : i32
    %c0_i32_1 = arith.constant 0 : i32
    return %c0_i32, %c0_i32_0 : i32, i32
  }
  func.func @transform_7(%arg0: i32) -> (i32, i32, i32) {
    %c0_i32 = arith.constant 0 : i32
    %c0_i32_0 = arith.constant 0 : i32
    %c0_i32_1 = arith.constant 0 : i32
    return %arg0, %c0_i32, %c0_i32_0 : i32, i32, i32
  }
}

module attributes {stable_mosaic.version = 11 : i64} {
  func.func @_ul_block_kernel(%arg0: i32, %arg1: memref<1x192x32xf32, #tpu.memory_space<vmem>>, %arg2: memref<1x192x32xf32, #tpu.memory_space<vmem>>, %arg3: memref<160x1xf32, #tpu.memory_space<vmem>>, %arg4: memref<136x1xf32, #tpu.memory_space<vmem>>, %arg5: memref<4x64x32xbf16, #tpu.memory_space<vmem>>, %arg6: memref<1x32xf32, #tpu.memory_space<vmem>>, %arg7: memref<64x32xbf16, #tpu.memory_space<vmem>>, %arg8: memref<1x32xf32, #tpu.memory_space<vmem>>, %arg9: memref<4x64x64xbf16, #tpu.memory_space<vmem>>, %arg10: memref<1x64xf32, #tpu.memory_space<vmem>>, %arg11: memref<1x192x32xf32, #tpu.memory_space<vmem>>, %arg12: memref<192x64xf32, #tpu.memory_space<vmem>>, %arg13: memref<168x64xf32, #tpu.memory_space<vmem>>) attributes {dimension_semantics = [#tpu.dimension_semantics<parallel>], iteration_bounds = array<i64: 2>, scalar_prefetch = 0 : i64, scratch_operands = 2 : i64, tpu.core_type = #tpu.core_type<tc>, window_params = [{transform_indices = @transform_0, window_bounds = array<i64: 1, 192, 32>}, {transform_indices = @transform_1, window_bounds = array<i64: 1, 192, 32>}, {pipeline_mode = #tpu.pipeline_mode<synchronous>, transform_indices = @transform_2, window_bounds = array<i64: 160, 1>}, {pipeline_mode = #tpu.pipeline_mode<synchronous>, transform_indices = @transform_3, window_bounds = array<i64: 136, 1>}, {pipeline_mode = #tpu.pipeline_mode<synchronous>, transform_indices = @transform_4, window_bounds = array<i64: 4, 64, 32>}, {pipeline_mode = #tpu.pipeline_mode<synchronous>, transform_indices = @transform_5, window_bounds = array<i64: 1, 32>}, {pipeline_mode = #tpu.pipeline_mode<synchronous>, transform_indices = @transform_6, window_bounds = array<i64: 64, 32>}, {pipeline_mode = #tpu.pipeline_mode<synchronous>, transform_indices = @transform_7, window_bounds = array<i64: 1, 32>}, {pipeline_mode = #tpu.pipeline_mode<synchronous>, transform_indices = @transform_8, window_bounds = array<i64: 4, 64, 64>}, {pipeline_mode = #tpu.pipeline_mode<synchronous>, transform_indices = @transform_9, window_bounds = array<i64: 1, 64>}, {transform_indices = @transform_10, window_bounds = array<i64: 1, 192, 32>}]} {
    %c0 = arith.constant 0 : index
    %c0_0 = arith.constant 0 : index
    %c0_1 = arith.constant 0 : index
    %0 = vector.load %arg1[%c0, %c0_0, %c0_1] : memref<1x192x32xf32, #tpu.memory_space<vmem>>, vector<1x192x32xf32>
    %1 = vector.shape_cast %0 : vector<1x192x32xf32> to vector<192x32xf32>
    %cst = arith.constant 0.000000e+00 : f32
    %2 = vector.broadcast %cst : f32 to vector<192x32xf32>
    %3 = arith.cmpf ogt, %1, %2 : vector<192x32xf32>
    %cst_2 = arith.constant 0.000000e+00 : f32
    %4 = vector.broadcast %cst_2 : f32 to vector<192x32xf32>
    %5 = arith.minimumf %1, %4 : vector<192x32xf32>
    %6 = math.exp %5 : vector<192x32xf32>
    %cst_3 = arith.constant 1.000000e+00 : f32
    %7 = vector.broadcast %cst_3 : f32 to vector<192x32xf32>
    %8 = arith.subf %6, %7 : vector<192x32xf32>
    %9 = arith.select %3, %1, %8 : vector<192x32xi1>, vector<192x32xf32>
    %cst_4 = arith.constant 0.000000e+00 : f32
    %10 = vector.broadcast %cst_4 : f32 to vector<192x32xf32>
    %11 = arith.subf %10, %1 : vector<192x32xf32>
    %cst_5 = arith.constant 0.000000e+00 : f32
    %12 = vector.broadcast %cst_5 : f32 to vector<192x32xf32>
    %13 = arith.cmpf ogt, %11, %12 : vector<192x32xf32>
    %cst_6 = arith.constant 0.000000e+00 : f32
    %14 = vector.broadcast %cst_6 : f32 to vector<192x32xf32>
    %15 = arith.minimumf %11, %14 : vector<192x32xf32>
    %16 = math.exp %15 : vector<192x32xf32>
    %cst_7 = arith.constant 1.000000e+00 : f32
    %17 = vector.broadcast %cst_7 : f32 to vector<192x32xf32>
    %18 = arith.subf %16, %17 : vector<192x32xf32>
    %19 = arith.select %13, %11, %18 : vector<192x32xi1>, vector<192x32xf32>
    %20 = tpu.concatenate %9, %19 in 1 : vector<192x32xf32>, vector<192x32xf32> -> vector<192x64xf32>
    %c0_8 = arith.constant 0 : index
    %c0_9 = arith.constant 0 : index
    %21 = vector.load %arg12[%c0_8, %c0_9] : memref<192x64xf32, #tpu.memory_space<vmem>>, vector<192x64xf32>
    tpu.vector_store %arg12[%c0_8, %c0_9], %20 {strides = array<i32>} : memref<192x64xf32, #tpu.memory_space<vmem>>, vector<192x64xf32>,
    %c0_10 = arith.constant 0 : index
    %c0_11 = arith.constant 0 : index
    %22 = vector.load %arg12[%c0_10, %c0_11] : memref<192x64xf32, #tpu.memory_space<vmem>>, vector<160x64xf32>
    %23 = arith.truncf %22 : vector<160x64xf32> to vector<160x64xbf16>
    %c0_12 = arith.constant 0 : index
    %c0_13 = arith.constant 0 : index
    %c0_14 = arith.constant 0 : index
    %24 = vector.load %arg5[%c0_12, %c0_13, %c0_14] : memref<4x64x32xbf16, #tpu.memory_space<vmem>>, vector<1x64x32xbf16>
    %25 = vector.shape_cast %24 : vector<1x64x32xbf16> to vector<64x32xbf16>
    %cst_15 = arith.constant dense<0.000000e+00> : vector<160x32xf32>
    %26 = tpu.matmul %23, %25, %cst_15 {dimension_numbers = #tpu.dot_dimension_numbers<[1], [0], [0], [1], [0, 0, 1, 1], [], []>} : vector<160x64xbf16>, vector<64x32xbf16>, vector<160x32xf32> -> vector<160x32xf32>
    %c1 = arith.constant 1 : index
    %c0_16 = arith.constant 0 : index
    %27 = vector.load %arg12[%c1, %c0_16] : memref<192x64xf32, #tpu.memory_space<vmem>>, vector<160x64xf32>
    %28 = arith.truncf %27 : vector<160x64xf32> to vector<160x64xbf16>
    %c1_17 = arith.constant 1 : index
    %c0_18 = arith.constant 0 : index
    %c0_19 = arith.constant 0 : index
    %29 = vector.load %arg5[%c1_17, %c0_18, %c0_19] : memref<4x64x32xbf16, #tpu.memory_space<vmem>>, vector<1x64x32xbf16>
    %30 = vector.shape_cast %29 : vector<1x64x32xbf16> to vector<64x32xbf16>
    %cst_20 = arith.constant dense<0.000000e+00> : vector<160x32xf32>
    %31 = tpu.matmul %28, %30, %cst_20 {dimension_numbers = #tpu.dot_dimension_numbers<[1], [0], [0], [1], [0, 0, 1, 1], [], []>} : vector<160x64xbf16>, vector<64x32xbf16>, vector<160x32xf32> -> vector<160x32xf32>
    %32 = arith.addf %26, %31 : vector<160x32xf32>
    %c16 = arith.constant 16 : index
    %c0_21 = arith.constant 0 : index
    %33 = vector.load %arg12[%c16, %c0_21] : memref<192x64xf32, #tpu.memory_space<vmem>>, vector<160x64xf32>
    %34 = arith.truncf %33 : vector<160x64xf32> to vector<160x64xbf16>
    %c2 = arith.constant 2 : index
    %c0_22 = arith.constant 0 : index
    %c0_23 = arith.constant 0 : index
    %35 = vector.load %arg5[%c2, %c0_22, %c0_23] : memref<4x64x32xbf16, #tpu.memory_space<vmem>>, vector<1x64x32xbf16>
    %36 = vector.shape_cast %35 : vector<1x64x32xbf16> to vector<64x32xbf16>
    %cst_24 = arith.constant dense<0.000000e+00> : vector<160x32xf32>
    %37 = tpu.matmul %34, %36, %cst_24 {dimension_numbers = #tpu.dot_dimension_numbers<[1], [0], [0], [1], [0, 0, 1, 1], [], []>} : vector<160x64xbf16>, vector<64x32xbf16>, vector<160x32xf32> -> vector<160x32xf32>
    %38 = arith.addf %32, %37 : vector<160x32xf32>
    %c17 = arith.constant 17 : index
    %c0_25 = arith.constant 0 : index
    %39 = vector.load %arg12[%c17, %c0_25] : memref<192x64xf32, #tpu.memory_space<vmem>>, vector<160x64xf32>
    %40 = arith.truncf %39 : vector<160x64xf32> to vector<160x64xbf16>
    %c3 = arith.constant 3 : index
    %c0_26 = arith.constant 0 : index
    %c0_27 = arith.constant 0 : index
    %41 = vector.load %arg5[%c3, %c0_26, %c0_27] : memref<4x64x32xbf16, #tpu.memory_space<vmem>>, vector<1x64x32xbf16>
    %42 = vector.shape_cast %41 : vector<1x64x32xbf16> to vector<64x32xbf16>
    %cst_28 = arith.constant dense<0.000000e+00> : vector<160x32xf32>
    %43 = tpu.matmul %40, %42, %cst_28 {dimension_numbers = #tpu.dot_dimension_numbers<[1], [0], [0], [1], [0, 0, 1, 1], [], []>} : vector<160x64xbf16>, vector<64x32xbf16>, vector<160x32xf32> -> vector<160x32xf32>
    %44 = arith.addf %38, %43 : vector<160x32xf32>
    %c0_29 = arith.constant 0 : index
    %c17_30 = arith.constant 17 : index
    %c0_31 = arith.constant 0 : index
    %45 = vector.load %arg2[%c0_29, %c17_30, %c0_31] : memref<1x192x32xf32, #tpu.memory_space<vmem>>, vector<1x160x32xf32>
    %46 = vector.shape_cast %45 : vector<1x160x32xf32> to vector<160x32xf32>
    %cst_32 = arith.constant 0.000000e+00 : f32
    %47 = vector.broadcast %cst_32 : f32 to vector<160x32xf32>
    %48 = arith.cmpf ogt, %46, %47 : vector<160x32xf32>
    %cst_33 = arith.constant 0.000000e+00 : f32
    %49 = vector.broadcast %cst_33 : f32 to vector<160x32xf32>
    %50 = arith.minimumf %46, %49 : vector<160x32xf32>
    %51 = math.exp %50 : vector<160x32xf32>
    %cst_34 = arith.constant 1.000000e+00 : f32
    %52 = vector.broadcast %cst_34 : f32 to vector<160x32xf32>
    %53 = arith.subf %51, %52 : vector<160x32xf32>
    %54 = arith.select %48, %46, %53 : vector<160x32xi1>, vector<160x32xf32>
    %cst_35 = arith.constant 0.000000e+00 : f32
    %55 = vector.broadcast %cst_35 : f32 to vector<160x32xf32>
    %56 = arith.subf %55, %46 : vector<160x32xf32>
    %cst_36 = arith.constant 0.000000e+00 : f32
    %57 = vector.broadcast %cst_36 : f32 to vector<160x32xf32>
    %58 = arith.cmpf ogt, %56, %57 : vector<160x32xf32>
    %cst_37 = arith.constant 0.000000e+00 : f32
    %59 = vector.broadcast %cst_37 : f32 to vector<160x32xf32>
    %60 = arith.minimumf %56, %59 : vector<160x32xf32>
    %61 = math.exp %60 : vector<160x32xf32>
    %cst_38 = arith.constant 1.000000e+00 : f32
    %62 = vector.broadcast %cst_38 : f32 to vector<160x32xf32>
    %63 = arith.subf %61, %62 : vector<160x32xf32>
    %64 = arith.select %58, %56, %63 : vector<160x32xi1>, vector<160x32xf32>
    %65 = tpu.concatenate %54, %64 in 1 : vector<160x32xf32>, vector<160x32xf32> -> vector<160x64xf32>
    %66 = arith.truncf %65 : vector<160x64xf32> to vector<160x64xbf16>
    %c0_39 = arith.constant 0 : index
    %c0_40 = arith.constant 0 : index
    %67 = vector.load %arg7[%c0_39, %c0_40] : memref<64x32xbf16, #tpu.memory_space<vmem>>, vector<64x32xbf16>
    %cst_41 = arith.constant dense<0.000000e+00> : vector<160x32xf32>
    %68 = tpu.matmul %66, %67, %cst_41 {dimension_numbers = #tpu.dot_dimension_numbers<[1], [0], [0], [1], [0, 0, 1, 1], [], []>} : vector<160x64xbf16>, vector<64x32xbf16>, vector<160x32xf32> -> vector<160x32xf32>
    %69 = arith.addf %44, %68 : vector<160x32xf32>
    %c0_42 = arith.constant 0 : index
    %c0_43 = arith.constant 0 : index
    %70 = vector.load %arg6[%c0_42, %c0_43] : memref<1x32xf32, #tpu.memory_space<vmem>>, vector<1x32xf32>
    %71 = vector.broadcast %70 : vector<1x32xf32> to vector<160x32xf32>
    %72 = arith.addf %69, %71 : vector<160x32xf32>
    %c0_44 = arith.constant 0 : index
    %c0_45 = arith.constant 0 : index
    %73 = vector.load %arg8[%c0_44, %c0_45] : memref<1x32xf32, #tpu.memory_space<vmem>>, vector<1x32xf32>
    %74 = vector.broadcast %73 : vector<1x32xf32> to vector<160x32xf32>
    %75 = arith.addf %72, %74 : vector<160x32xf32>
    %c0_46 = arith.constant 0 : index
    %c0_47 = arith.constant 0 : index
    %76 = vector.load %arg3[%c0_46, %c0_47] : memref<160x1xf32, #tpu.memory_space<vmem>>, vector<160x1xf32>
    %77 = vector.broadcast %76 : vector<160x1xf32> to vector<160x32xf32>
    %78 = arith.mulf %75, %77 : vector<160x32xf32>
    %cst_48 = arith.constant 0.000000e+00 : f32
    %79 = vector.broadcast %cst_48 : f32 to vector<8x64xf32>
    %c0_49 = arith.constant 0 : index
    %c0_50 = arith.constant 0 : index
    %80 = vector.load %arg13[%c0_49, %c0_50] : memref<168x64xf32, #tpu.memory_space<vmem>>, vector<8x64xf32>
    tpu.vector_store %arg13[%c0_49, %c0_50], %79 {strides = array<i32>} : memref<168x64xf32, #tpu.memory_space<vmem>>, vector<8x64xf32>,
    %cst_51 = arith.constant 0.000000e+00 : f32
    %81 = vector.broadcast %cst_51 : f32 to vector<160x32xf32>
    %82 = arith.cmpf ogt, %78, %81 : vector<160x32xf32>
    %cst_52 = arith.constant 0.000000e+00 : f32
    %83 = vector.broadcast %cst_52 : f32 to vector<160x32xf32>
    %84 = arith.minimumf %78, %83 : vector<160x32xf32>
    %85 = math.exp %84 : vector<160x32xf32>
    %cst_53 = arith.constant 1.000000e+00 : f32
    %86 = vector.broadcast %cst_53 : f32 to vector<160x32xf32>
    %87 = arith.subf %85, %86 : vector<160x32xf32>
    %88 = arith.select %82, %78, %87 : vector<160x32xi1>, vector<160x32xf32>
    %cst_54 = arith.constant 0.000000e+00 : f32
    %89 = vector.broadcast %cst_54 : f32 to vector<160x32xf32>
    %90 = arith.subf %89, %78 : vector<160x32xf32>
    %cst_55 = arith.constant 0.000000e+00 : f32
    %91 = vector.broadcast %cst_55 : f32 to vector<160x32xf32>
    %92 = arith.cmpf ogt, %90, %91 : vector<160x32xf32>
    %cst_56 = arith.constant 0.000000e+00 : f32
    %93 = vector.broadcast %cst_56 : f32 to vector<160x32xf32>
    %94 = arith.minimumf %90, %93 : vector<160x32xf32>
    %95 = math.exp %94 : vector<160x32xf32>
    %cst_57 = arith.constant 1.000000e+00 : f32
    %96 = vector.broadcast %cst_57 : f32 to vector<160x32xf32>
    %97 = arith.subf %95, %96 : vector<160x32xf32>
    %98 = arith.select %92, %90, %97 : vector<160x32xi1>, vector<160x32xf32>
    %99 = tpu.concatenate %88, %98 in 1 : vector<160x32xf32>, vector<160x32xf32> -> vector<160x64xf32>
    %c8 = arith.constant 8 : index
    %c0_58 = arith.constant 0 : index
    %100 = vector.load %arg13[%c8, %c0_58] : memref<168x64xf32, #tpu.memory_space<vmem>>, vector<160x64xf32>
    tpu.vector_store %arg13[%c8, %c0_58], %99 {strides = array<i32>} : memref<168x64xf32, #tpu.memory_space<vmem>>, vector<160x64xf32>,
    %c6 = arith.constant 6 : index
    %c0_59 = arith.constant 0 : index
    %101 = vector.load %arg13[%c6, %c0_59] : memref<168x64xf32, #tpu.memory_space<vmem>>, vector<136x64xf32>
    %102 = arith.truncf %101 : vector<136x64xf32> to vector<136x64xbf16>
    %c0_60 = arith.constant 0 : index
    %c0_61 = arith.constant 0 : index
    %c0_62 = arith.constant 0 : index
    %103 = vector.load %arg9[%c0_60, %c0_61, %c0_62] : memref<4x64x64xbf16, #tpu.memory_space<vmem>>, vector<1x64x64xbf16>
    %104 = vector.shape_cast %103 : vector<1x64x64xbf16> to vector<64x64xbf16>
    %cst_63 = arith.constant dense<0.000000e+00> : vector<136x64xf32>
    %105 = tpu.matmul %102, %104, %cst_63 {dimension_numbers = #tpu.dot_dimension_numbers<[1], [0], [0], [1], [0, 0, 1, 1], [], []>} : vector<136x64xbf16>, vector<64x64xbf16>, vector<136x64xf32> -> vector<136x64xf32>
    %c7 = arith.constant 7 : index
    %c0_64 = arith.constant 0 : index
    %106 = vector.load %arg13[%c7, %c0_64] : memref<168x64xf32, #tpu.memory_space<vmem>>, vector<136x64xf32>
    %107 = arith.truncf %106 : vector<136x64xf32> to vector<136x64xbf16>
    %c1_65 = arith.constant 1 : index
    %c0_66 = arith.constant 0 : index
    %c0_67 = arith.constant 0 : index
    %108 = vector.load %arg9[%c1_65, %c0_66, %c0_67] : memref<4x64x64xbf16, #tpu.memory_space<vmem>>, vector<1x64x64xbf16>
    %109 = vector.shape_cast %108 : vector<1x64x64xbf16> to vector<64x64xbf16>
    %cst_68 = arith.constant dense<0.000000e+00> : vector<136x64xf32>
    %110 = tpu.matmul %107, %109, %cst_68 {dimension_numbers = #tpu.dot_dimension_numbers<[1], [0], [0], [1], [0, 0, 1, 1], [], []>} : vector<136x64xbf16>, vector<64x64xbf16>, vector<136x64xf32> -> vector<136x64xf32>
    %111 = arith.addf %105, %110 : vector<136x64xf32>
    %c22 = arith.constant 22 : index
    %c0_69 = arith.constant 0 : index
    %112 = vector.load %arg13[%c22, %c0_69] : memref<168x64xf32, #tpu.memory_space<vmem>>, vector<136x64xf32>
    %113 = arith.truncf %112 : vector<136x64xf32> to vector<136x64xbf16>
    %c2_70 = arith.constant 2 : index
    %c0_71 = arith.constant 0 : index
    %c0_72 = arith.constant 0 : index
    %114 = vector.load %arg9[%c2_70, %c0_71, %c0_72] : memref<4x64x64xbf16, #tpu.memory_space<vmem>>, vector<1x64x64xbf16>
    %115 = vector.shape_cast %114 : vector<1x64x64xbf16> to vector<64x64xbf16>
    %cst_73 = arith.constant dense<0.000000e+00> : vector<136x64xf32>
    %116 = tpu.matmul %113, %115, %cst_73 {dimension_numbers = #tpu.dot_dimension_numbers<[1], [0], [0], [1], [0, 0, 1, 1], [], []>} : vector<136x64xbf16>, vector<64x64xbf16>, vector<136x64xf32> -> vector<136x64xf32>
    %117 = arith.addf %111, %116 : vector<136x64xf32>
    %c23 = arith.constant 23 : index
    %c0_74 = arith.constant 0 : index
    %118 = vector.load %arg13[%c23, %c0_74] : memref<168x64xf32, #tpu.memory_space<vmem>>, vector<136x64xf32>
    %119 = arith.truncf %118 : vector<136x64xf32> to vector<136x64xbf16>
    %c3_75 = arith.constant 3 : index
    %c0_76 = arith.constant 0 : index
    %c0_77 = arith.constant 0 : index
    %120 = vector.load %arg9[%c3_75, %c0_76, %c0_77] : memref<4x64x64xbf16, #tpu.memory_space<vmem>>, vector<1x64x64xbf16>
    %121 = vector.shape_cast %120 : vector<1x64x64xbf16> to vector<64x64xbf16>
    %cst_78 = arith.constant dense<0.000000e+00> : vector<136x64xf32>
    %122 = tpu.matmul %119, %121, %cst_78 {dimension_numbers = #tpu.dot_dimension_numbers<[1], [0], [0], [1], [0, 0, 1, 1], [], []>} : vector<136x64xbf16>, vector<64x64xbf16>, vector<136x64xf32> -> vector<136x64xf32>
    %123 = arith.addf %117, %122 : vector<136x64xf32>
    %c0_79 = arith.constant 0 : index
    %c0_80 = arith.constant 0 : index
    %124 = vector.load %arg10[%c0_79, %c0_80] : memref<1x64xf32, #tpu.memory_space<vmem>>, vector<1x64xf32>
    %125 = vector.broadcast %124 : vector<1x64xf32> to vector<136x64xf32>
    %126 = arith.addf %123, %125 : vector<136x64xf32>
    %c0_81 = arith.constant 0 : index
    %c32 = arith.constant 32 : index
    %c0_82 = arith.constant 0 : index
    %127 = vector.load %arg1[%c0_81, %c32, %c0_82] : memref<1x192x32xf32, #tpu.memory_space<vmem>>, vector<1x136x32xf32>
    %128 = vector.shape_cast %127 : vector<1x136x32xf32> to vector<136x32xf32>
    %129 = vector.extract_strided_slice %126 {offsets = [0, 0], sizes = [136, 32], strides = [1, 1]} : vector<136x64xf32> to vector<136x32xf32>
    %130 = vector.extract_strided_slice %126 {offsets = [0, 32], sizes = [136, 32], strides = [1, 1]} : vector<136x64xf32> to vector<136x32xf32>
    %131 = arith.negf %130 : vector<136x32xf32>
    %132 = math.exp %131 : vector<136x32xf32>
    %cst_83 = arith.constant 1.000000e+00 : f32
    %133 = vector.broadcast %cst_83 : f32 to vector<136x32xf32>
    %134 = arith.addf %133, %132 : vector<136x32xf32>
    %135 = arith.divf %133, %134 : vector<136x32xf32>
    %136 = arith.mulf %129, %135 : vector<136x32xf32>
    %137 = arith.addf %128, %136 : vector<136x32xf32>
    %c0_84 = arith.constant 0 : index
    %c0_85 = arith.constant 0 : index
    %138 = vector.load %arg4[%c0_84, %c0_85] : memref<136x1xf32, #tpu.memory_space<vmem>>, vector<136x1xf32>
    %139 = vector.broadcast %138 : vector<136x1xf32> to vector<136x32xf32>
    %140 = arith.mulf %137, %139 : vector<136x32xf32>
    %cst_86 = arith.constant 0.000000e+00 : f32
    %141 = vector.broadcast %cst_86 : f32 to vector<32x32xf32>
    %c0_87 = arith.constant 0 : index
    %c0_88 = arith.constant 0 : index
    %c0_89 = arith.constant 0 : index
    %142 = vector.load %arg11[%c0_87, %c0_88, %c0_89] : memref<1x192x32xf32, #tpu.memory_space<vmem>>, vector<1x32x32xf32>
    %143 = vector.shape_cast %142 : vector<1x32x32xf32> to vector<32x32xf32>
    %144 = vector.shape_cast %141 : vector<32x32xf32> to vector<1x32x32xf32>
    tpu.vector_store %arg11[%c0_87, %c0_88, %c0_89], %144 {strides = array<i32>} : memref<1x192x32xf32, #tpu.memory_space<vmem>>, vector<1x32x32xf32>,
    %c0_90 = arith.constant 0 : index
    %c32_91 = arith.constant 32 : index
    %c0_92 = arith.constant 0 : index
    %145 = vector.load %arg11[%c0_90, %c32_91, %c0_92] : memref<1x192x32xf32, #tpu.memory_space<vmem>>, vector<1x136x32xf32>
    %146 = vector.shape_cast %145 : vector<1x136x32xf32> to vector<136x32xf32>
    %147 = vector.shape_cast %140 : vector<136x32xf32> to vector<1x136x32xf32>
    tpu.vector_store %arg11[%c0_90, %c32_91, %c0_92], %147 {strides = array<i32>} : memref<1x192x32xf32, #tpu.memory_space<vmem>>, vector<1x136x32xf32>,
    %cst_93 = arith.constant 0.000000e+00 : f32
    %148 = vector.broadcast %cst_93 : f32 to vector<24x32xf32>
    %c0_94 = arith.constant 0 : index
    %c168 = arith.constant 168 : index
    %c0_95 = arith.constant 0 : index
    %149 = vector.load %arg11[%c0_94, %c168, %c0_95] : memref<1x192x32xf32, #tpu.memory_space<vmem>>, vector<1x24x32xf32>
    %150 = vector.shape_cast %149 : vector<1x24x32xf32> to vector<24x32xf32>
    %151 = vector.shape_cast %148 : vector<24x32xf32> to vector<1x24x32xf32>
    tpu.vector_store %arg11[%c0_94, %c168, %c0_95], %151 {strides = array<i32>} : memref<1x192x32xf32, #tpu.memory_space<vmem>>, vector<1x24x32xf32>,
    return
  }
  func.func @transform_0(%arg0: i32) -> (i32, i32, i32) {
    %c0_i32 = arith.constant 0 : i32
    %c0_i32_0 = arith.constant 0 : i32
    %c0_i32_1 = arith.constant 0 : i32
    return %arg0, %c0_i32, %c0_i32_0 : i32, i32, i32
  }
  func.func @transform_1(%arg0: i32) -> (i32, i32, i32) {
    %c0_i32 = arith.constant 0 : i32
    %c0_i32_0 = arith.constant 0 : i32
    %c0_i32_1 = arith.constant 0 : i32
    return %arg0, %c0_i32, %c0_i32_0 : i32, i32, i32
  }
  func.func @transform_2(%arg0: i32) -> (i32, i32) {
    %c0_i32 = arith.constant 0 : i32
    %c0_i32_0 = arith.constant 0 : i32
    %c0_i32_1 = arith.constant 0 : i32
    return %c0_i32, %c0_i32_0 : i32, i32
  }
  func.func @transform_3(%arg0: i32) -> (i32, i32) {
    %c0_i32 = arith.constant 0 : i32
    %c0_i32_0 = arith.constant 0 : i32
    %c0_i32_1 = arith.constant 0 : i32
    return %c0_i32, %c0_i32_0 : i32, i32
  }
  func.func @transform_4(%arg0: i32) -> (i32, i32, i32) {
    %c0_i32 = arith.constant 0 : i32
    %c0_i32_0 = arith.constant 0 : i32
    %c0_i32_1 = arith.constant 0 : i32
    %c0_i32_2 = arith.constant 0 : i32
    return %c0_i32, %c0_i32_0, %c0_i32_1 : i32, i32, i32
  }
  func.func @transform_5(%arg0: i32) -> (i32, i32) {
    %c0_i32 = arith.constant 0 : i32
    %c0_i32_0 = arith.constant 0 : i32
    %c0_i32_1 = arith.constant 0 : i32
    return %c0_i32, %c0_i32_0 : i32, i32
  }
  func.func @transform_6(%arg0: i32) -> (i32, i32) {
    %c0_i32 = arith.constant 0 : i32
    %c0_i32_0 = arith.constant 0 : i32
    %c0_i32_1 = arith.constant 0 : i32
    return %c0_i32, %c0_i32_0 : i32, i32
  }
  func.func @transform_7(%arg0: i32) -> (i32, i32) {
    %c0_i32 = arith.constant 0 : i32
    %c0_i32_0 = arith.constant 0 : i32
    %c0_i32_1 = arith.constant 0 : i32
    return %c0_i32, %c0_i32_0 : i32, i32
  }
  func.func @transform_8(%arg0: i32) -> (i32, i32, i32) {
    %c0_i32 = arith.constant 0 : i32
    %c0_i32_0 = arith.constant 0 : i32
    %c0_i32_1 = arith.constant 0 : i32
    %c0_i32_2 = arith.constant 0 : i32
    return %c0_i32, %c0_i32_0, %c0_i32_1 : i32, i32, i32
  }
  func.func @transform_9(%arg0: i32) -> (i32, i32) {
    %c0_i32 = arith.constant 0 : i32
    %c0_i32_0 = arith.constant 0 : i32
    %c0_i32_1 = arith.constant 0 : i32
    return %c0_i32, %c0_i32_0 : i32, i32
  }
  func.func @transform_10(%arg0: i32) -> (i32, i32, i32) {
    %c0_i32 = arith.constant 0 : i32
    %c0_i32_0 = arith.constant 0 : i32
    %c0_i32_1 = arith.constant 0 : i32
    return %arg0, %c0_i32, %c0_i32_0 : i32, i32, i32
  }
}

</mosaic_0001>

<bundles_post_ra>
// kernel: pixelcnn_layer_up.5
= control target key start
LH: loop header
LB: loop body
LE: loop exit
PB: predicated region body
PF: predicated region fallthrough
CT: control target
= control target key end

     0   :  { %s5527_s13 = smov 0   ;;  %s7354_s0 = inlined_call_operand.vmem [shape: f32[2,192,32], index: 0, kind: input, shape index: {}]   ;;  %s7355_s1 = inlined_call_operand.vmem [shape: f32[2,192,32], index: 1, kind: input, shape index: {}]   ;;  %s7356_s2 = inlined_call_operand.vmem [shape: f32[160,1], index: 2, kind: input, shape index: {}]   ;;  %s7357_s3 = inlined_call_operand.vmem [shape: f32[136,1], index: 3, kind: input, shape index: {}]   ;;  %s7358_s4 = inlined_call_operand.vmem [shape: bf16[4,64,32], index: 4, kind: input, shape index: {}]   ;;  %s7359_s5 = inlined_call_operand.vmem [shape: f32[1,32], index: 5, kind: input, shape index: {}]   ;;  %s7360_s6 = inlined_call_operand.vmem [shape: bf16[64,32], index: 6, kind: input, shape index: {}]   ;;  %s7361_s7 = inlined_call_operand.vmem [shape: f32[1,32], index: 7, kind: input, shape index: {}]   ;;  %s7362_s8 = inlined_call_operand.vmem [shape: bf16[4,64,64], index: 8, kind: input, shape index: {}]   ;;  %s7363_s9 = inlined_call_operand.vmem [shape: f32[1,64], index: 9, kind: input, shape index: {}]   ;;  %s7364_s10 = inlined_call_operand.vmem [shape: f32[2,192,32], index: 10, kind: output, shape index: {}]  }
   0x1 LB: > { %s4134_s14 = sadd.s32 4294967295, %s5465_s13   ;;  %p4138_p0 = scmp.ge.s32.totalorder %s5465_s13, 1  ;;  %s5465_s13 = sphi %s5527_s13, %s20_s13  }
   0x2   : > { %p322_p1 = scmp.lt.s32.totalorder %s5465_s13, 3 }
   0x4   : > { %p323_p2 = pnand %p4138_p0, %p322_p1 }
   0x5   : > { %p365_p3 = scmp.lt.s32.totalorder (!%p323_p2), %s4134_s14, 1  ;;  %v5054_v41 = vld [vmem:[%s7358_s4 + $0x20] sm:$0xff] (!%p323_p2)   ;;  %v5055_v51 = vld [vmem:[%s7358_s4 + $0x28] sm:$0xff] (!%p323_p2)   ;;  %s5467_s25 = smov (!%p323_p2), 32  }
   0x6   : > { %326 = sbr.rel (%p323_p2) target bundleno = 1264 (0x4f0), region = 60  ;;  %4584 = vmatprep.subr.bf16.mxu0 (!%p323_p2), %v5054_v41  ;;  %4900 = vmatprep.subr.bf16.mxu1 (!%p323_p2), %v5054_v41  ;;  %s5471_s19 = smov (!%p323_p2), 96  }
   0x7   : > { %4585 = vmatpush3.bf16.msra.mxu0 (!%p323_p2), %v5054_v41  ;;  %4904 = vmatpush3.bf16.msra.mxu1 (!%p323_p2), %v5054_v41 }
   0x8   : > { %4586 = vmatprep.subr.bf16.mxu0 (!%p323_p2), %v5055_v51  ;;  %4901 = vmatprep.subr.bf16.mxu1 (!%p323_p2), %v5055_v51 }
   0xb   : > { %4587 = vmatpush3.bf16.msra.mxu0 (!%p323_p2), %v5055_v51  ;;  %4905 = vmatpush3.bf16.msra.mxu1 (!%p323_p2), %v5055_v51 }
   0xd   : > { %s7366_s14 = smov (!%p365_p3, %s4134_s14), 1 }
   0xe   : > { %s5535_s15 = smul.u32 192, %s7366_s14 }
  0x10   : > { %s5541_s18 = scalar_lea.vmem %s7354_s0, %s5535_s15  ;;  %s5776_s12 = scalar_lea.vmem %s7355_s1, %s5535_s15 }
  0x11   : > { %v5544_v0 = vld [vmem:[%s5541_s18 + $0x10] sm:$0xff]  ;;  %v5547_v1 = vld [vmem:[%s5541_s18] sm:$0xff]  ;;  %v5550_v2 = vld [vmem:[%s5541_s18 + $0x18] sm:$0xff]  ;;  %s7100_s16 = scalar_lea.vmem %s7364_s10, %s5535_s15 }
  0x12   : > { %v5553_v3 = vsub.f32 0.0, %v5544_v0  ;;  %v5556_v4 = vsub.f32 0.0, %v5547_v1  ;;  %v5559_v5 = vsub.f32 0.0, %v5550_v2  ;;  %v5562_v6 = vld [vmem:[%s5541_s18 + $0x8] sm:$0xff]  ;;  %v5568_v8 = vld [vmem:[%s5541_s18 + $0x20] sm:$0xff]  ;;  %v5584_v16 = vld [vmem:[%s5541_s18 + $0x38] sm:$0xff] }
  0x13   : > { %v5565_v7 = vld [vmem:[%s5541_s18 + $0x28] sm:$0xff]  ;;  %v5571_v9 = vsub.f32 0.0, %v5562_v6  ;;  %v5577_v11 = vsub.f32 0.0, %v5568_v8  ;;  %v5587_v17 = vld [vmem:[%s5541_s18 + $0x30] sm:$0xff]  ;;  %v5594_v22 = vld [vmem:[%s5541_s18 + $0x40] sm:$0xff]  ;;  %v5598_v27 = vsub.f32 0.0, %v5584_v16 }
  0x14   : > { %v5574_v10 = vsub.f32 0.0, %v5565_v7  ;;  %v599_v12 = vmin.f32 %v5553_v3, 0.0  ;;  %v597_v13 = vmin.f32 %v5556_v4, 0.0  ;;  %v600_v14 = vmin.f32 %v5559_v5, 0.0  ;;  %v5590_v18 = vld [vmem:[%s5541_s18 + $0x48] sm:$0xff]  ;;  %v5611_v33 = vld [vmem:[%s5541_s18 + $0x50] sm:$0xff] }
  0x15   : > { %v598_v15 = vmin.f32 %v5571_v9, 0.0  ;;  %v601_v25 = vmin.f32 %v5577_v11, 0.0  ;;  %v5601_v28 = vsub.f32 0.0, %v5587_v17  ;;  %v5604_v30 = vsub.f32 0.0, %v5590_v18  ;;  %v5616_v36 = vld [vmem:[%s5541_s18 + $0x58] sm:$0xff]  ;;  %v393_v39 = vld [vmem:[%s5541_s18 + $0x60] sm:$0xff] }
  0x16   : > { %v625_v19 = vmul.f32 1.442695, %v599_v12  ;;  %v621_v20 = vmul.f32 1.442695, %v597_v13  ;;  %v602_v21 = vmin.f32 %v5574_v10, 0.0  ;;  %v5607_v31 = vsub.f32 0.0, %v5594_v22 }
  0x17   : > { %v627_v23 = vmul.f32 1.442695, %v600_v14  ;;  %v623_v24 = vmul.f32 1.442695, %v598_v15  ;;  %v629_v29 = vmul.f32 1.442695, %v601_v25 }
  0x18   : > { %5090 = vpow2.f32 %v625_v19  ;;  %v631_v26 = vmul.f32 1.442695, %v602_v21  ;;  %v604_v32 = vmin.f32 %v5598_v27, 0.0  ;;  %v603_v34 = vmin.f32 %v5601_v28, 0.0  ;;  %v5621_v40 = vld [vmem:[%s5541_s18 + $0x68] sm:$0xff]  ;;  %v395_v47 = vld [vmem:[%s5541_s18 + $0x70] sm:$0xff] }
  0x19   : > { %5092 = vpow2.f32 %v621_v20  ;;  %v606_v35 = vmin.f32 %v5604_v30, 0.0  ;;  %v605_v38 = vmin.f32 %v5607_v31, 0.0  ;;  %v5627_v44 = vsub.f32 0.0, %v5611_v33  ;;  %v5644_v53 = vld [vmem:[%s5541_s18 + $0x78] sm:$0xff]  ;;  %v397_v59 = vld [vmem:[%s5541_s18 + $0x80] sm:$0xff]  ;;  %v5056_v12 = vld [vmem:[%s7358_s4 + $0x30] sm:$0xff]  }
  0x1a   : > { %5094 = vpow2.f32 %v627_v23  ;;  %v635_v37 = vmul.f32 1.442695, %v604_v32  ;;  %v633_v42 = vmul.f32 1.442695, %v603_v34  ;;  %v5630_v46 = vsub.f32 0.0, %v5616_v36  ;;  %4588 = vmatprep.subr.bf16.mxu0 %v5056_v12  ;;  %4902 = vmatprep.subr.bf16.mxu1 %v5056_v12  ;;  %v5698_v51 = vld [vmem:[%s5541_s18 + $0x98] sm:$0xff] }
  0x1b   : > { %5096 = vpow2.f32 %v623_v24  ;;  %v639_v43 = vmul.f32 1.442695, %v606_v35  ;;  %v637_v45 = vmul.f32 1.442695, %v605_v38  ;;  %v607_v48 = vmin.f32 %v5627_v44, 0.0  ;;  %v5678_v38 = vld [vmem:[%s5541_s18 + $0x88] sm:$0xff]  ;;  %4589 = vmatpush3.bf16.msra.mxu0 %v5056_v12  ;;  %4906 = vmatpush3.bf16.msra.mxu1 %v5056_v12 }
  0x1c   : > { %5098 = vpow2.f32 %v631_v26  ;;  %v5634_v49 = vsub.f32 0.0, %v393_v39  ;;  %v5637_v50 = vsub.f32 0.0, %v5621_v40  ;;  %v608_v52 = vmin.f32 %v5630_v46, 0.0 }
  0x1d   : > { %5100 = vpow2.f32 %v629_v29  ;;  %vm575_vm0 = vcmp.gt.f32.partialorder %v5553_v3, 0.0  ;;  %vm573_vm1 = vcmp.gt.f32.partialorder %v5556_v4, 0.0  ;;  %v641_v54 = vmul.f32 1.442695, %v607_v48 }
  0x1e   : > { %5102 = vpow2.f32 %v635_v37  ;;  %vm576_vm2 = vcmp.gt.f32.partialorder %v5559_v5, 0.0  ;;  %v643_v56 = vmul.f32 1.442695, %v608_v52  ;;  %v610_v57 = vmin.f32 %v5637_v50, 0.0 }
  0x1f   : > { %5104 = vpow2.f32 %v633_v42  ;;  %v5650_v58 = vsub.f32 0.0, %v395_v47  ;;  %v609_v62 = vmin.f32 %v5634_v49, 0.0  ;;  %v5655_v63 = vsub.f32 0.0, %v5644_v53  ;;  %v5689_v42 = vld [vmem:[%s5541_s18 + $0x90] sm:$0xff] }
  0x20   : > { %5106 = vpow2.f32 %v639_v43  ;;  %vm574_vm3 = vcmp.gt.f32.partialorder %v5571_v9, 0.0  ;;  %vm578_vm4 = vcmp.gt.f32.partialorder %v5574_v10, 0.0  ;;  %v5666_v23 = vsub.f32 0.0, %v397_v59  ;;  %v5058_v59 = vld [vmem:[%s7358_s4] sm:$0xff]  }
  0x21   : > { %5108 = vpow2.f32 %v637_v45  ;;  %v611_v21 = vmin.f32 %v5650_v58, 0.0  ;;  %v645_v35 = vmul.f32 1.442695, %v609_v62  ;;  %v612_v37 = vmin.f32 %v5655_v63, 0.0  ;;  %v5717_v62 = vld [vmem:[%s5541_s18 + $0xa8] sm:$0xff] }
  0x22   : > { %v5091_v55 = vpop.eup %5090  ;;  %5110 = vpow2.f32 %v641_v54  ;;  %vm577_vm5 = vcmp.gt.f32.partialorder %v5577_v11, 0.0  ;;  %vm580_vm6 = vcmp.gt.f32.partialorder %v5598_v27, 0.0  ;;  %vm579_vm7 = vcmp.gt.f32.partialorder %v5601_v28, 0.0 }
  0x23   : > { %v5093_v60 = vpop.eup %5092  ;;  %v4168_v61 = vadd.f32 -1.0, %v5091_v55  ;;  %5112 = vpow2.f32 %v643_v56  ;;  %v649_v45 = vmul.f32 1.442695, %v611_v21  ;;  %v613_v47 = vmin.f32 %v5666_v23, 0.0 }
  0x24   : > { %v5095_v13 = vpop.eup %5094  ;;  %v4166_v14 = vadd.f32 -1.0, %v5093_v60  ;;  %v5695_v48 = vsub.f32 0.0, %v5678_v38  ;;  %v5705_v56 = vsub.f32 0.0, %v5689_v42  ;;  %vm582_vm8 = vcmp.gt.f32.partialorder %v5604_v30, 0.0 }
  0x25   : > { %v5097_v15 = vpop.eup %5096  ;;  %v695_v19 = vsel %vm575_vm0, %v5553_v3, %v4168_v61  ;;  %v4169_v20 = vadd.f32 -1.0, %v5095_v13  ;;  %v647_v3 = vmul.f32 1.442695, %v610_v57  ;;  %v5708_v57 = vld [vmem:[%s5541_s18 + $0xa0] sm:$0xff]  ;;  %v653_v12 = vmul.f32 1.442695, %v613_v47 }
  0x26   : > { %v5099_v24 = vpop.eup %5098  ;;  %745 = vrot.lane.b32.xlu1 %v695_v19, %s5467_s25  ;;  %v693_v25 = vsel %vm573_vm1, %v5556_v4, %v4166_v14  ;;  %v4167_v26 = vadd.f32 -1.0, %v5097_v15  ;;  %v5057_v4 = vld [vmem:[%s7358_s4 + $0x38] sm:$0xff]   ;;  %v614_v13 = vmin.f32 %v5695_v48, 0.0  ;;  %v615_v14 = vmin.f32 %v5705_v56, 0.0 }
  0x27   : > { %v5101_v29 = vpop.eup %5100  ;;  %741 = vrot.lane.b32.xlu0 %v693_v25, %s5467_s25  ;;  %v696_v32 = vsel %vm576_vm2, %v5559_v5, %v4169_v20  ;;  %v4171_v34 = vadd.f32 -1.0, %v5099_v24  ;;  %4590 = vmatprep.subr.bf16.mxu0 %v5057_v4  ;;  %5114 = vpow2.f32 %v647_v3  ;;  %v5731_v24 = vsub.f32 0.0, %v5708_v57 }
  0x28   : > { %v5103_v39 = vpop.eup %5102  ;;  %v694_v41 = vsel %vm574_vm3, %v5571_v9, %v4167_v26  ;;  %v4170_v5 = vadd.f32 -1.0, %v5101_v29  ;;  %4903 = vmatprep.subr.bf16.mxu1 %v5057_v4  ;;  %v651_v9 = vmul.f32 1.442695, %v612_v37  ;;  %5116 = vpow2.f32 %v645_v35  ;;  %4591 = vmatpush3.bf16.msra.mxu0 %v5057_v4 }
  0x29   : > { %v5105_v43 = vpop.eup %5104  ;;  %v698_v54 = vsel %vm578_vm4, %v5574_v10, %v4171_v34  ;;  %v4173_v55 = vadd.f32 -1.0, %v5103_v39  ;;  %4907 = vmatpush3.bf16.msra.mxu1 %v5057_v4  ;;  %5118 = vpow2.f32 %v649_v45  ;;  %4612 = vmatprep.subr.bf16.mxu0 %v5058_v59  ;;  %v655_v21 = vmul.f32 1.442695, %v614_v13  ;;  %v5742_v34 = vld [vmem:[%s5541_s18 + $0xb0] sm:$0xff] }
  0x2a   : > { %747 = vrot.lane.b32.xlu1 %v696_v32, %s5467_s25  ;;  %v5107_v52 = vpop.eup %5106  ;;  %v697_v60 = vsel %vm577_vm5, %v5577_v11, %v4170_v5  ;;  %v4172_v61 = vadd.f32 -1.0, %v5105_v43  ;;  %5120 = vpow2.f32 %v651_v9  ;;  %v5724_v11 = vsub.f32 0.0, %v5698_v51 }
  0x2b   : > { %743 = vrot.lane.b32.xlu0 %v694_v41, %s5467_s25  ;;  %v5109_v10 = vpop.eup %5108  ;;  %v4175_v19 = vadd.f32 -1.0, %v5107_v52  ;;  %v700_v20 = vsel %vm580_vm6, %v5598_v27, %v4173_v55  ;;  %v5734_v25 = vsub.f32 0.0, %v5717_v62  ;;  %vm581_vm9 = vcmp.gt.f32.partialorder %v5607_v31, 0.0 }
  0x2c   : > { %v5111_v15 = vpop.eup %5110  ;;  %v699_v3 = vsel %vm579_vm7, %v5601_v28, %v4172_v61  ;;  %v4174_v29 = vadd.f32 -1.0, %v5109_v10  ;;  %v616_v32 = vmin.f32 %v5724_v11, 0.0  ;;  %5122 = vpow2.f32 %v653_v12 }
  0x2d   : > { %v5113_v26 = vpop.eup %5112  ;;  %v657_v27 = vmul.f32 1.442695, %v615_v14  ;;  %v702_v35 = vsel %vm582_vm8, %v5604_v30, %v4175_v19  ;;  %5124 = vpow2.f32 %v655_v21  ;;  %v617_v4 = vmin.f32 %v5731_v24, 0.0 }
  0x2e   : > { %751 = vrot.lane.b32.xlu1 %v698_v54, %s5467_s25  ;;  %v659_v37 = vmul.f32 1.442695, %v616_v32  ;;  %v4177_v28 = vadd.f32 -1.0, %v5113_v26  ;;  %v618_v39 = vmin.f32 %v5734_v25, 0.0  ;;  %v5752_v41 = vsub.f32 0.0, %v5742_v34  ;;  %v1727_v32 = vld [vmem:[%s5776_s12 + $0x19] sm:$0xff] }
  0x2f   : > { %749 = vrot.lane.b32.xlu0 %v697_v60, %s5467_s25  ;;  %v701_v43 = vsel %vm581_vm9, %v5607_v31, %v4174_v29  ;;  %v4176_v45 = vadd.f32 -1.0, %v5111_v15  ;;  %vm584_vm10 = vcmp.gt.f32.partialorder %v5630_v46, 0.0  ;;  %vm583_vm11 = vcmp.gt.f32.partialorder %v5627_v44, 0.0 }
  0x30   : > { %5126 = vpow2.f32 %v657_v27  ;;  %v663_v47 = vmul.f32 1.442695, %v618_v39  ;;  %v704_v52 = vsel %vm584_vm10, %v5630_v46, %v4177_v28  ;;  %v661_v55 = vmul.f32 1.442695, %v617_v4  ;;  %v1728_v27 = vld [vmem:[%s5776_s12 + $0x21] sm:$0xff] }
  0x31   : > { %v5115_v5 = vpop.eup %5114  ;;  %5128 = vpow2.f32 %v659_v37  ;;  %v619_v31 = vmin.f32 %v5752_v41, 0.0  ;;  %v703_v60 = vsel %vm583_vm11, %v5627_v44, %v4176_v45  ;;  %vm586_vm12 = vcmp.gt.f32.partialorder %v5637_v50, 0.0 }
  0x32   : > { %755 = vrot.lane.b32.xlu1 %v700_v20, %s5467_s25  ;;  %v5117_v30 = vpop.eup %5116  ;;  %v4179_v54 = vadd.f32 -1.0, %v5115_v5  ;;  %vm585_vm13 = vcmp.gt.f32.partialorder %v5634_v49, 0.0  ;;  %5130 = vpow2.f32 %v663_v47  ;;  %vm588_vm14 = vcmp.gt.f32.partialorder %v5655_v63, 0.0  ;;  %v1729_v5 = vld [vmem:[%s5776_s12 + $0x29] sm:$0xff] }
  0x33   : > { %753 = vrot.lane.b32.xlu0 %v699_v3, %s5467_s25  ;;  %v5119_v9 = vpop.eup %5118  ;;  %v4178_v61 = vadd.f32 -1.0, %v5117_v30  ;;  %5132 = vpow2.f32 %v661_v55  ;;  %v665_v13 = vmul.f32 1.442695, %v619_v31  ;;  %vm587_vm15 = vcmp.gt.f32.partialorder %v5650_v58, 0.0  ;;  %v1726_v3 = vld [vmem:[%s5776_s12 + $0x11] sm:$0xff] }
  0x34   : > { %v5121_v59 = vpop.eup %5120  ;;  %v706_v46 = vsel %vm586_vm12, %v5637_v50, %v4179_v54  ;;  %v4180_v15 = vadd.f32 -1.0, %v5119_v9  ;;  %vm590_vm0 = vcmp.gt.f32.partialorder %v5695_v48, 0.0  ;;  %vm589_vm1 = vcmp.gt.f32.partialorder %v5666_v23, 0.0 }
  0x35   : > { %v4181_v12 = vadd.f32 -1.0, %v5121_v59  ;;  %v705_v44 = vsel %vm585_vm13, %v5634_v49, %v4178_v61  ;;  %5134 = vpow2.f32 %v665_v13  ;;  %v1866_v37 = vsub.f32 0.0, %v1726_v3 }
  0x36   : > { %759 = vrot.lane.b32.xlu1 %v702_v35, %s5467_s25  ;;  %v5123_v10 = vpop.eup %5122  ;;  %v707_v21 = vsel %vm587_vm15, %v5650_v58, %v4180_v15  ;;  %vm591_vm2 = vcmp.gt.f32.partialorder %v5705_v56, 0.0  ;;  %vm592_vm3 = vcmp.gt.f32.partialorder %v5724_v11, 0.0  ;;  %v1867_v39 = vsub.f32 0.0, %v1727_v32 }
  0x37   : > { %757 = vrot.lane.b32.xlu0 %v701_v43, %s5467_s25  ;;  %v5125_v14 = vpop.eup %5124  ;;  %v708_v49 = vsel %vm588_vm14, %v5655_v63, %v4181_v12  ;;  %v4182_v26 = vadd.f32 -1.0, %v5123_v10  ;;  %v1906_v43 = vmin.f32 %v1866_v37, 0.0  ;;  %v5795_v45 = vsub.f32 0.0, %v1728_v27  ;;  %v1730_v12 = vld [vmem:[%s5776_s12 + $0x31] sm:$0xff] }
  0x38   : > { %v4183_v19 = vadd.f32 -1.0, %v5125_v14  ;;  %vm594_vm4 = vcmp.gt.f32.partialorder %v5734_v25, 0.0  ;;  %v1907_v9 = vmin.f32 %v1867_v39, 0.0  ;;  %v1869_v54 = vsub.f32 0.0, %v1729_v5  ;;  %v1732_v14 = vld [vmem:[%s5776_s12 + $0x41] sm:$0xff] }
  0x39   : > { %v709_v58 = vsel %vm589_vm1, %v5666_v23, %v4182_v26  ;;  %vm593_vm5 = vcmp.gt.f32.partialorder %v5731_v24, 0.0  ;;  %v1908_v31 = vmin.f32 %v5795_v45, 0.0  ;;  %vm595_vm6 = vcmp.gt.f32.partialorder %v5752_v41, 0.0 }
  0x3a   : > { %763 = vrot.lane.b32.xlu1 %v704_v52, %s5467_s25  ;;  %v5127_v50 = vpop.eup %5126  ;;  %v710_v63 = vsel %vm590_vm0, %v5695_v48, %v4183_v19  ;;  %v1926_v52 = vmul.f32 1.442695, %v1906_v43  ;;  %v1928_v59 = vmul.f32 1.442695, %v1907_v9  ;;  %vm1886_vm7 = vcmp.gt.f32.partialorder %v1866_v37, 0.0 }
  0x3b   : > { %761 = vrot.lane.b32.xlu0 %v703_v60, %s5467_s25  ;;  %v5129_v20 = vpop.eup %5128  ;;  %v4184_v29 = vadd.f32 -1.0, %v5127_v50  ;;  %v1930_v10 = vmul.f32 1.442695, %v1908_v31  ;;  %v5820_v50 = vsub.f32 0.0, %v1732_v14  ;;  %vm1887_vm8 = vcmp.gt.f32.partialorder %v1867_v39, 0.0 }
  0x3c   : > { %v4185_v35 = vadd.f32 -1.0, %v5129_v20  ;;  %v5131_v28 = vpop.eup %5130  ;;  %5136 = vpow2.f32 %v1926_v52  ;;  %vm1888_vm9 = vcmp.gt.f32.partialorder %v5795_v45, 0.0  ;;  %vm1889_vm10 = vcmp.gt.f32.partialorder %v1869_v54, 0.0  ;;  %v1735_v52 = vld [vmem:[%s5776_s12 + $0x59] sm:$0xff] }
  0x3d   : > { %v5133_v4 = vpop.eup %5132  ;;  %v711_v48 = vsel %vm591_vm2, %v5705_v56, %v4184_v29  ;;  %v4187_v23 = vadd.f32 -1.0, %v5131_v28  ;;  %5138 = vpow2.f32 %v1928_v59  ;;  %v1912_v3 = vmin.f32 %v5820_v50, 0.0  ;;  %v1737_v59 = vld [vmem:[%s5776_s12 + $0x69] sm:$0xff] }
  0x3e   : > { %767 = vrot.lane.b32.xlu1 %v706_v46, %s5467_s25  ;;  %v712_v30 = vsel %vm592_vm3, %v5724_v11, %v4185_v35  ;;  %v4186_v47 = vadd.f32 -1.0, %v5133_v4  ;;  %v1909_v11 = vmin.f32 %v1869_v54, 0.0  ;;  %5140 = vpow2.f32 %v1930_v10 }
  0x3f   : > { %765 = vrot.lane.b32.xlu0 %v705_v44, %s5467_s25  ;;  %v5135_v55 = vpop.eup %5134  ;;  %v714_v56 = vsel %vm594_vm4, %v5734_v25, %v4187_v23  ;;  %v1731_v25 = vld [vmem:[%s5776_s12 + $0x39] sm:$0xff]  ;;  %v5814_v44 = vsub.f32 0.0, %v1730_v12  ;;  %vm1892_vm13 = vcmp.gt.f32.partialorder %v5820_v50, 0.0 }
  0x40   : > { %v713_v60 = vsel %vm593_vm5, %v5731_v24, %v4186_v47  ;;  %v4188_v61 = vadd.f32 -1.0, %v5135_v55  ;;  %v1932_v46 = vmul.f32 1.442695, %v1909_v11  ;;  %v1733_v24 = vld [vmem:[%s5776_s12 + $0x49] sm:$0xff]  ;;  %v5818_v15 = vsub.f32 0.0, %v1731_v25  ;;  %v1734_v47 = vld [vmem:[%s5776_s12 + $0x51] sm:$0xff] }
  0x41   : > { %v1910_v20 = vmin.f32 %v5814_v44, 0.0  ;;  %v5835_v31 = vsub.f32 0.0, %v1734_v47  ;;  %vm1890_vm11 = vcmp.gt.f32.partialorder %v5814_v44, 0.0 }
  0x42   : > { %771 = vrot.lane.b32.xlu1 %v708_v49, %s5467_s25  ;;  %5142 = vpow2.f32 %v1932_v46  ;;  %v715_v13 = vsel %vm595_vm6, %v5752_v41, %v4188_v61  ;;  %v5824_v41 = vsub.f32 0.0, %v1733_v24  ;;  %vm1891_vm12 = vcmp.gt.f32.partialorder %v5818_v15, 0.0 }
  0x43   : > { %769 = vrot.lane.b32.xlu0 %v707_v21, %s5467_s25  ;;  %v1911_v21 = vmin.f32 %v5818_v15, 0.0  ;;  %v1934_v27 = vmul.f32 1.442695, %v1910_v20  ;;  %vm1894_vm15 = vcmp.gt.f32.partialorder %v5835_v31, 0.0 }
  0x44   : > { %v1913_v28 = vmin.f32 %v5824_v41, 0.0  ;;  %vm1893_vm14 = vcmp.gt.f32.partialorder %v5824_v41, 0.0 }
  0x45   : > { %5144 = vpow2.f32 %v1934_v27  ;;  %v1738_v27 = vld [vmem:[%s5776_s12 + $0x71] sm:$0xff] }
  0x46   : > { %775 = vrot.lane.b32.xlu1 %v710_v63, %s5467_s25  ;;  %v5137_v49 = vpop.eup %5136  ;;  %v1936_v63 = vmul.f32 1.442695, %v1911_v21 }
  0x47   : > { %773 = vrot.lane.b32.xlu0 %v709_v58, %s5467_s25  ;;  %v4290_v19 = vadd.f32 -1.0, %v5137_v49  ;;  %v5139_v26 = vpop.eup %5138  ;;  %v1938_v58 = vmul.f32 1.442695, %v1912_v3 }
  0x48   : > { %v4291_v29 = vadd.f32 -1.0, %v5139_v26  ;;  %v5141_v35 = vpop.eup %5140  ;;  %5146 = vpow2.f32 %v1936_v63 }
  0x49   : > { %v1986_v32 = vsel %vm1886_vm7, %v1866_v37, %v4290_v19  ;;  %v4292_v43 = vadd.f32 -1.0, %v5141_v35  ;;  %v1940_v37 = vmul.f32 1.442695, %v1913_v28  ;;  %5148 = vpow2.f32 %v1938_v58  ;;  %v1739_v28 = vld [vmem:[%s5776_s12 + $0x79] sm:$0xff] }
  0x4a   : > { %779 = vrot.lane.b32.xlu1 %v712_v30, %s5467_s25  ;;  %v1987_v5 = vsel %vm1887_vm8, %v1867_v39, %v4291_v29  ;;  %v1736_v39 = vld [vmem:[%s5776_s12 + $0x61] sm:$0xff] }
  0x4b   : > { %777 = vrot.lane.b32.xlu0 %v711_v48, %s5467_s25  ;;  %v5002_v48 = vpack.i.bf16 %v1987_v5, %v1986_v32  ;;  %v1988_v23 = vsel %vm1888_vm9, %v5795_v45, %v4292_v43  ;;  %5150 = vpow2.f32 %v1940_v37  ;;  %v5840_v11 = vsub.f32 0.0, %v1736_v39  ;;  %v1742_v37 = vld [vmem:[%s5776_s12 + $0x91] sm:$0xff] }
  0x4c   : > { %v5143_v4 = vpop.eup %5142  ;;  %v1914_v45 = vmin.f32 %v5835_v31, 0.0  ;;  %v5866_v5 = vsub.f32 0.0, %v1739_v28  ;;  %v5880_v39 = vsub.f32 0.0, %v1742_v37 }
  0x4d   : > { %v4293_v30 = vadd.f32 -1.0, %v5143_v4  ;;  %v1916_v25 = vmin.f32 %v5840_v11, 0.0  ;;  %v5864_v4 = vsub.f32 0.0, %v1738_v27  ;;  %vm1896_vm1 = vcmp.gt.f32.partialorder %v5840_v11, 0.0 }
  0x4e   : > { %783 = vrot.lane.b32.xlu1 %v714_v56, %s5467_s25  ;;  %v5838_v56 = vsub.f32 0.0, %v1735_v52  ;;  %v1942_v12 = vmul.f32 1.442695, %v1914_v45  ;;  %vm1899_vm4 = vcmp.gt.f32.partialorder %v5866_v5, 0.0  ;;  %vm1902_vm7 = vcmp.gt.f32.partialorder %v5880_v39, 0.0 }
  0x4f   : > { %781 = vrot.lane.b32.xlu0 %v713_v60, %s5467_s25  ;;  %v1989_v9 = vsel %vm1889_vm10, %v1869_v54, %v4293_v30  ;;  %v5145_v61 = vpop.eup %5144  ;;  %v5846_v54 = vsub.f32 0.0, %v1737_v59  ;;  %v1946_v26 = vmul.f32 1.442695, %v1916_v25  ;;  %v1919_v30 = vmin.f32 %v5866_v5, 0.0 }
  0x50   : > { %v5007_v55 = vpack.i.bf16 %v1989_v9, %v1988_v23  ;;  %v1915_v60 = vmin.f32 %v5838_v56, 0.0  ;;  %v4294_v46 = vadd.f32 -1.0, %v5145_v61  ;;  %5152 = vpow2.f32 %v1942_v12  ;;  %v1743_v23 = vld [vmem:[%s5776_s12 + $0x99] sm:$0xff] }
  0x51   : > { %v1917_v49 = vmin.f32 %v5846_v54, 0.0  ;;  %v1952_v47 = vmul.f32 1.442695, %v1919_v30  ;;  %v5882_v59 = vsub.f32 0.0, %v1743_v23  ;;  %vm1895_vm0 = vcmp.gt.f32.partialorder %v5838_v56, 0.0 }
  0x52   : > { %5003 = vrot.lane.b32.xlu1 %v5002_v48, %s5467_s25  ;;  %v5147_v10 = vpop.eup %5146  ;;  %v1990_v20 = vsel %vm1890_vm11, %v5814_v44, %v4294_v46  ;;  %v1740_v44 = vld [vmem:[%s5776_s12 + $0x81] sm:$0xff]  ;;  %v1741_v48 = vld [vmem:[%s5776_s12 + $0x89] sm:$0xff]  ;;  %vm1897_vm2 = vcmp.gt.f32.partialorder %v5846_v54, 0.0  ;;  %vm1898_vm3 = vcmp.gt.f32.partialorder %v5864_v4, 0.0  ;;  %v431_v30 = vmin.f32 %v5544_v0, 0.0 }
  0x53   : > { %785 = vrot.lane.b32.xlu0 %v715_v13, %s5467_s25  ;;  %v1944_v13 = vmul.f32 1.442695, %v1915_v60  ;;  %v5149_v14 = vpop.eup %5148  ;;  %v4295_v24 = vadd.f32 -1.0, %v5147_v10  ;;  %v1948_v32 = vmul.f32 1.442695, %v1917_v49  ;;  %v5868_v43 = vsub.f32 0.0, %v1740_v44 }
  0x54   : > { %v4296_v21 = vadd.f32 -1.0, %v5149_v14  ;;  %v5876_v9 = vsub.f32 0.0, %v1741_v48  ;;  %v1922_v49 = vmin.f32 %v5880_v39, 0.0  ;;  %vm1903_vm8 = vcmp.gt.f32.partialorder %v5882_v59, 0.0 }
  0x55   : > { %v5151_v19 = vpop.eup %5150  ;;  %v1991_v3 = vsel %vm1891_vm12, %v5818_v15, %v4295_v24  ;;  %5154 = vpow2.f32 %v1944_v13  ;;  %v1920_v52 = vmin.f32 %v5868_v43, 0.0  ;;  %vm1900_vm5 = vcmp.gt.f32.partialorder %v5868_v43, 0.0 }
  0x56   : > { %v4297_v29 = vadd.f32 -1.0, %v5151_v19  ;;  %v5012_v63 = vpack.i.bf16 %v1991_v3, %v1990_v20  ;;  %v1992_v35 = vsel %vm1892_vm13, %v5820_v50, %v4296_v21  ;;  %5156 = vpow2.f32 %v1946_v26  ;;  %v1744_v19 = vld [vmem:[%s5776_s12 + $0xa1] sm:$0xff]  ;;  %v1745_v20 = vld [vmem:[%s5776_s12 + $0xa9] sm:$0xff] }
  0x57   : > { %5008 = vrot.lane.b32.xlu0 %v5007_v55, %s5467_s25  ;;  %5158 = vpow2.f32 %v1948_v32  ;;  %v1918_v50 = vmin.f32 %v5864_v4, 0.0  ;;  %v1921_v61 = vmin.f32 %v5876_v9, 0.0  ;;  %v1954_v12 = vmul.f32 1.442695, %v1920_v52 }
  0x58   : > { %v1993_v58 = vsel %vm1893_vm14, %v5824_v41, %v4297_v29  ;;  %5013 = vrot.lane.b32.xlu1 %v5012_v63, %s5467_s25  ;;  %v1923_v3 = vmin.f32 %v5882_v59, 0.0  ;;  %v1958_v27 = vmul.f32 1.442695, %v1922_v49  ;;  %v5902_v28 = vsub.f32 0.0, %v1745_v20 }
  0x59   : > { %v5017_v15 = vpack.i.bf16 %v1993_v58, %v1992_v35  ;;  %v1950_v41 = vmul.f32 1.442695, %v1918_v50  ;;  %v1956_v24 = vmul.f32 1.442695, %v1921_v61  ;;  %v5900_v35 = vsub.f32 0.0, %v1744_v19 }
  0x5a   : > { %v5153_v55 = vpop.eup %5152  ;;  %v1960_v63 = vmul.f32 1.442695, %v1923_v3  ;;  %v1925_v44 = vmin.f32 %v5902_v28, 0.0  ;;  %vm1901_vm6 = vcmp.gt.f32.partialorder %v5876_v9, 0.0  ;;  %v457_v61 = vmul.f32 1.442695, %v431_v30 }
  0x5b   : > { %5018 = vrot.lane.b32.xlu0 %v5017_v15, %s5467_s25  ;;  %5160 = vpow2.f32 %v1950_v41  ;;  %v4298_v60 = vadd.f32 -1.0, %v5153_v55  ;;  %v433_v20 = vmin.f32 %v5568_v8, 0.0  ;;  %vm1904_vm9 = vcmp.gt.f32.partialorder %v5900_v35, 0.0  ;;  %v5415_v30 = vld [vmem:[%s5541_s18] sm:$0xff] }
  0x5c   : > { %5162 = vpow2.f32 %v1952_v47  ;;  %v1964_v48 = vmul.f32 1.442695, %v1925_v44  ;;  %v429_v47 = vmin.f32 %v5547_v1, 0.0  ;;  %v436_v3 = vmin.f32 %v5584_v16, 0.0 }
  0x5d   : > { %v1994_v25 = vsel %vm1894_vm15, %v5835_v31, %v4298_v60  ;;  %5164 = vpow2.f32 %v1954_v12  ;;  %vm1905_vm10 = vcmp.gt.f32.partialorder %v5902_v28, 0.0  ;;  %vm405_vm12 = vcmp.gt.f32.partialorder %v5415_v30, 0.0 }
  0x5e   : > { %5166 = vpow2.f32 %v1956_v24  ;;  %v453_v12 = vmul.f32 1.442695, %v429_v47  ;;  %vm813_vm13 = vcmask 261120   ;;  %vm838_vm14 = vcmask 523264  }
  0x5f   : > { %v5155_v45 = vpop.eup %5154  ;;  %5168 = vpow2.f32 %v1958_v27  ;;  %v438_v27 = vmin.f32 %v5590_v18, 0.0  ;;  %v440_v18 = vmin.f32 %v5616_v36, 0.0 }
  0x60   : > { %v5157_v10 = vpop.eup %5156  ;;  %v4299_v46 = vadd.f32 -1.0, %v5155_v45  ;;  %5170 = vpow2.f32 %v1960_v63  ;;  %v467_v63 = vmul.f32 1.442695, %v436_v3 }
  0x61   : > { %v5159_v13 = vpop.eup %5158  ;;  %v4300_v14 = vadd.f32 -1.0, %v5157_v10  ;;  %v475_v36 = vmul.f32 1.442695, %v440_v18 }
  0x62   : > { %v1995_v21 = vsel %vm1895_vm0, %v5838_v56, %v4299_v46  ;;  %v4301_v26 = vadd.f32 -1.0, %v5159_v13  ;;  %v432_v46 = vmin.f32 %v5550_v2, 0.0 }
  0x63   : > { %v5022_v29 = vpack.i.bf16 %v1995_v21, %v1994_v25  ;;  %v1996_v32 = vsel %vm1896_vm1, %v5840_v11, %v4300_v14  ;;  %v1924_v11 = vmin.f32 %v5900_v35, 0.0  ;;  %v434_v14 = vmin.f32 %v5565_v7, 0.0 }
  0x64   : > { %v1997_v31 = vsel %vm1897_vm2, %v5846_v54, %v4301_v26 }
  0x65   : > { %5023 = vrot.lane.b32.xlu1 %v5022_v29, %s5467_s25  ;;  %v5027_v56 = vpack.i.bf16 %v1997_v31, %v1996_v32  ;;  %v5161_v58 = vpop.eup %5160  ;;  %v1962_v50 = vmul.f32 1.442695, %v1924_v11  ;;  %v463_v26 = vmul.f32 1.442695, %v434_v14  ;;  %v435_v32 = vmin.f32 %v5587_v17, 0.0 }
  0x66   : > { %v5163_v54 = vpop.eup %5162  ;;  %v4302_v15 = vadd.f32 -1.0, %v5161_v58  ;;  %v437_v11 = vmin.f32 %v5594_v22, 0.0  ;;  %v471_v58 = vmul.f32 1.442695, %v438_v27  ;;  %v5967_v27 = vld [vmem:[%s5541_s18 + $0x80] sm:$0xff] }
  0x67   : > { %5028 = vrot.lane.b32.xlu0 %v5027_v56, %s5467_s25  ;;  %v4303_v37 = vadd.f32 -1.0, %v5163_v54  ;;  %5172 = vpow2.f32 %v1962_v50  ;;  %v5165_v41 = vpop.eup %5164  ;;  %v465_v56 = vmul.f32 1.442695, %v435_v32  ;;  %v5414_v50 = vld [vmem:[%s5541_s18 + $0x10] sm:$0xff] }
  0x68   : > { %v1998_v23 = vsel %vm1898_vm3, %v5864_v4, %v4302_v15  ;;  %5174 = vpow2.f32 %v1964_v48  ;;  %v5167_v55 = vpop.eup %5166  ;;  %v4304_v60 = vadd.f32 -1.0, %v5165_v41  ;;  %v430_v4 = vmin.f32 %v5562_v6, 0.0 }
  0x69   : > { %v1999_v52 = vsel %vm1899_vm4, %v5866_v5, %v4303_v37  ;;  %v4305_v10 = vadd.f32 -1.0, %v5167_v55  ;;  %v5169_v0 = vpop.eup %5168  ;;  %5176 = vpow2.f32 %v457_v61  ;;  %v459_v6 = vmul.f32 1.442695, %v432_v46 }
  0x6a   : > { %v5032_v45 = vpack.i.bf16 %v1999_v52, %v1998_v23  ;;  %v2000_v1 = vsel %vm1900_vm5, %v5868_v43, %v4304_v60  ;;  %v5171_v5 = vpop.eup %5170  ;;  %v4306_v25 = vadd.f32 -1.0, %v5169_v0  ;;  %5178 = vpow2.f32 %v453_v12  ;;  %v5944_v52 = vld [vmem:[%s5541_s18 + $0x60] sm:$0xff]  ;;  %v5417_v60 = vld [vmem:[%s5541_s18 + $0x18] sm:$0xff]  ;;  %v5419_v12 = vld [vmem:[%s5541_s18 + $0x28] sm:$0xff] }
  0x6b   : > { %v2001_v13 = vsel %vm1901_vm6, %v5876_v9, %v4305_v10  ;;  %v4307_v49 = vadd.f32 -1.0, %v5171_v5  ;;  %v455_v19 = vmul.f32 1.442695, %v430_v4  ;;  %5180 = vpow2.f32 %v459_v6 }
  0x6c   : > { %5033 = vrot.lane.b32.xlu1 %v5032_v45, %s5467_s25  ;;  %v5037_v24 = vpack.i.bf16 %v2001_v13, %v2000_v1  ;;  %v2002_v2 = vsel %vm1902_vm7, %v5880_v39, %v4306_v25  ;;  %vm407_vm11 = vcmp.gt.f32.partialorder %v5414_v50, 0.0  ;;  %v442_v23 = vmin.f32 %v5621_v40, 0.0  ;;  %v5418_v40 = vld [vmem:[%s5541_s18 + $0x8] sm:$0xff] }
  0x6d   : > { %v2003_v43 = vsel %vm1903_vm8, %v5882_v59, %v4307_v49  ;;  %5182 = vpow2.f32 %v455_v19  ;;  %v461_v59 = vmul.f32 1.442695, %v433_v20  ;;  %v441_v55 = vmin.f32 %v5944_v52, 0.0 }
  0x6e   : > { %5038 = vrot.lane.b32.xlu0 %v5037_v24, %s5467_s25  ;;  %v5042_v9 = vpack.i.bf16 %v2003_v43, %v2002_v2  ;;  %5184 = vpow2.f32 %v463_v26  ;;  %vm408_vm15 = vcmp.gt.f32.partialorder %v5417_v60, 0.0  ;;  %vm406_vm0 = vcmp.gt.f32.partialorder %v5418_v40, 0.0  ;;  %v5956_v2 = vld [vmem:[%s5541_s18 + $0x70] sm:$0xff] }
  0x6f   : > { %5186 = vpow2.f32 %v461_v59  ;;  %v479_v4 = vmul.f32 1.442695, %v442_v23  ;;  %vm410_vm1 = vcmp.gt.f32.partialorder %v5419_v12, 0.0  ;;  %v444_v13 = vmin.f32 %v5644_v53, 0.0 }
  0x70   : > { %5043 = vrot.lane.b32.xlu1 %v5042_v9, %s5467_s25  ;;  %5188 = vpow2.f32 %v467_v63  ;;  %v477_v49 = vmul.f32 1.442695, %v441_v55  ;;  %v443_v6 = vmin.f32 %v5956_v2, 0.0  ;;  %v446_v59 = vmin.f32 %v5678_v38, 0.0  ;;  %v5424_v38 = vld [vmem:[%s5541_s18 + $0x30] sm:$0xff] }
  0x71   : > { %v5173_v21 = vpop.eup %5172  ;;  %5190 = vpow2.f32 %v465_v56  ;;  %vm411_vm4 = vcmp.gt.f32.partialorder %v5424_v38, 0.0 }
  0x72   : > { %v5175_v7 = vpop.eup %5174  ;;  %v4308_v39 = vadd.f32 -1.0, %v5173_v21  ;;  %5192 = vpow2.f32 %v471_v58  ;;  %v5421_v21 = vld [vmem:[%s5541_s18 + $0x20] sm:$0xff]  ;;  %v5425_v58 = vld [vmem:[%s5541_s18 + $0x48] sm:$0xff] }
  0x73   : > { %v4309_v29 = vadd.f32 -1.0, %v5175_v7  ;;  %v5177_v44 = vpop.eup %5176  ;;  %vm409_vm2 = vcmp.gt.f32.partialorder %v5421_v21, 0.0  ;;  %vm414_vm5 = vcmp.gt.f32.partialorder %v5425_v58, 0.0 }
  0x74   : > { %v2004_v8 = vsel %vm1904_vm9, %v5900_v35, %v4308_v39  ;;  %v5179_v17 = vpop.eup %5178  ;;  %v439_v35 = vmin.f32 %v5611_v33, 0.0  ;;  %v4144_v54 = vadd.f32 -1.0, %v5177_v44 }
  0x75   : > { %v2005_v31 = vsel %vm1905_vm10, %v5902_v28, %v4309_v29  ;;  %v469_v28 = vmul.f32 1.442695, %v437_v11  ;;  %v5181_v15 = vpop.eup %5180  ;;  %v4142_v48 = vadd.f32 -1.0, %v5179_v17  ;;  %v483_v29 = vmul.f32 1.442695, %v444_v13 }
  0x76   : > { %v5047_v16 = vpack.i.bf16 %v2005_v31, %v2004_v8  ;;  %v473_v37 = vmul.f32 1.442695, %v439_v35  ;;  %v527_v41 = vsel %vm407_vm11, %v5414_v50, %v4144_v54  ;;  %v4145_v47 = vadd.f32 -1.0, %v5181_v15 }
  0x77   : > { %v5183_v22 = vpop.eup %5182  ;;  %5194 = vpow2.f32 %v469_v28  ;;  %v525_v45 = vsel %vm405_vm12, %v5415_v30, %v4142_v48  ;;  %v481_v8 = vmul.f32 1.442695, %v443_v6  ;;  %v445_v31 = vmin.f32 %v5967_v27, 0.0 }
  0x78   : > { %5048 = vrot.lane.b32.xlu0 %v5047_v16, %s5467_s25  ;;  %v5185_v33 = vpop.eup %5184  ;;  %v4143_v61 = vadd.f32 -1.0, %v5183_v22  ;;  %5196 = vpow2.f32 %v473_v37  ;;  %v528_v24 = vsel %vm408_vm15, %v5417_v60, %v4145_v47  ;;  %v5423_v16 = vld [vmem:[%s5541_s18 + $0x38] sm:$0xff]  ;;  %v447_v35 = vmin.f32 %v5689_v42, 0.0 }
  0x79   : > { %v5187_v10 = vpop.eup %5186  ;;  %v4147_v46 = vadd.f32 -1.0, %v5185_v33  ;;  %5198 = vpow2.f32 %v475_v36  ;;  %vm412_vm3 = vcmp.gt.f32.partialorder %v5423_v16, 0.0  ;;  %v487_v28 = vmul.f32 1.442695, %v446_v59 }
  0x7a   : > { %v5189_v25 = vpop.eup %5188  ;;  %v526_v43 = vsel %vm406_vm0, %v5418_v40, %v4143_v61  ;;  %v4146_v19 = vadd.f32 -1.0, %v5187_v10  ;;  %5200 = vpow2.f32 %v479_v4  ;;  %v448_v15 = vmin.f32 %v5698_v51, 0.0 }
  0x7b   : > { %v5191_v20 = vpop.eup %5190  ;;  %v530_v9 = vsel %vm410_vm1, %v5419_v12, %v4147_v46  ;;  %v4149_v39 = vadd.f32 -1.0, %v5189_v25  ;;  %5202 = vpow2.f32 %v477_v49  ;;  %v485_v30 = vmul.f32 1.442695, %v445_v31 }
  0x7c   : > { %v5193_v26 = vpop.eup %5192  ;;  %v529_v63 = vsel %vm409_vm2, %v5421_v21, %v4146_v19  ;;  %v4148_v56 = vadd.f32 -1.0, %v5191_v20  ;;  %5204 = vpow2.f32 %v483_v29  ;;  %v489_v51 = vmul.f32 1.442695, %v447_v35  ;;  %v5059_v29 = vld [vmem:[%s7358_s4 + $0x8] sm:$0xff]  }
  0x7d   : > { %v4151_v17 = vadd.f32 -1.0, %v5193_v26  ;;  %v532_v22 = vsel %vm412_vm3, %v5423_v16, %v4149_v39  ;;  %5206 = vpow2.f32 %v481_v8  ;;  %v450_v60 = vmin.f32 %v5717_v62, 0.0  ;;  %v5427_v62 = vld [vmem:[%s5541_s18 + $0x58] sm:$0xff] }
  0x7e   : > { %v531_v42 = vsel %vm411_vm4, %v5424_v38, %v4148_v56  ;;  %5208 = vpow2.f32 %v487_v28  ;;  %v449_v4 = vmin.f32 %v5708_v57, 0.0  ;;  %vm416_vm7 = vcmp.gt.f32.partialorder %v5427_v62, 0.0  ;;  %v5430_v56 = vld [vmem:[%s7358_s4] sm:$0xff]  }
  0x7f   : > { %v534_v36 = vsel %vm414_vm5, %v5425_v58, %v4151_v17  ;;  %5210 = vpow2.f32 %v485_v30  ;;  %v451_v26 = vmin.f32 %v5742_v34, 0.0  ;;  %vm417_vm10 = vcmp.gt.f32.partialorder %v5944_v52, 0.0 }
  0x80   : > { %5212 = vpow2.f32 %v489_v51  ;;  %v493_v21 = vmul.f32 1.442695, %v449_v4  ;;  %vm419_vm12 = vcmp.gt.f32.partialorder %v5956_v2, 0.0  ;;  %vm421_vm0 = vcmp.gt.f32.partialorder %v5967_v27, 0.0 }
  0x81   : > { %v5195_v11 = vpop.eup %5194  ;;  %v497_v58 = vmul.f32 1.442695, %v451_v26 }
  0x82   : > { %v5197_v50 = vpop.eup %5196  ;;  %v4150_v23 = vadd.f32 -1.0, %v5195_v11 }
  0x83   : > { %v5199_v37 = vpop.eup %5198  ;;  %v4152_v12 = vadd.f32 -1.0, %v5197_v50 }
  0x84   : > { %v5201_v61 = vpop.eup %5200  ;;  %v4153_v46 = vadd.f32 -1.0, %v5199_v37 }
  0x85   : > { %v5203_v13 = vpop.eup %5202  ;;  %v4155_v57 = vadd.f32 -1.0, %v5201_v61 }
  0x86   : > { %v4154_v59 = vadd.f32 -1.0, %v5203_v13 }
  0x98   : > { %v746_v0 = vpop.permute.xlu1 %745 }
  0x99   : > { %v816_v1 = vsel %vm813_vm13, %v527_v41, %v746_v0  ;;  %v742_v5 = vpop.permute.xlu0 %741  ;;  %v5426_v41 = vld [vmem:[%s5541_s18 + $0x40] sm:$0xff] }
  0x9a   : > { %841 = vst.msk [vmem:[#allocation2 + $0x10] sm:$0xff] %vm838_vm14, %v816_v1  ;;  %v814_v14 = vsel %vm813_vm13, %v525_v45, %v742_v5  ;;  %vm413_vm6 = vcmp.gt.f32.partialorder %v5426_v41, 0.0  ;;  %v491_v45 = vmul.f32 1.442695, %v448_v15  ;;  %v5431_v15 = vld [vmem:[%s5541_s18 + $0x78] sm:$0xff] }
  0x9b   : > { %839 = vst.msk [vmem:[#allocation2] sm:$0xff] %vm838_vm14, %v814_v14  ;;  %v533_v1 = vsel %vm413_vm6, %v5426_v41, %v4150_v23  ;;  %v5428_v14 = vld [vmem:[%s5541_s18 + $0x50] sm:$0xff]  ;;  %vm420_vm11 = vcmp.gt.f32.partialorder %v5431_v15, 0.0 }
  0x9c   : > { %v748_v53 = vpop.permute.xlu1 %747  ;;  %vm415_vm8 = vcmp.gt.f32.partialorder %v5428_v14, 0.0  ;;  %5214 = vpow2.f32 %v491_v45  ;;  %v5061_v45 = vld [vmem:[%s7358_s4 + $0x18] sm:$0xff]  }
  0x9d   : > { %v817_v7 = vsel %vm813_vm13, %v528_v24, %v748_v53  ;;  %v744_v3 = vpop.permute.xlu0 %743  ;;  %v5429_v24 = vld [vmem:[%s5541_s18 + $0x68] sm:$0xff] }
  0x9e   : > { %842 = vst.msk [vmem:[#allocation2 + $0x18] sm:$0xff] %vm838_vm14, %v817_v7  ;;  %v815_v32 = vsel %vm813_vm13, %v526_v43, %v744_v3  ;;  %vm418_vm9 = vcmp.gt.f32.partialorder %v5429_v24, 0.0  ;;  %v495_v43 = vmul.f32 1.442695, %v450_v60  ;;  %v5205_v7 = vpop.eup %5204  ;;  %v535_v3 = vsel %vm415_vm8, %v5428_v14, %v4152_v12 }
  0x9f   : > { %840 = vst.msk [vmem:[#allocation2 + $0x8] sm:$0xff] %vm838_vm14, %v815_v32  ;;  %v5207_v32 = vpop.eup %5206  ;;  %v4157_v38 = vadd.f32 -1.0, %v5205_v7 }
  0xa0   : > { %v752_v44 = vpop.permute.xlu1 %751  ;;  %5216 = vpow2.f32 %v495_v43  ;;  %v5209_v17 = vpop.eup %5208  ;;  %v4156_v28 = vadd.f32 -1.0, %v5207_v32 }
  0xa1   : > { %v819_v18 = vsel %vm813_vm13, %v530_v9, %v752_v44  ;;  %v750_v54 = vpop.permute.xlu0 %749  ;;  %v536_v9 = vsel %vm416_vm7, %v5427_v62, %v4153_v46  ;;  %5218 = vpow2.f32 %v493_v21  ;;  %v5211_v50 = vpop.eup %5210  ;;  %v4159_v41 = vadd.f32 -1.0, %v5209_v17 }
  0xa2   : > { %844 = vst.msk [vmem:[#allocation2 + $0x28] sm:$0xff] %vm838_vm14, %v819_v18  ;;  %v818_v48 = vsel %vm813_vm13, %v529_v63, %v750_v54  ;;  %v538_v63 = vsel %vm418_vm9, %v5429_v24, %v4155_v57  ;;  %v5060_v18 = vld [vmem:[%s7358_s4 + $0x10] sm:$0xff]   ;;  %v537_v54 = vsel %vm417_vm10, %v5944_v52, %v4154_v59  ;;  %5220 = vpow2.f32 %v497_v58  ;;  %v5062_v24 = vld [vmem:[%s7358_s4 + $0x40] sm:$0xff]   ;;  %v5434_v57 = vld [vmem:[%s5541_s18 + $0x98] sm:$0xff] }
  0xa3   : > { %843 = vst.msk [vmem:[#allocation2 + $0x20] sm:$0xff] %vm838_vm14, %v818_v48  ;;  %v539_v60 = vsel %vm419_vm12, %v5956_v2, %v4156_v28  ;;  %v4158_v61 = vadd.f32 -1.0, %v5211_v50  ;;  %vm424_vm2 = vcmp.gt.f32.partialorder %v5434_v57, 0.0  ;;  %v5436_v58 = vld [vmem:[%s5541_s18 + $0xa0] sm:$0xff] }
  0xa4   : > { %v756_v33 = vpop.permute.xlu1 %755  ;;  %vm425_vm4 = vcmp.gt.f32.partialorder %v5436_v58, 0.0 }
  0xa5   : > { %v821_v47 = vsel %vm813_vm13, %v532_v22, %v756_v33  ;;  %v754_v55 = vpop.permute.xlu0 %753  ;;  %v903_v20 = vld [vmem:[#allocation2 + $0x11] sm:$0xff] }
  0xa6   : > { %846 = vst.msk [vmem:[#allocation2 + $0x38] sm:$0xff] %vm838_vm14, %v821_v47  ;;  %v820_v10 = vsel %vm813_vm13, %v531_v42, %v754_v55  ;;  %v901_v0 = vld [vmem:[#allocation2 + $0x1] sm:$0xff]  ;;  %v902_v40 = vld [vmem:[#allocation2 + $0x9] sm:$0xff]  ;;  %v5213_v42 = vpop.eup %5212 }
  0xa7   : > { %845 = vst.msk [vmem:[#allocation2 + $0x30] sm:$0xff] %vm838_vm14, %v820_v10  ;;  %v921_v5 = vpack.c.bf16 %v902_v40, %v901_v0  ;;  %v864_v22 = vld [vmem:[#allocation2 + $0x8] sm:$0xff]  ;;  %v5215_v51 = vpop.eup %5214  ;;  %v863_v55 = vld [vmem:[#allocation2] sm:$0xff]  ;;  %v4160_v62 = vadd.f32 -1.0, %v5213_v42 }
  0xa8   : > { %v760_v25 = vpop.permute.xlu1 %759  ;;  %v5432_v10 = vld [vmem:[%s5541_s18 + $0x88] sm:$0xff]  ;;  %v883_v0 = vpack.c.bf16 %v864_v22, %v863_v55  ;;  %v4161_v13 = vadd.f32 -1.0, %v5215_v51  ;;  %v5064_v22 = vld [vmem:[%s7358_s4 + $0x50] sm:$0xff]  }
  0xa9   : > { %v823_v49 = vsel %vm813_vm13, %v534_v36, %v760_v25  ;;  %v758_v6 = vpop.permute.xlu0 %757  ;;  %4592 = vmatprep.mubr.msk.bf16.mxu0 %vm838_vm14, %v921_v5  ;;  %v540_v36 = vsel %vm420_vm11, %v5431_v15, %v4157_v38  ;;  %vm422_vm15 = vcmp.gt.f32.partialorder %v5432_v10, 0.0  ;;  %v868_v26 = vld [vmem:[#allocation2 + $0x28] sm:$0xff] }
  0xaa   : > { %848 = vst.msk [vmem:[#allocation2 + $0x48] sm:$0xff] %vm838_vm14, %v823_v49  ;;  %v822_v19 = vsel %vm813_vm13, %v533_v1, %v758_v6  ;;  %v904_v53 = vld [vmem:[#allocation2 + $0x19] sm:$0xff]  ;;  %v905_v11 = vld [vmem:[#allocation2 + $0x21] sm:$0xff]  ;;  %v542_v12 = vsel %vm422_vm15, %v5432_v10, %v4159_v41  ;;  %v5217_v25 = vpop.eup %5216  ;;  %v541_v49 = vsel %vm421_vm0, %v5967_v27, %v4158_v61  ;;  %v5433_v6 = vld [vmem:[%s5541_s18 + $0x90] sm:$0xff]  ;;  %v544_v32 = vsel %vm424_vm2, %v5434_v57, %v4161_v13 }
  0xab   : > { %847 = vst.msk [vmem:[#allocation2 + $0x40] sm:$0xff] %vm838_vm14, %v822_v19  ;;  %v6002_v39 = vpack.c.bf16 %v904_v53, %v903_v20  ;;  %vm423_vm1 = vcmp.gt.f32.partialorder %v5433_v6, 0.0  ;;  %v5219_v43 = vpop.eup %5218  ;;  %v865_v19 = vld [vmem:[#allocation2 + $0x10] sm:$0xff]  ;;  %v866_v20 = vld [vmem:[#allocation2 + $0x18] sm:$0xff]  ;;  %v867_v21 = vld [vmem:[#allocation2 + $0x20] sm:$0xff] }
  0xac   : > { %v764_v8 = vpop.permute.xlu1 %763  ;;  %v543_v59 = vsel %vm423_vm1, %v5433_v6, %v4160_v62  ;;  %v5066_v6 = vld [vmem:[%s7358_s4 + $0x60] sm:$0xff]  }
  0xad   : > { %v762_v31 = vpop.permute.xlu0 %761  ;;  %4593 = vmatmul.mubr.msk.bf16.vlgmr.msra.gmra.mrb[0].mxu0 %vm838_vm14, %v6002_v39  ;;  %v825_v34 = vsel %vm813_vm13, %v536_v9, %v764_v8  ;;  %v4163_v8 = vadd.f32 -1.0, %v5217_v25 }
  0xae   : > { %v824_v16 = vsel %vm813_vm13, %v535_v3, %v762_v31  ;;  %4613 = vmatpush3.bf16.msra.mxu0 %v5430_v56  ;;  %v906_v44 = vld [vmem:[#allocation2 + $0x29] sm:$0xff]  ;;  %850 = vst.msk [vmem:[#allocation2 + $0x58] sm:$0xff] %vm838_vm14, %v825_v34  ;;  %v907_v23 = vld [vmem:[#allocation2 + $0x31] sm:$0xff]  ;;  %v6068_v31 = vpack.c.bf16 %v866_v20, %v865_v19 }
  0xaf   : > { %849 = vst.msk [vmem:[#allocation2 + $0x50] sm:$0xff] %vm838_vm14, %v824_v16  ;;  %4614 = vmatprep.subr.bf16.mxu0 %v5059_v29  ;;  %v6018_v35 = vpack.c.bf16 %v906_v44, %v905_v11  ;;  %v5063_v34 = vld [vmem:[%s7358_s4 + $0x48] sm:$0xff]   ;;  %v4162_v16 = vadd.f32 -1.0, %v5219_v43  ;;  %v5221_v11 = vpop.eup %5220  ;;  %v6077_v44 = vpack.c.bf16 %v868_v26, %v867_v21  ;;  %v869_v42 = vld [vmem:[#allocation2 + $0x30] sm:$0xff] }
  0xb0   : > { %v768_v48 = vpop.permute.xlu1 %767  ;;  %v5435_v56 = vld [vmem:[%s5541_s18 + $0xa8] sm:$0xff] }
  0xb1   : > { %4596 = vmatprep.mubr.msk.bf16.mxu0 %vm838_vm14, %v6018_v35  ;;  %v766_v30 = vpop.permute.xlu0 %765  ;;  %v827_v37 = vsel %vm813_vm13, %v538_v63, %v768_v48  ;;  %vm426_vm3 = vcmp.gt.f32.partialorder %v5435_v56, 0.0  ;;  %v545_v48 = vsel %vm425_vm4, %v5436_v58, %v4162_v16  ;;  %v872_v51 = vld [vmem:[#allocation2 + $0x48] sm:$0xff]  ;;  %v2367_v16 = vld [vmem:[%s7356_s2 + $0x10] sm:$0xff] }
  0xb2   : > { %4615 = vmatpush3.bf16.msra.mxu0 %v5059_v29  ;;  %v908_v33 = vld [vmem:[#allocation2 + $0x39] sm:$0xff]  ;;  %v826_v52 = vsel %vm813_vm13, %v537_v54, %v766_v30  ;;  %852 = vst.msk [vmem:[#allocation2 + $0x68] sm:$0xff] %vm838_vm14, %v827_v37  ;;  %v909_v1 = vld [vmem:[#allocation2 + $0x41] sm:$0xff]  ;;  %v546_v50 = vsel %vm426_vm3, %v5435_v56, %v4163_v8  ;;  %v4164_v37 = vadd.f32 -1.0, %v5221_v11  ;;  %v2371_v58 = vld [vmem:[%s7356_s2 + $0x30] sm:$0xff] }
  0xb3   : > { %4616 = vmatprep.subr.bf16.mxu0 %v5060_v18  ;;  %v6033_v47 = vpack.c.bf16 %v908_v33, %v907_v23  ;;  %851 = vst.msk [vmem:[#allocation2 + $0x60] sm:$0xff] %vm838_vm14, %v826_v52  ;;  %v870_v23 = vld [vmem:[#allocation2 + $0x38] sm:$0xff]  ;;  %v871_v41 = vld [vmem:[#allocation2 + $0x40] sm:$0xff] }
  0xb4   : > { %v772_v40 = vpop.permute.xlu1 %771  ;;  %v6102_v10 = vpack.c.bf16 %v870_v23, %v869_v42  ;;  %v2369_v11 = vld [vmem:[%s7356_s2 + $0x20] sm:$0xff]  ;;  %v2378_v23 = vld [vmem:[%s7356_s2 + $0x68] sm:$0xff] }
  0xb5   : > { %4597 = vmatmul.mubr.msk.bf16.gmra.mrb[4].mxu0 %vm838_vm14, %v6033_v47  ;;  %v770_v46 = vpop.permute.xlu0 %769  ;;  %v829_v4 = vsel %vm813_vm13, %v540_v36, %v772_v40  ;;  %v5437_v36 = vld [vmem:[%s5541_s18 + $0xb0] sm:$0xff]  ;;  %v5065_v40 = vld [vmem:[%s7358_s4 + $0x58] sm:$0xff]   ;;  %v5070_v42 = vld [vmem:[%s7360_s6] sm:$0xff]  }
  0xb6   : > { %4617 = vmatpush3.bf16.msra.mxu0 %v5060_v18  ;;  %4620 = vmatprep.mubr.msk.bf16.mxu0 %vm838_vm14, %v883_v0  ;;  %v910_v2 = vld [vmem:[#allocation2 + $0x49] sm:$0xff]  ;;  %v828_v5 = vsel %vm813_vm13, %v539_v60, %v770_v46  ;;  %854 = vst.msk [vmem:[#allocation2 + $0x78] sm:$0xff] %vm838_vm14, %v829_v4  ;;  %v911_v9 = vld [vmem:[#allocation2 + $0x51] sm:$0xff]  ;;  %vm427_vm5 = vcmp.gt.f32.partialorder %v5437_v36, 0.0  ;;  %v6110_v4 = vpack.c.bf16 %v872_v51, %v871_v41 }
  0xb7   : > { %4618 = vmatprep.subr.bf16.mxu0 %v5061_v45  ;;  %v6050_v14 = vpack.c.bf16 %v910_v2, %v909_v1  ;;  %853 = vst.msk [vmem:[#allocation2 + $0x70] sm:$0xff] %vm838_vm14, %v828_v5  ;;  %v547_v46 = vsel %vm427_vm5, %v5437_v36, %v4164_v37  ;;  %v873_v5 = vld [vmem:[#allocation2 + $0x50] sm:$0xff] }
  0xb8   : > { %v776_v53 = vpop.permute.xlu1 %775  ;;  %v2379_v37 = vld [vmem:[%s7356_s2 + $0x70] sm:$0xff] }
  0xb9   : > { %4600 = vmatprep.mubr.msk.bf16.mxu1 %vm838_vm14, %v6050_v14  ;;  %v774_v7 = vpop.permute.xlu0 %773  ;;  %v831_v3 = vsel %vm813_vm13, %v542_v12, %v776_v53  ;;  %v874_v12 = vld [vmem:[#allocation2 + $0x58] sm:$0xff] }
  0xba   : > { %4619 = vmatpush3.bf16.msra.mxu0 %v5061_v45  ;;  %v830_v27 = vsel %vm813_vm13, %v541_v49, %v774_v7  ;;  %856 = vst.msk [vmem:[#allocation2 + $0x88] sm:$0xff] %vm838_vm14, %v831_v3  ;;  %v912_v29 = vld [vmem:[#allocation2 + $0x59] sm:$0xff]  ;;  %v913_v17 = vld [vmem:[#allocation2 + $0x61] sm:$0xff]  ;;  %v888_v43 = vpack.c.bf16 %v874_v12, %v873_v5 }
  0xbb   : > { %4640 = vmatprep.subr.bf16.mxu0 %v5062_v24  ;;  %855 = vst.msk [vmem:[#allocation2 + $0x80] sm:$0xff] %vm838_vm14, %v830_v27  ;;  %v6074_v63 = vpack.c.bf16 %v912_v29, %v911_v9  ;;  %v875_v25 = vld [vmem:[#allocation2 + $0x60] sm:$0xff] }
  0xbc   : > { %v780_v38 = vpop.permute.xlu1 %779  ;;  %v2365_v29 = vld [vmem:[%s7356_s2] sm:$0xff] }
  0xbd   : > { %4621 = vmatmul.mubr.msk.bf16.vlgmr.msra.gmra.mrb[0].mxu0 %vm838_vm14, %v6068_v31  ;;  %4601 = vmatmul.mubr.msk.bf16.vlgmr.msra.gmra.mrb[0].mxu1 %vm838_vm14, %v6074_v63  ;;  %v778_v18 = vpop.permute.xlu0 %777  ;;  %v833_v54 = vsel %vm813_vm13, %v544_v32, %v780_v38  ;;  %v878_v21 = vld [vmem:[#allocation2 + $0x78] sm:$0xff] }
  0xbe   : > { %4641 = vmatpush3.bf16.msra.mxu0 %v5062_v24  ;;  %4624 = vmatprep.mubr.msk.bf16.mxu0 %vm838_vm14, %v6077_v44  ;;  %v832_v28 = vsel %vm813_vm13, %v543_v59, %v778_v18  ;;  %858 = vst.msk [vmem:[#allocation2 + $0x98] sm:$0xff] %vm838_vm14, %v833_v54  ;;  %v914_v15 = vld [vmem:[#allocation2 + $0x69] sm:$0xff]  ;;  %v915_v33 = vld [vmem:[#allocation2 + $0x71] sm:$0xff]  ;;  %v2373_v18 = vld [vmem:[%s7356_s2 + $0x40] sm:$0xff] }
  0xbf   : > { %4642 = vmatprep.subr.bf16.mxu0 %v5063_v34  ;;  %857 = vst.msk [vmem:[#allocation2 + $0x90] sm:$0xff] %vm838_vm14, %v832_v28  ;;  %v6094_v30 = vpack.c.bf16 %v914_v15, %v913_v17  ;;  %v876_v24 = vld [vmem:[#allocation2 + $0x68] sm:$0xff]  ;;  %v877_v9 = vld [vmem:[#allocation2 + $0x70] sm:$0xff]  ;;  %v2368_v38 = vld [vmem:[%s7356_s2 + $0x18] sm:$0xff] }
  0xc0   : > { %v784_v52 = vpop.permute.xlu1 %783  ;;  %v6127_v19 = vpack.c.bf16 %v876_v24, %v875_v25  ;;  %v890_v3 = vpack.c.bf16 %v878_v21, %v877_v9  ;;  %v2366_v59 = vld [vmem:[%s7356_s2 + $0x8] sm:$0xff]  ;;  %v2372_v28 = vld [vmem:[%s7356_s2 + $0x38] sm:$0xff]  ;;  %v5068_v15 = vld [vmem:[%s7358_s4 + $0x70] sm:$0xff]  }
  0xc1   : > { %v782_v55 = vpop.permute.xlu0 %781  ;;  %4604 = vmatprep.mubr.msk.bf16.mxu1 %vm838_vm14, %v6094_v30  ;;  %v835_v45 = vsel %vm813_vm13, %v546_v50, %v784_v52  ;;  %v880_v7 = vld [vmem:[#allocation2 + $0x88] sm:$0xff]  ;;  %v2380_v52 = vld [vmem:[%s7356_s2 + $0x78] sm:$0xff] }
  0xc2   : > { %4643 = vmatpush3.bf16.msra.mxu0 %v5063_v34  ;;  %v834_v60 = vsel %vm813_vm13, %v545_v48, %v782_v55  ;;  %v916_v61 = vld [vmem:[#allocation2 + $0x79] sm:$0xff]  ;;  %860 = vst.msk [vmem:[#allocation2 + $0xa8] sm:$0xff] %vm838_vm14, %v835_v45  ;;  %v917_v1 = vld [vmem:[#allocation2 + $0x81] sm:$0xff]  ;;  %v5468_v34 = vmov 0   ;;  %v6224_v55 = vld [vmem:[%s5776_s12 + $0x11] sm:$0xff] }
  0xc3   : > { %859 = vst.msk [vmem:[#allocation2 + $0xa0] sm:$0xff] %vm838_vm14, %v834_v60  ;;  %4644 = vmatprep.subr.bf16.mxu0 %v5064_v22  ;;  %v6105_v0 = vpack.c.bf16 %v916_v61, %v915_v33  ;;  %v879_v26 = vld [vmem:[#allocation2 + $0x80] sm:$0xff]  ;;  %5052 = vset.pattern.permute.xlu1 %v5468_v34  ;;  %v2370_v17 = vld [vmem:[%s7356_s2 + $0x28] sm:$0xff]  ;;  %v5069_v48 = vld [vmem:[%s7358_s4 + $0x78] sm:$0xff]   ;;  %v1766_v45 = vmin.f32 %v6224_v55, 0.0  ;;  %vm1746_vm6 = vcmp.gt.f32.partialorder %v6224_v55, 0.0 }
  0xc4   : > { %v6136_v27 = vpack.c.bf16 %v880_v7, %v879_v26  ;;  %2387 = vperm.xlu1 %5052, %v2365_v29   ;;  %5053 = vset.pattern.permute.xlu0 %v5468_v34  ;;  %v5067_v54 = vld [vmem:[%s7358_s4 + $0x68] sm:$0xff]   ;;  %v2381_v33 = vld [vmem:[%s7356_s2 + $0x80] sm:$0xff]  ;;  %v6273_v26 = vld [vmem:[%s5776_s12 + $0x51] sm:$0xff] }
  0xc5   : > { %4625 = vmatmul.mubr.msk.bf16.gmra.mrb[4].mxu0 %vm838_vm14, %v6102_v10  ;;  %4605 = vmatmul.mubr.msk.bf16.gmra.mrb[4].mxu1 %vm838_vm14, %v6105_v0  ;;  %v786_v2 = vpop.permute.xlu0 %785  ;;  %v882_v8 = vld [vmem:[#allocation2 + $0x98] sm:$0xff]  ;;  %v2374_v50 = vld [vmem:[%s7356_s2 + $0x48] sm:$0xff]  ;;  %vm1754_vm0 = vcmp.gt.f32.partialorder %v6273_v26, 0.0 }
  0xc6   : > { %4628 = vmatprep.mubr.msk.bf16.mxu0 %vm838_vm14, %v6110_v4  ;;  %4645 = vmatpush3.bf16.msra.mxu0 %v5064_v22  ;;  %v918_v62 = vld [vmem:[#allocation2 + $0x89] sm:$0xff]  ;;  %v836_v13 = vsel %vm813_vm13, %v547_v46, %v786_v2  ;;  %v919_v57 = vld [vmem:[#allocation2 + $0x91] sm:$0xff]  ;;  %v6231_v61 = vld [vmem:[%s5776_s12 + $0x19] sm:$0xff] }
  0xc7   : > { %v6119_v49 = vpack.c.bf16 %v918_v62, %v917_v1  ;;  %4646 = vmatprep.subr.bf16.mxu0 %v5065_v40  ;;  %861 = vst.msk [vmem:[#allocation2 + $0xb0] sm:$0xff] %vm838_vm14, %v836_v13  ;;  %v881_v32 = vld [vmem:[#allocation2 + $0x90] sm:$0xff]  ;;  %2392 = vperm.xlu0 %5053, %v2366_v59   ;;  %v2376_v22 = vld [vmem:[%s7356_s2 + $0x58] sm:$0xff]  ;;  %v5071_v60 = vld [vmem:[%s7360_s6 + $0x8] sm:$0xff]   ;;  %v1786_v1 = vmul.f32 1.442695, %v1766_v45 }
  0xc8   : > { %v892_v56 = vpack.c.bf16 %v882_v8, %v881_v32  ;;  %2397 = vperm.xlu1 %5052, %v2367_v16   ;;  %v5072_v2 = vld [vmem:[%s7360_s6 + $0x10] sm:$0xff]   ;;  %v6257_v25 = vld [vmem:[%s5776_s12 + $0x39] sm:$0xff]  ;;  %v6285_v8 = vld [vmem:[%s5776_s12 + $0x61] sm:$0xff]  ;;  %vm1747_vm7 = vcmp.gt.f32.partialorder %v6231_v61, 0.0 }
  0xc9   : > { %4608 = vmatprep.mubr.msk.bf16.mxu1 %vm838_vm14, %v6119_v49  ;;  %v1293_v41 = vld [vmem:[#allocation2 + $0xa8] sm:$0xff]  ;;  %5222 = vpow2.f32 %v1786_v1  ;;  %v1771_v24 = vmin.f32 %v6257_v25, 0.0  ;;  %v6277_v7 = vld [vmem:[%s5776_s12 + $0x59] sm:$0xff]  ;;  %v1776_v34 = vmin.f32 %v6285_v8, 0.0  ;;  %vm1751_vm11 = vcmp.gt.f32.partialorder %v6257_v25, 0.0 }
  0xca   : > { %v920_v20 = vld [vmem:[#allocation2 + $0x99] sm:$0xff]  ;;  %4647 = vmatpush3.bf16.msra.mxu0 %v5065_v40  ;;  %v6235_v40 = vld [vmem:[%s5776_s12 + $0x21] sm:$0xff]  ;;  %vm1755_vm1 = vcmp.gt.f32.partialorder %v6277_v7, 0.0  ;;  %vm1756_vm2 = vcmp.gt.f32.partialorder %v6285_v8, 0.0 }
  0xcb   : > { %v6129_v53 = vpack.c.bf16 %v920_v20, %v919_v57  ;;  %4668 = vmatprep.subr.bf16.mxu0 %v5066_v6  ;;  %2407 = vperm.xlu0 %5053, %v2369_v11   ;;  %v1292_v36 = vld [vmem:[#allocation2 + $0xa0] sm:$0xff]  ;;  %v1768_v46 = vmin.f32 %v6235_v40, 0.0  ;;  %v6269_v20 = vld [vmem:[%s5776_s12 + $0x49] sm:$0xff]  ;;  %vm1748_vm8 = vcmp.gt.f32.partialorder %v6235_v40, 0.0 }
  0xcc   : > { %2402 = vperm.xlu1 %5052, %v2368_v38   ;;  %v1303_v51 = vpack.c.bf16 %v1293_v41, %v1292_v36  ;;  %v1773_v9 = vmin.f32 %v6269_v20, 0.0  ;;  %v6290_v11 = vld [vmem:[%s5776_s12 + $0x69] sm:$0xff]  ;;  %vm1753_vm15 = vcmp.gt.f32.partialorder %v6269_v20, 0.0 }
  0xcd   : > { %4629 = vmatmul.mubr.msk.bf16.gmra.mrb[8].mxu0 %vm838_vm14, %v888_v43  ;;  %4609 = vmatmul.mubr.msk.bf16.gmra.mrb[8].mxu1 %vm838_vm14, %v6129_v53  ;;  %v1790_v12 = vmul.f32 1.442695, %v1768_v46  ;;  %v1777_v38 = vmin.f32 %v6290_v11, 0.0  ;;  %vm1757_vm3 = vcmp.gt.f32.partialorder %v6290_v11, 0.0 }
  0xce   : > { %4632 = vmatprep.mubr.msk.bf16.mxu0 %vm838_vm14, %v6127_v19 }
  0xcf   : > { %2417 = vperm.xlu0 %5053, %v2371_v58  }
  0xd0   : > { %2412 = vperm.xlu1 %5052, %v2370_v17   ;;  %v5004_v17 = vpop.permute.xlu1 %5003 }
  0xd3   : > { %2427 = vperm.xlu0 %5053, %v2373_v18   ;;  %v6294_v18 = vld [vmem:[%s5776_s12 + $0x71] sm:$0xff] }
  0xd4   : > { %2422 = vperm.xlu1 %5052, %v2372_v28   ;;  %v5014_v46 = vpop.permute.xlu1 %5013  ;;  %vm1758_vm4 = vcmp.gt.f32.partialorder %v6294_v18, 0.0 }
  0xd5   : > { %4633 = vmatmul.mubr.msk.bf16.gmra.mrb[12].mxu0 %vm838_vm14, %v890_v3 }
  0xd6   : > { %4636 = vmatprep.mubr.msk.bf16.mxu0 %vm838_vm14, %v6136_v27 }
  0xd8   : > { %2432 = vperm.xlu1 %5052, %v2374_v50   ;;  %v1806_v50 = vmul.f32 1.442695, %v1776_v34 }
  0xdc   : > { %2442 = vperm.xlu1 %5052, %v2376_v22   ;;  %v1808_v22 = vmul.f32 1.442695, %v1777_v38 }
  0xdd   : > { %4637 = vmatmul.mubr.msk.bf16.gmra.mrb[16].mxu0 %vm838_vm14, %v892_v56 }
  0xde   : > { %4648 = vmatprep.mubr.msk.bf16.mxu0 %vm838_vm14, %v6068_v31  ;;  %v2375_v31 = vld [vmem:[%s7356_s2 + $0x50] sm:$0xff] }
  0xdf   : > { %2437 = vperm.xlu0 %5053, %v2375_v31  }
  0xe0   : > { %2452 = vperm.xlu1 %5052, %v2378_v23  }
  0xe4   : > { %2462 = vperm.xlu1 %5052, %v2380_v52  }
  0xe5   : > { %4649 = vmatmul.mubr.msk.bf16.vlgmr.msra.gmra.mrb[0].mxu0 %vm838_vm14, %v6077_v44  ;;  %v2377_v44 = vld [vmem:[%s7356_s2 + $0x60] sm:$0xff] }
  0xe6   : > { %4669 = vmatpush3.bf16.msra.mxu0 %v5066_v6  ;;  %4652 = vmatprep.mubr.msk.bf16.mxu0 %vm838_vm14, %v6102_v10  ;;  %v1767_v10 = vmin.f32 %v6231_v61, 0.0  ;;  %v6261_v6 = vld [vmem:[%s5776_s12 + $0x41] sm:$0xff] }
  0xe7   : > { %4670 = vmatprep.subr.bf16.mxu0 %v5067_v54  ;;  %2447 = vperm.xlu0 %5053, %v2377_v44   ;;  %v1772_v57 = vmin.f32 %v6261_v6, 0.0  ;;  %v5006_v44 = vunpack.i.h.bf16 %v5004_v17  ;;  %vm1752_vm12 = vcmp.gt.f32.partialorder %v6261_v6, 0.0 }
  0xe8   : > { %v1788_v5 = vmul.f32 1.442695, %v1767_v10 }
  0xe9   : > { %v1798_v21 = vmul.f32 1.442695, %v1772_v57 }
  0xea   : > { %4671 = vmatpush3.bf16.msra.mxu0 %v5067_v54  ;;  %5224 = vpow2.f32 %v1788_v5  ;;  %v6301_v54 = vld [vmem:[%s5776_s12 + $0x79] sm:$0xff] }
  0xeb   : > { %4672 = vmatprep.subr.bf16.mxu0 %v5068_v15  ;;  %2457 = vperm.xlu0 %5053, %v2379_v37   ;;  %5226 = vpow2.f32 %v1790_v12  ;;  %v1779_v28 = vmin.f32 %v6301_v54, 0.0  ;;  %vm1759_vm5 = vcmp.gt.f32.partialorder %v6301_v54, 0.0 }
  0xed   : > { %4653 = vmatmul.mubr.msk.bf16.gmra.mrb[4].mxu0 %vm838_vm14, %v6110_v4  ;;  %v1812_v36 = vmul.f32 1.442695, %v1779_v28 }
  0xee   : > { %4656 = vmatprep.mubr.msk.bf16.mxu0 %vm838_vm14, %v888_v43  ;;  %4673 = vmatpush3.bf16.msra.mxu0 %v5068_v15 }
  0xef   : > { %4674 = vmatprep.subr.bf16.mxu0 %v5069_v48  ;;  %2467 = vperm.xlu0 %5053, %v2381_v33  }
  0xf2   : > { %4675 = vmatpush3.bf16.msra.mxu0 %v5069_v48  ;;  %v5005_v48 = vunpack.i.l.bf16 %v5004_v17 }
  0xf3   : > { %4696 = vmatprep.subr.bf16.mxu0 %v5070_v42 }
  0xf5   : > { %4657 = vmatmul.mubr.msk.bf16.gmra.mrb[8].mxu0 %vm838_vm14, %v6127_v19  ;;  %v1796_v19 = vmul.f32 1.442695, %v1771_v24  ;;  %v6332_v24 = vld [vmem:[%s5776_s12 + $0x91] sm:$0xff] }
  0xf6   : > { %4660 = vmatprep.mubr.msk.bf16.mxu0 %vm838_vm14, %v890_v3  ;;  %v5223_v3 = vpop.eup %5222  ;;  %v1782_v57 = vmin.f32 %v6332_v24, 0.0 }
  0xf7   : > { %v5225_v29 = vpop.eup %5224  ;;  %v4270_v58 = vadd.f32 -1.0, %v5223_v3 }
  0xf8   : > { %v5227_v59 = vpop.eup %5226 }
  0xf9   : > { %v4272_v31 = vadd.f32 -1.0, %v5227_v59 }
  0xfd   : > { %4661 = vmatmul.mubr.msk.bf16.gmra.mrb[12].mxu0 %vm838_vm14, %v6136_v27  ;;  %v1800_v27 = vmul.f32 1.442695, %v1773_v9  ;;  %v5015_v9 = vunpack.i.l.bf16 %v5014_v46 }
  0xfe   : > { %4664 = vmatprep.mubr.msk.bf16.mxu0 %vm838_vm14, %v892_v56 }
 0x105   : > { %4665 = vmatmul.mubr.msk.bf16.gmra.mrb[16].mxu0 %vm838_vm14, %v1303_v51  ;;  %v1848_v51 = vsel %vm1748_vm8, %v6235_v40, %v4272_v31  ;;  %vm1762_vm8 = vcmp.gt.f32.partialorder %v6332_v24, 0.0 }
 0x106   : > { %4676 = vmatprep.mubr.msk.bf16.mxu0 %vm838_vm14, %v6002_v39  ;;  %v6241_v39 = vld [vmem:[%s5776_s12 + $0x29] sm:$0xff] }
 0x107   : > { %v1769_v4 = vmin.f32 %v6241_v39, 0.0  ;;  %vm1749_vm9 = vcmp.gt.f32.partialorder %v6241_v39, 0.0 }
 0x109   : > { %v1792_v62 = vmul.f32 1.442695, %v1769_v4 }
 0x10b   : > { %5228 = vpow2.f32 %v1792_v62 }
 0x10d   : > { %4677 = vmatmul.mubr.msk.bf16.vlgmr.msra.gmra.mrb[0].mxu0 %vm838_vm14, %v6018_v35  ;;  %v6250_v35 = vld [vmem:[%s5776_s12 + $0x31] sm:$0xff] }
 0x10e   : > { %4697 = vmatpush3.bf16.msra.mxu0 %v5070_v42  ;;  %4680 = vmatprep.mubr.msk.bf16.mxu0 %vm838_vm14, %v6033_v47  ;;  %v1770_v13 = vmin.f32 %v6250_v35, 0.0  ;;  %v5073_v47 = vld [vmem:[%s7360_s6 + $0x18] sm:$0xff]   ;;  %v1846_v42 = vsel %vm1746_vm6, %v6224_v55, %v4270_v58  ;;  %vm1750_vm10 = vcmp.gt.f32.partialorder %v6250_v35, 0.0 }
 0x10f   : > { %4698 = vmatprep.subr.bf16.mxu0 %v5071_v60 }
 0x110   : > { %v1794_v43 = vmul.f32 1.442695, %v1770_v13 }
 0x112   : > { %4699 = vmatpush3.bf16.msra.mxu0 %v5071_v60  ;;  %5230 = vpow2.f32 %v1794_v43  ;;  %v5009_v60 = vpop.permute.xlu0 %5008 }
 0x113   : > { %4700 = vmatprep.subr.bf16.mxu0 %v5072_v2  ;;  %5232 = vpow2.f32 %v1796_v19  ;;  %v5011_v13 = vunpack.i.h.bf16 %v5009_v60  ;;  %v5016_v19 = vunpack.i.h.bf16 %v5014_v46 }
 0x114   : > { %5234 = vpow2.f32 %v1798_v21  ;;  %v6336_v21 = vld [vmem:[%s5776_s12 + $0x99] sm:$0xff] }
 0x115   : > { %4681 = vmatmul.mubr.msk.bf16.gmra.mrb[4].mxu0 %vm838_vm14, %v6050_v14  ;;  %v1774_v14 = vmin.f32 %v6273_v26, 0.0  ;;  %v5229_v16 = vpop.eup %5228  ;;  %5236 = vpow2.f32 %v1800_v27 }
 0x116   : > { %4684 = vmatprep.mubr.msk.bf16.mxu0 %vm838_vm14, %v6074_v63  ;;  %4701 = vmatpush3.bf16.msra.mxu0 %v5072_v2  ;;  %v1775_v63 = vmin.f32 %v6277_v7, 0.0  ;;  %v4273_v15 = vadd.f32 -1.0, %v5229_v16  ;;  %v6328_v2 = vld [vmem:[%s5776_s12 + $0x89] sm:$0xff] }
 0x117   : > { %4702 = vmatprep.subr.bf16.mxu0 %v5073_v47  ;;  %v1802_v32 = vmul.f32 1.442695, %v1774_v14  ;;  %v1781_v5 = vmin.f32 %v6328_v2, 0.0  ;;  %v1783_v14 = vmin.f32 %v6336_v21, 0.0 }
 0x118   : > { %v1804_v56 = vmul.f32 1.442695, %v1775_v63  ;;  %v1849_v55 = vsel %vm1749_vm9, %v6241_v39, %v4273_v15  ;;  %v6323_v39 = vld [vmem:[%s5776_s12 + $0x81] sm:$0xff]  ;;  %v5024_v15 = vpop.permute.xlu1 %5023  ;;  %vm1763_vm9 = vcmp.gt.f32.partialorder %v6336_v21, 0.0 }
 0x119   : > { %5238 = vpow2.f32 %v1802_v32  ;;  %v1780_v4 = vmin.f32 %v6323_v39, 0.0  ;;  %v1816_v34 = vmul.f32 1.442695, %v1781_v5  ;;  %v2089_v16 = vsel %vm813_vm13, %v1849_v55, %v5011_v13 }
 0x11a   : > { %4703 = vmatpush3.bf16.msra.mxu0 %v5073_v47  ;;  %5240 = vpow2.f32 %v1804_v56  ;;  %v5010_v47 = vunpack.i.l.bf16 %v5009_v60  ;;  %v1820_v17 = vmul.f32 1.442695, %v1783_v14  ;;  %v5025_v55 = vunpack.i.l.bf16 %v5024_v15 }
 0x11b   : > { %5242 = vpow2.f32 %v1806_v50  ;;  %vm1760_vm6 = vcmp.gt.f32.partialorder %v6323_v39, 0.0 }
 0x11c   : > { %v5231_v37 = vpop.eup %5230  ;;  %5244 = vpow2.f32 %v1808_v22  ;;  %v2088_v56 = vsel %vm813_vm13, %v1848_v51, %v5010_v47  ;;  %v6362_v22 = vld [vmem:[%s5776_s12 + $0xa9] sm:$0xff]  ;;  %v5026_v51 = vunpack.i.h.bf16 %v5024_v15  ;;  %v5034_v5 = vpop.permute.xlu1 %5033 }
 0x11d   : > { %4685 = vmatmul.mubr.msk.bf16.gmra.mrb[8].mxu0 %vm838_vm14, %v6094_v30  ;;  %v4271_v30 = vadd.f32 -1.0, %v5225_v29  ;;  %v5233_v52 = vpop.eup %5232  ;;  %v4274_v10 = vadd.f32 -1.0, %v5231_v37  ;;  %v1814_v29 = vmul.f32 1.442695, %v1780_v4  ;;  %v1785_v37 = vmin.f32 %v6362_v22, 0.0 }
 0x11e   : > { %4688 = vmatprep.mubr.msk.bf16.mxu0 %vm838_vm14, %v6105_v0  ;;  %v1778_v0 = vmin.f32 %v6294_v18, 0.0  ;;  %v5235_v41 = vpop.eup %5234  ;;  %v4275_v40 = vadd.f32 -1.0, %v5233_v52  ;;  %v5036_v14 = vunpack.i.h.bf16 %v5034_v5 }
 0x11f   : > { %v1847_v23 = vsel %vm1747_vm7, %v6231_v61, %v4271_v30  ;;  %v1519_v61 = vld [vmem:[#allocation2 + $0xa9] sm:$0xff]  ;;  %v4276_v1 = vadd.f32 -1.0, %v5235_v41  ;;  %v5237_v12 = vpop.eup %5236  ;;  %v1850_v3 = vsel %vm1750_vm10, %v6250_v35, %v4274_v10  ;;  %v5019_v30 = vpop.permute.xlu0 %5018  ;;  %vm1761_vm7 = vcmp.gt.f32.partialorder %v6328_v2, 0.0 }
 0x120   : > { %v1810_v33 = vmul.f32 1.442695, %v1778_v0  ;;  %v2087_v45 = vsel %vm813_vm13, %v1847_v23, %v5006_v44  ;;  %v1851_v27 = vsel %vm1751_vm11, %v6257_v25, %v4275_v40  ;;  %v4277_v32 = vadd.f32 -1.0, %v5237_v12  ;;  %v6358_v44 = vld [vmem:[%s5776_s12 + $0xa1] sm:$0xff] }
 0x121   : > { %v1852_v35 = vsel %vm1752_vm12, %v6261_v6, %v4276_v1  ;;  %v1818_v25 = vmul.f32 1.442695, %v1782_v57  ;;  %v2091_v38 = vsel %vm813_vm13, %v1851_v27, %v5016_v19  ;;  %v2090_v58 = vsel %vm813_vm13, %v1850_v3, %v5015_v9 }
 0x122   : > { %5246 = vpow2.f32 %v1810_v33  ;;  %v2107_v6 = vpack.c.bf16 %v2089_v16, %v2088_v56  ;;  %v2108_v23 = vpack.c.bf16 %v2091_v38, %v2090_v58  ;;  %v5021_v33 = vunpack.i.h.bf16 %v5019_v30 }
 0x123   : > { %5248 = vpow2.f32 %v1812_v36  ;;  %v5239_v63 = vpop.eup %5238  ;;  %v5020_v52 = vunpack.i.l.bf16 %v5019_v30  ;;  %v1853_v41 = vsel %vm1753_vm15, %v6269_v20, %v4277_v32  ;;  %v1824_v20 = vmul.f32 1.442695, %v1785_v37  ;;  %v5029_v4 = vpop.permute.xlu0 %5028 }
 0x124   : > { %v5241_v59 = vpop.eup %5240  ;;  %v4278_v28 = vadd.f32 -1.0, %v5239_v63  ;;  %5250 = vpow2.f32 %v1814_v29  ;;  %v5031_v47 = vunpack.i.h.bf16 %v5029_v4  ;;  %v5030_v57 = vunpack.i.l.bf16 %v5029_v4 }
 0x125   : > { %4689 = vmatmul.mubr.msk.bf16.gmra.mrb[12].mxu0 %vm838_vm14, %v6119_v49  ;;  %v2086_v49 = vsel %vm813_vm13, %v1846_v42, %v5005_v48  ;;  %v5243_v0 = vpop.eup %5242  ;;  %v4279_v31 = vadd.f32 -1.0, %v5241_v59  ;;  %5252 = vpow2.f32 %v1816_v34  ;;  %v1784_v48 = vmin.f32 %v6358_v44, 0.0 }
 0x126   : > { %4692 = vmatprep.mubr.msk.bf16.mxu0 %vm838_vm14, %v6129_v53  ;;  %v1518_v53 = vld [vmem:[#allocation2 + $0xa1] sm:$0xff]  ;;  %v2106_v62 = vpack.c.bf16 %v2087_v45, %v2086_v49  ;;  %v5245_v50 = vpop.eup %5244  ;;  %5254 = vpow2.f32 %v1818_v25  ;;  %v1854_v45 = vsel %vm1754_vm0, %v6273_v26, %v4278_v28  ;;  %v4280_v46 = vadd.f32 -1.0, %v5243_v0  ;;  %v5044_v25 = vpop.permute.xlu1 %5043 }
 0x127   : > { %v1529_v43 = vpack.c.bf16 %v1519_v61, %v1518_v53  ;;  %5256 = vpow2.f32 %v1820_v17  ;;  %v1855_v49 = vsel %vm1755_vm1, %v6277_v7, %v4279_v31  ;;  %v1822_v60 = vmul.f32 1.442695, %v1784_v48 }
 0x128   : > { %v2093_v53 = vsel %vm813_vm13, %v1853_v41, %v5021_v33  ;;  %v2092_v61 = vsel %vm813_vm13, %v1852_v35, %v5020_v52  ;;  %v2095_v10 = vsel %vm813_vm13, %v1855_v49, %v5026_v51  ;;  %v2094_v40 = vsel %vm813_vm13, %v1854_v45, %v5025_v55  ;;  %v5039_v35 = vpop.permute.xlu0 %5038 }
 0x129   : > { %v4281_v26 = vadd.f32 -1.0, %v5245_v50  ;;  %v2109_v12 = vpack.c.bf16 %v2093_v53, %v2092_v61  ;;  %5258 = vpow2.f32 %v1822_v60  ;;  %v2110_v13 = vpack.c.bf16 %v2095_v10, %v2094_v40 }
 0x12a   : > { %5260 = vpow2.f32 %v1824_v20  ;;  %v1856_v19 = vsel %vm1756_vm2, %v6285_v8, %v4280_v46  ;;  %v5035_v63 = vunpack.i.l.bf16 %v5034_v5  ;;  %v5041_v30 = vunpack.i.h.bf16 %v5039_v35 }
 0x12b   : > { %v1857_v9 = vsel %vm1757_vm3, %v6290_v11, %v4281_v26  ;;  %v2096_v34 = vsel %vm813_vm13, %v1856_v19, %v5030_v57  ;;  %v5040_v17 = vunpack.i.l.bf16 %v5039_v35  ;;  %v5046_v15 = vunpack.i.h.bf16 %v5044_v25 }
 0x12c   : > { %v5247_v42 = vpop.eup %5246  ;;  %v2097_v32 = vsel %vm813_vm13, %v1857_v9, %v5031_v47  ;;  %v5045_v50 = vunpack.i.l.bf16 %v5044_v25  ;;  %vm1764_vm10 = vcmp.gt.f32.partialorder %v6358_v44, 0.0  ;;  %vm1765_vm11 = vcmp.gt.f32.partialorder %v6362_v22, 0.0  ;;  %v6456_v9 = vld [vmem:[%s7359_s5] ss:$0 sm:$0xff] }
 0x12d   : > { %4693 = vmatmul.mubr.msk.bf16.gmra.mrb[16].mxu0 %vm838_vm14, %v1529_v43  ;;  %v5249_v36 = vpop.eup %5248  ;;  %v4282_v7 = vadd.f32 -1.0, %v5247_v42  ;;  %v2111_v38 = vpack.c.bf16 %v2097_v32, %v2096_v34 }
 0x12e   : > { %4704 = vmatprep.mubr.msk.bf16.mxu0 %vm838_vm14, %v2106_v62  ;;  %v4283_v1 = vadd.f32 -1.0, %v5249_v36  ;;  %v5251_v62 = vpop.eup %5250  ;;  %v5049_v36 = vpop.permute.xlu0 %5048 }
 0x12f   : > { %v5253_v43 = vpop.eup %5252  ;;  %v1858_v27 = vsel %vm1758_vm4, %v6294_v18, %v4282_v7  ;;  %v4284_v16 = vadd.f32 -1.0, %v5251_v62  ;;  %v5051_v41 = vunpack.i.h.bf16 %v5049_v36  ;;  %v5050_v51 = vunpack.i.l.bf16 %v5049_v36 }
 0x130   : > { %v5255_v3 = vpop.eup %5254  ;;  %v1859_v29 = vsel %vm1759_vm5, %v6301_v54, %v4283_v1  ;;  %v2098_v11 = vsel %vm813_vm13, %v1858_v27, %v5035_v63  ;;  %v4285_v56 = vadd.f32 -1.0, %v5253_v43  ;;  %v5469_v62 = vmov 0.0   ;;  %v6461_v63 = vld [vmem:[%s7361_s7] ss:$0 sm:$0xff] }
 0x131   : > { %v5257_v59 = vpop.eup %5256  ;;  %v2099_v8 = vsel %vm813_vm13, %v1859_v29, %v5036_v14  ;;  %v4286_v18 = vadd.f32 -1.0, %v5255_v3  ;;  %v1860_v28 = vsel %vm1760_vm6, %v6323_v39, %v4284_v16  ;;  %4724 = vmatprep.subr.bf16.mxu1 %v5469_v62  ;;  %2505 = vst.msk [vmem:[#allocation3] sm:$0xff] %vm838_vm14, %v5469_v62  ;;  %4856 = vmatprep.subr.bf16.mxu0 %v5469_v62 }
 0x132   : > { %v4287_v54 = vadd.f32 -1.0, %v5257_v59  ;;  %v2112_v58 = vpack.c.bf16 %v2099_v8, %v2098_v11  ;;  %v1861_v31 = vsel %vm1761_vm7, %v6328_v2, %v4285_v56  ;;  %4043 = vst.msk [vmem:[%s7100_s16] sm:$0xff] %vm813_vm13, %v5469_v62  ;;  %4044 = vst.msk [vmem:[%s7100_s16 + $0x8] sm:$0xff] %vm813_vm13, %v5469_v62 }
 0x133   : > { %v5259_v0 = vpop.eup %5258  ;;  %v1862_v48 = vsel %vm1762_vm8, %v6332_v24, %v4286_v18  ;;  %v2101_v42 = vsel %vm813_vm13, %v1861_v31, %v5041_v30  ;;  %4045 = vst.msk [vmem:[%s7100_s16 + $0x10] sm:$0xff] %vm813_vm13, %v5469_v62  ;;  %4046 = vst.msk [vmem:[%s7100_s16 + $0x18] sm:$0xff] %vm813_vm13, %v5469_v62 }
 0x134   : > { %v1863_v37 = vsel %vm1763_vm9, %v6336_v21, %v4287_v54  ;;  %v2102_v39 = vsel %vm813_vm13, %v1862_v48, %v5045_v50  ;;  %v4288_v2 = vadd.f32 -1.0, %v5259_v0  ;;  %vm5470_vm9 = vmmov 0   ;;  %4064 = vst.msk [vmem:[%s7100_s16 + $0xa8] sm:$0xff] %vm813_vm13, %v5469_v62  ;;  %4065 = vst.msk [vmem:[%s7100_s16 + $0xb0] sm:$0xff] %vm813_vm13, %v5469_v62 }
 0x135   : > { %4705 = vmatmul.mubr.msk.bf16.vlgmr.msra.gmra.mrb[0].mxu0 %vm838_vm14, %v2107_v6  ;;  %v5261_v6 = vpop.eup %5260  ;;  %v2103_v33 = vsel %vm813_vm13, %v1863_v37, %v5046_v15  ;;  %4732 = vmatprep.mubr.msk.bf16.mxu1 %vm5470_vm9, %v5469_v62  ;;  %4066 = vst.msk [vmem:[%s7100_s16 + $0xb8] sm:$0xff] %vm813_vm13, %v5469_v62 }
 0x136   : > { %4708 = vmatprep.mubr.msk.bf16.mxu0 %vm838_vm14, %v2108_v23  ;;  %v2100_v23 = vsel %vm813_vm13, %v1860_v28, %v5040_v17  ;;  %v4289_v52 = vadd.f32 -1.0, %v5261_v6  ;;  %v2114_v21 = vpack.c.bf16 %v2103_v33, %v2102_v39  ;;  %v1864_v55 = vsel %vm1764_vm10, %v6358_v44, %v4288_v2 }
 0x137   : > { %v2113_v24 = vpack.c.bf16 %v2101_v42, %v2100_v23  ;;  %v2104_v60 = vsel %vm813_vm13, %v1864_v55, %v5050_v51 }
 0x138   : > { %v1865_v45 = vsel %vm1765_vm11, %v6362_v22, %v4289_v52 }
 0x139   : > { %v2105_v49 = vsel %vm813_vm13, %v1865_v45, %v5051_v41 }
 0x13a   : > { %v2115_v53 = vpack.c.bf16 %v2105_v49, %v2104_v60 }
 0x13d   : > { %4709 = vmatmul.mubr.msk.bf16.gmra.mrb[4].mxu0 %vm838_vm14, %v2109_v12  ;;  %v5074_v12 = vld [vmem:[%s7362_s8 + $0x20] sm:$0xff]  }
 0x13e   : > { %4712 = vmatprep.mubr.msk.bf16.mxu0 %vm838_vm14, %v2110_v13  ;;  %4725 = vmatpush3.bf16.msra.mxu1 %v5074_v12  ;;  %v5075_v13 = vld [vmem:[%s7362_s8 + $0x28] sm:$0xff]  }
 0x13f   : > { %4726 = vmatprep.subr.bf16.mxu1 %v5469_v62 }
 0x142   : > { %4727 = vmatpush3.bf16.msra.mxu1 %v5075_v13 }
 0x143   : > { %4728 = vmatprep.subr.bf16.mxu1 %v5469_v62  ;;  %v2388_v47 = vpop.permute.xlu1 %2387 }
 0x145   : > { %4713 = vmatmul.mubr.msk.bf16.gmra.mrb[8].mxu0 %vm838_vm14, %v2111_v38 }
 0x146   : > { %4716 = vmatprep.mubr.msk.bf16.mxu0 %vm838_vm14, %v2112_v58  ;;  %v2393_v43 = vpop.permute.xlu0 %2392 }
 0x147   : > { %v2398_v57 = vpop.permute.xlu1 %2397 }
 0x14a   : > { %v2408_v3 = vpop.permute.xlu0 %2407 }
 0x14b   : > { %v2403_v19 = vpop.permute.xlu1 %2402 }
 0x14d   : > { %4717 = vmatmul.mubr.msk.bf16.gmra.mrb[12].mxu0 %vm838_vm14, %v2113_v24 }
 0x14e   : > { %4720 = vmatprep.mubr.msk.bf16.mxu0 %vm838_vm14, %v2114_v21  ;;  %v2418_v58 = vpop.permute.xlu0 %2417 }
 0x14f   : > { %v2413_v34 = vpop.permute.xlu1 %2412 }
 0x152   : > { %v2428_v55 = vpop.permute.xlu0 %2427 }
 0x153   : > { %v2423_v15 = vpop.permute.xlu1 %2422 }
 0x155   : > { %4721 = vmatmul.mubr.msk.bf16.gmra.mrb[16].mxu0 %vm838_vm14, %v2115_v53 }
 0x156   : > { %4864 = vmatprep.mubr.msk.bf16.mxu0 %vm5470_vm9, %v5469_v62 }
 0x190   : > { %v6417_v61 = vpop.f32.mrb[0].mxu1 }
 0x191   : > { %v6419_v20 = vpop.f32.mrb[1].mxu1 }
 0x192   : > { %v6421_v10 = vpop.f32.mrb[2].mxu1 }
 0x193   : > { %v6423_v44 = vpop.f32.mrb[3].mxu1 }
 0x198   : > { %v6425_v22 = vpop.f32.mrb[4].mxu1 }
 0x199   : > { %v6427_v40 = vpop.f32.mrb[5].mxu1 }
 0x19a   : > { %v6429_v46 = vpop.f32.mrb[6].mxu1 }
 0x19b   : > { %v6431_v26 = vpop.f32.mrb[7].mxu1 }
 0x1a0   : > { %v6433_v4 = vpop.f32.mrb[8].mxu1 }
 0x1a1   : > { %v6435_v7 = vpop.f32.mrb[9].mxu1 }
 0x1a2   : > { %v6437_v1 = vpop.f32.mrb[10].mxu1 }
 0x1a3   : > { %v6439_v5 = vpop.f32.mrb[11].mxu1 }
 0x208   : > { %v4706_v14 = vpop.f32.mrb[0].mxu0 }
 0x209   : > { %v2320_v27 = vadd.f32 %v4706_v14, %v6456_v9  ;;  %v2212_v29 = vpop.f32.mrb[1].mxu0 }
 0x20a   : > { %v2318_v59 = vadd.f32 %v6456_v9, %v2212_v29  ;;  %v4707_v32 = vpop.f32.mrb[2].mxu0 }
 0x20b   : > { %v2347_v8 = vadd.f32 %v6461_v63, %v2320_v27  ;;  %v2321_v11 = vadd.f32 %v4707_v32, %v6456_v9  ;;  %v2215_v16 = vpop.f32.mrb[3].mxu0 }
 0x20c   : > { %v2345_v56 = vadd.f32 %v6461_v63, %v2318_v59  ;;  %v2319_v35 = vadd.f32 %v6456_v9, %v2215_v16 }
 0x20d   : > { %v6469_v18 = vmul.f32 %v2398_v57, %v2347_v8  ;;  %v2348_v54 = vadd.f32 %v6461_v63, %v2321_v11 }
 0x20e   : > { %v6472_v25 = vmul.f32 %v2388_v47, %v2345_v56  ;;  %v2346_v38 = vadd.f32 %v6461_v63, %v2319_v35  ;;  %v2433_v47 = vpop.permute.xlu1 %2432  ;;  %v6524_v35 = vpop.permute.xlu0 %2437 }
 0x20f   : > { %v6475_v30 = vmul.f32 %v2403_v19, %v2348_v54  ;;  %v6478_v17 = vsub.f32 0.0, %v6469_v18 }
 0x210   : > { %v6480_v0 = vmul.f32 %v2393_v43, %v2346_v38  ;;  %v4710_v28 = vpop.f32.mrb[4].mxu0  ;;  %v6483_v31 = vsub.f32 0.0, %v6472_v25 }
 0x211   : > { %v2324_v50 = vadd.f32 %v4710_v28, %v6456_v9  ;;  %v2228_v6 = vpop.f32.mrb[5].mxu0  ;;  %v2668_v48 = vmin.f32 %v6478_v17, 0.0  ;;  %v6493_v39 = vsub.f32 0.0, %v6475_v30  ;;  %vm2648_vm15 = vcmp.gt.f32.partialorder %v6478_v17, 0.0 }
 0x212   : > { %v2322_v37 = vadd.f32 %v6456_v9, %v2228_v6  ;;  %v4711_v42 = vpop.f32.mrb[6].mxu0  ;;  %v2666_v23 = vmin.f32 %v6483_v31, 0.0  ;;  %v6490_v33 = vsub.f32 0.0, %v6480_v0  ;;  %vm2646_vm12 = vcmp.gt.f32.partialorder %v6483_v31, 0.0 }
 0x213   : > { %v2351_v2 = vadd.f32 %v6461_v63, %v2324_v50  ;;  %v2325_v52 = vadd.f32 %v4711_v42, %v6456_v9  ;;  %v2231_v36 = vpop.f32.mrb[7].mxu0  ;;  %v2690_v24 = vmul.f32 1.442695, %v2668_v48  ;;  %v2669_v13 = vmin.f32 %v6493_v39, 0.0 }
 0x214   : > { %v2349_v21 = vadd.f32 %v6461_v63, %v2322_v37  ;;  %v2323_v41 = vadd.f32 %v6456_v9, %v2231_v36  ;;  %v2686_v51 = vmul.f32 1.442695, %v2666_v23  ;;  %v2667_v60 = vmin.f32 %v6490_v33, 0.0  ;;  %v5078_v36 = vld [vmem:[%s7362_s8 + $0x68] sm:$0xff]  }
 0x215   : > { %v6499_v45 = vmul.f32 %v2418_v58, %v2351_v2  ;;  %v2352_v49 = vadd.f32 %v6461_v63, %v2325_v52  ;;  %5262 = vpow2.f32 %v2690_v24  ;;  %v2692_v29 = vmul.f32 1.442695, %v2669_v13  ;;  %v5079_v24 = vld [vmem:[%s7362_s8 + $0x38] sm:$0xff]   ;;  %v2448_v13 = vpop.permute.xlu0 %2447 }
 0x216   : > { %v6503_v53 = vmul.f32 %v2408_v3, %v2349_v21  ;;  %v2350_v12 = vadd.f32 %v6461_v63, %v2323_v41  ;;  %5264 = vpow2.f32 %v2686_v51  ;;  %v2688_v57 = vmul.f32 1.442695, %v2667_v60  ;;  %v5076_v3 = vld [vmem:[%s7362_s8 + $0x30] sm:$0xff]  }
 0x217   : > { %v6508_v43 = vsub.f32 0.0, %v6499_v45  ;;  %v6510_v19 = vmul.f32 %v2423_v15, %v2352_v49  ;;  %4729 = vmatpush3.bf16.msra.mxu1 %v5076_v3  ;;  %vm2647_vm0 = vcmp.gt.f32.partialorder %v6490_v33, 0.0  ;;  %vm2649_vm1 = vcmp.gt.f32.partialorder %v6493_v39, 0.0 }
 0x218   : > { %v6512_v14 = vmul.f32 %v2413_v34, %v2350_v12  ;;  %v4714_v27 = vpop.f32.mrb[8].mxu0  ;;  %v6515_v59 = vsub.f32 0.0, %v6503_v53  ;;  %5266 = vpow2.f32 %v2688_v57  ;;  %4730 = vmatprep.subr.bf16.mxu1 %v5469_v62 }
 0x219   : > { %v4908_v32 = vadd.f32 %v4714_v27, %v6417_v61  ;;  %v2244_v8 = vpop.f32.mrb[9].mxu0  ;;  %v2672_v11 = vmin.f32 %v6508_v43, 0.0  ;;  %5268 = vpow2.f32 %v2692_v29  ;;  %v6538_v48 = vsub.f32 0.0, %v6510_v19 }
 0x21a   : > { %v4909_v16 = vadd.f32 %v2244_v8, %v6419_v20  ;;  %v4715_v56 = vpop.f32.mrb[10].mxu0  ;;  %v2670_v34 = vmin.f32 %v6515_v59, 0.0  ;;  %v6529_v61 = vsub.f32 0.0, %v6512_v14  ;;  %v5077_v20 = vld [vmem:[%s7362_s8 + $0x60] sm:$0xff]   ;;  %vm2650_vm2 = vcmp.gt.f32.partialorder %v6515_v59, 0.0 }
 0x21b   : > { %v2328_v54 = vadd.f32 %v4908_v32, %v6456_v9  ;;  %v4910_v38 = vadd.f32 %v4715_v56, %v6421_v10  ;;  %v2247_v58 = vpop.f32.mrb[11].mxu0  ;;  %v2698_v28 = vmul.f32 1.442695, %v2672_v11  ;;  %v6540_v10 = vpop.permute.xlu1 %2442  ;;  %4857 = vmatpush3.bf16.msra.mxu0 %v5077_v20  ;;  %v2673_v12 = vmin.f32 %v6538_v48, 0.0  ;;  %4731 = vmatpush3.bf16.msra.mxu1 %v5079_v24 }
 0x21c   : > { %v2326_v15 = vadd.f32 %v4909_v16, %v6456_v9  ;;  %v4911_v50 = vadd.f32 %v2247_v58, %v6423_v44  ;;  %v2694_v6 = vmul.f32 1.442695, %v2670_v34  ;;  %v2671_v42 = vmin.f32 %v6529_v61, 0.0  ;;  %4858 = vmatprep.subr.bf16.mxu0 %v5469_v62  ;;  %4768 = vmatprep.subr.bf16.mxu1 %v5469_v62  ;;  %v5080_v58 = vld [vmem:[%s7362_s8 + $0x70] sm:$0xff]  }
 0x21d   : > { %v2329_v37 = vadd.f32 %v4910_v38, %v6456_v9  ;;  %v2355_v41 = vadd.f32 %v6461_v63, %v2328_v54  ;;  %v2700_v16 = vmul.f32 1.442695, %v2673_v12  ;;  %vm2652_vm3 = vcmp.gt.f32.partialorder %v6508_v43, 0.0 }
 0x21e   : > { %v2353_v23 = vadd.f32 %v6461_v63, %v2326_v15  ;;  %v2327_v2 = vadd.f32 %v4911_v50, %v6456_v9  ;;  %5270 = vpow2.f32 %v2694_v6  ;;  %v2696_v52 = vmul.f32 1.442695, %v2671_v42 }
 0x21f   : > { %v5263_v44 = vpop.eup %5262  ;;  %5272 = vpow2.f32 %v2698_v28  ;;  %v2356_v57 = vadd.f32 %v6461_v63, %v2329_v37  ;;  %4859 = vmatpush3.bf16.msra.mxu0 %v5078_v36  ;;  %vm2651_vm4 = vcmp.gt.f32.partialorder %v6529_v61, 0.0  ;;  %vm2653_vm5 = vcmp.gt.f32.partialorder %v6538_v48, 0.0 }
 0x220   : > { %v5265_v21 = vpop.eup %5264  ;;  %v6558_v51 = vmul.f32 %v2428_v55, %v2353_v23  ;;  %v2354_v49 = vadd.f32 %v6461_v63, %v2327_v2  ;;  %v4718_v60 = vpop.f32.mrb[12].mxu0  ;;  %5274 = vpow2.f32 %v2696_v52  ;;  %v4348_v11 = vadd.f32 -1.0, %v5263_v44  ;;  %4860 = vmatprep.subr.bf16.mxu0 %v5469_v62 }
 0x221   : > { %v4912_v27 = vadd.f32 %v4718_v60, %v6425_v22  ;;  %v2260_v29 = vpop.f32.mrb[13].mxu0  ;;  %v4346_v3 = vadd.f32 -1.0, %v5265_v21  ;;  %v2453_v22 = vpop.permute.xlu1 %2452  ;;  %5276 = vpow2.f32 %v2700_v16  ;;  %v6599_v44 = vmul.f32 %v6540_v10, %v2356_v57 }
 0x222   : > { %v6564_v32 = vmul.f32 %v2433_v47, %v2354_v49  ;;  %v4913_v55 = vadd.f32 %v2260_v29, %v6427_v40  ;;  %v4719_v8 = vpop.f32.mrb[14].mxu0  ;;  %v5267_v56 = vpop.eup %5266  ;;  %v6576_v47 = vsub.f32 0.0, %v6558_v51  ;;  %v2748_v36 = vsel %vm2648_vm15, %v6478_v17, %v4348_v11 }
 0x223   : > { %v2332_v34 = vadd.f32 %v4912_v27, %v6456_v9  ;;  %v4914_v54 = vadd.f32 %v4719_v8, %v6429_v46  ;;  %v2263_v38 = vpop.f32.mrb[15].mxu0  ;;  %v2746_v40 = vsel %vm2646_vm12, %v6483_v31, %v4346_v3  ;;  %v5269_v28 = vpop.eup %5268  ;;  %v4347_v46 = vadd.f32 -1.0, %v5267_v56  ;;  %4861 = vmatpush3.bf16.msra.mxu0 %v5080_v58 }
 0x224   : > { %v2330_v20 = vadd.f32 %v4913_v55, %v6456_v9  ;;  %v4915_v15 = vadd.f32 %v2263_v38, %v6431_v26  ;;  %2786 = vrot.lane.b32.xlu1 %v2746_v40, %s5467_s25  ;;  %v6586_v31 = vmul.f32 %v6524_v35, %v2355_v41  ;;  %v4349_v37 = vadd.f32 -1.0, %v5269_v28  ;;  %4862 = vmatprep.subr.bf16.mxu0 %v5469_v62  ;;  %v2458_v35 = vpop.permute.xlu0 %2457 }
 0x225   : > { %v2359_v50 = vadd.f32 %v6461_v63, %v2332_v34  ;;  %v2333_v6 = vadd.f32 %v4914_v54, %v6456_v9  ;;  %v2747_v23 = vsel %vm2647_vm0, %v6490_v33, %v4347_v46  ;;  %v2674_v2 = vmin.f32 %v6576_v47, 0.0  ;;  %v5082_v33 = vld [vmem:[%s7362_s8 + $0x78] sm:$0xff]   ;;  %v2463_v57 = vpop.permute.xlu1 %2462 }
 0x226   : > { %v2357_v42 = vadd.f32 %v6461_v63, %v2330_v20  ;;  %v2331_v26 = vadd.f32 %v4915_v15, %v6456_v9  ;;  %2788 = vrot.lane.b32.xlu0 %v2747_v23, %s5467_s25  ;;  %v6607_v24 = vsub.f32 0.0, %v6564_v32  ;;  %v2749_v60 = vsel %vm2649_vm1, %v6493_v39, %v4349_v37 }
 0x227   : > { %v2360_v52 = vadd.f32 %v6461_v63, %v2333_v6  ;;  %v6612_v41 = vmul.f32 %v2458_v35, %v2359_v50  ;;  %v2702_v17 = vmul.f32 1.442695, %v2674_v2  ;;  %v6623_v8 = vsub.f32 0.0, %v6586_v31  ;;  %4863 = vmatpush3.bf16.msra.mxu0 %v5082_v33 }
 0x228   : > { %v5271_v21 = vpop.eup %5270  ;;  %v2358_v10 = vadd.f32 %v6461_v63, %v2331_v26  ;;  %2790 = vrot.lane.b32.xlu1 %v2748_v36, %s5467_s25  ;;  %v4722_v49 = vpop.f32.mrb[16].mxu0  ;;  %v6619_v27 = vmul.f32 %v2448_v13, %v2357_v42  ;;  %v2675_v40 = vmin.f32 %v6607_v24, 0.0  ;;  %v2637_v37 = vsub.f32 0.0, %v6599_v44 }
 0x229   : > { %v5273_v12 = vpop.eup %5272  ;;  %v4916_v29 = vadd.f32 %v4722_v49, %v6433_v4  ;;  %v2276_v3 = vpop.f32.mrb[17].mxu0  ;;  %v4350_v55 = vadd.f32 -1.0, %v5271_v21  ;;  %v6625_v11 = vmul.f32 %v2463_v57, %v2360_v52  ;;  %5278 = vpow2.f32 %v2702_v17 }
 0x22a   : > { %v4917_v16 = vadd.f32 %v2276_v3, %v6435_v7  ;;  %v4723_v56 = vpop.f32.mrb[18].mxu0  ;;  %v4352_v34 = vadd.f32 -1.0, %v5273_v12  ;;  %v5275_v39 = vpop.eup %5274  ;;  %2792 = vrot.lane.b32.xlu0 %v2749_v60, %s5467_s25  ;;  %v6637_v58 = vmul.f32 %v2453_v22, %v2358_v10  ;;  %v2704_v46 = vmul.f32 1.442695, %v2675_v40 }
 0x22b   : > { %v6629_v54 = vadd.f32 %v4916_v29, %v6456_v9  ;;  %v4918_v4 = vadd.f32 %v4723_v56, %v6437_v1  ;;  %v2279_v13 = vpop.f32.mrb[19].mxu0  ;;  %v2750_v38 = vsel %vm2650_vm2, %v6515_v59, %v4350_v55  ;;  %v4351_v20 = vadd.f32 -1.0, %v5275_v39  ;;  %v5277_v50 = vpop.eup %5276 }
 0x22c   : > { %v2334_v7 = vadd.f32 %v4917_v16, %v6456_v9  ;;  %v4919_v28 = vadd.f32 %v2279_v13, %v6439_v5  ;;  %2794 = vrot.lane.b32.xlu1 %v2750_v38, %s5467_s25  ;;  %v2752_v1 = vsel %vm2652_vm3, %v6508_v43, %v4352_v34  ;;  %v2676_v59 = vmin.f32 %v6623_v8, 0.0  ;;  %v2468_v42 = vpop.permute.xlu0 %2467 }
 0x22d   : > { %v6643_v15 = vadd.f32 %v4918_v4, %v6456_v9  ;;  %v2751_v5 = vsel %vm2651_vm4, %v6529_v61, %v4351_v20  ;;  %v4353_v26 = vadd.f32 -1.0, %v5277_v50  ;;  %5280 = vpow2.f32 %v2704_v46 }
 0x22e   : > { %v2361_v22 = vadd.f32 %v6461_v63, %v2334_v7  ;;  %v6651_v6 = vadd.f32 %v4919_v28, %v6456_v9  ;;  %2796 = vrot.lane.b32.xlu0 %v2751_v5, %s5467_s25  ;;  %v2706_v43 = vmul.f32 1.442695, %v2676_v59  ;;  %v2638_v23 = vsub.f32 0.0, %v6619_v27 }
 0x22f   : > { %v2677_v9 = vmin.f32 %v2637_v37, 0.0  ;;  %v2639_v35 = vsub.f32 0.0, %v6637_v58  ;;  %v2753_v52 = vsel %vm2653_vm5, %v6538_v48, %v4353_v26  ;;  %v2640_v21 = vsub.f32 0.0, %v6612_v41 }
 0x230   : > { %v6659_v2 = vmul.f32 %v2468_v42, %v2361_v22  ;;  %2798 = vrot.lane.b32.xlu1 %v2752_v1, %s5467_s25  ;;  %5282 = vpow2.f32 %v2706_v43  ;;  %v2678_v61 = vmin.f32 %v2638_v23, 0.0  ;;  %v2641_v49 = vsub.f32 0.0, %v6625_v11 }
 0x231   : > { %v2708_v36 = vmul.f32 1.442695, %v2677_v9  ;;  %v2679_v33 = vmin.f32 %v2639_v35, 0.0  ;;  %v2680_v57 = vmin.f32 %v2640_v21, 0.0  ;;  %vm2654_vm6 = vcmp.gt.f32.partialorder %v6576_v47, 0.0 }
 0x232   : > { %2800 = vrot.lane.b32.xlu0 %v2753_v52, %s5467_s25  ;;  %v2710_v10 = vmul.f32 1.442695, %v2678_v61  ;;  %v2642_v60 = vsub.f32 0.0, %v6659_v2  ;;  %v2681_v3 = vmin.f32 %v2641_v49, 0.0  ;;  %vm2655_vm7 = vcmp.gt.f32.partialorder %v6607_v24, 0.0 }
 0x233   : > { %v5279_v17 = vpop.eup %5278  ;;  %5284 = vpow2.f32 %v2708_v36  ;;  %v2712_v12 = vmul.f32 1.442695, %v2679_v33  ;;  %v2714_v48 = vmul.f32 1.442695, %v2680_v57  ;;  %vm2656_vm8 = vcmp.gt.f32.partialorder %v6623_v8, 0.0 }
 0x234   : > { %v4354_v29 = vadd.f32 -1.0, %v5279_v17  ;;  %5286 = vpow2.f32 %v2710_v10  ;;  %v2682_v55 = vmin.f32 %v2642_v60, 0.0  ;;  %v2716_v56 = vmul.f32 1.442695, %v2681_v3 }
 0x235   : > { %5288 = vpow2.f32 %v2712_v12  ;;  %vm2657_vm10 = vcmp.gt.f32.partialorder %v2637_v37, 0.0  ;;  %vm2658_vm11 = vcmp.gt.f32.partialorder %v2638_v23, 0.0  ;;  %vm2659_vm12 = vcmp.gt.f32.partialorder %v2639_v35, 0.0 }
 0x236   : > { %v2754_v16 = vsel %vm2654_vm6, %v6576_v47, %v4354_v29  ;;  %5290 = vpow2.f32 %v2714_v48  ;;  %v2718_v34 = vmul.f32 1.442695, %v2682_v55  ;;  %vm2660_vm15 = vcmp.gt.f32.partialorder %v2640_v21, 0.0 }
 0x237   : > { %2802 = vrot.lane.b32.xlu1 %v2754_v16, %s5467_s25  ;;  %v5281_v39 = vpop.eup %5280  ;;  %5292 = vpow2.f32 %v2716_v56  ;;  %vm2662_vm0 = vcmp.gt.f32.partialorder %v2642_v60, 0.0  ;;  %vm2661_vm1 = vcmp.gt.f32.partialorder %v2641_v49, 0.0  ;;  %v2526_v36 = vmin.f32 %v6472_v25, 0.0 }
 0x238   : > { %v4355_v4 = vadd.f32 -1.0, %v5281_v39  ;;  %5294 = vpow2.f32 %v2718_v34  ;;  %v2527_v33 = vmin.f32 %v6480_v0, 0.0  ;;  %v2528_v10 = vmin.f32 %v6469_v18, 0.0 }
 0x239   : > { %v2530_v12 = vmin.f32 %v6503_v53, 0.0  ;;  %v2531_v29 = vmin.f32 %v6512_v14, 0.0  ;;  %v2532_v48 = vmin.f32 %v6499_v45, 0.0  ;;  %v2533_v16 = vmin.f32 %v6510_v19, 0.0 }
 0x23a   : > { %v5283_v13 = vpop.eup %5282  ;;  %v2755_v38 = vsel %vm2655_vm7, %v6607_v24, %v4355_v4  ;;  %v2550_v17 = vmul.f32 1.442695, %v2528_v10  ;;  %v2534_v4 = vmin.f32 %v6558_v51, 0.0  ;;  %vm2506_vm2 = vcmp.gt.f32.partialorder %v6472_v25, 0.0 }
 0x23b   : > { %v4356_v40 = vadd.f32 -1.0, %v5283_v13  ;;  %2804 = vrot.lane.b32.xlu0 %v2755_v38, %s5467_s25  ;;  %v2554_v3 = vmul.f32 1.442695, %v2530_v12  ;;  %v2556_v55 = vmul.f32 1.442695, %v2531_v29  ;;  %vm2507_vm3 = vcmp.gt.f32.partialorder %v6480_v0, 0.0 }
 0x23c   : > { %v2558_v56 = vmul.f32 1.442695, %v2532_v48  ;;  %v2560_v39 = vmul.f32 1.442695, %v2533_v16  ;;  %vm2508_vm4 = vcmp.gt.f32.partialorder %v6469_v18, 0.0  ;;  %vm2509_vm5 = vcmp.gt.f32.partialorder %v6475_v30, 0.0 }
 0x23d   : > { %v5285_v47 = vpop.eup %5284  ;;  %v2756_v7 = vsel %vm2656_vm8, %v6623_v8, %v4356_v40  ;;  %vm2510_vm6 = vcmp.gt.f32.partialorder %v6503_v53, 0.0  ;;  %vm2511_vm7 = vcmp.gt.f32.partialorder %v6512_v14, 0.0  ;;  %v2540_v48 = vmin.f32 %v6612_v41, 0.0 }
 0x23e   : > { %v5287_v28 = vpop.eup %5286  ;;  %2806 = vrot.lane.b32.xlu1 %v2756_v7, %s5467_s25  ;;  %v4357_v20 = vadd.f32 -1.0, %v5285_v47  ;;  %v2562_v7 = vmul.f32 1.442695, %v2534_v4  ;;  %vm2512_vm8 = vcmp.gt.f32.partialorder %v6499_v45, 0.0 }
 0x23f   : > { %v5289_v24 = vpop.eup %5288  ;;  %v4358_v1 = vadd.f32 -1.0, %v5287_v28  ;;  %v2535_v28 = vmin.f32 %v6564_v32, 0.0 }
 0x240   : > { %v2757_v46 = vsel %vm2657_vm10, %v2637_v37, %v4357_v20  ;;  %v4359_v59 = vadd.f32 -1.0, %v5289_v24  ;;  %v5291_v50 = vpop.eup %5290  ;;  %vm2513_vm10 = vcmp.gt.f32.partialorder %v6510_v19, 0.0 }
 0x241   : > { %2808 = vrot.lane.b32.xlu0 %v2757_v46, %s5467_s25  ;;  %v2758_v8 = vsel %vm2658_vm11, %v2638_v23, %v4358_v1  ;;  %v5293_v22 = vpop.eup %5292  ;;  %v4360_v42 = vadd.f32 -1.0, %v5291_v50  ;;  %v2382_v23 = vld [vmem:[%s7356_s2 + $0x88] sm:$0xff]  ;;  %vm2514_vm11 = vcmp.gt.f32.partialorder %v6558_v51, 0.0 }
 0x242   : > { %2810 = vrot.lane.b32.xlu1 %v2758_v8, %s5467_s25  ;;  %v2759_v5 = vsel %vm2659_vm12, %v2639_v35, %v4359_v59  ;;  %v5295_v26 = vpop.eup %5294  ;;  %v4361_v43 = vadd.f32 -1.0, %v5293_v22  ;;  %v2383_v35 = vld [vmem:[%s7356_s2 + $0x90] sm:$0xff]  ;;  %v2536_v8 = vmin.f32 %v6586_v31, 0.0  ;;  %vm2515_vm12 = vcmp.gt.f32.partialorder %v6564_v32, 0.0 }
 0x243   : > { %v4362_v9 = vadd.f32 -1.0, %v5295_v26  ;;  %v2760_v61 = vsel %vm2660_vm15, %v2640_v21, %v4360_v42  ;;  %v2546_v21 = vmul.f32 1.442695, %v2526_v36  ;;  %v2564_v26 = vmul.f32 1.442695, %v2535_v28 }
 0x244   : > { %v2761_v52 = vsel %vm2661_vm1, %v2641_v49, %v4361_v43  ;;  %v2548_v49 = vmul.f32 1.442695, %v2527_v33  ;;  %v2538_v36 = vmin.f32 %v6619_v27, 0.0  ;;  %v2541_v28 = vmin.f32 %v6625_v11, 0.0 }
 0x245   : > { %2812 = vrot.lane.b32.xlu0 %v2759_v5, %s5467_s25  ;;  %v2762_v37 = vsel %vm2662_vm0, %v2642_v60, %v4362_v9  ;;  %v2529_v60 = vmin.f32 %v6475_v30, 0.0  ;;  %5296 = vpow2.f32 %v2546_v21  ;;  %vm2516_vm15 = vcmp.gt.f32.partialorder %v6586_v31, 0.0 }
 0x246   : > { %2814 = vrot.lane.b32.xlu1 %v2760_v61, %s5467_s25  ;;  %5298 = vpow2.f32 %v2548_v49  ;;  %vm2517_vm0 = vcmp.gt.f32.partialorder %v6599_v44, 0.0  ;;  %vm2518_vm1 = vcmp.gt.f32.partialorder %v6619_v27, 0.0 }
 0x247   : > { %v2552_v57 = vmul.f32 1.442695, %v2529_v60  ;;  %5300 = vpow2.f32 %v2550_v17 }
 0x249   : > { %2816 = vrot.lane.b32.xlu0 %v2761_v52, %s5467_s25  ;;  %5302 = vpow2.f32 %v2552_v57  ;;  %v2537_v52 = vmin.f32 %v6599_v44, 0.0 }
 0x24a   : > { %2818 = vrot.lane.b32.xlu1 %v2762_v37, %s5467_s25  ;;  %5304 = vpow2.f32 %v2554_v3  ;;  %v2539_v3 = vmin.f32 %v6637_v58, 0.0 }
 0x24b   : > { %5306 = vpow2.f32 %v2556_v55  ;;  %v2568_v57 = vmul.f32 1.442695, %v2537_v52 }
 0x24c   : > { %5308 = vpow2.f32 %v2558_v56 }
 0x24d   : > { %2472 = vperm.xlu0 %5053, %v2382_v23   ;;  %5310 = vpow2.f32 %v2560_v39 }
 0x24e   : > { %2477 = vperm.xlu1 %5052, %v2383_v35   ;;  %5312 = vpow2.f32 %v2562_v7  ;;  %v2572_v7 = vmul.f32 1.442695, %v2539_v3 }
 0x24f   : > { %v5297_v34 = vpop.eup %5296  ;;  %5314 = vpow2.f32 %v2564_v26 }
 0x250   : > { %v5299_v13 = vpop.eup %5298  ;;  %v4326_v38 = vadd.f32 -1.0, %v5297_v34 }
 0x251   : > { %v5301_v40 = vpop.eup %5300  ;;  %v4327_v47 = vadd.f32 -1.0, %v5299_v13 }
 0x252   : > { %v2606_v1 = vsel %vm2506_vm2, %v6472_v25, %v4326_v38  ;;  %v4328_v46 = vadd.f32 -1.0, %v5301_v40  ;;  %v5081_v38 = vld [vmem:[%s7362_s8] sm:$0xff]   ;;  %vm2519_vm2 = vcmp.gt.f32.partialorder %v6637_v58, 0.0 }
 0x253   : > { %v5303_v20 = vpop.eup %5302  ;;  %v2607_v5 = vsel %vm2507_vm3, %v6480_v0, %v4327_v47  ;;  %v2566_v0 = vmul.f32 1.442695, %v2536_v8  ;;  %vm2520_vm3 = vcmp.gt.f32.partialorder %v6612_v41, 0.0 }
 0x254   : > { %v5305_v59 = vpop.eup %5304  ;;  %v4329_v42 = vadd.f32 -1.0, %v5303_v20  ;;  %v2608_v9 = vsel %vm2508_vm4, %v6469_v18, %v4328_v46  ;;  %v2542_v20 = vmin.f32 %v6659_v2, 0.0  ;;  %vm2521_vm4 = vcmp.gt.f32.partialorder %v6625_v11, 0.0 }
 0x255   : > { %v5307_v43 = vpop.eup %5306  ;;  %v4330_v37 = vadd.f32 -1.0, %v5305_v59  ;;  %5316 = vpow2.f32 %v2566_v0 }
 0x256   : > { %v5309_v23 = vpop.eup %5308  ;;  %v2609_v33 = vsel %vm2509_vm5, %v6475_v30, %v4329_v42  ;;  %v4331_v18 = vadd.f32 -1.0, %v5307_v43  ;;  %v2570_v30 = vmul.f32 1.442695, %v2538_v36  ;;  %5318 = vpow2.f32 %v2568_v57 }
 0x257   : > { %v5311_v10 = vpop.eup %5310  ;;  %v2610_v17 = vsel %vm2510_vm6, %v6503_v53, %v4330_v37  ;;  %v4332_v12 = vadd.f32 -1.0, %v5309_v23  ;;  %v2578_v26 = vmul.f32 1.442695, %v2542_v20  ;;  %vm2522_vm5 = vcmp.gt.f32.partialorder %v6659_v2, 0.0 }
 0x258   : > { %v2611_v16 = vsel %vm2511_vm7, %v6512_v14, %v4331_v18  ;;  %v4333_v53 = vadd.f32 -1.0, %v5311_v10  ;;  %v5313_v40 = vpop.eup %5312  ;;  %5320 = vpow2.f32 %v2570_v30 }
 0x259   : > { %v2612_v34 = vsel %vm2512_vm8, %v6499_v45, %v4332_v12  ;;  %v2574_v45 = vmul.f32 1.442695, %v2540_v48  ;;  %v4334_v8 = vadd.f32 -1.0, %v5313_v40  ;;  %5322 = vpow2.f32 %v2572_v7 }
 0x25b   : > { %5324 = vpow2.f32 %v2574_v45 }
 0x296   : > { %v2787_v24 = vpop.permute.xlu1 %2786 }
 0x297   : > { %v2846_v50 = vsel %vm813_vm13, %v2606_v1, %v2787_v24  ;;  %v2613_v24 = vsel %vm2513_vm10, %v6510_v19, %v4333_v53  ;;  %v2576_v19 = vmul.f32 1.442695, %v2541_v28 }
 0x298   : > { %2866 = vst.msk [vmem:[#allocation3 + $0x8] sm:$0xff] %vm838_vm14, %v2846_v50  ;;  %v2789_v22 = vpop.permute.xlu0 %2788 }
 0x299   : > { %v2847_v25 = vsel %vm813_vm13, %v2607_v5, %v2789_v22  ;;  %v5083_v22 = vld [vmem:[%s7362_s8 + $0x8] sm:$0xff]   ;;  %v5315_v5 = vpop.eup %5314  ;;  %5326 = vpow2.f32 %v2576_v19 }
 0x29a   : > { %v2791_v61 = vpop.permute.xlu1 %2790  ;;  %2867 = vst.msk [vmem:[#allocation3 + $0x10] sm:$0xff] %vm838_vm14, %v2847_v25  ;;  %v5317_v43 = vpop.eup %5316  ;;  %v4335_v52 = vadd.f32 -1.0, %v5315_v5  ;;  %5328 = vpow2.f32 %v2578_v26  ;;  %v6823_v5 = vld [vmem:[%s5541_s18 + $0xb8] sm:$0xff]  ;;  %v2362_v26 = vadd.f32 %v6461_v63, %v6651_v6 }
 0x29b   : > { %v2848_v35 = vsel %vm813_vm13, %v2608_v9, %v2791_v61  ;;  %v2614_v9 = vsel %vm2514_vm11, %v6558_v51, %v4334_v8  ;;  %v5084_v61 = vld [vmem:[%s7362_s8 + $0x10] sm:$0xff]   ;;  %v5319_v23 = vpop.eup %5318  ;;  %v4336_v51 = vadd.f32 -1.0, %v5317_v43  ;;  %v572_v19 = vsub.f32 0.0, %v6823_v5 }
 0x29c   : > { %2868 = vst.msk [vmem:[#allocation3 + $0x18] sm:$0xff] %vm838_vm14, %v2848_v35  ;;  %v2793_v21 = vpop.permute.xlu0 %2792  ;;  %v5321_v0 = vpop.eup %5320  ;;  %v2615_v18 = vsel %vm2515_vm12, %v6564_v32, %v4335_v52 }
 0x29d   : > { %v2849_v49 = vsel %vm813_vm13, %v2609_v33, %v2793_v21  ;;  %v5085_v33 = vld [vmem:[%s7362_s8 + $0x18] sm:$0xff]   ;;  %v2616_v12 = vsel %vm2516_vm15, %v6586_v31, %v4336_v51  ;;  %vm596_vm8 = vcmp.gt.f32.partialorder %v572_v19, 0.0 }
 0x29e   : > { %v2795_v60 = vpop.permute.xlu1 %2794  ;;  %2869 = vst.msk [vmem:[#allocation3 + $0x20] sm:$0xff] %vm838_vm14, %v2849_v49 }
 0x29f   : > { %v2850_v29 = vsel %vm813_vm13, %v2610_v17, %v2795_v60  ;;  %v2920_v4 = vld [vmem:[#allocation3 + $0x7] sm:$0xff]  ;;  %v4337_v60 = vadd.f32 -1.0, %v5319_v23  ;;  %v5323_v17 = vpop.eup %5322 }
 0x2a0   : > { %2870 = vst.msk [vmem:[#allocation3 + $0x28] sm:$0xff] %vm838_vm14, %v2850_v29  ;;  %v2797_v55 = vpop.permute.xlu0 %2796  ;;  %v4338_v29 = vadd.f32 -1.0, %v5321_v0  ;;  %v5325_v3 = vpop.eup %5324  ;;  %v4339_v48 = vadd.f32 -1.0, %v5323_v17 }
 0x2a1   : > { %v2851_v56 = vsel %vm813_vm13, %v2611_v16, %v2797_v55  ;;  %v2921_v13 = vld [vmem:[#allocation3 + $0xf] sm:$0xff]  ;;  %v2617_v30 = vsel %vm2517_vm0, %v6599_v44, %v4337_v60 }
 0x2a2   : > { %v2799_v39 = vpop.permute.xlu1 %2798  ;;  %2871 = vst.msk [vmem:[#allocation3 + $0x30] sm:$0xff] %vm838_vm14, %v2851_v56  ;;  %v2937_v47 = vpack.c.bf16 %v2921_v13, %v2920_v4 }
 0x2a3   : > { %v2852_v14 = vsel %vm813_vm13, %v2612_v34, %v2799_v39  ;;  %v3472_v59 = vld [vmem:[#allocation3 + $0x17] sm:$0xff]  ;;  %v5327_v16 = vpop.eup %5326  ;;  %v2618_v34 = vsel %vm2518_vm1, %v6619_v27, %v4338_v29  ;;  %v4340_v39 = vadd.f32 -1.0, %v5325_v3  ;;  %v2619_v27 = vsel %vm2519_vm2, %v6637_v58, %v4339_v48 }
 0x2a4   : > { %2872 = vst.msk [vmem:[#allocation3 + $0x38] sm:$0xff] %vm838_vm14, %v2852_v14  ;;  %4733 = vmatmul.mubr.msk.bf16.vlgmr.msra.gmra.mrb[12].mxu1 %vm838_vm14, %v2937_v47  ;;  %v2801_v1 = vpop.permute.xlu0 %2800  ;;  %v5329_v4 = vpop.eup %5328  ;;  %v4341_v14 = vadd.f32 -1.0, %v5327_v16 }
 0x2a5   : > { %4769 = vmatpush3.bf16.msra.mxu1 %v5081_v38  ;;  %v2853_v46 = vsel %vm813_vm13, %v2613_v24, %v2801_v1  ;;  %v3473_v50 = vld [vmem:[#allocation3 + $0x1f] sm:$0xff]  ;;  %4736 = vmatprep.mubr.msk.bf16.mxu1 %vm5470_vm9, %v5469_v62  ;;  %v2620_v7 = vsel %vm2520_vm3, %v6612_v41, %v4340_v39  ;;  %v4342_v45 = vadd.f32 -1.0, %v5329_v4 }
 0x2a6   : > { %2873 = vst.msk [vmem:[#allocation3 + $0x40] sm:$0xff] %vm838_vm14, %v2853_v46  ;;  %v3489_v42 = vpack.c.bf16 %v3473_v50, %v3472_v59  ;;  %4770 = vmatprep.subr.bf16.mxu1 %v5469_v62  ;;  %v2621_v58 = vsel %vm2521_vm4, %v6625_v11, %v4341_v14  ;;  %v5086_v39 = vld [vmem:[%s7362_s8 + $0x40] sm:$0xff]   ;;  %v5088_v14 = vld [vmem:[%s7362_s8 + $0x50] sm:$0xff]  }
 0x2a7   : > { %v3474_v36 = vld [vmem:[#allocation3 + $0x27] sm:$0xff]  ;;  %v2622_v59 = vsel %vm2522_vm5, %v6659_v2, %v4342_v45 }
 0x2a8   : > { %4865 = vmatmul.mubr.msk.bf16.vlgmr.msra.gmra.mrb[20].mxu0 %vm838_vm14, %v3489_v42 }
 0x2a9   : > { %v2803_v25 = vpop.permute.xlu1 %2802  ;;  %4868 = vmatprep.mubr.msk.bf16.mxu0 %vm5470_vm9, %v5469_v62  ;;  %4771 = vmatpush3.bf16.msra.mxu1 %v5083_v22  ;;  %v3475_v35 = vld [vmem:[#allocation3 + $0x2f] sm:$0xff] }
 0x2aa   : > { %v2854_v37 = vsel %vm813_vm13, %v2614_v9, %v2803_v25  ;;  %4772 = vmatprep.subr.bf16.mxu1 %v5469_v62  ;;  %v3490_v10 = vpack.c.bf16 %v3475_v35, %v3474_v36  ;;  %v2363_v9 = vadd.f32 %v6461_v63, %v6629_v54  ;;  %v2891_v45 = vld [vmem:[#allocation3 + $0x2e] sm:$0xff] }
 0x2ab   : > { %2874 = vst.msk [vmem:[#allocation3 + $0x48] sm:$0xff] %vm838_vm14, %v2854_v37  ;;  %v3476_v44 = vld [vmem:[#allocation3 + $0x37] sm:$0xff] }
 0x2ac   : > { %4737 = vmatmul.mubr.msk.bf16.gmra.mrb[16].mxu1 %vm838_vm14, %v3489_v42 }
 0x2ad   : > { %4740 = vmatprep.mubr.msk.bf16.mxu1 %vm5470_vm9, %v5469_v62  ;;  %4773 = vmatpush3.bf16.msra.mxu1 %v5084_v61  ;;  %v2805_v21 = vpop.permute.xlu0 %2804  ;;  %v3477_v55 = vld [vmem:[#allocation3 + $0x3f] sm:$0xff]  ;;  %v620_v61 = vmin.f32 %v572_v19, 0.0 }
 0x2ae   : > { %4774 = vmatprep.subr.bf16.mxu1 %v5469_v62  ;;  %v2855_v49 = vsel %vm813_vm13, %v2615_v18, %v2805_v21  ;;  %v3491_v38 = vpack.c.bf16 %v3477_v55, %v3476_v44  ;;  %v2384_v55 = vld [vmem:[%s7356_s2 + $0x98] sm:$0xff]  ;;  %v5087_v44 = vld [vmem:[%s7362_s8 + $0x48] sm:$0xff]  }
 0x2af   : > { %2875 = vst.msk [vmem:[#allocation3 + $0x50] sm:$0xff] %vm838_vm14, %v2855_v49  ;;  %v667_v63 = vmul.f32 1.442695, %v620_v61 }
 0x2b0   : > { %v2807_v57 = vpop.permute.xlu1 %2806  ;;  %4869 = vmatmul.mubr.msk.bf16.gmra.mrb[24].mxu0 %vm838_vm14, %v3490_v10 }
 0x2b1   : > { %v2856_v32 = vsel %vm813_vm13, %v2616_v12, %v2807_v57  ;;  %4872 = vmatprep.mubr.msk.bf16.mxu0 %vm5470_vm9, %v5469_v62  ;;  %4775 = vmatpush3.bf16.msra.mxu1 %v5085_v33  ;;  %5330 = vpow2.f32 %v667_v63  ;;  %v452_v63 = vmin.f32 %v6823_v5, 0.0 }
 0x2b2   : > { %2876 = vst.msk [vmem:[#allocation3 + $0x58] sm:$0xff] %vm838_vm14, %v2856_v32  ;;  %4812 = vmatprep.subr.bf16.mxu1 %v5469_v62  ;;  %v3478_v8 = vld [vmem:[#allocation3 + $0x47] sm:$0xff] }
 0x2b3   : > { %v2809_v31 = vpop.permute.xlu0 %2808 }
 0x2b4   : > { %v2857_v53 = vsel %vm813_vm13, %v2617_v30, %v2809_v31  ;;  %v2811_v56 = vpop.permute.xlu1 %2810  ;;  %4741 = vmatmul.mubr.msk.bf16.gmra.mrb[20].mxu1 %vm838_vm14, %v3490_v10 }
 0x2b5   : > { %2877 = vst.msk [vmem:[#allocation3 + $0x60] sm:$0xff] %vm838_vm14, %v2857_v53  ;;  %v2858_v13 = vsel %vm813_vm13, %v2618_v34, %v2811_v56  ;;  %4744 = vmatprep.mubr.msk.bf16.mxu1 %vm5470_vm9, %v5469_v62  ;;  %v2887_v53 = vld [vmem:[#allocation3 + $0xe] sm:$0xff]  ;;  %v2886_v34 = vld [vmem:[#allocation3 + $0x6] sm:$0xff] }
 0x2b6   : > { %2878 = vst.msk [vmem:[#allocation3 + $0x68] sm:$0xff] %vm838_vm14, %v2858_v13  ;;  %v3479_v41 = vld [vmem:[#allocation3 + $0x4f] sm:$0xff]  ;;  %v2903_v4 = vpack.c.bf16 %v2887_v53, %v2886_v34  ;;  %v3927_v13 = vld [vmem:[%s7357_s3 + $0x18] sm:$0xff] }
 0x2b7   : > { %v2813_v40 = vpop.permute.xlu0 %2812  ;;  %v3492_v11 = vpack.c.bf16 %v3479_v41, %v3478_v8  ;;  %v3925_v56 = vld [vmem:[%s7357_s3 + $0x8] sm:$0xff]  ;;  %v3935_v41 = vld [vmem:[%s7357_s3 + $0x58] sm:$0xff] }
 0x2b8   : > { %v2859_v47 = vsel %vm813_vm13, %v2619_v27, %v2813_v40  ;;  %v2815_v28 = vpop.permute.xlu1 %2814  ;;  %4873 = vmatmul.mubr.msk.bf16.gmra.mrb[28].mxu0 %vm838_vm14, %v3491_v38  ;;  %v3929_v40 = vld [vmem:[%s7357_s3 + $0x28] sm:$0xff]  ;;  %v2888_v27 = vld [vmem:[#allocation3 + $0x16] sm:$0xff] }
 0x2b9   : > { %2879 = vst.msk [vmem:[#allocation3 + $0x70] sm:$0xff] %vm838_vm14, %v2859_v47  ;;  %v2860_v20 = vsel %vm813_vm13, %v2620_v7, %v2815_v28  ;;  %4876 = vmatprep.mubr.msk.bf16.mxu0 %vm5470_vm9, %v5469_v62  ;;  %v3480_v2 = vld [vmem:[#allocation3 + $0x57] sm:$0xff]  ;;  %v2895_v8 = vld [vmem:[#allocation3 + $0x4e] sm:$0xff] }
 0x2ba   : > { %2880 = vst.msk [vmem:[#allocation3 + $0x78] sm:$0xff] %vm838_vm14, %v2860_v20  ;;  %v3931_v7 = vld [vmem:[%s7357_s3 + $0x38] sm:$0xff]  ;;  %v3933_v20 = vld [vmem:[%s7357_s3 + $0x48] sm:$0xff] }
 0x2bb   : > { %v2817_v24 = vpop.permute.xlu0 %2816  ;;  %v5331_v60 = vpop.eup %5330  ;;  %v5089_v28 = vld [vmem:[%s7362_s8 + $0x58] sm:$0xff]  }
 0x2bc   : > { %v2861_v1 = vsel %vm813_vm13, %v2621_v58, %v2817_v24  ;;  %v2819_v46 = vpop.permute.xlu1 %2818  ;;  %4745 = vmatmul.mubr.msk.bf16.gmra.mrb[24].mxu1 %vm838_vm14, %v3491_v38  ;;  %v3481_v22 = vld [vmem:[#allocation3 + $0x5f] sm:$0xff]  ;;  %v4189_v32 = vadd.f32 -1.0, %v5331_v60 }
 0x2bd   : > { %2881 = vst.msk [vmem:[#allocation3 + $0x80] sm:$0xff] %vm838_vm14, %v2861_v1  ;;  %v2862_v50 = vsel %vm813_vm13, %v2622_v59, %v2819_v46  ;;  %4748 = vmatprep.mubr.msk.bf16.mxu1 %vm5470_vm9, %v5469_v62  ;;  %v3493_v42 = vpack.c.bf16 %v3481_v22, %v3480_v2  ;;  %v3482_v23 = vld [vmem:[#allocation3 + $0x67] sm:$0xff]  ;;  %v2889_v38 = vld [vmem:[#allocation3 + $0x1e] sm:$0xff]  ;;  %v2892_v59 = vld [vmem:[#allocation3 + $0x36] sm:$0xff] }
 0x2be   : > { %2882 = vst.msk [vmem:[#allocation3 + $0x88] sm:$0xff] %vm838_vm14, %v2862_v50  ;;  %v716_v16 = vsel %vm596_vm8, %v572_v19, %v4189_v32  ;;  %v2904_v47 = vpack.c.bf16 %v2889_v38, %v2888_v27  ;;  %v2890_v58 = vld [vmem:[#allocation3 + $0x26] sm:$0xff]  ;;  %v2893_v1 = vld [vmem:[#allocation3 + $0x3e] sm:$0xff] }
 0x2bf   : > { %v2905_v24 = vpack.c.bf16 %v2891_v45, %v2890_v58  ;;  %v3937_v46 = vld [vmem:[%s7357_s3 + $0x68] sm:$0xff]  ;;  %v2906_v50 = vpack.c.bf16 %v2893_v1, %v2892_v59  ;;  %v2897_v2 = vld [vmem:[#allocation3 + $0x5e] sm:$0xff] }
 0x2c0   : > { %4877 = vmatmul.mubr.msk.bf16.gmra.mrb[32].mxu0 %vm838_vm14, %v3492_v11  ;;  %v3483_v43 = vld [vmem:[#allocation3 + $0x6f] sm:$0xff] }
 0x2c1   : > { %4880 = vmatprep.mubr.msk.bf16.mxu0 %vm5470_vm9, %v5469_v62  ;;  %v3494_v51 = vpack.c.bf16 %v3483_v43, %v3482_v23  ;;  %v3484_v10 = vld [vmem:[#allocation3 + $0x77] sm:$0xff]  ;;  %v2898_v43 = vld [vmem:[#allocation3 + $0x66] sm:$0xff] }
 0x2c2   : > { %v2900_v61 = vld [vmem:[#allocation3 + $0x76] sm:$0xff] }
 0x2c4   : > { %4749 = vmatmul.mubr.msk.bf16.gmra.mrb[28].mxu1 %vm838_vm14, %v3492_v11  ;;  %v3485_v33 = vld [vmem:[#allocation3 + $0x7f] sm:$0xff] }
 0x2c5   : > { %4752 = vmatprep.mubr.msk.bf16.mxu1 %vm5470_vm9, %v5469_v62  ;;  %v3495_v49 = vpack.c.bf16 %v3485_v33, %v3484_v10  ;;  %v6854_v12 = vld [vmem:[#allocation3 + $0x87] sm:$0xff]  ;;  %v499_v33 = vmul.f32 1.442695, %v452_v63 }
 0x2c6   : > { %v2945_v31 = vpack.c.bf16 %v6854_v12, %v6854_v12  ;;  %v2894_v11 = vld [vmem:[#allocation3 + $0x46] sm:$0xff] }
 0x2c7   : > { %v2907_v22 = vpack.c.bf16 %v2895_v8, %v2894_v11  ;;  %v2902_v23 = vld [vmem:[#allocation3 + $0x86] sm:$0xff] }
 0x2c8   : > { %4881 = vmatmul.mubr.msk.bf16.gmra.mrb[36].mxu0 %vm838_vm14, %v3493_v42 }
 0x2c9   : > { %4884 = vmatprep.mubr.msk.bf16.mxu0 %vm5470_vm9, %v5469_v62 }
 0x2cc   : > { %v2473_v25 = vpop.permute.xlu0 %2472  ;;  %4753 = vmatmul.mubr.msk.bf16.gmra.mrb[32].mxu1 %vm838_vm14, %v3493_v42  ;;  %v2896_v42 = vld [vmem:[#allocation3 + $0x56] sm:$0xff] }
 0x2cd   : > { %v6834_v37 = vmul.f32 %v2473_v25, %v2362_v26  ;;  %v2478_v52 = vpop.permute.xlu1 %2477  ;;  %4756 = vmatprep.mubr.msk.bf16.mxu1 %vm5470_vm9, %v5469_v62  ;;  %v2908_v19 = vpack.c.bf16 %v2897_v2, %v2896_v42  ;;  %v2899_v26 = vld [vmem:[#allocation3 + $0x6e] sm:$0xff]  ;;  %v3928_v42 = vld [vmem:[%s7357_s3 + $0x20] sm:$0xff] }
 0x2ce   : > { %v6838_v35 = vmul.f32 %v2478_v52, %v2363_v9  ;;  %v2909_v25 = vpack.c.bf16 %v2899_v26, %v2898_v43  ;;  %v2901_v9 = vld [vmem:[#allocation3 + $0x7e] sm:$0xff] }
 0x2cf   : > { %v2643_v6 = vsub.f32 0.0, %v6834_v37  ;;  %v2910_v52 = vpack.c.bf16 %v2901_v9, %v2900_v61  ;;  %vm2523_vm10 = vcmp.gt.f32.partialorder %v6834_v37, 0.0  ;;  %v3930_v9 = vld [vmem:[%s7357_s3 + $0x30] sm:$0xff] }
 0x2d0   : > { %4885 = vmatmul.mubr.msk.bf16.gmra.mrb[40].mxu0 %vm838_vm14, %v3494_v51  ;;  %v2644_v0 = vsub.f32 0.0, %v6838_v35  ;;  %vm2524_vm11 = vcmp.gt.f32.partialorder %v6838_v35, 0.0 }
 0x2d1   : > { %4888 = vmatprep.mubr.msk.bf16.mxu0 %vm5470_vm9, %v5469_v62  ;;  %v2683_v54 = vmin.f32 %v2643_v6, 0.0  ;;  %vm2663_vm6 = vcmp.gt.f32.partialorder %v2643_v6, 0.0 }
 0x2d2   : > { %v2684_v36 = vmin.f32 %v2644_v0, 0.0  ;;  %vm2664_vm7 = vcmp.gt.f32.partialorder %v2644_v0, 0.0 }
 0x2d3   : > { %v2720_v21 = vmul.f32 1.442695, %v2683_v54 }
 0x2d4   : > { %4757 = vmatmul.mubr.msk.bf16.gmra.mrb[36].mxu1 %vm838_vm14, %v3494_v51  ;;  %v2722_v18 = vmul.f32 1.442695, %v2684_v36  ;;  %v2911_v51 = vpack.c.bf16 %v2902_v23, %v2902_v23 }
 0x2d5   : > { %4760 = vmatprep.mubr.msk.bf16.mxu1 %vm5470_vm9, %v5469_v62  ;;  %5332 = vpow2.f32 %v2720_v21 }
 0x2d6   : > { %5334 = vpow2.f32 %v2722_v18 }
 0x2d8   : > { %4889 = vmatmul.mubr.msk.bf16.gmra.mrb[44].mxu0 %vm838_vm14, %v3495_v49 }
 0x2d9   : > { %4892 = vmatprep.mubr.msk.bf16.mxu0 %vm5470_vm9, %v5469_v62 }
 0x2dc   : > { %4761 = vmatmul.mubr.msk.bf16.gmra.mrb[40].mxu1 %vm838_vm14, %v3495_v49 }
 0x2dd   : > { %4764 = vmatprep.mubr.msk.bf16.mxu1 %vm5470_vm9, %v5469_v62 }
 0x2df   : > { %v5333_v17 = vpop.eup %5332 }
 0x2e0   : > { %v5335_v57 = vpop.eup %5334  ;;  %v4363_v29 = vadd.f32 -1.0, %v5333_v17 }
 0x2e1   : > { %v4364_v3 = vadd.f32 -1.0, %v5335_v57 }
 0x2e2   : > { %v2763_v30 = vsel %vm2663_vm6, %v2643_v6, %v4363_v29  ;;  %v2543_v6 = vmin.f32 %v6834_v37, 0.0 }
 0x2e3   : > { %2820 = vrot.lane.b32.xlu0 %v2763_v30, %s5467_s25  ;;  %v2764_v48 = vsel %vm2664_vm7, %v2644_v0, %v4364_v3  ;;  %v2544_v0 = vmin.f32 %v6838_v35, 0.0 }
 0x2e4   : > { %2822 = vrot.lane.b32.xlu1 %v2764_v48, %s5467_s25  ;;  %4765 = vmatmul.mubr.msk.bf16.gmra.mrb[44].mxu1 %vm838_vm14, %v2945_v31  ;;  %v2580_v54 = vmul.f32 1.442695, %v2543_v6  ;;  %v5458_v48 = vld [vmem:[%s7361_s7] ss:$0 sm:$0xff] }
 0x2e5   : > { %4776 = vmatprep.mubr.msk.bf16.mxu1 %vm5470_vm9, %v5469_v62  ;;  %v2582_v36 = vmul.f32 1.442695, %v2544_v0  ;;  %v3932_v6 = vld [vmem:[%s7357_s3 + $0x40] sm:$0xff] }
 0x2e6   : > { %5336 = vpow2.f32 %v2580_v54 }
 0x2e7   : > { %2482 = vperm.xlu0 %5053, %v2384_v55   ;;  %5338 = vpow2.f32 %v2582_v36  ;;  %v2364_v55 = vadd.f32 %v5458_v48, %v6643_v15 }
 0x2e8   : > { %787 = vrot.lane.b32.xlu1 %v716_v16, %s5467_s25  ;;  %5340 = vpow2.f32 %v499_v33  ;;  %v3934_v33 = vld [vmem:[%s7357_s3 + $0x50] sm:$0xff] }
 0x2ec   : > { %3948 = vperm.xlu1 %5052, %v3925_v56   ;;  %4777 = vmatmul.mubr.msk.bf16.vlgmr.msra.gmra.mrb[48].mxu1 %vm838_vm14, %v2903_v4 }
 0x2ed   : > { %4813 = vmatpush3.bf16.msra.mxu1 %v5086_v39  ;;  %4780 = vmatprep.mubr.msk.bf16.mxu1 %vm5470_vm9, %v5469_v62 }
 0x2ee   : > { %4814 = vmatprep.subr.bf16.mxu1 %v5469_v62 }
 0x2f0   : > { %3958 = vperm.xlu1 %5052, %v3927_v13   ;;  %v5337_v21 = vpop.eup %5336 }
 0x2f1   : > { %4815 = vmatpush3.bf16.msra.mxu1 %v5087_v44  ;;  %v5339_v18 = vpop.eup %5338  ;;  %v4343_v5 = vadd.f32 -1.0, %v5337_v21 }
 0x2f2   : > { %4816 = vmatprep.subr.bf16.mxu1 %v5469_v62  ;;  %v5341_v10 = vpop.eup %5340  ;;  %v4344_v49 = vadd.f32 -1.0, %v5339_v18 }
 0x2f3   : > { %v2623_v17 = vsel %vm2523_vm10, %v6834_v37, %v4343_v5 }
 0x2f4   : > { %3968 = vperm.xlu1 %5052, %v3929_v40   ;;  %4781 = vmatmul.mubr.msk.bf16.gmra.mrb[52].mxu1 %vm838_vm14, %v2904_v47  ;;  %v2624_v3 = vsel %vm2524_vm11, %v6838_v35, %v4344_v49  ;;  %v3936_v49 = vld [vmem:[%s7357_s3 + $0x60] sm:$0xff] }
 0x2f5   : > { %4784 = vmatprep.mubr.msk.bf16.mxu1 %vm5470_vm9, %v5469_v62  ;;  %4817 = vmatpush3.bf16.msra.mxu1 %v5088_v14 }
 0x2f6   : > { %4818 = vmatprep.subr.bf16.mxu1 %v5469_v62 }
 0x2f8   : > { %3978 = vperm.xlu1 %5052, %v3931_v7  }
 0x2f9   : > { %4819 = vmatpush3.bf16.msra.mxu1 %v5089_v28 }
 0x2fc   : > { %3988 = vperm.xlu1 %5052, %v3933_v20   ;;  %4785 = vmatmul.mubr.msk.bf16.gmra.mrb[56].mxu1 %vm838_vm14, %v2905_v24 }
 0x2fd   : > { %4788 = vmatprep.mubr.msk.bf16.mxu1 %vm5470_vm9, %v5469_v62 }
 0x300   : > { %3998 = vperm.xlu1 %5052, %v3935_v41  }
 0x304   : > { %4008 = vperm.xlu1 %5052, %v3937_v46   ;;  %4789 = vmatmul.mubr.msk.bf16.gmra.mrb[60].mxu1 %vm838_vm14, %v2906_v50 }
 0x305   : > { %4792 = vmatprep.mubr.msk.bf16.mxu1 %vm5470_vm9, %v5469_v62 }
 0x30c   : > { %4793 = vmatmul.mubr.msk.bf16.gmra.mrb[64].mxu1 %vm838_vm14, %v2907_v22 }
 0x30d   : > { %4796 = vmatprep.mubr.msk.bf16.mxu1 %vm5470_vm9, %v5469_v62 }
 0x314   : > { %4797 = vmatmul.mubr.msk.bf16.gmra.mrb[68].mxu1 %vm838_vm14, %v2908_v19 }
 0x315   : > { %4800 = vmatprep.mubr.msk.bf16.mxu1 %vm5470_vm9, %v5469_v62 }
 0x31c   : > { %4801 = vmatmul.mubr.msk.bf16.gmra.mrb[72].mxu1 %vm838_vm14, %v2909_v25 }
 0x31d   : > { %4804 = vmatprep.mubr.msk.bf16.mxu1 %vm5470_vm9, %v5469_v62 }
 0x324   : > { %4805 = vmatmul.mubr.msk.bf16.gmra.mrb[76].mxu1 %vm838_vm14, %v2910_v52 }
 0x325   : > { %4808 = vmatprep.mubr.msk.bf16.mxu1 %vm5470_vm9, %v5469_v62 }
 0x32c   : > { %4809 = vmatmul.mubr.msk.bf16.gmra.mrb[80].mxu1 %vm838_vm14, %v2911_v51 }
 0x32d   : > { %4820 = vmatprep.mubr.msk.bf16.mxu1 %vm5470_vm9, %v5469_v62 }
 0x334   : > { %4821 = vmatmul.mubr.msk.bf16.vlgmr.msra.gmra.mrb[84].mxu1 %vm838_vm14, %v2904_v47 }
 0x335   : > { %4824 = vmatprep.mubr.msk.bf16.mxu1 %vm5470_vm9, %v5469_v62 }
 0x33c   : > { %4825 = vmatmul.mubr.msk.bf16.gmra.mrb[88].mxu1 %vm838_vm14, %v2905_v24  ;;  %v3924_v24 = vld [vmem:[%s7357_s3] sm:$0xff] }
 0x33d   : > { %4828 = vmatprep.mubr.msk.bf16.mxu1 %vm5470_vm9, %v5469_v62 }
 0x344   : > { %4829 = vmatmul.mubr.msk.bf16.gmra.mrb[92].mxu1 %vm838_vm14, %v2906_v50  ;;  %v3926_v50 = vld [vmem:[%s7357_s3 + $0x10] sm:$0xff] }
 0x345   : > { %4832 = vmatprep.mubr.msk.bf16.mxu1 %vm5470_vm9, %v5469_v62 }
 0x34c   : > { %4833 = vmatmul.mubr.msk.bf16.gmra.mrb[96].mxu1 %vm838_vm14, %v2907_v22 }
 0x34d   : > { %4836 = vmatprep.mubr.msk.bf16.mxu1 %vm5470_vm9, %v5469_v62 }
 0x354   : > { %4837 = vmatmul.mubr.msk.bf16.gmra.mrb[100].mxu1 %vm838_vm14, %v2908_v19 }
 0x355   : > { %v2821_v60 = vpop.permute.xlu0 %2820  ;;  %4840 = vmatprep.mubr.msk.bf16.mxu1 %vm5470_vm9, %v5469_v62 }
 0x356   : > { %v2863_v57 = vsel %vm813_vm13, %v2623_v17, %v2821_v60  ;;  %v2823_v29 = vpop.permute.xlu1 %2822 }
 0x357   : > { %2883 = vst.msk [vmem:[#allocation3 + $0x90] sm:$0xff] %vm838_vm14, %v2863_v57  ;;  %v2864_v32 = vsel %vm813_vm13, %v2624_v3, %v2823_v29  ;;  %v3938_v3 = vld [vmem:[%s7357_s3 + $0x70] sm:$0xff] }
 0x358   : > { %2884 = vst.msk [vmem:[#allocation3 + $0x98] sm:$0xff] %vm838_vm14, %v2864_v32 }
 0x35a   : > { %v788_v30 = vpop.permute.xlu1 %787 }
 0x35c   : > { %4841 = vmatmul.mubr.msk.bf16.gmra.mrb[104].mxu1 %vm838_vm14, %v2909_v25 }
 0x35d   : > { %4844 = vmatprep.mubr.msk.bf16.mxu1 %vm5470_vm9, %v5469_v62 }
 0x35e   : > { %v3487_v37 = vld [vmem:[#allocation3 + $0x8f] sm:$0xff] }
 0x35f   : > { %v3496_v31 = vpack.c.bf16 %v3487_v37, %v6854_v12  ;;  %v3488_v35 = vld [vmem:[#allocation3 + $0x97] sm:$0xff]  ;;  %v3280_v56 = vld [vmem:[#allocation3 + $0x8e] sm:$0xff] }
 0x360   : > { %v3497_v12 = vpack.c.bf16 %v3488_v35, %v3488_v35  ;;  %v3289_v39 = vpack.c.bf16 %v3280_v56, %v2902_v23  ;;  %v3281_v13 = vld [vmem:[#allocation3 + $0x96] sm:$0xff] }
 0x361   : > { %4893 = vmatmul.mubr.msk.bf16.gmra.mrb[48].mxu0 %vm838_vm14, %v3496_v31  ;;  %v3290_v44 = vpack.c.bf16 %v3281_v13, %v3281_v13 }
 0x362   : > { %4896 = vmatprep.mubr.msk.bf16.mxu0 %vm5470_vm9, %v5469_v62 }
 0x364   : > { %4845 = vmatmul.mubr.msk.bf16.gmra.mrb[108].mxu1 %vm838_vm14, %v2910_v52 }
 0x365   : > { %4848 = vmatprep.mubr.msk.bf16.mxu1 %vm5470_vm9, %v5469_v62 }
 0x366   : > { %v2483_v16 = vpop.permute.xlu0 %2482 }
 0x367   : > { %v6970_v53 = vmul.f32 %v2483_v16, %v2364_v55 }
 0x369   : > { %4897 = vmatmul.mubr.msk.bf16.gmra.mrb[52].mxu0 %vm838_vm14, %v3497_v12  ;;  %v2645_v34 = vsub.f32 0.0, %v6970_v53 }
 0x36b   : > { %v2685_v4 = vmin.f32 %v2645_v34, 0.0  ;;  %vm2665_vm12 = vcmp.gt.f32.partialorder %v2645_v34, 0.0 }
 0x36c   : > { %4849 = vmatmul.mubr.msk.bf16.gmra.mrb[112].mxu1 %vm838_vm14, %v3289_v39 }
 0x36d   : > { %4852 = vmatprep.mubr.msk.bf16.mxu1 %vm5470_vm9, %v5469_v62  ;;  %v2724_v15 = vmul.f32 1.442695, %v2685_v4 }
 0x36f   : > { %5342 = vpow2.f32 %v2724_v15 }
 0x374   : > { %4853 = vmatmul.mubr.msk.bf16.gmra.mrb[116].mxu1 %vm838_vm14, %v3290_v44 }
 0x377   : > { %v6978_v38 = vpop.f32.mrb[12].mxu1 }
 0x378   : > { %v4734_v40 = vpop.f32.mrb[13].mxu1 }
 0x379   : > { %v5343_v27 = vpop.eup %5342  ;;  %v6980_v14 = vpop.f32.mrb[14].mxu1 }
 0x37a   : > { %v4365_v47 = vadd.f32 -1.0, %v5343_v27  ;;  %v4735_v7 = vpop.f32.mrb[15].mxu1 }
 0x37b   : > { %v6982_v28 = vpop.f32.mrb[20].mxu0 }
 0x37c   : > { %v2765_v45 = vsel %vm2665_vm12, %v2645_v34, %v4365_v47  ;;  %v4866_v20 = vpop.f32.mrb[21].mxu0 }
 0x37d   : > { %2824 = vrot.lane.b32.xlu0 %v2765_v45, %s5467_s25  ;;  %v6985_v58 = vpop.f32.mrb[22].mxu0 }
 0x37e   : > { %v4867_v41 = vpop.f32.mrb[23].mxu0 }
 0x37f   : > { %v6990_v1 = vpop.f32.mrb[16].mxu1 }
 0x380   : > { %v4738_v46 = vpop.f32.mrb[17].mxu1 }
 0x381   : > { %3943 = vperm.xlu0 %5053, %v3924_v24   ;;  %v6992_v59 = vpop.f32.mrb[18].mxu1 }
 0x382   : > { %v4739_v8 = vpop.f32.mrb[19].mxu1 }
 0x383   : > { %v6997_v11 = vpop.f32.mrb[24].mxu0 }
 0x384   : > { %v4870_v22 = vpop.f32.mrb[25].mxu0 }
 0x385   : > { %3953 = vperm.xlu0 %5053, %v3926_v50   ;;  %v6999_v2 = vpop.f32.mrb[26].mxu0 }
 0x386   : > { %v4871_v19 = vpop.f32.mrb[27].mxu0 }
 0x387   : > { %v7004_v26 = vpop.f32.mrb[20].mxu1 }
 0x388   : > { %v4742_v43 = vpop.f32.mrb[21].mxu1 }
 0x389   : > { %3963 = vperm.xlu0 %5053, %v3928_v42   ;;  %v7006_v25 = vpop.f32.mrb[22].mxu1 }
 0x38a   : > { %v4743_v61 = vpop.f32.mrb[23].mxu1 }
 0x38b   : > { %v7011_v52 = vpop.f32.mrb[28].mxu0 }
 0x38c   : > { %v4874_v23 = vpop.f32.mrb[29].mxu0 }
 0x38d   : > { %3973 = vperm.xlu0 %5053, %v3930_v9   ;;  %v7013_v51 = vpop.f32.mrb[30].mxu0 }
 0x38e   : > { %v4875_v0 = vpop.f32.mrb[31].mxu0 }
 0x38f   : > { %v7018_v63 = vpop.f32.mrb[24].mxu1 }
 0x390   : > { %v4746_v54 = vpop.f32.mrb[25].mxu1 }
 0x391   : > { %3983 = vperm.xlu0 %5053, %v3932_v6   ;;  %v7020_v36 = vpop.f32.mrb[26].mxu1 }
 0x392   : > { %v4747_v21 = vpop.f32.mrb[27].mxu1 }
 0x393   : > { %v7025_v18 = vpop.f32.mrb[32].mxu0 }
 0x394   : > { %v4878_v10 = vpop.f32.mrb[33].mxu0 }
 0x395   : > { %3993 = vperm.xlu0 %5053, %v3934_v33   ;;  %v7027_v5 = vpop.f32.mrb[34].mxu0 }
 0x396   : > { %v4879_v60 = vpop.f32.mrb[35].mxu0 }
 0x397   : > { %v7032_v17 = vpop.f32.mrb[28].mxu1 }
 0x398   : > { %v4750_v57 = vpop.f32.mrb[29].mxu1 }
 0x399   : > { %4003 = vperm.xlu0 %5053, %v3936_v49   ;;  %v7034_v29 = vpop.f32.mrb[30].mxu1 }
 0x39a   : > { %v4751_v32 = vpop.f32.mrb[31].mxu1 }
 0x39b   : > { %v7039_v30 = vpop.f32.mrb[36].mxu0 }
 0x39c   : > { %v4882_v37 = vpop.f32.mrb[37].mxu0 }
 0x39d   : > { %4013 = vperm.xlu0 %5053, %v3938_v3   ;;  %v7041_v31 = vpop.f32.mrb[38].mxu0  ;;  %v2545_v37 = vmin.f32 %v6970_v53, 0.0 }
 0x39e   : > { %v4883_v35 = vpop.f32.mrb[39].mxu0 }
 0x39f   : > { %v3080_v48 = vpop.f32.mrb[32].mxu1 }
 0x3a0   : > { %v4754_v55 = vpop.f32.mrb[33].mxu1 }
 0x3a1   : > { %v3083_v16 = vpop.f32.mrb[34].mxu1 }
 0x3a2   : > { %v4755_v12 = vpop.f32.mrb[35].mxu1 }
 0x3a3   : > { %v7043_v56 = vpop.f32.mrb[40].mxu0  ;;  %v2584_v12 = vmul.f32 1.442695, %v2545_v37 }
 0x3a4   : > { %v4886_v34 = vpop.f32.mrb[41].mxu0 }
 0x3a5   : > { %v7045_v39 = vpop.f32.mrb[42].mxu0  ;;  %5344 = vpow2.f32 %v2584_v12 }
 0x3a6   : > { %v4887_v4 = vpop.f32.mrb[43].mxu0 }
 0x3a7   : > { %v7047_v15 = vpop.f32.mrb[36].mxu1 }
 0x3a8   : > { %v4758_v13 = vpop.f32.mrb[37].mxu1 }
 0x3a9   : > { %v7049_v44 = vpop.f32.mrb[38].mxu1 }
 0x3aa   : > { %v4759_v40 = vpop.f32.mrb[39].mxu1 }
 0x3ab   : > { %v7051_v27 = vpop.f32.mrb[44].mxu0 }
 0x3ac   : > { %v4890_v47 = vpop.f32.mrb[45].mxu0 }
 0x3ad   : > { %v7053_v7 = vpop.f32.mrb[46].mxu0 }
 0x3ae   : > { %v4891_v45 = vpop.f32.mrb[47].mxu0 }
 0x3af   : > { %v7055_v20 = vpop.f32.mrb[40].mxu1  ;;  %v5345_v45 = vpop.eup %5344 }
 0x3b0   : > { %v4762_v24 = vpop.f32.mrb[41].mxu1 }
 0x3b1   : > { %v7057_v41 = vpop.f32.mrb[42].mxu1 }
 0x3b2   : > { %v4763_v46 = vpop.f32.mrb[43].mxu1 }
 0x3b7   : > { %v7059_v50 = vpop.f32.mrb[44].mxu1 }
 0x3b8   : > { %v4766_v8 = vpop.f32.mrb[45].mxu1 }
 0x3b9   : > { %v3107_v22 = vpop.f32.mrb[46].mxu1 }
 0x3ba   : > { %v4767_v42 = vpop.f32.mrb[47].mxu1 }
 0x3bf   : > { %v3195_v19 = vpop.f32.mrb[48].mxu1 }
 0x3c0   : > { %v7062_v43 = vadd.f32 %v3195_v19, %v6978_v38  ;;  %v4778_v9 = vpop.f32.mrb[49].mxu1 }
 0x3c1   : > { %v3198_v61 = vpop.f32.mrb[50].mxu1 }
 0x3c2   : > { %v7065_v23 = vadd.f32 %v3198_v61, %v6980_v14  ;;  %v4779_v6 = vpop.f32.mrb[51].mxu1 }
 0x3c7   : > { %v3203_v0 = vpop.f32.mrb[52].mxu1 }
 0x3c8   : > { %v7068_v54 = vadd.f32 %v3203_v0, %v6990_v1  ;;  %v4782_v33 = vpop.f32.mrb[53].mxu1 }
 0x3c9   : > { %v3206_v21 = vpop.f32.mrb[54].mxu1 }
 0x3ca   : > { %v7071_v10 = vadd.f32 %v3206_v21, %v6992_v59  ;;  %v4783_v49 = vpop.f32.mrb[55].mxu1 }
 0x3cf   : > { %v3211_v60 = vpop.f32.mrb[56].mxu1 }
 0x3d0   : > { %v7074_v38 = vadd.f32 %v3211_v60, %v7004_v26  ;;  %v4786_v57 = vpop.f32.mrb[57].mxu1 }
 0x3d1   : > { %v3214_v3 = vpop.f32.mrb[58].mxu1 }
 0x3d2   : > { %v7077_v14 = vadd.f32 %v3214_v3, %v7006_v25  ;;  %v4787_v32 = vpop.f32.mrb[59].mxu1 }
 0x3d7   : > { %v3219_v1 = vpop.f32.mrb[60].mxu1 }
 0x3d8   : > { %v7081_v35 = vadd.f32 %v3219_v1, %v7018_v63  ;;  %v4790_v55 = vpop.f32.mrb[61].mxu1 }
 0x3d9   : > { %v3222_v59 = vpop.f32.mrb[62].mxu1 }
 0x3da   : > { %v7084_v34 = vadd.f32 %v3222_v59, %v7020_v36  ;;  %v4791_v26 = vpop.f32.mrb[63].mxu1 }
 0x3df   : > { %v3227_v4 = vpop.f32.mrb[64].mxu1 }
 0x3e0   : > { %v7087_v25 = vadd.f32 %v3227_v4, %v7032_v17  ;;  %v4794_v13 = vpop.f32.mrb[65].mxu1 }
 0x3e1   : > { %v3230_v40 = vpop.f32.mrb[66].mxu1 }
 0x3e2   : > { %v7090_v53 = vadd.f32 %v3230_v40, %v7034_v29  ;;  %v4795_v63 = vpop.f32.mrb[67].mxu1 }
 0x3e7   : > { %v3235_v47 = vpop.f32.mrb[68].mxu1 }
 0x3e8   : > { %v7092_v24 = vadd.f32 %v3235_v47, %v3080_v48  ;;  %v4798_v46 = vpop.f32.mrb[69].mxu1 }
 0x3e9   : > { %v3238_v36 = vpop.f32.mrb[70].mxu1 }
 0x3ea   : > { %v7094_v8 = vadd.f32 %v3238_v36, %v3083_v16  ;;  %v4799_v22 = vpop.f32.mrb[71].mxu1 }
 0x3ef   : > { %v2825_v17 = vpop.permute.xlu0 %2824  ;;  %v3243_v29 = vpop.f32.mrb[72].mxu1 }
 0x3f0   : > { %v7124_v48 = vadd.f32 %v3243_v29, %v7047_v15  ;;  %v4802_v16 = vpop.f32.mrb[73].mxu1 }
 0x3f1   : > { %v3246_v42 = vpop.f32.mrb[74].mxu1 }
 0x3f2   : > { %v7127_v19 = vadd.f32 %v3246_v42, %v7049_v44  ;;  %v4803_v9 = vpop.f32.mrb[75].mxu1 }
 0x3f7   : > { %v3251_v61 = vpop.f32.mrb[76].mxu1 }
 0x3f8   : > { %v7130_v6 = vadd.f32 %v3251_v61, %v7055_v20  ;;  %v4806_v0 = vpop.f32.mrb[77].mxu1  ;;  %v7142_v20 = vld [vmem:[%s7363_s9] ss:$0 sm:$0xff] }
 0x3f9   : > { %v3254_v33 = vpop.f32.mrb[78].mxu1 }
 0x3fa   : > { %v7133_v21 = vadd.f32 %v3254_v33, %v7057_v41  ;;  %v4807_v62 = vpop.f32.mrb[79].mxu1 }
 0x3ff   : > { %v3259_v49 = vpop.f32.mrb[80].mxu1 }
 0x400   : > { %v7136_v15 = vadd.f32 %v3259_v49, %v7059_v50  ;;  %v4810_v60 = vpop.f32.mrb[81].mxu1 }
 0x401   : > { %v3262_v57 = vpop.f32.mrb[82].mxu1 }
 0x402   : > { %v4811_v3 = vpop.f32.mrb[83].mxu1 }
 0x407   : > { %v3385_v44 = vpop.f32.mrb[84].mxu1 }
 0x408   : > { %v3455_v32 = vadd.f32 %v3385_v44, %v7062_v43  ;;  %v4822_v37 = vpop.f32.mrb[85].mxu1 }
 0x409   : > { %v3388_v1 = vpop.f32.mrb[86].mxu1 }
 0x40a   : > { %v3662_v41 = vadd.f32 %v6982_v28, %v3455_v32  ;;  %v3456_v55 = vadd.f32 %v3388_v1, %v7065_v23  ;;  %v4823_v59 = vpop.f32.mrb[87].mxu1 }
 0x40c   : > { %v7147_v50 = vadd.f32 %v7142_v20, %v3662_v41  ;;  %v3663_v12 = vadd.f32 %v6985_v58, %v3456_v55 }
 0x40e   : > { %v4443_v26 = vmul.f32 -1.442695, %v7147_v50  ;;  %v7152_v43 = vadd.f32 %v7142_v20, %v3663_v12 }
 0x40f   : > { %v3393_v4 = vpop.f32.mrb[88].mxu1 }
 0x410   : > { %5346 = vpow2.f32 %v4443_v26  ;;  %v4444_v13 = vmul.f32 -1.442695, %v7152_v43  ;;  %v3457_v40 = vadd.f32 %v3393_v4, %v7068_v54  ;;  %v4826_v28 = vpop.f32.mrb[89].mxu1 }
 0x411   : > { %v3396_v63 = vpop.f32.mrb[90].mxu1 }
 0x412   : > { %5348 = vpow2.f32 %v4444_v13  ;;  %v3664_v23 = vadd.f32 %v6997_v11, %v3457_v40  ;;  %v3458_v47 = vadd.f32 %v3396_v63, %v7071_v10  ;;  %v4827_v45 = vpop.f32.mrb[91].mxu1 }
 0x414   : > { %v7159_v58 = vadd.f32 %v7142_v20, %v3664_v23  ;;  %v3665_v46 = vadd.f32 %v6999_v2, %v3458_v47 }
 0x416   : > { %v4445_v36 = vmul.f32 -1.442695, %v7159_v58  ;;  %v7164_v22 = vadd.f32 %v7142_v20, %v3665_v46 }
 0x417   : > { %v3401_v17 = vpop.f32.mrb[92].mxu1 }
 0x418   : > { %5350 = vpow2.f32 %v4445_v36  ;;  %v4446_v54 = vmul.f32 -1.442695, %v7164_v22  ;;  %v3459_v29 = vadd.f32 %v3401_v17, %v7074_v38  ;;  %v4830_v11 = vpop.f32.mrb[93].mxu1 }
 0x419   : > { %v3404_v16 = vpop.f32.mrb[94].mxu1 }
 0x41a   : > { %v5347_v10 = vpop.eup %5346  ;;  %5352 = vpow2.f32 %v4446_v54  ;;  %v3666_v42 = vadd.f32 %v7011_v52, %v3459_v29  ;;  %v3460_v9 = vadd.f32 %v3404_v16, %v7077_v14  ;;  %v4831_v2 = vpop.f32.mrb[95].mxu1 }
 0x41b   : > { %v3771_v61 = vadd.f32 1.0, %v5347_v10 }
 0x41c   : > { %v5349_v0 = vpop.eup %5348  ;;  %v7171_v33 = vadd.f32 %v7142_v20, %v3666_v42  ;;  %v3667_v62 = vadd.f32 %v7013_v51, %v3460_v9 }
 0x41d   : > { %5354 = vrcp.f32 %v3771_v61  ;;  %v3772_v49 = vadd.f32 1.0, %v5349_v0 }
 0x41e   : > { %v4447_v38 = vmul.f32 -1.442695, %v7171_v33  ;;  %v7176_v60 = vadd.f32 %v7142_v20, %v3667_v62 }
 0x41f   : > { %5356 = vrcp.f32 %v3772_v49  ;;  %v3409_v57 = vpop.f32.mrb[96].mxu1 }
 0x420   : > { %5358 = vpow2.f32 %v4447_v38  ;;  %v4448_v52 = vmul.f32 -1.442695, %v7176_v60  ;;  %v3461_v14 = vadd.f32 %v3409_v57, %v7081_v35  ;;  %v4834_v3 = vpop.f32.mrb[97].mxu1 }
 0x421   : > { %v3412_v44 = vpop.f32.mrb[98].mxu1 }
 0x422   : > { %v5351_v32 = vpop.eup %5350  ;;  %5360 = vpow2.f32 %v4448_v52  ;;  %v3668_v51 = vadd.f32 %v7025_v18, %v3461_v14  ;;  %v3462_v37 = vadd.f32 %v3412_v44, %v7084_v34  ;;  %v4835_v1 = vpop.f32.mrb[99].mxu1 }
 0x423   : > { %v3773_v41 = vadd.f32 1.0, %v5351_v32 }
 0x424   : > { %v5353_v55 = vpop.eup %5352  ;;  %v7183_v59 = vadd.f32 %v7142_v20, %v3668_v51  ;;  %v3669_v12 = vadd.f32 %v7027_v5, %v3462_v37 }
 0x425   : > { %5362 = vrcp.f32 %v3773_v41  ;;  %v3774_v26 = vadd.f32 1.0, %v5353_v55 }
 0x426   : > { %v4449_v35 = vmul.f32 -1.442695, %v7183_v59  ;;  %v7188_v4 = vadd.f32 %v7142_v20, %v3669_v12 }
 0x427   : > { %v5355_v13 = vpop.eup %5354  ;;  %5364 = vrcp.f32 %v3774_v26  ;;  %v3417_v18 = vpop.f32.mrb[100].mxu1 }
 0x428   : > { %5366 = vpow2.f32 %v4449_v35  ;;  %v4450_v34 = vmul.f32 -1.442695, %v7188_v4  ;;  %v3463_v40 = vadd.f32 %v3417_v18, %v7087_v25  ;;  %v4838_v28 = vpop.f32.mrb[101].mxu1  ;;  %3839 = vrot.lane.b32.xlu1 %v5355_v13, %s5471_s19 }
 0x429   : > { %v5357_v5 = vpop.eup %5356  ;;  %v3420_v63 = vpop.f32.mrb[102].mxu1 }
 0x42a   : > { %v5359_v23 = vpop.eup %5358  ;;  %5368 = vpow2.f32 %v4450_v34  ;;  %v3670_v47 = vadd.f32 %v7039_v30, %v3463_v40  ;;  %v3464_v45 = vadd.f32 %v3420_v63, %v7090_v53  ;;  %v4839_v46 = vpop.f32.mrb[103].mxu1  ;;  %3841 = vrot.lane.b32.xlu0 %v5357_v5, %s5471_s19 }
 0x42b   : > { %v3775_v36 = vadd.f32 1.0, %v5359_v23 }
 0x42c   : > { %v5361_v17 = vpop.eup %5360  ;;  %v7197_v54 = vadd.f32 %v7142_v20, %v3670_v47  ;;  %v3671_v25 = vadd.f32 %v7041_v31, %v3464_v45 }
 0x42d   : > { %5370 = vrcp.f32 %v3775_v36  ;;  %v3776_v29 = vadd.f32 1.0, %v5361_v17 }
 0x42e   : > { %v4451_v11 = vmul.f32 -1.442695, %v7197_v54  ;;  %v7202_v16 = vadd.f32 %v7142_v20, %v3671_v25 }
 0x42f   : > { %v5363_v30 = vpop.eup %5362  ;;  %5372 = vrcp.f32 %v3776_v29  ;;  %v3425_v53 = vpop.f32.mrb[104].mxu1 }
 0x430   : > { %5374 = vpow2.f32 %v4451_v11  ;;  %v4452_v10 = vmul.f32 -1.442695, %v7202_v16  ;;  %v3465_v42 = vadd.f32 %v3425_v53, %v7092_v24  ;;  %v4842_v9 = vpop.f32.mrb[105].mxu1  ;;  %3843 = vrot.lane.b32.xlu1 %v5363_v30, %s5471_s19 }
 0x431   : > { %v5365_v2 = vpop.eup %5364  ;;  %v3428_v31 = vpop.f32.mrb[106].mxu1 }
 0x432   : > { %v5367_v61 = vpop.eup %5366  ;;  %5376 = vpow2.f32 %v4452_v10  ;;  %v3672_v0 = vadd.f32 %v7043_v56, %v3465_v42  ;;  %v3466_v62 = vadd.f32 %v3428_v31, %v7094_v8  ;;  %v4843_v49 = vpop.f32.mrb[107].mxu1  ;;  %3845 = vrot.lane.b32.xlu0 %v5365_v2, %s5471_s19 }
 0x433   : > { %v3777_v38 = vadd.f32 1.0, %v5367_v61 }
 0x434   : > { %v5369_v57 = vpop.eup %5368  ;;  %v7211_v52 = vadd.f32 %v7142_v20, %v3672_v0  ;;  %v3648_v24 = vpop.f32.mrb[48].mxu0  ;;  %v3673_v14 = vadd.f32 %v7045_v39, %v3466_v62 }
 0x435   : > { %5378 = vrcp.f32 %v3777_v38  ;;  %v3778_v3 = vadd.f32 1.0, %v5369_v57  ;;  %v4894_v44 = vpop.f32.mrb[49].mxu0 }
 0x436   : > { %v4453_v32 = vmul.f32 -1.442695, %v7211_v52  ;;  %v7216_v56 = vadd.f32 %v7142_v20, %v3673_v14  ;;  %v3651_v8 = vpop.f32.mrb[50].mxu0 }
 0x437   : > { %v5371_v51 = vpop.eup %5370  ;;  %5380 = vrcp.f32 %v3778_v3  ;;  %v4895_v37 = vpop.f32.mrb[51].mxu0 }
 0x438   : > { %v3433_v1 = vpop.f32.mrb[108].mxu1  ;;  %5382 = vpow2.f32 %v4453_v32  ;;  %v4454_v41 = vmul.f32 -1.442695, %v7216_v56  ;;  %3847 = vrot.lane.b32.xlu1 %v5371_v51, %s5471_s19 }
 0x439   : > { %v3467_v55 = vadd.f32 %v3433_v1, %v7124_v48  ;;  %v4846_v12 = vpop.f32.mrb[109].mxu1  ;;  %v5373_v39 = vpop.eup %5372 }
 0x43a   : > { %v3436_v26 = vpop.f32.mrb[110].mxu1  ;;  %v5375_v35 = vpop.eup %5374  ;;  %5384 = vpow2.f32 %v4454_v41  ;;  %3849 = vrot.lane.b32.xlu0 %v5373_v39, %s5471_s19 }
 0x43b   : > { %v3674_v13 = vadd.f32 %v7051_v27, %v3467_v55  ;;  %v3468_v18 = vadd.f32 %v3436_v26, %v7127_v19  ;;  %v4847_v34 = vpop.f32.mrb[111].mxu1  ;;  %v3779_v40 = vadd.f32 1.0, %v5375_v35 }
 0x43c   : > { %v5377_v28 = vpop.eup %5376  ;;  %v3656_v48 = vpop.f32.mrb[52].mxu0 }
 0x43d   : > { %v7225_v5 = vadd.f32 %v7142_v20, %v3674_v13  ;;  %v3675_v63 = vadd.f32 %v7053_v7, %v3468_v18  ;;  %5386 = vrcp.f32 %v3779_v40  ;;  %v3780_v23 = vadd.f32 1.0, %v5377_v28  ;;  %v4898_v47 = vpop.f32.mrb[53].mxu0 }
 0x43e   : > { %v3659_v19 = vpop.f32.mrb[54].mxu0 }
 0x43f   : > { %v4455_v45 = vmul.f32 -1.442695, %v7225_v5  ;;  %v7230_v27 = vadd.f32 %v7142_v20, %v3675_v63  ;;  %v5379_v46 = vpop.eup %5378  ;;  %5388 = vrcp.f32 %v3780_v23  ;;  %v4899_v36 = vpop.f32.mrb[55].mxu0  ;;  %v3940_v23 = vld [vmem:[%s7357_s3 + $0x80] sm:$0xff] }
 0x440   : > { %v3441_v17 = vpop.f32.mrb[112].mxu1  ;;  %3851 = vrot.lane.b32.xlu1 %v5379_v46, %s5471_s19  ;;  %v3944_v19 = vpop.permute.xlu0 %3943 }
 0x441   : > { %5390 = vpow2.f32 %v4455_v45  ;;  %v4456_v25 = vmul.f32 -1.442695, %v7230_v27  ;;  %v3469_v29 = vadd.f32 %v3441_v17, %v7130_v6  ;;  %v4850_v7 = vpop.f32.mrb[113].mxu1  ;;  %v5381_v11 = vpop.eup %5380  ;;  %v3939_v45 = vld [vmem:[%s7357_s3 + $0x78] sm:$0xff] }
 0x442   : > { %v3444_v30 = vpop.f32.mrb[114].mxu1  ;;  %v5383_v53 = vpop.eup %5382  ;;  %3853 = vrot.lane.b32.xlu0 %v5381_v11, %s5471_s19 }
 0x443   : > { %5392 = vpow2.f32 %v4456_v25  ;;  %v3676_v10 = vadd.f32 %v3648_v24, %v3469_v29  ;;  %v3470_v42 = vadd.f32 %v3444_v30, %v7133_v21  ;;  %v4851_v9 = vpop.f32.mrb[115].mxu1  ;;  %v3781_v2 = vadd.f32 1.0, %v5383_v53  ;;  %v3949_v46 = vpop.permute.xlu1 %3948 }
 0x444   : > { %v5385_v31 = vpop.eup %5384  ;;  %v3954_v36 = vpop.permute.xlu0 %3953 }
 0x445   : > { %v7238_v61 = vadd.f32 %v7142_v20, %v3676_v10  ;;  %v3677_v0 = vadd.f32 %v3651_v8, %v3470_v42  ;;  %5394 = vrcp.f32 %v3781_v2  ;;  %v3782_v6 = vadd.f32 1.0, %v5385_v31 }
 0x447   : > { %v4457_v62 = vmul.f32 -1.442695, %v7238_v61  ;;  %v7242_v49 = vadd.f32 %v7142_v20, %v3677_v0  ;;  %v5387_v38 = vpop.eup %5386  ;;  %5396 = vrcp.f32 %v3782_v6  ;;  %v3449_v57 = vpop.f32.mrb[116].mxu1  ;;  %v3703_v0 = vld [vmem:[%s5541_s18 + $0x20] sm:$0xff] }
 0x448   : > { %v3471_v24 = vadd.f32 %v3449_v57, %v7136_v15  ;;  %3855 = vrot.lane.b32.xlu1 %v5387_v38, %s5471_s19  ;;  %v4854_v14 = vpop.f32.mrb[117].mxu1  ;;  %v3959_v17 = vpop.permute.xlu1 %3958  ;;  %v3704_v38 = vld [vmem:[%s5541_s18 + $0x28] sm:$0xff] }
 0x449   : > { %5398 = vpow2.f32 %v4457_v62  ;;  %v4458_v21 = vmul.f32 -1.442695, %v7242_v49  ;;  %v5389_v3 = vpop.eup %5388  ;;  %v3452_v44 = vpop.f32.mrb[118].mxu1 }
 0x44a   : > { %v3678_v8 = vadd.f32 %v3656_v48, %v3471_v24  ;;  %3857 = vrot.lane.b32.xlu0 %v5389_v3, %s5471_s19  ;;  %v4855_v51 = vpop.f32.mrb[119].mxu1  ;;  %v3964_v25 = vpop.permute.xlu0 %3963 }
 0x44b   : > { %v5391_v32 = vpop.eup %5390  ;;  %5400 = vpow2.f32 %v4458_v21  ;;  %v3706_v51 = vld [vmem:[%s5541_s18 + $0x38] sm:$0xff] }
 0x44c   : > { %v3783_v37 = vadd.f32 1.0, %v5391_v32  ;;  %v7249_v41 = vadd.f32 %v7142_v20, %v3678_v8  ;;  %v3969_v29 = vpop.permute.xlu1 %3968  ;;  %v3705_v32 = vld [vmem:[%s5541_s18 + $0x30] sm:$0xff] }
 0x44d   : > { %v5393_v1 = vpop.eup %5392 }
 0x44e   : > { %5402 = vrcp.f32 %v3783_v37  ;;  %v3784_v55 = vadd.f32 1.0, %v5393_v1  ;;  %v4459_v15 = vmul.f32 -1.442695, %v7249_v41  ;;  %v3974_v7 = vpop.permute.xlu0 %3973 }
 0x44f   : > { %v5395_v12 = vpop.eup %5394 }
 0x450   : > { %5404 = vrcp.f32 %v3784_v55  ;;  %3859 = vrot.lane.b32.xlu1 %v5395_v12, %s5471_s19  ;;  %v3979_v11 = vpop.permute.xlu1 %3978 }
 0x451   : > { %5406 = vpow2.f32 %v4459_v15  ;;  %v5397_v39 = vpop.eup %5396 }
 0x452   : > { %3861 = vrot.lane.b32.xlu0 %v5397_v39, %s5471_s19  ;;  %v3984_v30 = vpop.permute.xlu0 %3983  ;;  %v3707_v39 = vld [vmem:[%s5541_s18 + $0x40] sm:$0xff] }
 0x453   : > { %v5399_v26 = vpop.eup %5398 }
 0x454   : > { %v3785_v35 = vadd.f32 1.0, %v5399_v26  ;;  %v7265_v53 = vpop.permute.xlu1 %3988 }
 0x455   : > { %v5401_v13 = vpop.eup %5400 }
 0x456   : > { %5408 = vrcp.f32 %v3785_v35  ;;  %v3786_v18 = vadd.f32 1.0, %v5401_v13  ;;  %v7267_v10 = vpop.permute.xlu0 %3993  ;;  %v3708_v35 = vld [vmem:[%s5541_s18 + $0x48] sm:$0xff] }
 0x458   : > { %v5403_v34 = vpop.eup %5402  ;;  %5410 = vrcp.f32 %v3786_v18  ;;  %v7269_v42 = vpop.permute.xlu1 %3998 }
 0x459   : > { %3863 = vrot.lane.b32.xlu1 %v5403_v34, %s5471_s19 }
 0x45a   : > { %v5405_v20 = vpop.eup %5404  ;;  %v7271_v9 = vpop.permute.xlu0 %4003 }
 0x45b   : > { %v5407_v40 = vpop.eup %5406  ;;  %3865 = vrot.lane.b32.xlu0 %v5405_v20, %s5471_s19 }
 0x45c   : > { %v3787_v28 = vadd.f32 1.0, %v5407_v40  ;;  %v7273_v2 = vpop.permute.xlu1 %4008 }
 0x45e   : > { %5412 = vrcp.f32 %v3787_v28  ;;  %v7275_v31 = vpop.permute.xlu0 %4013  ;;  %v3709_v28 = vld [vmem:[%s5541_s18 + $0x50] sm:$0xff] }
 0x460   : > { %v5409_v48 = vpop.eup %5408 }
 0x461   : > { %3867 = vrot.lane.b32.xlu1 %v5409_v48, %s5471_s19 }
 0x462   : > { %v5411_v63 = vpop.eup %5410 }
 0x463   : > { %3869 = vrot.lane.b32.xlu0 %v5411_v63, %s5471_s19  ;;  %v3710_v63 = vld [vmem:[%s5541_s18 + $0x58] sm:$0xff] }
 0x467   : > { %4023 = vperm.xlu0 %5053, %v3940_v23  }
 0x468   : > { %v5413_v47 = vpop.eup %5412 }
 0x469   : > { %3871 = vrot.lane.b32.xlu1 %v5413_v47, %s5471_s19 }
 0x46d   : > { %4018 = vperm.xlu1 %5052, %v3939_v45  }
 0x49a   : > { %v3840_v6 = vpop.permute.xlu1 %3839 }
 0x49b   : > { %v3890_v62 = vmul.f32 %v3840_v6, %v7147_v50 }
 0x49c   : > { %v3842_v57 = vpop.permute.xlu0 %3841 }
 0x49d   : > { %v3907_v21 = vadd.f32 %v3890_v62, %v3703_v0  ;;  %v3891_v24 = vmul.f32 %v3842_v57, %v7152_v43  ;;  %v3713_v62 = vld [vmem:[%s5541_s18 + $0x70] sm:$0xff]  ;;  %v3714_v57 = vld [vmem:[%s5541_s18 + $0x78] sm:$0xff] }
 0x49f   : > { %v4026_v14 = vmul.f32 %v3944_v19, %v3907_v21  ;;  %v3908_v3 = vadd.f32 %v3891_v24, %v3704_v38 }
 0x4a1   : > { %4047 = vst.msk [vmem:[%s7100_s16 + $0x20] sm:$0xff] %vm813_vm13, %v4026_v14  ;;  %v4027_v44 = vmul.f32 %v3949_v46, %v3908_v3  ;;  %v3715_v3 = vld [vmem:[%s5541_s18 + $0x80] sm:$0xff] }
 0x4a2   : > { %v3844_v8 = vpop.permute.xlu1 %3843 }
 0x4a3   : > { %4048 = vst.msk [vmem:[%s7100_s16 + $0x28] sm:$0xff] %vm813_vm13, %v4027_v44  ;;  %v3892_v50 = vmul.f32 %v3844_v8, %v7159_v58 }
 0x4a4   : > { %v3846_v37 = vpop.permute.xlu0 %3845 }
 0x4a5   : > { %v3909_v1 = vadd.f32 %v3892_v50, %v3705_v32  ;;  %v3893_v43 = vmul.f32 %v3846_v37, %v7164_v22  ;;  %v3716_v32 = vld [vmem:[%s5541_s18 + $0x88] sm:$0xff]  ;;  %v3717_v37 = vld [vmem:[%s5541_s18 + $0x90] sm:$0xff] }
 0x4a7   : > { %v4028_v55 = vmul.f32 %v3954_v36, %v3909_v1  ;;  %v3910_v15 = vadd.f32 %v3893_v43, %v3706_v51  ;;  %v3711_v36 = vld [vmem:[%s5541_s18 + $0x60] sm:$0xff] }
 0x4a9   : > { %4049 = vst.msk [vmem:[%s7100_s16 + $0x30] sm:$0xff] %vm813_vm13, %v4028_v55  ;;  %v4029_v12 = vmul.f32 %v3959_v17, %v3910_v15 }
 0x4aa   : > { %v3848_v26 = vpop.permute.xlu1 %3847 }
 0x4ab   : > { %4050 = vst.msk [vmem:[%s7100_s16 + $0x38] sm:$0xff] %vm813_vm13, %v4029_v12  ;;  %v3894_v58 = vmul.f32 %v3848_v26, %v7171_v33  ;;  %v3719_v12 = vld [vmem:[%s5541_s18 + $0xa0] sm:$0xff] }
 0x4ac   : > { %v3850_v13 = vpop.permute.xlu0 %3849 }
 0x4ad   : > { %v3911_v18 = vadd.f32 %v3894_v58, %v3707_v39  ;;  %v3895_v22 = vmul.f32 %v3850_v13, %v7176_v60 }
 0x4af   : > { %v4030_v34 = vmul.f32 %v3964_v25, %v3911_v18  ;;  %v3912_v20 = vadd.f32 %v3895_v22, %v3708_v35  ;;  %v3712_v25 = vld [vmem:[%s5541_s18 + $0x68] sm:$0xff]  ;;  %v3718_v35 = vld [vmem:[%s5541_s18 + $0x98] sm:$0xff] }
 0x4b1   : > { %4051 = vst.msk [vmem:[%s7100_s16 + $0x40] sm:$0xff] %vm813_vm13, %v4030_v34  ;;  %v4031_v40 = vmul.f32 %v3969_v29, %v3912_v20 }
 0x4b2   : > { %v3852_v48 = vpop.permute.xlu1 %3851 }
 0x4b3   : > { %4052 = vst.msk [vmem:[%s7100_s16 + $0x48] sm:$0xff] %vm813_vm13, %v4031_v40  ;;  %v3896_v33 = vmul.f32 %v3852_v48, %v7183_v59 }
 0x4b4   : > { %v3854_v23 = vpop.permute.xlu0 %3853 }
 0x4b5   : > { %v3913_v47 = vadd.f32 %v3896_v33, %v3709_v28  ;;  %v3897_v60 = vmul.f32 %v3854_v23, %v7188_v4 }
 0x4b7   : > { %v4032_v45 = vmul.f32 %v3974_v7, %v3913_v47  ;;  %v3914_v19 = vadd.f32 %v3897_v60, %v3710_v63 }
 0x4b9   : > { %4053 = vst.msk [vmem:[%s7100_s16 + $0x50] sm:$0xff] %vm813_vm13, %v4032_v45  ;;  %v4033_v46 = vmul.f32 %v3979_v11, %v3914_v19 }
 0x4ba   : > { %v3856_v17 = vpop.permute.xlu1 %3855 }
 0x4bb   : > { %4054 = vst.msk [vmem:[%s7100_s16 + $0x58] sm:$0xff] %vm813_vm13, %v4033_v46  ;;  %v3898_v59 = vmul.f32 %v3856_v17, %v7197_v54 }
 0x4bc   : > { %v3858_v29 = vpop.permute.xlu0 %3857 }
 0x4bd   : > { %v3915_v0 = vadd.f32 %v3898_v59, %v3711_v36  ;;  %v3899_v4 = vmul.f32 %v3858_v29, %v7202_v16 }
 0x4bf   : > { %v4034_v7 = vmul.f32 %v3984_v30, %v3915_v0  ;;  %v3916_v6 = vadd.f32 %v3899_v4, %v3712_v25 }
 0x4c1   : > { %4055 = vst.msk [vmem:[%s7100_s16 + $0x60] sm:$0xff] %vm813_vm13, %v4034_v7  ;;  %v4035_v11 = vmul.f32 %v7265_v53, %v3916_v6 }
 0x4c2   : > { %v3860_v38 = vpop.permute.xlu1 %3859 }
 0x4c3   : > { %4056 = vst.msk [vmem:[%s7100_s16 + $0x68] sm:$0xff] %vm813_vm13, %v4035_v11  ;;  %v3900_v54 = vmul.f32 %v3860_v38, %v7211_v52 }
 0x4c4   : > { %v3862_v21 = vpop.permute.xlu0 %3861 }
 0x4c5   : > { %v3917_v24 = vadd.f32 %v3900_v54, %v3713_v62  ;;  %v3901_v16 = vmul.f32 %v3862_v21, %v7216_v56 }
 0x4c7   : > { %v4036_v30 = vmul.f32 %v7267_v10, %v3917_v24  ;;  %v3918_v14 = vadd.f32 %v3901_v16, %v3714_v57 }
 0x4c9   : > { %4057 = vst.msk [vmem:[%s7100_s16 + $0x70] sm:$0xff] %vm813_vm13, %v4036_v30  ;;  %v4037_v53 = vmul.f32 %v7269_v42, %v3918_v14 }
 0x4cb   : > { %v3864_v44 = vpop.permute.xlu1 %3863  ;;  %4058 = vst.msk [vmem:[%s7100_s16 + $0x78] sm:$0xff] %vm813_vm13, %v4037_v53 }
 0x4cc   : > { %v3902_v52 = vmul.f32 %v3864_v44, %v7225_v5 }
 0x4cd   : > { %v3866_v8 = vpop.permute.xlu0 %3865 }
 0x4ce   : > { %v3919_v50 = vadd.f32 %v3902_v52, %v3715_v3  ;;  %v3903_v56 = vmul.f32 %v3866_v8, %v7230_v27 }
 0x4d0   : > { %v4038_v10 = vmul.f32 %v7271_v9, %v3919_v50  ;;  %v3920_v51 = vadd.f32 %v3903_v56, %v3716_v32 }
 0x4d2   : > { %4059 = vst.msk [vmem:[%s7100_s16 + $0x80] sm:$0xff] %vm813_vm13, %v4038_v10  ;;  %v4039_v42 = vmul.f32 %v7273_v2, %v3920_v51 }
 0x4d3   : > { %v3868_v1 = vpop.permute.xlu1 %3867 }
 0x4d4   : > { %4060 = vst.msk [vmem:[%s7100_s16 + $0x88] sm:$0xff] %vm813_vm13, %v4039_v42  ;;  %v3904_v5 = vmul.f32 %v3868_v1, %v7238_v61 }
 0x4d5   : > { %v3870_v15 = vpop.permute.xlu0 %3869 }
 0x4d6   : > { %v3921_v43 = vadd.f32 %v3904_v5, %v3717_v37  ;;  %v3905_v26 = vmul.f32 %v3870_v15, %v7242_v49 }
 0x4d8   : > { %v4040_v55 = vmul.f32 %v7275_v31, %v3921_v43  ;;  %v3922_v61 = vadd.f32 %v3905_v26, %v3718_v35 }
 0x4da   : > { %4061 = vst.msk [vmem:[%s7100_s16 + $0x90] sm:$0xff] %vm813_vm13, %v4040_v55 }
 0x4db   : > { %v3872_v27 = vpop.permute.xlu1 %3871 }
 0x4dc   : > { %v3906_v9 = vmul.f32 %v3872_v27, %v7249_v41 }
 0x4de   : > { %v3923_v2 = vadd.f32 %v3906_v9, %v3719_v12 }
 0x4e6   : > { %v4024_v39 = vpop.permute.xlu0 %4023 }
 0x4e7   : > { %v4042_v58 = vmul.f32 %v4024_v39, %v3923_v2 }
 0x4e9   : > { %4063 = vst.msk [vmem:[%s7100_s16 + $0xa0] sm:$0xff] %vm813_vm13, %v4042_v58 }
 0x4ec   : > { %v4019_v13 = vpop.permute.xlu1 %4018 }
 0x4ed   : > { %v4041_v18 = vmul.f32 %v4019_v13, %v3922_v61 }
 0x4ef   : > { %4062 = vst.msk [vmem:[%s7100_s16 + $0x98] sm:$0xff] %vm813_vm13, %v4041_v18 }
 0x4f0 PF: > { %s20_s13 = sadd.s32 1, %s5465_s13  }
 0x4f1   : > { %p17_p4 = scmp.ge.s32.totalorder %s20_s13, 4  }
 0x4f3   :  { %19 = sbr.rel (!%p17_p4) target bundleno = 1 (0x1), region = 99 }

// kernel: pixelcnn_layer_up.4
= control target key start
LH: loop header
LB: loop body
LE: loop exit
PB: predicated region body
PF: predicated region fallthrough
CT: control target
= control target key end

     0   :  { %s5696_s24 = smov 0   ;;  %s7568_s0 = inlined_call_operand.vmem [shape: f32[2,192,32], index: 0, kind: input, shape index: {}]   ;;  %s7569_s1 = inlined_call_operand.vmem [shape: f32[160,1], index: 1, kind: input, shape index: {}]   ;;  %s7570_s2 = inlined_call_operand.vmem [shape: f32[136,1], index: 2, kind: input, shape index: {}]   ;;  %s7571_s3 = inlined_call_operand.vmem [shape: bf16[6,64,32], index: 3, kind: input, shape index: {}]   ;;  %s7572_s4 = inlined_call_operand.vmem [shape: f32[1,32], index: 4, kind: input, shape index: {}]   ;;  %s7573_s5 = inlined_call_operand.vmem [shape: bf16[6,64,64], index: 5, kind: input, shape index: {}]   ;;  %s7574_s6 = inlined_call_operand.vmem [shape: f32[1,64], index: 6, kind: input, shape index: {}]   ;;  %s7575_s7 = inlined_call_operand.vmem [shape: f32[2,192,32], index: 7, kind: output, shape index: {}]  }
   0x1 LB: > { %s4275_s25 = sadd.s32 4294967295, %s5649_s24   ;;  %p4279_p0 = scmp.ge.s32.totalorder %s5649_s24, 1  ;;  %s5649_s24 = sphi %s5696_s24, %s17_s24  }
   0x2   : > { %p237_p1 = scmp.lt.s32.totalorder %s5649_s24, 3 }
   0x4   : > { %p238_p2 = pnand %p4279_p0, %p237_p1 }
   0x5   : > { %p269_p3 = scmp.lt.s32.totalorder (!%p238_p2), %s4275_s25, 1  ;;  %v5351_v41 = vld [vmem:[%s7571_s3 + $0x20] sm:$0xff] (!%p238_p2)   ;;  %v5352_v51 = vld [vmem:[%s7571_s3 + $0x28] sm:$0xff] (!%p238_p2)   ;;  %s5651_s13 = smov (!%p238_p2), 32  }
   0x6   : > { %241 = sbr.rel (%p238_p2) target bundleno = 1455 (0x5af), region = 48  ;;  %4795 = vmatprep.subr.bf16.mxu0 (!%p238_p2), %v5351_v41  ;;  %s5655_s16 = smov (!%p238_p2), 96  }
   0x7   : > { %4796 = vmatpush3.bf16.msra.mxu0 (!%p238_p2), %v5351_v41 }
   0x8   : > { %4797 = vmatprep.subr.bf16.mxu0 (!%p238_p2), %v5352_v51 }
   0xb   : > { %4798 = vmatpush3.bf16.msra.mxu0 (!%p238_p2), %v5352_v51 }
   0xd   : > { %s7577_s25 = smov (!%p269_p3, %s4275_s25), 1 }
   0xe   : > { %s5335_s26 = smul.u32 192, %s7577_s25 }
  0x10   : > { %s5712_s29 = scalar_lea.vmem %s7568_s0, %s5335_s26  ;;  %s7320_s15 = scalar_lea.vmem %s7575_s7, %s5335_s26 }
  0x11   : > { %v5715_v0 = vld [vmem:[%s5712_s29 + $0x10] sm:$0xff]  ;;  %v5718_v1 = vld [vmem:[%s5712_s29] sm:$0xff]  ;;  %v5721_v2 = vld [vmem:[%s5712_s29 + $0x18] sm:$0xff] }
  0x12   : > { %v5724_v3 = vsub.f32 0.0, %v5715_v0  ;;  %v5727_v4 = vsub.f32 0.0, %v5718_v1  ;;  %v5730_v5 = vsub.f32 0.0, %v5721_v2  ;;  %v5733_v6 = vld [vmem:[%s5712_s29 + $0x8] sm:$0xff]  ;;  %v5739_v8 = vld [vmem:[%s5712_s29 + $0x20] sm:$0xff]  ;;  %v5755_v16 = vld [vmem:[%s5712_s29 + $0x38] sm:$0xff] }
  0x13   : > { %v5736_v7 = vld [vmem:[%s5712_s29 + $0x28] sm:$0xff]  ;;  %v5742_v9 = vsub.f32 0.0, %v5733_v6  ;;  %v5748_v11 = vsub.f32 0.0, %v5739_v8  ;;  %v5758_v17 = vld [vmem:[%s5712_s29 + $0x30] sm:$0xff]  ;;  %v5765_v22 = vld [vmem:[%s5712_s29 + $0x40] sm:$0xff]  ;;  %v5769_v27 = vsub.f32 0.0, %v5755_v16 }
  0x14   : > { %v5745_v10 = vsub.f32 0.0, %v5736_v7  ;;  %v498_v12 = vmin.f32 %v5724_v3, 0.0  ;;  %v496_v13 = vmin.f32 %v5727_v4, 0.0  ;;  %v499_v14 = vmin.f32 %v5730_v5, 0.0  ;;  %v5761_v18 = vld [vmem:[%s5712_s29 + $0x48] sm:$0xff]  ;;  %v5782_v33 = vld [vmem:[%s5712_s29 + $0x58] sm:$0xff] }
  0x15   : > { %v497_v15 = vmin.f32 %v5742_v9, 0.0  ;;  %v500_v25 = vmin.f32 %v5748_v11, 0.0  ;;  %v5772_v28 = vsub.f32 0.0, %v5758_v17  ;;  %v5775_v30 = vsub.f32 0.0, %v5761_v18  ;;  %v5787_v36 = vld [vmem:[%s5712_s29 + $0x50] sm:$0xff]  ;;  %v5790_v37 = vld [vmem:[%s5712_s29 + $0x68] sm:$0xff] }
  0x16   : > { %v524_v19 = vmul.f32 1.442695, %v498_v12  ;;  %v520_v20 = vmul.f32 1.442695, %v496_v13  ;;  %v501_v21 = vmin.f32 %v5745_v10, 0.0  ;;  %v5778_v31 = vsub.f32 0.0, %v5765_v22 }
  0x17   : > { %v526_v23 = vmul.f32 1.442695, %v499_v14  ;;  %v522_v24 = vmul.f32 1.442695, %v497_v15  ;;  %v528_v29 = vmul.f32 1.442695, %v500_v25 }
  0x18   : > { %5399 = vpow2.f32 %v524_v19  ;;  %v530_v26 = vmul.f32 1.442695, %v501_v21  ;;  %v503_v32 = vmin.f32 %v5769_v27, 0.0  ;;  %v502_v34 = vmin.f32 %v5772_v28, 0.0  ;;  %v5794_v40 = vld [vmem:[%s5712_s29 + $0x60] sm:$0xff]  ;;  %v5813_v50 = vld [vmem:[%s5712_s29 + $0x78] sm:$0xff] }
  0x19   : > { %5401 = vpow2.f32 %v520_v20  ;;  %v505_v35 = vmin.f32 %v5775_v30, 0.0  ;;  %v504_v39 = vmin.f32 %v5778_v31, 0.0  ;;  %v5800_v44 = vsub.f32 0.0, %v5782_v33  ;;  %v5822_v53 = vld [vmem:[%s5712_s29 + $0x70] sm:$0xff]  ;;  %v5826_v56 = vld [vmem:[%s5712_s29 + $0x88] sm:$0xff] }
  0x1a   : > { %5403 = vpow2.f32 %v526_v23  ;;  %v534_v38 = vmul.f32 1.442695, %v503_v32  ;;  %v532_v42 = vmul.f32 1.442695, %v502_v34  ;;  %v5803_v46 = vsub.f32 0.0, %v5787_v36  ;;  %v5353_v12 = vld [vmem:[%s7571_s3 + $0x30] sm:$0xff]  }
  0x1b   : > { %5405 = vpow2.f32 %v522_v24  ;;  %v538_v43 = vmul.f32 1.442695, %v505_v35  ;;  %v536_v45 = vmul.f32 1.442695, %v504_v39  ;;  %v5806_v47 = vsub.f32 0.0, %v5790_v37  ;;  %4799 = vmatprep.subr.bf16.mxu0 %v5353_v12  ;;  %v5858_v39 = vld [vmem:[%s5712_s29 + $0x80] sm:$0xff] }
  0x1c   : > { %5407 = vpow2.f32 %v530_v26  ;;  %v507_v48 = vmin.f32 %v5800_v44, 0.0  ;;  %v5810_v49 = vsub.f32 0.0, %v5794_v40  ;;  %vm474_vm0 = vcmp.gt.f32.partialorder %v5724_v3, 0.0  ;;  %4800 = vmatpush3.bf16.msra.mxu0 %v5353_v12 }
  0x1d   : > { %5409 = vpow2.f32 %v528_v29  ;;  %vm472_vm1 = vcmp.gt.f32.partialorder %v5727_v4, 0.0  ;;  %v506_v52 = vmin.f32 %v5803_v46, 0.0  ;;  %v509_v55 = vmin.f32 %v5806_v47, 0.0 }
  0x1e   : > { %5411 = vpow2.f32 %v534_v38  ;;  %v542_v54 = vmul.f32 1.442695, %v507_v48  ;;  %vm475_vm2 = vcmp.gt.f32.partialorder %v5730_v5, 0.0  ;;  %vm473_vm3 = vcmp.gt.f32.partialorder %v5742_v9, 0.0 }
  0x1f   : > { %5413 = vpow2.f32 %v532_v42  ;;  %v540_v58 = vmul.f32 1.442695, %v506_v52  ;;  %v5831_v59 = vsub.f32 0.0, %v5813_v50  ;;  %v508_v62 = vmin.f32 %v5810_v49, 0.0 }
  0x20   : > { %5415 = vpow2.f32 %v538_v43  ;;  %v5835_v63 = vsub.f32 0.0, %v5822_v53  ;;  %v546_v15 = vmul.f32 1.442695, %v509_v55  ;;  %v5841_v19 = vsub.f32 0.0, %v5826_v56  ;;  %v5869_v43 = vld [vmem:[%s5712_s29 + $0x98] sm:$0xff]  ;;  %v5881_v55 = vld [vmem:[%s5712_s29 + $0xa8] sm:$0xff] }
  0x21   : > { %5417 = vpow2.f32 %v536_v45  ;;  %v511_v24 = vmin.f32 %v5831_v59, 0.0  ;;  %vm477_vm4 = vcmp.gt.f32.partialorder %v5745_v10, 0.0  ;;  %v544_v35 = vmul.f32 1.442695, %v508_v62  ;;  %v5893_v62 = vld [vmem:[%s7571_s3] sm:$0xff]  }
  0x22   : > { %v5400_v57 = vpop.eup %5399  ;;  %5419 = vpow2.f32 %v542_v54  ;;  %v510_v38 = vmin.f32 %v5835_v63, 0.0  ;;  %vm476_vm5 = vcmp.gt.f32.partialorder %v5748_v11, 0.0  ;;  %vm479_vm6 = vcmp.gt.f32.partialorder %v5769_v27, 0.0  ;;  %v5878_v54 = vld [vmem:[%s5712_s29 + $0x90] sm:$0xff] }
  0x23   : > { %v5402_v60 = vpop.eup %5401  ;;  %v4308_v61 = vadd.f32 -1.0, %v5400_v57  ;;  %5421 = vpow2.f32 %v540_v58  ;;  %vm478_vm7 = vcmp.gt.f32.partialorder %v5772_v28, 0.0  ;;  %v550_v48 = vmul.f32 1.442695, %v511_v24 }
  0x24   : > { %v5404_v13 = vpop.eup %5403  ;;  %v4306_v14 = vadd.f32 -1.0, %v5402_v60  ;;  %v513_v51 = vmin.f32 %v5841_v19, 0.0  ;;  %5423 = vpow2.f32 %v546_v15  ;;  %v548_v60 = vmul.f32 1.442695, %v510_v38 }
  0x25   : > { %v5406_v20 = vpop.eup %5405  ;;  %v594_v21 = vsel %vm474_vm0, %v5724_v3, %v4308_v61  ;;  %v4309_v23 = vadd.f32 -1.0, %v5404_v13  ;;  %5425 = vpow2.f32 %v544_v35  ;;  %v5888_v61 = vsub.f32 0.0, %v5869_v43 }
  0x26   : > { %v5408_v25 = vpop.eup %5407  ;;  %644 = vrot.lane.b32.xlu1 %v594_v21, %s5651_s13  ;;  %v592_v26 = vsel %vm472_vm1, %v5727_v4, %v4306_v14  ;;  %v4307_v29 = vadd.f32 -1.0, %v5406_v20  ;;  %v5354_v4 = vld [vmem:[%s7571_s3 + $0x38] sm:$0xff]   ;;  %v5899_v14 = vld [vmem:[%s5712_s29 + $0xa0] sm:$0xff]  ;;  %vm481_vm8 = vcmp.gt.f32.partialorder %v5775_v30, 0.0  ;;  %5427 = vpow2.f32 %v550_v48 }
  0x27   : > { %v5410_v3 = vpop.eup %5409  ;;  %640 = vrot.lane.b32.xlu0 %v592_v26, %s5651_s13  ;;  %v595_v32 = vsel %vm475_vm2, %v5730_v5, %v4309_v23  ;;  %v4311_v34 = vadd.f32 -1.0, %v5408_v25  ;;  %4801 = vmatprep.subr.bf16.mxu0 %v5354_v4  ;;  %v515_v23 = vmin.f32 %v5888_v61, 0.0  ;;  %v5910_v24 = vsub.f32 0.0, %v5881_v55 }
  0x28   : > { %v5412_v41 = vpop.eup %5411  ;;  %v593_v42 = vsel %vm473_vm3, %v5742_v9, %v4307_v29  ;;  %v4310_v5 = vadd.f32 -1.0, %v5410_v3  ;;  %v5875_v9 = vsub.f32 0.0, %v5858_v39  ;;  %4802 = vmatpush3.bf16.msra.mxu0 %v5354_v4  ;;  %5429 = vpow2.f32 %v548_v60  ;;  %v5924_v4 = vld [vmem:[%s5712_s29 + $0xb0] sm:$0xff] }
  0x29   : > { %v5414_v45 = vpop.eup %5413  ;;  %v4313_v52 = vadd.f32 -1.0, %v5412_v41  ;;  %v597_v58 = vsel %vm477_vm4, %v5745_v10, %v4311_v34  ;;  %v554_v10 = vmul.f32 1.442695, %v513_v51  ;;  %4823 = vmatprep.subr.bf16.mxu0 %v5893_v62  ;;  %v5917_v3 = vsub.f32 0.0, %v5899_v14 }
  0x2a   : > { %646 = vrot.lane.b32.xlu1 %v595_v32, %s5651_s13  ;;  %v5416_v57 = vpop.eup %5415  ;;  %v596_v12 = vsel %vm476_vm5, %v5748_v11, %v4310_v5  ;;  %v4312_v13 = vadd.f32 -1.0, %v5414_v45  ;;  %v512_v20 = vmin.f32 %v5875_v9, 0.0  ;;  %v5907_v11 = vsub.f32 0.0, %v5878_v54 }
  0x2b   : > { %642 = vrot.lane.b32.xlu0 %v593_v42, %s5651_s13  ;;  %v5418_v15 = vpop.eup %5417  ;;  %v4315_v21 = vadd.f32 -1.0, %v5416_v57  ;;  %v599_v26 = vsel %vm479_vm6, %v5769_v27, %v4313_v52  ;;  %vm480_vm9 = vcmp.gt.f32.partialorder %v5778_v31, 0.0  ;;  %vm483_vm10 = vcmp.gt.f32.partialorder %v5800_v44, 0.0 }
  0x2c   : > { %v5420_v25 = vpop.eup %5419  ;;  %v552_v29 = vmul.f32 1.442695, %v512_v20  ;;  %v598_v34 = vsel %vm478_vm7, %v5772_v28, %v4312_v13  ;;  %v4314_v35 = vadd.f32 -1.0, %v5418_v15  ;;  %v514_v38 = vmin.f32 %v5907_v11, 0.0 }
  0x2d   : > { %v5422_v32 = vpop.eup %5421  ;;  %5431 = vpow2.f32 %v554_v10  ;;  %v601_v27 = vsel %vm481_vm8, %v5775_v30, %v4315_v21  ;;  %v4317_v41 = vadd.f32 -1.0, %v5420_v25  ;;  %v558_v42 = vmul.f32 1.442695, %v515_v23 }
  0x2e   : > { %650 = vrot.lane.b32.xlu1 %v597_v58, %s5651_s13  ;;  %v517_v28 = vmin.f32 %v5910_v24, 0.0  ;;  %5433 = vpow2.f32 %v552_v29  ;;  %v556_v5 = vmul.f32 1.442695, %v514_v38  ;;  %v516_v45 = vmin.f32 %v5917_v3, 0.0  ;;  %v5424_v51 = vpop.eup %5423 }
  0x2f   : > { %648 = vrot.lane.b32.xlu0 %v596_v12, %s5651_s13  ;;  %v5936_v48 = vsub.f32 0.0, %v5924_v4  ;;  %v600_v52 = vsel %vm480_vm9, %v5778_v31, %v4314_v35  ;;  %v4316_v57 = vadd.f32 -1.0, %v5422_v32  ;;  %v5426_v58 = vpop.eup %5425  ;;  %vm482_vm11 = vcmp.gt.f32.partialorder %v5803_v46, 0.0 }
  0x30   : > { %v603_v30 = vsel %vm483_vm10, %v5800_v44, %v4317_v41  ;;  %5435 = vpow2.f32 %v558_v42  ;;  %v562_v60 = vmul.f32 1.442695, %v517_v28  ;;  %v5428_v12 = vpop.eup %5427  ;;  %v4319_v13 = vadd.f32 -1.0, %v5424_v51 }
  0x31   : > { %5437 = vpow2.f32 %v556_v5  ;;  %v560_v15 = vmul.f32 1.442695, %v516_v45  ;;  %v518_v31 = vmin.f32 %v5936_v48, 0.0  ;;  %v602_v10 = vsel %vm482_vm11, %v5803_v46, %v4316_v57 }
  0x32   : > { %654 = vrot.lane.b32.xlu1 %v599_v26, %s5651_s13  ;;  %vm485_vm12 = vcmp.gt.f32.partialorder %v5806_v47, 0.0  ;;  %v4318_v20 = vadd.f32 -1.0, %v5426_v58  ;;  %v5430_v21 = vpop.eup %5429  ;;  %vm484_vm13 = vcmp.gt.f32.partialorder %v5810_v49, 0.0  ;;  %5439 = vpow2.f32 %v562_v60 }
  0x33   : > { %652 = vrot.lane.b32.xlu0 %v598_v34, %s5651_s13  ;;  %v605_v23 = vsel %vm485_vm12, %v5806_v47, %v4319_v13  ;;  %v4321_v25 = vadd.f32 -1.0, %v5428_v12  ;;  %5441 = vpow2.f32 %v560_v15  ;;  %v564_v26 = vmul.f32 1.442695, %v518_v31 }
  0x34   : > { %v604_v29 = vsel %vm484_vm13, %v5810_v49, %v4318_v20  ;;  %vm487_vm14 = vcmp.gt.f32.partialorder %v5831_v59, 0.0  ;;  %v4320_v46 = vadd.f32 -1.0, %v5430_v21  ;;  %vm486_vm15 = vcmp.gt.f32.partialorder %v5835_v63, 0.0 }
  0x35   : > { %v607_v34 = vsel %vm487_vm14, %v5831_v59, %v4321_v25  ;;  %5443 = vpow2.f32 %v564_v26  ;;  %vm489_vm0 = vcmp.gt.f32.partialorder %v5841_v19, 0.0  ;;  %vm488_vm1 = vcmp.gt.f32.partialorder %v5875_v9, 0.0 }
  0x36   : > { %658 = vrot.lane.b32.xlu1 %v601_v27, %s5651_s13  ;;  %v606_v38 = vsel %vm486_vm15, %v5835_v63, %v4320_v46  ;;  %vm491_vm2 = vcmp.gt.f32.partialorder %v5888_v61, 0.0  ;;  %vm490_vm3 = vcmp.gt.f32.partialorder %v5907_v11, 0.0  ;;  %vm493_vm4 = vcmp.gt.f32.partialorder %v5910_v24, 0.0 }
  0x37   : > { %656 = vrot.lane.b32.xlu0 %v600_v52, %s5651_s13  ;;  %v5432_v44 = vpop.eup %5431  ;;  %vm492_vm5 = vcmp.gt.f32.partialorder %v5917_v3, 0.0  ;;  %vm494_vm6 = vcmp.gt.f32.partialorder %v5936_v48, 0.0  ;;  %v328_v60 = vmin.f32 %v5718_v1, 0.0  ;;  %v333_v15 = vmin.f32 %v5736_v7, 0.0 }
  0x38   : > { %v5434_v32 = vpop.eup %5433  ;;  %v4323_v35 = vadd.f32 -1.0, %v5432_v44  ;;  %v335_v21 = vmin.f32 %v5755_v16, 0.0  ;;  %v337_v25 = vmin.f32 %v5761_v18, 0.0  ;;  %v336_v46 = vmin.f32 %v5765_v22, 0.0 }
  0x39   : > { %v4322_v49 = vadd.f32 -1.0, %v5434_v32  ;;  %v352_v13 = vmul.f32 1.442695, %v328_v60  ;;  %v362_v20 = vmul.f32 1.442695, %v333_v15  ;;  %vm306_vm7 = vcmp.gt.f32.partialorder %v5715_v0, 0.0 }
  0x3a   : > { %662 = vrot.lane.b32.xlu1 %v603_v30, %s5651_s13  ;;  %v5436_v47 = vpop.eup %5435  ;;  %v609_v41 = vsel %vm489_vm0, %v5841_v19, %v4323_v35  ;;  %v366_v26 = vmul.f32 1.442695, %v335_v21  ;;  %v339_v35 = vmin.f32 %v5782_v33, 0.0  ;;  %vm304_vm8 = vcmp.gt.f32.partialorder %v5718_v1, 0.0 }
  0x3b   : > { %660 = vrot.lane.b32.xlu0 %v602_v10, %s5651_s13  ;;  %v5438_v27 = vpop.eup %5437  ;;  %v4325_v42 = vadd.f32 -1.0, %v5436_v47  ;;  %v608_v59 = vsel %vm488_vm1, %v5875_v9, %v4322_v49  ;;  %vm712_vm9 = vcmask 261120   ;;  %vm307_vm10 = vcmp.gt.f32.partialorder %v5721_v2, 0.0 }
  0x3c   : > { %v5440_v28 = vpop.eup %5439  ;;  %v4324_v5 = vadd.f32 -1.0, %v5438_v27  ;;  %v368_v27 = vmul.f32 1.442695, %v336_v46  ;;  %vm737_vm11 = vcmask 523264   ;;  %vm305_vm12 = vcmp.gt.f32.partialorder %v5733_v6, 0.0 }
  0x3d   : > { %v5442_v63 = vpop.eup %5441  ;;  %v611_v45 = vsel %vm491_vm2, %v5888_v61, %v4325_v42  ;;  %v4327_v51 = vadd.f32 -1.0, %v5440_v28  ;;  %v374_v28 = vmul.f32 1.442695, %v339_v35  ;;  %vm309_vm13 = vcmp.gt.f32.partialorder %v5736_v7, 0.0 }
  0x3e   : > { %666 = vrot.lane.b32.xlu1 %v605_v23, %s5651_s13  ;;  %v610_v52 = vsel %vm490_vm3, %v5907_v11, %v4324_v5  ;;  %v4326_v19 = vadd.f32 -1.0, %v5442_v63  ;;  %v330_v11 = vmin.f32 %v5715_v0, 0.0  ;;  %v334_v23 = vmin.f32 %v5758_v17, 0.0 }
  0x3f   : > { %664 = vrot.lane.b32.xlu0 %v604_v29, %s5651_s13  ;;  %v5444_v57 = vpop.eup %5443  ;;  %v613_v9 = vsel %vm493_vm4, %v5910_v24, %v4327_v51  ;;  %v331_v24 = vmin.f32 %v5721_v2, 0.0  ;;  %v341_v5 = vmin.f32 %v5790_v37, 0.0  ;;  %v342_v15 = vmin.f32 %v5822_v53, 0.0 }
  0x40   : > { %v612_v58 = vsel %vm492_vm5, %v5917_v3, %v4326_v19  ;;  %v4328_v30 = vadd.f32 -1.0, %v5444_v57  ;;  %v356_v12 = vmul.f32 1.442695, %v330_v11  ;;  %v329_v3 = vmin.f32 %v5733_v6, 0.0 }
  0x41   : > { %v358_v31 = vmul.f32 1.442695, %v331_v24  ;;  %v364_v29 = vmul.f32 1.442695, %v334_v23  ;;  %v340_v19 = vmin.f32 %v5794_v40, 0.0  ;;  %v343_v11 = vmin.f32 %v5813_v50, 0.0 }
  0x42   : > { %670 = vrot.lane.b32.xlu1 %v607_v34, %s5651_s13  ;;  %v614_v61 = vsel %vm494_vm6, %v5936_v48, %v4328_v30  ;;  %5445 = vpow2.f32 %v356_v12  ;;  %v354_v10 = vmul.f32 1.442695, %v329_v3  ;;  %v332_v48 = vmin.f32 %v5739_v8, 0.0 }
  0x43   : > { %668 = vrot.lane.b32.xlu0 %v606_v38, %s5651_s13  ;;  %5447 = vpow2.f32 %v352_v13  ;;  %v370_v34 = vmul.f32 1.442695, %v337_v25  ;;  %v338_v38 = vmin.f32 %v5787_v36, 0.0  ;;  %v376_v3 = vmul.f32 1.442695, %v340_v19 }
  0x44   : > { %5449 = vpow2.f32 %v358_v31  ;;  %v360_v44 = vmul.f32 1.442695, %v332_v48  ;;  %vm308_vm14 = vcmp.gt.f32.partialorder %v5739_v8, 0.0  ;;  %vm311_vm15 = vcmp.gt.f32.partialorder %v5755_v16, 0.0 }
  0x45   : > { %5451 = vpow2.f32 %v354_v10  ;;  %v372_v63 = vmul.f32 1.442695, %v338_v38  ;;  %v382_v21 = vmul.f32 1.442695, %v343_v11  ;;  %v380_v46 = vmul.f32 1.442695, %v342_v15 }
  0x46   : > { %674 = vrot.lane.b32.xlu1 %v609_v41, %s5651_s13  ;;  %5453 = vpow2.f32 %v362_v20  ;;  %vm310_vm0 = vcmp.gt.f32.partialorder %v5758_v17, 0.0  ;;  %vm313_vm1 = vcmp.gt.f32.partialorder %v5761_v18, 0.0  ;;  %vm312_vm2 = vcmp.gt.f32.partialorder %v5765_v22, 0.0 }
  0x47   : > { %672 = vrot.lane.b32.xlu0 %v608_v59, %s5651_s13  ;;  %5455 = vpow2.f32 %v360_v44  ;;  %vm315_vm3 = vcmp.gt.f32.partialorder %v5782_v33, 0.0  ;;  %vm314_vm4 = vcmp.gt.f32.partialorder %v5787_v36, 0.0  ;;  %vm317_vm5 = vcmp.gt.f32.partialorder %v5790_v37, 0.0 }
  0x48   : > { %5457 = vpow2.f32 %v366_v26  ;;  %vm316_vm6 = vcmp.gt.f32.partialorder %v5794_v40, 0.0 }
  0x49   : > { %5459 = vpow2.f32 %v364_v29 }
  0x4a   : > { %678 = vrot.lane.b32.xlu1 %v611_v45, %s5651_s13  ;;  %5461 = vpow2.f32 %v370_v34 }
  0x4b   : > { %676 = vrot.lane.b32.xlu0 %v610_v52, %s5651_s13  ;;  %5463 = vpow2.f32 %v368_v27 }
  0x4c   : > { %v5446_v32 = vpop.eup %5445  ;;  %5465 = vpow2.f32 %v374_v28 }
  0x4d   : > { %v5448_v47 = vpop.eup %5447  ;;  %v4284_v49 = vadd.f32 -1.0, %v5446_v32  ;;  %5467 = vpow2.f32 %v372_v63  ;;  %v344_v32 = vmin.f32 %v5858_v39, 0.0  ;;  %v346_v63 = vmin.f32 %v5878_v54, 0.0 }
  0x4e   : > { %682 = vrot.lane.b32.xlu1 %v613_v9, %s5651_s13  ;;  %v5450_v41 = vpop.eup %5449  ;;  %v4282_v42 = vadd.f32 -1.0, %v5448_v47 }
  0x4f   : > { %680 = vrot.lane.b32.xlu0 %v612_v58, %s5651_s13  ;;  %v5452_v59 = vpop.eup %5451  ;;  %v426_v51 = vsel %vm306_vm7, %v5715_v0, %v4284_v49  ;;  %v4285_v52 = vadd.f32 -1.0, %v5450_v41  ;;  %vm319_vm7 = vcmp.gt.f32.partialorder %v5813_v50, 0.0 }
  0x50   : > { %v5454_v45 = vpop.eup %5453  ;;  %v424_v57 = vsel %vm304_vm8, %v5718_v1, %v4282_v42  ;;  %v4283_v9 = vadd.f32 -1.0, %v5452_v59  ;;  %vm318_vm8 = vcmp.gt.f32.partialorder %v5822_v53, 0.0 }
  0x51   : > { %v5456_v58 = vpop.eup %5455  ;;  %v4287_v12 = vadd.f32 -1.0, %v5454_v45  ;;  %v427_v13 = vsel %vm307_vm10, %v5721_v2, %v4285_v52  ;;  %vm321_vm10 = vcmp.gt.f32.partialorder %v5826_v56, 0.0 }
  0x52   : > { %v5458_v1 = vpop.eup %5457  ;;  %v425_v31 = vsel %vm305_vm12, %v5733_v6, %v4283_v9  ;;  %v4286_v10 = vadd.f32 -1.0, %v5456_v58  ;;  %v345_v6 = vmin.f32 %v5826_v56, 0.0  ;;  %vm320_vm12 = vcmp.gt.f32.partialorder %v5858_v39, 0.0 }
  0x53   : > { %684 = vrot.lane.b32.xlu0 %v614_v61, %s5651_s13  ;;  %v378_v61 = vmul.f32 1.442695, %v341_v5  ;;  %v5460_v48 = vpop.eup %5459  ;;  %v429_v25 = vsel %vm309_vm13, %v5736_v7, %v4287_v12  ;;  %v4289_v26 = vadd.f32 -1.0, %v5458_v1  ;;  %v384_v5 = vmul.f32 1.442695, %v344_v32 }
  0x54   : > { %v5462_v44 = vpop.eup %5461  ;;  %v428_v34 = vsel %vm308_vm14, %v5739_v8, %v4286_v10  ;;  %v4288_v35 = vadd.f32 -1.0, %v5460_v48  ;;  %v386_v28 = vmul.f32 1.442695, %v345_v6  ;;  %v347_v8 = vmin.f32 %v5869_v43, 0.0 }
  0x55   : > { %5469 = vpow2.f32 %v378_v61  ;;  %v5464_v47 = vpop.eup %5463  ;;  %v4291_v38 = vadd.f32 -1.0, %v5462_v44  ;;  %v431_v42 = vsel %vm311_vm15, %v5755_v16, %v4289_v26  ;;  %v349_v61 = vmin.f32 %v5881_v55, 0.0 }
  0x56   : > { %5471 = vpow2.f32 %v376_v3  ;;  %v5466_v49 = vpop.eup %5465  ;;  %v4290_v52 = vadd.f32 -1.0, %v5464_v47  ;;  %v348_v12 = vmin.f32 %v5899_v14, 0.0  ;;  %vm323_vm13 = vcmp.gt.f32.partialorder %v5869_v43, 0.0 }
  0x57   : > { %5473 = vpow2.f32 %v382_v21  ;;  %v5468_v45 = vpop.eup %5467  ;;  %v433_v19 = vsel %vm313_vm1, %v5761_v18, %v4291_v38  ;;  %v388_v18 = vmul.f32 1.442695, %v346_v63  ;;  %vm322_vm14 = vcmp.gt.f32.partialorder %v5878_v54, 0.0 }
  0x58   : > { %5475 = vpow2.f32 %v380_v46  ;;  %v432_v1 = vsel %vm312_vm2, %v5765_v22, %v4290_v52  ;;  %v394_v22 = vmul.f32 1.442695, %v349_v61  ;;  %v5356_v46 = vld [vmem:[%s7571_s3 + $0x8] sm:$0xff]   ;;  %vm325_vm15 = vcmp.gt.f32.partialorder %v5881_v55, 0.0 }
  0x59   : > { %5477 = vpow2.f32 %v386_v28  ;;  %vm326_vm1 = vcmp.gt.f32.partialorder %v5924_v4, 0.0 }
  0x5a   : > { %5479 = vpow2.f32 %v384_v5 }
  0x5f   : > { %v5470_v11 = vpop.eup %5469 }
  0x60   : > { %v5472_v3 = vpop.eup %5471 }
  0x61   : > { %v5474_v21 = vpop.eup %5473 }
  0x62   : > { %v5476_v32 = vpop.eup %5475 }
  0x98   : > { %v645_v30 = vpop.permute.xlu1 %644 }
  0x99   : > { %v715_v0 = vsel %vm712_vm9, %v426_v51, %v645_v30  ;;  %v641_v60 = vpop.permute.xlu0 %640  ;;  %v430_v51 = vsel %vm310_vm0, %v5758_v17, %v4288_v35  ;;  %v390_v30 = vmul.f32 1.442695, %v347_v8  ;;  %v4296_v8 = vadd.f32 -1.0, %v5476_v32 }
  0x9a   : > { %740 = vst.msk [vmem:[#allocation2 + $0x10] sm:$0xff] %vm737_vm11, %v715_v0  ;;  %v713_v24 = vsel %vm712_vm9, %v424_v57, %v641_v60  ;;  %v4293_v57 = vadd.f32 -1.0, %v5466_v49  ;;  %vm324_vm0 = vcmp.gt.f32.partialorder %v5899_v14, 0.0 }
  0x9b   : > { %738 = vst.msk [vmem:[#allocation2] sm:$0xff] %vm737_vm11, %v713_v24  ;;  %5481 = vpow2.f32 %v390_v30 }
  0x9c   : > { %v647_v20 = vpop.permute.xlu1 %646  ;;  %5483 = vpow2.f32 %v388_v18 }
  0x9d   : > { %v716_v23 = vsel %vm712_vm9, %v427_v13, %v647_v20  ;;  %v643_v2 = vpop.permute.xlu0 %642  ;;  %v4292_v13 = vadd.f32 -1.0, %v5468_v45  ;;  %v4295_v20 = vadd.f32 -1.0, %v5470_v11  ;;  %5485 = vpow2.f32 %v394_v22 }
  0x9e   : > { %741 = vst.msk [vmem:[#allocation2 + $0x18] sm:$0xff] %vm737_vm11, %v716_v23  ;;  %v714_v29 = vsel %vm712_vm9, %v425_v31, %v643_v2  ;;  %v435_v31 = vsel %vm315_vm3, %v5782_v33, %v4293_v57  ;;  %v392_v33 = vmul.f32 1.442695, %v348_v12 }
  0x9f   : > { %739 = vst.msk [vmem:[#allocation2 + $0x8] sm:$0xff] %vm737_vm11, %v714_v29  ;;  %v434_v26 = vsel %vm314_vm4, %v5787_v36, %v4292_v13  ;;  %v4294_v29 = vadd.f32 -1.0, %v5472_v3  ;;  %v437_v36 = vsel %vm317_vm5, %v5790_v37, %v4295_v20 }
  0xa0   : > { %v651_v7 = vpop.permute.xlu1 %650  ;;  %5487 = vpow2.f32 %v392_v33 }
  0xa1   : > { %v718_v27 = vsel %vm712_vm9, %v429_v25, %v651_v7  ;;  %v649_v41 = vpop.permute.xlu0 %648  ;;  %v350_v25 = vmin.f32 %v5924_v4, 0.0  ;;  %v436_v28 = vsel %vm316_vm6, %v5794_v40, %v4294_v29 }
  0xa2   : > { %743 = vst.msk [vmem:[#allocation2 + $0x28] sm:$0xff] %vm737_vm11, %v718_v27  ;;  %v717_v59 = vsel %vm712_vm9, %v428_v34, %v649_v41  ;;  %v4297_v27 = vadd.f32 -1.0, %v5474_v21 }
  0xa3   : > { %742 = vst.msk [vmem:[#allocation2 + $0x20] sm:$0xff] %vm737_vm11, %v717_v59  ;;  %v396_v41 = vmul.f32 1.442695, %v350_v25 }
  0xa4   : > { %v655_v16 = vpop.permute.xlu1 %654 }
  0xa5   : > { %v720_v9 = vsel %vm712_vm9, %v431_v42, %v655_v16  ;;  %v653_v58 = vpop.permute.xlu0 %652  ;;  %v802_v23 = vld [vmem:[#allocation2 + $0x11] sm:$0xff]  ;;  %v5478_v42 = vpop.eup %5477  ;;  %5489 = vpow2.f32 %v396_v41 }
  0xa6   : > { %745 = vst.msk [vmem:[#allocation2 + $0x38] sm:$0xff] %vm737_vm11, %v720_v9  ;;  %v719_v17 = vsel %vm712_vm9, %v430_v51, %v653_v58  ;;  %v800_v0 = vld [vmem:[#allocation2 + $0x1] sm:$0xff]  ;;  %v801_v60 = vld [vmem:[#allocation2 + $0x9] sm:$0xff]  ;;  %v5480_v59 = vpop.eup %5479  ;;  %v439_v51 = vsel %vm319_vm7, %v5813_v50, %v4297_v27  ;;  %v438_v9 = vsel %vm318_vm8, %v5822_v53, %v4296_v8  ;;  %v5358_v50 = vld [vmem:[%s7571_s3 + $0x18] sm:$0xff]  }
  0xa7   : > { %744 = vst.msk [vmem:[#allocation2 + $0x30] sm:$0xff] %vm737_vm11, %v719_v17  ;;  %v820_v24 = vpack.c.bf16 %v801_v60, %v800_v0  ;;  %v5482_v57 = vpop.eup %5481  ;;  %v4298_v30 = vadd.f32 -1.0, %v5480_v59 }
  0xa8   : > { %v659_v15 = vpop.permute.xlu1 %658  ;;  %v5484_v61 = vpop.eup %5483 }
  0xa9   : > { %v722_v10 = vsel %vm712_vm9, %v433_v19, %v659_v15  ;;  %v657_v48 = vpop.permute.xlu0 %656  ;;  %4803 = vmatprep.mubr.msk.bf16.mxu0 %vm737_vm11, %v820_v24  ;;  %v4299_v19 = vadd.f32 -1.0, %v5478_v42  ;;  %v5486_v24 = vpop.eup %5485  ;;  %v440_v13 = vsel %vm320_vm12, %v5858_v39, %v4298_v30  ;;  %v4300_v15 = vadd.f32 -1.0, %v5484_v61  ;;  %v767_v30 = vld [vmem:[#allocation2 + $0x28] sm:$0xff] }
  0xaa   : > { %747 = vst.msk [vmem:[#allocation2 + $0x48] sm:$0xff] %vm737_vm11, %v722_v10  ;;  %v721_v44 = vsel %vm712_vm9, %v432_v1, %v657_v48  ;;  %v803_v2 = vld [vmem:[#allocation2 + $0x19] sm:$0xff]  ;;  %v804_v38 = vld [vmem:[#allocation2 + $0x21] sm:$0xff]  ;;  %v4301_v1 = vadd.f32 -1.0, %v5482_v57  ;;  %vm5654_vm12 = vmmov 0  }
  0xab   : > { %746 = vst.msk [vmem:[#allocation2 + $0x40] sm:$0xff] %vm737_vm11, %v721_v44  ;;  %v6069_v6 = vpack.c.bf16 %v803_v2, %v802_v23  ;;  %v441_v60 = vsel %vm321_vm10, %v5826_v56, %v4299_v19  ;;  %v5488_v56 = vpop.eup %5487  ;;  %v4303_v23 = vadd.f32 -1.0, %v5486_v24  ;;  %v442_v2 = vsel %vm322_vm14, %v5878_v54, %v4300_v15  ;;  %v764_v19 = vld [vmem:[#allocation2 + $0x10] sm:$0xff]  ;;  %v765_v57 = vld [vmem:[#allocation2 + $0x18] sm:$0xff]  ;;  %v5360_v61 = vld [vmem:[%s7571_s3 + $0x48] sm:$0xff]  }
  0xac   : > { %v663_v34 = vpop.permute.xlu1 %662  ;;  %v443_v22 = vsel %vm323_vm13, %v5869_v43, %v4301_v1  ;;  %v4302_v25 = vadd.f32 -1.0, %v5488_v56  ;;  %v5362_v1 = vld [vmem:[%s7571_s3 + $0x58] sm:$0xff]  }
  0xad   : > { %v724_v35 = vsel %vm712_vm9, %v435_v31, %v663_v34  ;;  %v661_v47 = vpop.permute.xlu0 %660  ;;  %4804 = vmatmul.mubr.msk.bf16.vlgmr.msra.gmra.mrb[0].mxu0 %vm737_vm11, %v6069_v6  ;;  %v6124_v31 = vld [vmem:[%s7571_s3 + $0x40] sm:$0xff]   ;;  %v445_v32 = vsel %vm325_vm15, %v5881_v55, %v4303_v23 }
  0xae   : > { %749 = vst.msk [vmem:[#allocation2 + $0x58] sm:$0xff] %vm737_vm11, %v724_v35  ;;  %v723_v7 = vsel %vm712_vm9, %v434_v26, %v661_v47  ;;  %4824 = vmatpush3.bf16.msra.mxu0 %v5893_v62  ;;  %v805_v49 = vld [vmem:[#allocation2 + $0x29] sm:$0xff]  ;;  %v806_v52 = vld [vmem:[#allocation2 + $0x31] sm:$0xff]  ;;  %v444_v47 = vsel %vm324_vm0, %v5899_v14, %v4302_v25 }
  0xaf   : > { %748 = vst.msk [vmem:[#allocation2 + $0x50] sm:$0xff] %vm737_vm11, %v723_v7  ;;  %v6088_v37 = vpack.c.bf16 %v805_v49, %v804_v38  ;;  %4825 = vmatprep.subr.bf16.mxu0 %v5356_v46  ;;  %v5357_v62 = vld [vmem:[%s7571_s3 + $0x10] sm:$0xff]   ;;  %v5490_v26 = vpop.eup %5489 }
  0xb0   : > { %v667_v5 = vpop.permute.xlu1 %666  ;;  %v4304_v7 = vadd.f32 -1.0, %v5490_v26 }
  0xb1   : > { %v726_v63 = vsel %vm712_vm9, %v437_v36, %v667_v5  ;;  %v665_v45 = vpop.permute.xlu0 %664  ;;  %4807 = vmatprep.mubr.msk.bf16.mxu0 %vm737_vm11, %v6088_v37 }
  0xb2   : > { %751 = vst.msk [vmem:[#allocation2 + $0x68] sm:$0xff] %vm737_vm11, %v726_v63  ;;  %v725_v40 = vsel %vm712_vm9, %v436_v28, %v665_v45  ;;  %v807_v16 = vld [vmem:[#allocation2 + $0x39] sm:$0xff]  ;;  %4826 = vmatpush3.bf16.msra.mxu0 %v5356_v46  ;;  %v808_v18 = vld [vmem:[#allocation2 + $0x41] sm:$0xff]  ;;  %v446_v14 = vsel %vm326_vm1, %v5924_v4, %v4304_v7 }
  0xb3   : > { %750 = vst.msk [vmem:[#allocation2 + $0x60] sm:$0xff] %vm737_vm11, %v725_v40  ;;  %v6103_v58 = vpack.c.bf16 %v807_v16, %v806_v52  ;;  %4827 = vmatprep.subr.bf16.mxu0 %v5357_v62  ;;  %v763_v45 = vld [vmem:[#allocation2 + $0x8] sm:$0xff]  ;;  %v762_v52 = vld [vmem:[#allocation2] sm:$0xff] }
  0xb4   : > { %v671_v11 = vpop.permute.xlu1 %670  ;;  %v782_v16 = vpack.c.bf16 %v763_v45, %v762_v52  ;;  %v1177_v7 = vld [vmem:[#allocation2 + $0x22] sm:$0xff] }
  0xb5   : > { %v728_v17 = vsel %vm712_vm9, %v439_v51, %v671_v11  ;;  %v669_v0 = vpop.permute.xlu0 %668  ;;  %4808 = vmatmul.mubr.msk.bf16.gmra.mrb[4].mxu0 %vm737_vm11, %v6103_v58 }
  0xb6   : > { %753 = vst.msk [vmem:[#allocation2 + $0x78] sm:$0xff] %vm737_vm11, %v728_v17  ;;  %v727_v53 = vsel %vm712_vm9, %v438_v9, %v669_v0  ;;  %v809_v12 = vld [vmem:[#allocation2 + $0x49] sm:$0xff]  ;;  %4828 = vmatpush3.bf16.msra.mxu0 %v5357_v62  ;;  %v810_v21 = vld [vmem:[#allocation2 + $0x51] sm:$0xff]  ;;  %v766_v9 = vld [vmem:[#allocation2 + $0x20] sm:$0xff] }
  0xb7   : > { %752 = vst.msk [vmem:[#allocation2 + $0x70] sm:$0xff] %vm737_vm11, %v727_v53  ;;  %v6118_v3 = vpack.c.bf16 %v809_v12, %v808_v18  ;;  %4829 = vmatprep.subr.bf16.mxu0 %v5358_v50  ;;  %v6178_v11 = vpack.c.bf16 %v767_v30, %v766_v9  ;;  %v5361_v17 = vld [vmem:[%s7571_s3 + $0x50] sm:$0xff]   ;;  %v769_v53 = vld [vmem:[#allocation2 + $0x38] sm:$0xff]  ;;  %v771_v18 = vld [vmem:[#allocation2 + $0x48] sm:$0xff] }
  0xb8   : > { %v675_v10 = vpop.permute.xlu1 %674  ;;  %v768_v0 = vld [vmem:[#allocation2 + $0x30] sm:$0xff] }
  0xb9   : > { %v730_v48 = vsel %vm712_vm9, %v441_v60, %v675_v10  ;;  %v673_v20 = vpop.permute.xlu0 %672  ;;  %4811 = vmatprep.mubr.msk.bf16.mxu0 %vm737_vm11, %v6118_v3  ;;  %v770_v60 = vld [vmem:[#allocation2 + $0x40] sm:$0xff]  ;;  %v6188_v12 = vpack.c.bf16 %v769_v53, %v768_v0  ;;  %v772_v15 = vld [vmem:[#allocation2 + $0x50] sm:$0xff]  ;;  %v775_v10 = vld [vmem:[#allocation2 + $0x68] sm:$0xff] }
  0xba   : > { %755 = vst.msk [vmem:[#allocation2 + $0x88] sm:$0xff] %vm737_vm11, %v730_v48  ;;  %v729_v39 = vsel %vm712_vm9, %v440_v13, %v673_v20  ;;  %v811_v44 = vld [vmem:[#allocation2 + $0x59] sm:$0xff]  ;;  %4830 = vmatpush3.bf16.msra.mxu0 %v5358_v50  ;;  %v812_v34 = vld [vmem:[#allocation2 + $0x61] sm:$0xff]  ;;  %v6173_v50 = vpack.c.bf16 %v765_v57, %v764_v19  ;;  %v6193_v24 = vpack.c.bf16 %v771_v18, %v770_v60  ;;  %v2110_v60 = vld [vmem:[%s7569_s1 + $0x30] sm:$0xff]  ;;  %v5652_v18 = vmov 0  }
  0xbb   : > { %754 = vst.msk [vmem:[#allocation2 + $0x80] sm:$0xff] %vm737_vm11, %v729_v39  ;;  %v6135_v33 = vpack.c.bf16 %v811_v44, %v810_v21  ;;  %4851 = vmatprep.subr.bf16.mxu0 %v6124_v31  ;;  %v5363_v13 = vld [vmem:[%s7571_s3 + $0x60] sm:$0xff]   ;;  %v2109_v53 = vld [vmem:[%s7569_s1 + $0x28] sm:$0xff]  ;;  %5349 = vset.pattern.permute.xlu1 %v5652_v18 }
  0xbc   : > { %v679_v29 = vpop.permute.xlu1 %678  ;;  %v774_v56 = vld [vmem:[#allocation2 + $0x60] sm:$0xff]  ;;  %2151 = vperm.xlu1 %5349, %v2109_v53   ;;  %5350 = vset.pattern.permute.xlu0 %v5652_v18 }
  0xbd   : > { %v732_v43 = vsel %vm712_vm9, %v443_v22, %v679_v29  ;;  %v677_v46 = vpop.permute.xlu0 %676  ;;  %4812 = vmatmul.mubr.msk.bf16.gmra.mrb[8].mxu0 %vm737_vm11, %v6135_v33  ;;  %v6204_v20 = vpack.c.bf16 %v775_v10, %v774_v56  ;;  %v777_v22 = vld [vmem:[#allocation2 + $0x78] sm:$0xff]  ;;  %v1173_v29 = vld [vmem:[#allocation2 + $0x2] sm:$0xff]  ;;  %2156 = vperm.xlu0 %5350, %v2110_v60  }
  0xbe   : > { %757 = vst.msk [vmem:[#allocation2 + $0x98] sm:$0xff] %vm737_vm11, %v732_v43  ;;  %v731_v54 = vsel %vm712_vm9, %v442_v2, %v677_v46  ;;  %v813_v35 = vld [vmem:[#allocation2 + $0x69] sm:$0xff]  ;;  %v814_v41 = vld [vmem:[#allocation2 + $0x71] sm:$0xff]  ;;  %v1184_v45 = vld [vmem:[#allocation2 + $0x5a] sm:$0xff] }
  0xbf   : > { %756 = vst.msk [vmem:[#allocation2 + $0x90] sm:$0xff] %vm737_vm11, %v731_v54  ;;  %v6148_v36 = vpack.c.bf16 %v813_v35, %v812_v34  ;;  %v776_v39 = vld [vmem:[#allocation2 + $0x70] sm:$0xff]  ;;  %v2112_v10 = vld [vmem:[%s7569_s1 + $0x40] sm:$0xff] }
  0xc0   : > { %v683_v38 = vpop.permute.xlu1 %682  ;;  %v6210_v23 = vpack.c.bf16 %v777_v22, %v776_v39  ;;  %v1174_v43 = vld [vmem:[#allocation2 + $0xa] sm:$0xff]  ;;  %v1175_v35 = vld [vmem:[#allocation2 + $0x12] sm:$0xff] }
  0xc1   : > { %v734_v49 = vsel %vm712_vm9, %v445_v32, %v683_v38  ;;  %v681_v27 = vpop.permute.xlu0 %680  ;;  %4815 = vmatprep.mubr.msk.bf16.mxu0 %vm737_vm11, %v6148_v36  ;;  %v779_v44 = vld [vmem:[#allocation2 + $0x88] sm:$0xff]  ;;  %v1193_v54 = vpack.c.bf16 %v1174_v43, %v1173_v29  ;;  %v1176_v32 = vld [vmem:[#allocation2 + $0x1a] sm:$0xff]  ;;  %v1187_v30 = vld [vmem:[#allocation2 + $0x72] sm:$0xff] }
  0xc2   : > { %759 = vst.msk [vmem:[#allocation2 + $0xa8] sm:$0xff] %vm737_vm11, %v734_v49  ;;  %v733_v55 = vsel %vm712_vm9, %v444_v47, %v681_v27  ;;  %v815_v42 = vld [vmem:[#allocation2 + $0x79] sm:$0xff]  ;;  %v816_v59 = vld [vmem:[#allocation2 + $0x81] sm:$0xff]  ;;  %v1178_v34 = vld [vmem:[#allocation2 + $0x2a] sm:$0xff]  ;;  %v6223_v47 = vpack.c.bf16 %v1176_v32, %v1175_v35 }
  0xc3   : > { %758 = vst.msk [vmem:[#allocation2 + $0xa0] sm:$0xff] %vm737_vm11, %v733_v55  ;;  %v6158_v28 = vpack.c.bf16 %v815_v42, %v814_v41  ;;  %v778_v21 = vld [vmem:[#allocation2 + $0x80] sm:$0xff]  ;;  %v5364_v38 = vld [vmem:[%s7571_s3 + $0x68] sm:$0xff]   ;;  %v6228_v49 = vpack.c.bf16 %v1178_v34, %v1177_v7  ;;  %v5365_v27 = vld [vmem:[%s7571_s3 + $0x70] sm:$0xff]  }
  0xc4   : > { %v6212_v2 = vpack.c.bf16 %v779_v44, %v778_v21  ;;  %v1180_v55 = vld [vmem:[#allocation2 + $0x3a] sm:$0xff]  ;;  %v1182_v41 = vld [vmem:[#allocation2 + $0x4a] sm:$0xff]  ;;  %v1179_v42 = vld [vmem:[#allocation2 + $0x32] sm:$0xff] }
  0xc5   : > { %v685_v8 = vpop.permute.xlu0 %684  ;;  %4816 = vmatmul.mubr.msk.bf16.gmra.mrb[12].mxu0 %vm737_vm11, %v6158_v28  ;;  %v781_v26 = vld [vmem:[#allocation2 + $0x98] sm:$0xff]  ;;  %v2114_v22 = vld [vmem:[%s7569_s1 + $0x50] sm:$0xff]  ;;  %v2117_v21 = vld [vmem:[%s7569_s1 + $0x68] sm:$0xff] }
  0xc6   : > { %v735_v62 = vsel %vm712_vm9, %v446_v14, %v685_v8  ;;  %v817_v5 = vld [vmem:[#allocation2 + $0x89] sm:$0xff]  ;;  %v818_v40 = vld [vmem:[#allocation2 + $0x91] sm:$0xff]  ;;  %v6237_v14 = vpack.c.bf16 %v1180_v55, %v1179_v42  ;;  %v1188_v57 = vld [vmem:[#allocation2 + $0x7a] sm:$0xff] }
  0xc7   : > { %760 = vst.msk [vmem:[#allocation2 + $0xb0] sm:$0xff] %vm737_vm11, %v735_v62  ;;  %v6164_v63 = vpack.c.bf16 %v817_v5, %v816_v59  ;;  %v780_v25 = vld [vmem:[#allocation2 + $0x90] sm:$0xff]  ;;  %v1181_v8 = vld [vmem:[#allocation2 + $0x42] sm:$0xff]  ;;  %v5366_v62 = vld [vmem:[%s7571_s3 + $0x78] sm:$0xff]  }
  0xc8   : > { %v6218_v46 = vpack.c.bf16 %v781_v26, %v780_v25  ;;  %v6242_v59 = vpack.c.bf16 %v1182_v41, %v1181_v8  ;;  %v5367_v5 = vld [vmem:[%s7571_s3 + $0x80] sm:$0xff]   ;;  %v1190_v9 = vld [vmem:[#allocation2 + $0x8a] sm:$0xff]  ;;  %v2115_v39 = vld [vmem:[%s7569_s1 + $0x58] sm:$0xff] }
  0xc9   : > { %4819 = vmatprep.mubr.msk.bf16.mxu0 %vm737_vm11, %v6164_v63  ;;  %v5368_v44 = vld [vmem:[%s7571_s3 + $0x88] sm:$0xff]   ;;  %v2116_v25 = vld [vmem:[%s7569_s1 + $0x60] sm:$0xff]  ;;  %v5369_v26 = vld [vmem:[%s7571_s3 + $0x90] sm:$0xff]  }
  0xca   : > { %v819_v4 = vld [vmem:[#allocation2 + $0x99] sm:$0xff]  ;;  %v2118_v29 = vld [vmem:[%s7569_s1 + $0x70] sm:$0xff]  ;;  %v2105_v34 = vld [vmem:[%s7569_s1 + $0x8] sm:$0xff] }
  0xcb   : > { %v6168_v51 = vpack.c.bf16 %v819_v4, %v818_v40  ;;  %v1186_v40 = vld [vmem:[#allocation2 + $0x6a] sm:$0xff]  ;;  %v1183_v4 = vld [vmem:[#allocation2 + $0x52] sm:$0xff]  ;;  %v2120_v43 = vld [vmem:[%s7569_s1 + $0x80] sm:$0xff] }
  0xcc   : > { %v6251_v52 = vpack.c.bf16 %v1184_v45, %v1183_v4  ;;  %v5371_v32 = vld [vmem:[%s7571_s3 + $0xa0] sm:$0xff]   ;;  %v1418_v7 = vld [vmem:[#allocation2 + $0xa8] sm:$0xff] }
  0xcd   : > { %4820 = vmatmul.mubr.msk.bf16.gmra.mrb[16].mxu0 %vm737_vm11, %v6168_v51  ;;  %v1417_v35 = vld [vmem:[#allocation2 + $0xa0] sm:$0xff] }
  0xce   : > { %4831 = vmatprep.mubr.msk.bf16.mxu0 %vm737_vm11, %v782_v16  ;;  %v1185_v16 = vld [vmem:[#allocation2 + $0x62] sm:$0xff] }
  0xcf   : > { %v6253_v19 = vpack.c.bf16 %v1186_v40, %v1185_v16 }
  0xd5   : > { %4832 = vmatmul.mubr.msk.bf16.vlgmr.msra.gmra.mrb[0].mxu0 %vm737_vm11, %v6173_v50 }
  0xd6   : > { %4852 = vmatpush3.bf16.msra.mxu0 %v6124_v31  ;;  %4835 = vmatprep.mubr.msk.bf16.mxu0 %vm737_vm11, %v6178_v11  ;;  %v773_v31 = vld [vmem:[#allocation2 + $0x58] sm:$0xff] }
  0xd7   : > { %4853 = vmatprep.subr.bf16.mxu0 %v5360_v61  ;;  %v6202_v48 = vpack.c.bf16 %v773_v31, %v772_v15  ;;  %v2113_v15 = vld [vmem:[%s7569_s1 + $0x48] sm:$0xff]  ;;  %v1191_v31 = vld [vmem:[#allocation2 + $0x92] sm:$0xff] }
  0xd8   : > { %2171 = vperm.xlu0 %5350, %v2113_v15  }
  0xda   : > { %4854 = vmatpush3.bf16.msra.mxu0 %v5360_v61  ;;  %v6259_v61 = vpack.c.bf16 %v1188_v57, %v1187_v30 }
  0xdb   : > { %4855 = vmatprep.subr.bf16.mxu0 %v5361_v17 }
  0xdc   : > { %2181 = vperm.xlu0 %5350, %v2115_v39  }
  0xdd   : > { %4836 = vmatmul.mubr.msk.bf16.gmra.mrb[4].mxu0 %vm737_vm11, %v6188_v12 }
  0xde   : > { %4839 = vmatprep.mubr.msk.bf16.mxu0 %vm737_vm11, %v6193_v24  ;;  %4856 = vmatpush3.bf16.msra.mxu0 %v5361_v17  ;;  %v1189_v17 = vld [vmem:[#allocation2 + $0x82] sm:$0xff] }
  0xdf   : > { %4857 = vmatprep.subr.bf16.mxu0 %v5362_v1  ;;  %v6261_v0 = vpack.c.bf16 %v1190_v9, %v1189_v17 }
  0xe0   : > { %2191 = vperm.xlu0 %5350, %v2117_v21  }
  0xe2   : > { %4858 = vmatpush3.bf16.msra.mxu0 %v5362_v1  ;;  %v1192_v1 = vld [vmem:[#allocation2 + $0x9a] sm:$0xff] }
  0xe3   : > { %4879 = vmatprep.subr.bf16.mxu0 %v5363_v13  ;;  %v6279_v56 = vpack.c.bf16 %v1192_v1, %v1191_v31 }
  0xe5   : > { %4840 = vmatmul.mubr.msk.bf16.gmra.mrb[8].mxu0 %vm737_vm11, %v6202_v48 }
  0xe6   : > { %4843 = vmatprep.mubr.msk.bf16.mxu0 %vm737_vm11, %v6204_v20 }
  0xed   : > { %4844 = vmatmul.mubr.msk.bf16.gmra.mrb[12].mxu0 %vm737_vm11, %v6210_v23 }
  0xee   : > { %4847 = vmatprep.mubr.msk.bf16.mxu0 %vm737_vm11, %v6212_v2 }
  0xf5   : > { %4848 = vmatmul.mubr.msk.bf16.gmra.mrb[16].mxu0 %vm737_vm11, %v6218_v46 }
  0xf6   : > { %4859 = vmatprep.mubr.msk.bf16.mxu0 %vm737_vm11, %v1193_v54  ;;  %v2106_v54 = vld [vmem:[%s7569_s1 + $0x10] sm:$0xff] }
  0xfd   : > { %4860 = vmatmul.mubr.msk.bf16.vlgmr.msra.gmra.mrb[0].mxu0 %vm737_vm11, %v6223_v47 }
  0xfe   : > { %4880 = vmatpush3.bf16.msra.mxu0 %v5363_v13  ;;  %4863 = vmatprep.mubr.msk.bf16.mxu0 %vm737_vm11, %v6228_v49  ;;  %v2111_v13 = vld [vmem:[%s7569_s1 + $0x38] sm:$0xff] }
  0xff   : > { %4881 = vmatprep.subr.bf16.mxu0 %v5364_v38  ;;  %2161 = vperm.xlu1 %5349, %v2111_v13  }
 0x102   : > { %4882 = vmatpush3.bf16.msra.mxu0 %v5364_v38  ;;  %v1428_v38 = vpack.c.bf16 %v1418_v7, %v1417_v35 }
 0x103   : > { %4883 = vmatprep.subr.bf16.mxu0 %v5365_v27  ;;  %2166 = vperm.xlu1 %5349, %v2112_v10  }
 0x105   : > { %4864 = vmatmul.mubr.msk.bf16.gmra.mrb[4].mxu0 %vm737_vm11, %v6237_v14 }
 0x106   : > { %4867 = vmatprep.mubr.msk.bf16.mxu0 %vm737_vm11, %v6242_v59  ;;  %4884 = vmatpush3.bf16.msra.mxu0 %v5365_v27 }
 0x107   : > { %4885 = vmatprep.subr.bf16.mxu0 %v5366_v62  ;;  %2176 = vperm.xlu1 %5349, %v2114_v22  }
 0x10a   : > { %4886 = vmatpush3.bf16.msra.mxu0 %v5366_v62 }
 0x10b   : > { %4907 = vmatprep.subr.bf16.mxu0 %v5367_v5  ;;  %2186 = vperm.xlu1 %5349, %v2116_v25  }
 0x10d   : > { %4868 = vmatmul.mubr.msk.bf16.gmra.mrb[8].mxu0 %vm737_vm11, %v6251_v52 }
 0x10e   : > { %4871 = vmatprep.mubr.msk.bf16.mxu0 %vm737_vm11, %v6253_v19 }
 0x10f   : > { %2196 = vperm.xlu1 %5349, %v2118_v29  }
 0x113   : > { %2206 = vperm.xlu1 %5349, %v2120_v43  }
 0x115   : > { %4872 = vmatmul.mubr.msk.bf16.gmra.mrb[12].mxu0 %vm737_vm11, %v6259_v61 }
 0x116   : > { %4875 = vmatprep.mubr.msk.bf16.mxu0 %vm737_vm11, %v6261_v0 }
 0x117   : > { %2131 = vperm.xlu1 %5349, %v2105_v34  }
 0x11d   : > { %4876 = vmatmul.mubr.msk.bf16.gmra.mrb[16].mxu0 %vm737_vm11, %v6279_v56 }
 0x11e   : > { %4887 = vmatprep.mubr.msk.bf16.mxu0 %vm737_vm11, %v6173_v50  ;;  %v2119_v50 = vld [vmem:[%s7569_s1 + $0x78] sm:$0xff] }
 0x11f   : > { %2201 = vperm.xlu0 %5350, %v2119_v50  }
 0x125   : > { %4888 = vmatmul.mubr.msk.bf16.vlgmr.msra.gmra.mrb[0].mxu0 %vm737_vm11, %v6178_v11  ;;  %v2104_v11 = vld [vmem:[%s7569_s1] sm:$0xff] }
 0x126   : > { %4908 = vmatpush3.bf16.msra.mxu0 %v5367_v5  ;;  %4891 = vmatprep.mubr.msk.bf16.mxu0 %vm737_vm11, %v6188_v12  ;;  %v5370_v12 = vld [vmem:[%s7571_s3 + $0x98] sm:$0xff]   ;;  %v6409_v5 = vld [vmem:[%s7572_s4] ss:$0 sm:$0xff] }
 0x127   : > { %4909 = vmatprep.subr.bf16.mxu0 %v5368_v44  ;;  %2126 = vperm.xlu0 %5350, %v2104_v11  }
 0x12a   : > { %4910 = vmatpush3.bf16.msra.mxu0 %v5368_v44 }
 0x12b   : > { %4911 = vmatprep.subr.bf16.mxu0 %v5369_v26  ;;  %2136 = vperm.xlu0 %5350, %v2106_v54  }
 0x12d   : > { %4892 = vmatmul.mubr.msk.bf16.gmra.mrb[4].mxu0 %vm737_vm11, %v6193_v24  ;;  %v2108_v24 = vld [vmem:[%s7569_s1 + $0x20] sm:$0xff] }
 0x12e   : > { %4895 = vmatprep.mubr.msk.bf16.mxu0 %vm737_vm11, %v6202_v48  ;;  %4912 = vmatpush3.bf16.msra.mxu0 %v5369_v26  ;;  %v2107_v48 = vld [vmem:[%s7569_s1 + $0x18] sm:$0xff] }
 0x12f   : > { %4913 = vmatprep.subr.bf16.mxu0 %v5370_v12  ;;  %2146 = vperm.xlu0 %5350, %v2108_v24  }
 0x130   : > { %2141 = vperm.xlu1 %5349, %v2107_v48  }
 0x132   : > { %4914 = vmatpush3.bf16.msra.mxu0 %v5370_v12 }
 0x133   : > { %4935 = vmatprep.subr.bf16.mxu0 %v5371_v32 }
 0x135   : > { %4896 = vmatmul.mubr.msk.bf16.gmra.mrb[8].mxu0 %vm737_vm11, %v6204_v20  ;;  %v5372_v20 = vld [vmem:[%s7571_s3 + $0xa8] sm:$0xff]  }
 0x136   : > { %4899 = vmatprep.mubr.msk.bf16.mxu0 %vm737_vm11, %v6210_v23  ;;  %v5373_v23 = vld [vmem:[%s7571_s3 + $0xb0] sm:$0xff]  }
 0x13d   : > { %4900 = vmatmul.mubr.msk.bf16.gmra.mrb[12].mxu0 %vm737_vm11, %v6212_v2  ;;  %v2157_v2 = vpop.permute.xlu0 %2156 }
 0x13e   : > { %4903 = vmatprep.mubr.msk.bf16.mxu0 %vm737_vm11, %v6218_v46 }
 0x145   : > { %4904 = vmatmul.mubr.msk.bf16.gmra.mrb[16].mxu0 %vm737_vm11, %v1428_v38 }
 0x146   : > { %4915 = vmatprep.mubr.msk.bf16.mxu0 %vm737_vm11, %v6069_v6  ;;  %v5374_v6 = vld [vmem:[%s7571_s3 + $0xb8] sm:$0xff]  }
 0x14d   : > { %4916 = vmatmul.mubr.msk.bf16.vlgmr.msra.gmra.mrb[0].mxu0 %vm737_vm11, %v6088_v37  ;;  %v1644_v37 = vld [vmem:[#allocation2 + $0xa9] sm:$0xff] }
 0x14e   : > { %4936 = vmatpush3.bf16.msra.mxu0 %v5371_v32  ;;  %4919 = vmatprep.mubr.msk.bf16.mxu0 %vm737_vm11, %v6103_v58  ;;  %v1643_v58 = vld [vmem:[#allocation2 + $0xa1] sm:$0xff] }
 0x14f   : > { %4937 = vmatprep.subr.bf16.mxu0 %v5372_v20 }
 0x152   : > { %4938 = vmatpush3.bf16.msra.mxu0 %v5372_v20 }
 0x153   : > { %4939 = vmatprep.subr.bf16.mxu0 %v5373_v23 }
 0x155   : > { %4920 = vmatmul.mubr.msk.bf16.gmra.mrb[4].mxu0 %vm737_vm11, %v6118_v3  ;;  %v1654_v3 = vpack.c.bf16 %v1644_v37, %v1643_v58 }
 0x156   : > { %4923 = vmatprep.mubr.msk.bf16.mxu0 %vm737_vm11, %v6135_v33  ;;  %4940 = vmatpush3.bf16.msra.mxu0 %v5373_v23  ;;  %v1870_v33 = vld [vmem:[#allocation2 + $0xaa] sm:$0xff] }
 0x157   : > { %4941 = vmatprep.subr.bf16.mxu0 %v5374_v6 }
 0x15a   : > { %4942 = vmatpush3.bf16.msra.mxu0 %v5374_v6 }
 0x15d   : > { %4924 = vmatmul.mubr.msk.bf16.gmra.mrb[8].mxu0 %vm737_vm11, %v6148_v36  ;;  %v1869_v36 = vld [vmem:[#allocation2 + $0xa2] sm:$0xff] }
 0x15e   : > { %4927 = vmatprep.mubr.msk.bf16.mxu0 %vm737_vm11, %v6158_v28  ;;  %v1880_v28 = vpack.c.bf16 %v1870_v33, %v1869_v36 }
 0x165   : > { %4928 = vmatmul.mubr.msk.bf16.gmra.mrb[12].mxu0 %vm737_vm11, %v6164_v63  ;;  %v2152_v63 = vpop.permute.xlu1 %2151 }
 0x166   : > { %4931 = vmatprep.mubr.msk.bf16.mxu0 %vm737_vm11, %v6168_v51 }
 0x16d   : > { %4932 = vmatmul.mubr.msk.bf16.gmra.mrb[16].mxu0 %vm737_vm11, %v1654_v3 }
 0x16e   : > { %4943 = vmatprep.mubr.msk.bf16.mxu0 %vm737_vm11, %v6223_v47  ;;  %v2172_v47 = vpop.permute.xlu0 %2171 }
 0x172   : > { %v2182_v27 = vpop.permute.xlu0 %2181 }
 0x175   : > { %4944 = vmatmul.mubr.msk.bf16.vlgmr.msra.gmra.mrb[0].mxu0 %vm737_vm11, %v6228_v49 }
 0x176   : > { %4947 = vmatprep.mubr.msk.bf16.mxu0 %vm737_vm11, %v6237_v14  ;;  %v6402_v62 = vpop.permute.xlu0 %2191 }
 0x17d   : > { %4948 = vmatmul.mubr.msk.bf16.gmra.mrb[4].mxu0 %vm737_vm11, %v6242_v59 }
 0x17e   : > { %4951 = vmatprep.mubr.msk.bf16.mxu0 %vm737_vm11, %v6251_v52  ;;  %v2162_v51 = vpop.permute.xlu1 %2161 }
 0x182   : > { %v2167_v46 = vpop.permute.xlu1 %2166 }
 0x185   : > { %4952 = vmatmul.mubr.msk.bf16.gmra.mrb[8].mxu0 %vm737_vm11, %v6253_v19 }
 0x186   : > { %4955 = vmatprep.mubr.msk.bf16.mxu0 %vm737_vm11, %v6259_v61  ;;  %v2177_v49 = vpop.permute.xlu1 %2176 }
 0x18a   : > { %v6400_v55 = vpop.permute.xlu1 %2186 }
 0x18d   : > { %4956 = vmatmul.mubr.msk.bf16.gmra.mrb[12].mxu0 %vm737_vm11, %v6261_v0 }
 0x18e   : > { %4959 = vmatprep.mubr.msk.bf16.mxu0 %vm737_vm11, %v6279_v56  ;;  %v6404_v59 = vpop.permute.xlu1 %2196 }
 0x192   : > { %v6419_v30 = vpop.permute.xlu1 %2206 }
 0x195   : > { %4960 = vmatmul.mubr.msk.bf16.gmra.mrb[16].mxu0 %vm737_vm11, %v1880_v28 }
 0x196   : > { %v2132_v39 = vpop.permute.xlu1 %2131 }
 0x19e   : > { %v6414_v52 = vpop.permute.xlu0 %2201 }
 0x1a6   : > { %v2127_v18 = vpop.permute.xlu0 %2126 }
 0x1aa   : > { %v2137_v34 = vpop.permute.xlu0 %2136 }
 0x1af   : > { %v2142_v37 = vpop.permute.xlu1 %2141 }
 0x248   : > { %v4945_v41 = vpop.f32.mrb[0].mxu0 }
 0x249   : > { %v1978_v42 = vpop.f32.mrb[1].mxu0  ;;  %v2086_v54 = vadd.f32 %v4945_v41, %v6409_v5 }
 0x24a   : > { %v4946_v14 = vpop.f32.mrb[2].mxu0  ;;  %v2084_v22 = vadd.f32 %v6409_v5, %v1978_v42 }
 0x24b   : > { %v1981_v8 = vpop.f32.mrb[3].mxu0  ;;  %v2087_v20 = vadd.f32 %v4946_v14, %v6409_v5  ;;  %v6462_v3 = vmul.f32 %v2137_v34, %v2086_v54 }
 0x24c   : > { %v6456_v38 = vmul.f32 %v2127_v18, %v2084_v22  ;;  %v2085_v6 = vadd.f32 %v6409_v5, %v1981_v8 }
 0x24e   : > { %v6476_v41 = vsub.f32 0.0, %v6456_v38  ;;  %v6478_v42 = vmul.f32 %v2132_v39, %v2085_v6 }
 0x250   : > { %v4949_v45 = vpop.f32.mrb[4].mxu0  ;;  %v6500_v22 = vsub.f32 0.0, %v6478_v42  ;;  %vm2385_vm1 = vcmp.gt.f32.partialorder %v6476_v41, 0.0 }
 0x251   : > { %v2090_v40 = vadd.f32 %v4949_v45, %v6409_v5  ;;  %v6412_v4 = vpop.f32.mrb[5].mxu0 }
 0x252   : > { %v4950_v16 = vpop.f32.mrb[6].mxu0 }
 0x253   : > { %v6416_v19 = vmul.f32 %v2157_v2, %v2090_v40  ;;  %v2091_v57 = vadd.f32 %v4950_v16, %v6409_v5  ;;  %v1997_v9 = vpop.f32.mrb[7].mxu0 }
 0x254   : > { %v2089_v61 = vadd.f32 %v6409_v5, %v1997_v9  ;;  %v6487_v9 = vsub.f32 0.0, %v6462_v3 }
 0x255   : > { %v6422_v17 = vmul.f32 %v2162_v51, %v2091_v57  ;;  %v6425_v0 = vsub.f32 0.0, %v6416_v19 }
 0x256   : > { %v6427_v53 = vmul.f32 %v2152_v63, %v2089_v61 }
 0x257   : > { %v2411_v60 = vmin.f32 %v6425_v0, 0.0  ;;  %v6434_v15 = vsub.f32 0.0, %v6422_v17  ;;  %vm2391_vm2 = vcmp.gt.f32.partialorder %v6425_v0, 0.0 }
 0x258   : > { %v4953_v1 = vpop.f32.mrb[8].mxu0  ;;  %v6431_v13 = vsub.f32 0.0, %v6427_v53 }
 0x259   : > { %v2094_v31 = vadd.f32 %v4953_v1, %v6409_v5  ;;  %v2010_v56 = vpop.f32.mrb[9].mxu0  ;;  %v2437_v10 = vmul.f32 1.442695, %v2411_v60  ;;  %v2412_v43 = vmin.f32 %v6434_v15, 0.0  ;;  %vm2392_vm4 = vcmp.gt.f32.partialorder %v6434_v15, 0.0 }
 0x25a   : > { %v2092_v21 = vadd.f32 %v6409_v5, %v2010_v56  ;;  %v4954_v44 = vpop.f32.mrb[10].mxu0  ;;  %v2410_v29 = vmin.f32 %v6431_v13, 0.0  ;;  %v2405_v56 = vmin.f32 %v6476_v41, 0.0  ;;  %vm2390_vm3 = vcmp.gt.f32.partialorder %v6431_v13, 0.0 }
 0x25b   : > { %v6439_v25 = vmul.f32 %v2177_v49, %v2094_v31  ;;  %v2095_v50 = vadd.f32 %v4954_v44, %v6409_v5  ;;  %v2013_v26 = vpop.f32.mrb[11].mxu0  ;;  %5491 = vpow2.f32 %v2437_v10  ;;  %v2439_v48 = vmul.f32 1.442695, %v2412_v43 }
 0x25c   : > { %v6443_v11 = vmul.f32 %v2167_v46, %v2092_v21  ;;  %v2093_v12 = vadd.f32 %v6409_v5, %v2013_v26  ;;  %v2435_v32 = vmul.f32 1.442695, %v2410_v29  ;;  %v6470_v46 = vmul.f32 %v2142_v37, %v2087_v20  ;;  %v2147_v20 = vpop.permute.xlu0 %2146 }
 0x25d   : > { %v6454_v7 = vsub.f32 0.0, %v6439_v25  ;;  %v6459_v23 = vmul.f32 %v2182_v27, %v2095_v50 }
 0x25e   : > { %v6448_v24 = vmul.f32 %v2172_v47, %v2093_v12  ;;  %v6451_v35 = vsub.f32 0.0, %v6443_v11  ;;  %5493 = vpow2.f32 %v2435_v32 }
 0x25f   : > { %5495 = vpow2.f32 %v2439_v48  ;;  %v2415_v2 = vmin.f32 %v6454_v7, 0.0  ;;  %v6473_v27 = vsub.f32 0.0, %v6459_v23  ;;  %vm2395_vm7 = vcmp.gt.f32.partialorder %v6454_v7, 0.0 }
 0x260   : > { %v4957_v58 = vpop.f32.mrb[12].mxu0  ;;  %v2413_v36 = vmin.f32 %v6451_v35, 0.0  ;;  %v6466_v28 = vsub.f32 0.0, %v6448_v24  ;;  %vm2393_vm5 = vcmp.gt.f32.partialorder %v6451_v35, 0.0 }
 0x261   : > { %v2026_v33 = vpop.f32.mrb[13].mxu0  ;;  %v2445_v45 = vmul.f32 1.442695, %v2415_v2  ;;  %v2098_v16 = vadd.f32 %v4957_v58, %v6409_v5  ;;  %v2416_v31 = vmin.f32 %v6473_v27, 0.0  ;;  %vm2396_vm8 = vcmp.gt.f32.partialorder %v6473_v27, 0.0 }
 0x262   : > { %v2096_v63 = vadd.f32 %v6409_v5, %v2026_v33  ;;  %v4958_v51 = vpop.f32.mrb[14].mxu0  ;;  %v2441_v49 = vmul.f32 1.442695, %v2413_v36  ;;  %v2414_v8 = vmin.f32 %v6466_v28, 0.0  ;;  %vm2394_vm6 = vcmp.gt.f32.partialorder %v6466_v28, 0.0 }
 0x263   : > { %v2029_v47 = vpop.f32.mrb[15].mxu0  ;;  %v2099_v61 = vadd.f32 %v4958_v51, %v6409_v5  ;;  %v6503_v21 = vmul.f32 %v6404_v59, %v2098_v16  ;;  %v2447_v26 = vmul.f32 1.442695, %v2416_v31  ;;  %v2407_v51 = vmin.f32 %v6487_v9, 0.0 }
 0x264   : > { %v2097_v14 = vadd.f32 %v6409_v5, %v2029_v47  ;;  %v6484_v57 = vmul.f32 %v6400_v55, %v2096_v63  ;;  %5497 = vpow2.f32 %v2441_v49  ;;  %v2443_v1 = vmul.f32 1.442695, %v2414_v8 }
 0x265   : > { %v5492_v40 = vpop.eup %5491  ;;  %5499 = vpow2.f32 %v2445_v45  ;;  %v2088_v55 = vadd.f32 %v6409_v5, %v6412_v4  ;;  %v6534_v36 = vsub.f32 0.0, %v6503_v21  ;;  %v2425_v63 = vmul.f32 1.442695, %v2405_v56 }
 0x266   : > { %v6491_v60 = vmul.f32 %v6402_v62, %v2097_v14  ;;  %v4481_v18 = vadd.f32 -1.0, %v5492_v40  ;;  %5501 = vpow2.f32 %v2443_v1  ;;  %v6510_v4 = vsub.f32 0.0, %v6484_v57 }
 0x267   : > { %5503 = vpow2.f32 %v2447_v26  ;;  %v6546_v49 = vmul.f32 %v2147_v20, %v2088_v55  ;;  %v2419_v8 = vmin.f32 %v6534_v36, 0.0  ;;  %v2406_v16 = vmin.f32 %v6500_v22, 0.0 }
 0x268   : > { %v4961_v10 = vpop.f32.mrb[16].mxu0  ;;  %v2491_v39 = vsel %vm2391_vm2, %v6425_v0, %v4481_v18  ;;  %v5494_v62 = vpop.eup %5493  ;;  %v6513_v0 = vmul.f32 %v6414_v52, %v2099_v61  ;;  %v6517_v59 = vsub.f32 0.0, %v6491_v60  ;;  %v2417_v58 = vmin.f32 %v6510_v4, 0.0 }
 0x269   : > { %v6506_v44 = vadd.f32 %v4961_v10, %v6409_v5  ;;  %2537 = vrot.lane.b32.xlu0 %v2491_v39, %s5651_s13  ;;  %v2042_v50 = vpop.f32.mrb[17].mxu0  ;;  %v5496_v29 = vpop.eup %5495  ;;  %v4480_v54 = vadd.f32 -1.0, %v5494_v62  ;;  %v2453_v18 = vmul.f32 1.442695, %v2419_v8  ;;  %v2429_v62 = vmul.f32 1.442695, %v2407_v51 }
 0x26a   : > { %v2100_v12 = vadd.f32 %v6409_v5, %v2042_v50  ;;  %v4962_v43 = vpop.f32.mrb[18].mxu0  ;;  %v4482_v48 = vadd.f32 -1.0, %v5496_v29  ;;  %v2418_v33 = vmin.f32 %v6517_v59, 0.0  ;;  %v2449_v2 = vmul.f32 1.442695, %v2417_v58 }
 0x26b   : > { %v6520_v32 = vadd.f32 %v4962_v43, %v6409_v5  ;;  %v2045_v34 = vpop.f32.mrb[19].mxu0  ;;  %v2490_v37 = vsel %vm2390_vm3, %v6431_v13, %v4480_v54  ;;  %v6544_v13 = vsub.f32 0.0, %v6470_v46  ;;  %v2427_v26 = vmul.f32 1.442695, %v2406_v16  ;;  %v5375_v54 = vld [vmem:[%s7573_s5 + $0x20] sm:$0xff]  }
 0x26c   : > { %v6524_v6 = vmul.f32 %v6419_v30, %v2100_v12  ;;  %v6527_v52 = vadd.f32 %v6409_v5, %v2045_v34  ;;  %2535 = vrot.lane.b32.xlu1 %v2490_v37, %s5651_s13  ;;  %v6538_v30 = vsub.f32 0.0, %v6513_v0  ;;  %v2451_v14 = vmul.f32 1.442695, %v2418_v33  ;;  %v5376_v33 = vld [vmem:[%s7573_s5 + $0x28] sm:$0xff]  }
 0x26d   : > { %v2492_v45 = vsel %vm2392_vm4, %v6434_v15, %v4482_v48  ;;  %5505 = vpow2.f32 %v2449_v2  ;;  %v2408_v29 = vmin.f32 %v6544_v13, 0.0  ;;  %v5653_v37 = vmov 0.0  }
 0x26e   : > { %v6541_v5 = vsub.f32 0.0, %v6524_v6  ;;  %v5498_v47 = vpop.eup %5497  ;;  %5507 = vpow2.f32 %v2451_v14  ;;  %v2420_v1 = vmin.f32 %v6538_v30, 0.0  ;;  %5227 = vmatprep.subr.bf16.mxu1 %v5653_v37  ;;  %2244 = vst.msk [vmem:[#allocation3] sm:$0xff] %vm737_vm11, %v5653_v37  ;;  %4963 = vmatprep.subr.bf16.mxu0 %v5653_v37  ;;  %vm2397_vm10 = vcmp.gt.f32.partialorder %v6510_v4, 0.0 }
 0x26f   : > { %v4483_v40 = vadd.f32 -1.0, %v5498_v47  ;;  %v5500_v61 = vpop.eup %5499  ;;  %5509 = vpow2.f32 %v2425_v63  ;;  %v2431_v20 = vmul.f32 1.442695, %v2408_v29  ;;  %5231 = vmatpush3.bf16.msra.mxu1 %v5375_v54  ;;  %4964 = vmatpush3.bf16.msra.mxu0 %v5375_v54  ;;  %vm2398_vm13 = vcmp.gt.f32.partialorder %v6517_v59, 0.0  ;;  %v2121_v54 = vld [vmem:[%s7569_s1 + $0x88] sm:$0xff]  ;;  %4196 = vst.msk [vmem:[%s7320_s15] sm:$0xff] %vm712_vm9, %v5653_v37 }
 0x270   : > { %2539 = vrot.lane.b32.xlu1 %v2492_v45, %s5651_s13  ;;  %v5502_v31 = vpop.eup %5501  ;;  %v4485_v55 = vadd.f32 -1.0, %v5500_v61  ;;  %v2421_v10 = vmin.f32 %v6541_v5, 0.0  ;;  %5511 = vpow2.f32 %v2453_v18  ;;  %v2455_v39 = vmul.f32 1.442695, %v2420_v1  ;;  %5228 = vmatprep.subr.bf16.mxu1 %v5653_v37  ;;  %v5377_v45 = vld [vmem:[%s7573_s5 + $0x30] sm:$0xff]   ;;  %4197 = vst.msk [vmem:[%s7320_s15 + $0x8] sm:$0xff] %vm712_vm9, %v5653_v37 }
 0x271   : > { %v2493_v56 = vsel %vm2393_vm5, %v6451_v35, %v4483_v40  ;;  %v4484_v15 = vadd.f32 -1.0, %v5502_v31  ;;  %v5504_v12 = vpop.eup %5503  ;;  %v6563_v35 = vsub.f32 0.0, %v6546_v49  ;;  %4965 = vmatprep.subr.bf16.mxu0 %v5653_v37  ;;  %4983 = vmatprep.mubr.msk.bf16.mxu1 %vm5654_vm12, %v5653_v37  ;;  %vm2399_vm14 = vcmp.gt.f32.partialorder %v6534_v36, 0.0  ;;  %4198 = vst.msk [vmem:[%s7320_s15 + $0x10] sm:$0xff] %vm712_vm9, %v5653_v37  ;;  %4199 = vst.msk [vmem:[%s7320_s15 + $0x18] sm:$0xff] %vm712_vm9, %v5653_v37 }
 0x272   : > { %2541 = vrot.lane.b32.xlu0 %v2493_v56, %s5651_s13  ;;  %v2457_v50 = vmul.f32 1.442695, %v2421_v10  ;;  %5513 = vpow2.f32 %v2455_v39  ;;  %v2495_v34 = vsel %vm2395_vm7, %v6454_v7, %v4485_v55  ;;  %v4486_v48 = vadd.f32 -1.0, %v5504_v12  ;;  %4971 = vmatprep.mubr.msk.bf16.mxu0 %vm5654_vm12, %v5653_v37  ;;  %4217 = vst.msk [vmem:[%s7320_s15 + $0xa8] sm:$0xff] %vm712_vm9, %v5653_v37  ;;  %4218 = vst.msk [vmem:[%s7320_s15 + $0xb0] sm:$0xff] %vm712_vm9, %v5653_v37 }
 0x273   : > { %v2494_v43 = vsel %vm2394_vm6, %v6466_v28, %v4484_v15  ;;  %v2409_v28 = vmin.f32 %v6563_v35, 0.0  ;;  %5232 = vmatpush3.bf16.msra.mxu1 %v5376_v33  ;;  %4966 = vmatpush3.bf16.msra.mxu0 %v5376_v33  ;;  %vm2400_vm15 = vcmp.gt.f32.partialorder %v6538_v30, 0.0  ;;  %vm2401_vm0 = vcmp.gt.f32.partialorder %v6541_v5, 0.0  ;;  %4219 = vst.msk [vmem:[%s7320_s15 + $0xb8] sm:$0xff] %vm712_vm9, %v5653_v37 }
 0x274   : > { %2543 = vrot.lane.b32.xlu1 %v2494_v43, %s5651_s13  ;;  %5515 = vpow2.f32 %v2457_v50  ;;  %v2496_v7 = vsel %vm2396_vm8, %v6473_v27, %v4486_v48  ;;  %5229 = vmatprep.subr.bf16.mxu1 %v5653_v37  ;;  %vm2386_vm2 = vcmp.gt.f32.partialorder %v6500_v22, 0.0  ;;  %vm2387_vm3 = vcmp.gt.f32.partialorder %v6487_v9, 0.0 }
 0x275   : > { %5517 = vpow2.f32 %v2427_v26  ;;  %v2433_v58 = vmul.f32 1.442695, %v2409_v28  ;;  %4967 = vmatprep.subr.bf16.mxu0 %v5653_v37  ;;  %vm2388_vm4 = vcmp.gt.f32.partialorder %v6544_v13, 0.0  ;;  %vm2389_vm5 = vcmp.gt.f32.partialorder %v6563_v35, 0.0 }
 0x276   : > { %2545 = vrot.lane.b32.xlu0 %v2495_v34, %s5651_s13  ;;  %5519 = vpow2.f32 %v2429_v62  ;;  %v2270_v48 = vmin.f32 %v6427_v53, 0.0  ;;  %v2272_v28 = vmin.f32 %v6422_v17, 0.0  ;;  %v2275_v33 = vmin.f32 %v6439_v25, 0.0 }
 0x277   : > { %v5506_v63 = vpop.eup %5505  ;;  %5521 = vpow2.f32 %v2431_v20  ;;  %5233 = vmatpush3.bf16.msra.mxu1 %v5377_v45  ;;  %4968 = vmatpush3.bf16.msra.mxu0 %v5377_v45  ;;  %v2273_v20 = vmin.f32 %v6443_v11, 0.0  ;;  %vm2251_vm6 = vcmp.gt.f32.partialorder %v6416_v19, 0.0  ;;  %vm2250_vm7 = vcmp.gt.f32.partialorder %v6427_v53, 0.0 }
 0x278   : > { %2547 = vrot.lane.b32.xlu1 %v2496_v7, %s5651_s13  ;;  %v5508_v51 = vpop.eup %5507  ;;  %v4487_v2 = vadd.f32 -1.0, %v5506_v63  ;;  %5523 = vpow2.f32 %v2433_v58  ;;  %5230 = vmatprep.subr.bf16.mxu1 %v5653_v37  ;;  %v2299_v7 = vmul.f32 1.442695, %v2272_v28  ;;  %v2274_v58 = vmin.f32 %v6448_v24, 0.0 }
 0x279   : > { %v5510_v47 = vpop.eup %5509  ;;  %v4488_v27 = vadd.f32 -1.0, %v5508_v51  ;;  %4969 = vmatprep.subr.bf16.mxu0 %v5653_v37  ;;  %v2301_v63 = vmul.f32 1.442695, %v2273_v20  ;;  %v2276_v51 = vmin.f32 %v6459_v23, 0.0  ;;  %vm2252_vm8 = vcmp.gt.f32.partialorder %v6422_v17, 0.0 }
 0x27a   : > { %v5512_v14 = vpop.eup %5511  ;;  %v2497_v8 = vsel %vm2397_vm10, %v6510_v4, %v4487_v2  ;;  %v4475_v10 = vadd.f32 -1.0, %v5510_v47  ;;  %v2303_v2 = vmul.f32 1.442695, %v2274_v58  ;;  %vm2253_vm10 = vcmp.gt.f32.partialorder %v6443_v11, 0.0 }
 0x27b   : > { %2549 = vrot.lane.b32.xlu0 %v2497_v8, %s5651_s13  ;;  %v2498_v40 = vsel %vm2398_vm13, %v6517_v59, %v4488_v27  ;;  %v4489_v16 = vadd.f32 -1.0, %v5512_v14  ;;  %v5378_v59 = vld [vmem:[%s7573_s5 + $0x38] sm:$0xff]   ;;  %v2305_v27 = vmul.f32 1.442695, %v2275_v33  ;;  %v2307_v14 = vmul.f32 1.442695, %v2276_v51 }
 0x27c   : > { %v5514_v61 = vpop.eup %5513  ;;  %2551 = vrot.lane.b32.xlu1 %v2498_v40, %s5651_s13  ;;  %5234 = vmatpush3.bf16.msra.mxu1 %v5378_v59  ;;  %v2277_v8 = vmin.f32 %v6484_v57, 0.0  ;;  %v2268_v33 = vmin.f32 %v6470_v46, 0.0  ;;  %v2269_v51 = vmin.f32 %v6546_v49, 0.0  ;;  %vm2254_vm13 = vcmp.gt.f32.partialorder %v6448_v24, 0.0 }
 0x27d   : > { %v4490_v18 = vadd.f32 -1.0, %v5514_v61  ;;  %v2499_v1 = vsel %vm2399_vm14, %v6534_v36, %v4489_v16  ;;  %4970 = vmatpush3.bf16.msra.mxu0 %v5378_v59  ;;  %5007 = vmatprep.subr.bf16.mxu1 %v5653_v37  ;;  %v2278_v16 = vmin.f32 %v6491_v60, 0.0  ;;  %v2279_v61 = vmin.f32 %v6503_v21, 0.0 }
 0x27e   : > { %v5516_v4 = vpop.eup %5515  ;;  %5139 = vmatprep.subr.bf16.mxu0 %v5653_v37  ;;  %vm2255_vm14 = vcmp.gt.f32.partialorder %v6439_v25, 0.0 }
 0x27f   : > { %v4491_v31 = vadd.f32 -1.0, %v5516_v4  ;;  %v5518_v56 = vpop.eup %5517  ;;  %2553 = vrot.lane.b32.xlu0 %v2499_v1, %s5651_s13  ;;  %v2500_v55 = vsel %vm2400_vm15, %v6538_v30, %v4490_v18  ;;  %v2485_v30 = vsel %vm2385_vm1, %v6476_v41, %v4475_v10  ;;  %v2309_v4 = vmul.f32 1.442695, %v2277_v8 }
 0x280   : > { %v5520_v36 = vpop.eup %5519  ;;  %2555 = vrot.lane.b32.xlu1 %v2500_v55, %s5651_s13  ;;  %v4476_v39 = vadd.f32 -1.0, %v5518_v56  ;;  %v2280_v56 = vmin.f32 %v6513_v0, 0.0  ;;  %v2311_v55 = vmul.f32 1.442695, %v2278_v16  ;;  %vm2256_vm15 = vcmp.gt.f32.partialorder %v6459_v23, 0.0 }
 0x281   : > { %v2501_v15 = vsel %vm2401_vm0, %v6541_v5, %v4491_v31  ;;  %v5522_v62 = vpop.eup %5521  ;;  %v4477_v50 = vadd.f32 -1.0, %v5520_v36  ;;  %vm2257_vm0 = vcmp.gt.f32.partialorder %v6484_v57, 0.0  ;;  %vm2258_vm1 = vcmp.gt.f32.partialorder %v6491_v60, 0.0 }
 0x282   : > { %v5524_v26 = vpop.eup %5523  ;;  %v2486_v5 = vsel %vm2386_vm2, %v6500_v22, %v4476_v39  ;;  %v4478_v29 = vadd.f32 -1.0, %v5522_v62  ;;  %v2313_v39 = vmul.f32 1.442695, %v2279_v61  ;;  %v2281_v62 = vmin.f32 %v6524_v6, 0.0 }
 0x283   : > { %2557 = vrot.lane.b32.xlu0 %v2501_v15, %s5651_s13  ;;  %v2487_v12 = vsel %vm2387_vm3, %v6487_v9, %v4477_v50  ;;  %v4479_v41 = vadd.f32 -1.0, %v5524_v26  ;;  %v2122_v9 = vld [vmem:[%s7569_s1 + $0x90] sm:$0xff]  ;;  %v2265_v15 = vmin.f32 %v6456_v38, 0.0  ;;  %v2315_v26 = vmul.f32 1.442695, %v2280_v56 }
 0x284   : > { %2525 = vrot.lane.b32.xlu1 %v2485_v30, %s5651_s13  ;;  %v2488_v43 = vsel %vm2388_vm4, %v6544_v13, %v4478_v29  ;;  %v2271_v13 = vmin.f32 %v6416_v19, 0.0  ;;  %v2291_v61 = vmul.f32 1.442695, %v2268_v33  ;;  %vm2259_vm2 = vcmp.gt.f32.partialorder %v6503_v21, 0.0  ;;  %v5384_v33 = vld [vmem:[%s7573_s5 + $0x18] sm:$0xff]  }
 0x285   : > { %v2489_v22 = vsel %vm2389_vm5, %v6563_v35, %v4479_v41  ;;  %v2295_v35 = vmul.f32 1.442695, %v2270_v48  ;;  %vm2260_vm3 = vcmp.gt.f32.partialorder %v6513_v0, 0.0  ;;  %vm2261_vm4 = vcmp.gt.f32.partialorder %v6524_v6, 0.0 }
 0x286   : > { %v2297_v34 = vmul.f32 1.442695, %v2271_v13  ;;  %vm2245_vm5 = vcmp.gt.f32.partialorder %v6456_v38, 0.0 }
 0x287   : > { %2527 = vrot.lane.b32.xlu0 %v2486_v5, %s5651_s13 }
 0x288   : > { %2529 = vrot.lane.b32.xlu1 %v2487_v12, %s5651_s13  ;;  %5525 = vpow2.f32 %v2297_v34 }
 0x289   : > { %5527 = vpow2.f32 %v2295_v35 }
 0x28a   : > { %5529 = vpow2.f32 %v2299_v7 }
 0x28b   : > { %2531 = vrot.lane.b32.xlu0 %v2488_v43, %s5651_s13  ;;  %5531 = vpow2.f32 %v2301_v63  ;;  %v2285_v43 = vmul.f32 1.442695, %v2265_v15 }
 0x28c   : > { %2533 = vrot.lane.b32.xlu1 %v2489_v22, %s5651_s13  ;;  %5533 = vpow2.f32 %v2303_v2  ;;  %v2267_v22 = vmin.f32 %v6462_v3, 0.0 }
 0x28d   : > { %5535 = vpow2.f32 %v2305_v27 }
 0x28e   : > { %5537 = vpow2.f32 %v2307_v14  ;;  %v2289_v58 = vmul.f32 1.442695, %v2267_v22 }
 0x28f   : > { %2211 = vperm.xlu0 %5350, %v2121_v54   ;;  %5539 = vpow2.f32 %v2309_v4  ;;  %v2266_v54 = vmin.f32 %v6478_v42, 0.0 }
 0x290   : > { %2216 = vperm.xlu1 %5349, %v2122_v9   ;;  %5541 = vpow2.f32 %v2311_v55  ;;  %v2317_v9 = vmul.f32 1.442695, %v2281_v62 }
 0x291   : > { %5543 = vpow2.f32 %v2313_v39  ;;  %v2287_v63 = vmul.f32 1.442695, %v2266_v54 }
 0x292   : > { %v5526_v47 = vpop.eup %5525  ;;  %5545 = vpow2.f32 %v2315_v26 }
 0x293   : > { %v4461_v45 = vadd.f32 -1.0, %v5526_v47  ;;  %v5528_v40 = vpop.eup %5527  ;;  %5547 = vpow2.f32 %v2317_v9  ;;  %v5381_v9 = vld [vmem:[%s7573_s5 + $0x10] sm:$0xff]  }
 0x294   : > { %v4460_v31 = vadd.f32 -1.0, %v5528_v40  ;;  %v5530_v59 = vpop.eup %5529  ;;  %5549 = vpow2.f32 %v2285_v43 }
 0x295   : > { %v2351_v1 = vsel %vm2251_vm6, %v6416_v19, %v4461_v45  ;;  %v5532_v36 = vpop.eup %5531  ;;  %v4462_v50 = vadd.f32 -1.0, %v5530_v59  ;;  %5551 = vpow2.f32 %v2287_v63  ;;  %v5379_v59 = vld [vmem:[%s7573_s5] sm:$0xff]   ;;  %vm2246_vm6 = vcmp.gt.f32.partialorder %v6478_v42, 0.0 }
 0x296   : > { %v2350_v19 = vsel %vm2250_vm7, %v6427_v53, %v4460_v31  ;;  %v5534_v29 = vpop.eup %5533  ;;  %v4463_v12 = vadd.f32 -1.0, %v5532_v36  ;;  %5553 = vpow2.f32 %v2289_v58  ;;  %vm2247_vm7 = vcmp.gt.f32.partialorder %v6462_v3, 0.0 }
 0x297   : > { %v5536_v41 = vpop.eup %5535  ;;  %v2352_v53 = vsel %vm2252_vm8, %v6422_v17, %v4462_v50  ;;  %v4464_v48 = vadd.f32 -1.0, %v5534_v29  ;;  %5555 = vpow2.f32 %v2291_v61  ;;  %vm2248_vm8 = vcmp.gt.f32.partialorder %v6470_v46, 0.0 }
 0x298   : > { %v5538_v28 = vpop.eup %5537  ;;  %v2353_v20 = vsel %vm2253_vm10, %v6443_v11, %v4463_v12  ;;  %v4465_v7 = vadd.f32 -1.0, %v5536_v41  ;;  %vm2249_vm10 = vcmp.gt.f32.partialorder %v6546_v49, 0.0 }
 0x299   : > { %v2354_v47 = vsel %vm2254_vm13, %v6448_v24, %v4464_v48  ;;  %v4466_v11 = vadd.f32 -1.0, %v5538_v28  ;;  %v5540_v27 = vpop.eup %5539  ;;  %v2293_v24 = vmul.f32 1.442695, %v2269_v51 }
 0x29a   : > { %v2355_v8 = vsel %vm2255_vm14, %v6439_v25, %v4465_v7  ;;  %v5542_v40 = vpop.eup %5541 }
 0x29b   : > { %v2356_v4 = vsel %vm2256_vm15, %v6459_v23, %v4466_v11  ;;  %v5544_v56 = vpop.eup %5543  ;;  %v4468_v36 = vadd.f32 -1.0, %v5542_v40  ;;  %5557 = vpow2.f32 %v2293_v24 }
 0x29c   : > { %v5546_v15 = vpop.eup %5545  ;;  %v4469_v62 = vadd.f32 -1.0, %v5544_v56 }
 0x29d   : > { %v4470_v29 = vadd.f32 -1.0, %v5546_v15 }
 0x29e   : > { %v2359_v43 = vsel %vm2259_vm2, %v6503_v21, %v4469_v62 }
 0x2db   : > { %v2538_v18 = vpop.permute.xlu0 %2537 }
 0x2dc   : > { %v2591_v10 = vsel %vm712_vm9, %v2351_v1, %v2538_v18  ;;  %v4467_v1 = vadd.f32 -1.0, %v5540_v27 }
 0x2dd   : > { %2611 = vst.msk [vmem:[#allocation3 + $0x38] sm:$0xff] %vm737_vm11, %v2591_v10 }
 0x2de   : > { %v2536_v30 = vpop.permute.xlu1 %2535  ;;  %v2357_v39 = vsel %vm2257_vm0, %v6484_v57, %v4467_v1 }
 0x2df   : > { %v2590_v5 = vsel %vm712_vm9, %v2350_v19, %v2536_v30  ;;  %v5380_v30 = vld [vmem:[%s7573_s5 + $0x8] sm:$0xff]   ;;  %v5548_v19 = vpop.eup %5547 }
 0x2e0   : > { %2610 = vst.msk [vmem:[#allocation3 + $0x30] sm:$0xff] %vm737_vm11, %v2590_v5  ;;  %v2358_v5 = vsel %vm2258_vm1, %v6491_v60, %v4468_v36  ;;  %v5550_v57 = vpop.eup %5549  ;;  %v4471_v54 = vadd.f32 -1.0, %v5548_v19 }
 0x2e2   : > { %v2540_v13 = vpop.permute.xlu1 %2539 }
 0x2e3   : > { %v2592_v34 = vsel %vm712_vm9, %v2352_v53, %v2540_v13  ;;  %v5552_v53 = vpop.eup %5551 }
 0x2e4   : > { %2612 = vst.msk [vmem:[#allocation3 + $0x40] sm:$0xff] %vm737_vm11, %v2592_v34  ;;  %v2542_v35 = vpop.permute.xlu0 %2541  ;;  %v2360_v34 = vsel %vm2260_vm3, %v6513_v0, %v4470_v29  ;;  %v5554_v21 = vpop.eup %5553  ;;  %v2361_v0 = vsel %vm2261_vm4, %v6524_v6, %v4471_v54  ;;  %v4456_v58 = vadd.f32 -1.0, %v5552_v53  ;;  %v5385_v29 = vld [vmem:[%s7573_s5 + $0x90] sm:$0xff]  }
 0x2e5   : > { %v2593_v17 = vsel %vm712_vm9, %v2353_v20, %v2542_v35  ;;  %v4455_v35 = vadd.f32 -1.0, %v5550_v57 }
 0x2e6   : > { %2613 = vst.msk [vmem:[#allocation3 + $0x48] sm:$0xff] %vm737_vm11, %v2593_v17  ;;  %v2544_v2 = vpop.permute.xlu1 %2543  ;;  %v5556_v17 = vpop.eup %5555 }
 0x2e7   : > { %v2594_v14 = vsel %vm712_vm9, %v2354_v47, %v2544_v2  ;;  %v2665_v31 = vld [vmem:[#allocation3 + $0x37] sm:$0xff]  ;;  %v2345_v51 = vsel %vm2245_vm5, %v6456_v38, %v4455_v35  ;;  %v4457_v47 = vadd.f32 -1.0, %v5554_v21  ;;  %v5558_v6 = vpop.eup %5557  ;;  %v4458_v38 = vadd.f32 -1.0, %v5556_v17 }
 0x2e8   : > { %v2546_v45 = vpop.permute.xlu0 %2545  ;;  %2614 = vst.msk [vmem:[#allocation3 + $0x50] sm:$0xff] %vm737_vm11, %v2594_v14  ;;  %v2346_v14 = vsel %vm2246_vm6, %v6478_v42, %v4456_v58 }
 0x2e9   : > { %v2595_v16 = vsel %vm712_vm9, %v2355_v8, %v2546_v45 }
 0x2ea   : > { %2615 = vst.msk [vmem:[#allocation3 + $0x58] sm:$0xff] %vm737_vm11, %v2595_v16  ;;  %v2548_v18 = vpop.permute.xlu1 %2547  ;;  %v2347_v16 = vsel %vm2247_vm7, %v6462_v3, %v4457_v47 }
 0x2eb   : > { %v2666_v25 = vld [vmem:[#allocation3 + $0x3f] sm:$0xff]  ;;  %v2596_v55 = vsel %vm712_vm9, %v2356_v4, %v2548_v18  ;;  %v4459_v4 = vadd.f32 -1.0, %v5558_v6  ;;  %v2348_v18 = vsel %vm2248_vm8, %v6470_v46, %v4458_v38 }
 0x2ec   : > { %v6683_v10 = vpack.c.bf16 %v2666_v25, %v2665_v31  ;;  %2616 = vst.msk [vmem:[#allocation3 + $0x60] sm:$0xff] %vm737_vm11, %v2596_v55 }
 0x2ed   : > { %v2550_v23 = vpop.permute.xlu0 %2549  ;;  %v2667_v60 = vld [vmem:[#allocation3 + $0x47] sm:$0xff]  ;;  %v2349_v31 = vsel %vm2249_vm10, %v6546_v49, %v4459_v4 }
 0x2ee   : > { %4984 = vmatmul.mubr.msk.bf16.vlgmr.msra.gmra.mrb[0].mxu1 %vm737_vm11, %v6683_v10  ;;  %v2597_v50 = vsel %vm712_vm9, %v2357_v39, %v2550_v23  ;;  %v2552_v26 = vpop.permute.xlu1 %2551  ;;  %v5382_v23 = vld [vmem:[%s7573_s5 + $0x80] sm:$0xff]   ;;  %v5383_v49 = vld [vmem:[%s7573_s5 + $0x88] sm:$0xff]  }
 0x2ef   : > { %5008 = vmatpush3.bf16.msra.mxu1 %v5379_v59  ;;  %4987 = vmatprep.mubr.msk.bf16.mxu1 %vm5654_vm12, %v5653_v37  ;;  %2617 = vst.msk [vmem:[#allocation3 + $0x68] sm:$0xff] %vm737_vm11, %v2597_v50  ;;  %v2598_v12 = vsel %vm712_vm9, %v2358_v5, %v2552_v26  ;;  %v2668_v41 = vld [vmem:[#allocation3 + $0x4f] sm:$0xff] }
 0x2f0   : > { %5009 = vmatprep.subr.bf16.mxu1 %v5653_v37  ;;  %2618 = vst.msk [vmem:[#allocation3 + $0x70] sm:$0xff] %vm737_vm11, %v2598_v12  ;;  %v6710_v28 = vpack.c.bf16 %v2668_v41, %v2667_v60 }
 0x2f1   : > { %v2554_v22 = vpop.permute.xlu0 %2553  ;;  %v2669_v45 = vld [vmem:[#allocation3 + $0x57] sm:$0xff] }
 0x2f2   : > { %v2599_v13 = vsel %vm712_vm9, %v2359_v43, %v2554_v22  ;;  %v2556_v48 = vpop.permute.xlu1 %2555  ;;  %v5386_v43 = vld [vmem:[%s7573_s5 + $0x98] sm:$0xff]  }
 0x2f3   : > { %5010 = vmatpush3.bf16.msra.mxu1 %v5380_v30  ;;  %2619 = vst.msk [vmem:[#allocation3 + $0x78] sm:$0xff] %vm737_vm11, %v2599_v13  ;;  %v2600_v20 = vsel %vm712_vm9, %v2360_v34, %v2556_v48  ;;  %v2670_v27 = vld [vmem:[#allocation3 + $0x5f] sm:$0xff] }
 0x2f4   : > { %5011 = vmatprep.subr.bf16.mxu1 %v5653_v37  ;;  %2620 = vst.msk [vmem:[#allocation3 + $0x80] sm:$0xff] %vm737_vm11, %v2600_v20  ;;  %v6737_v24 = vpack.c.bf16 %v2670_v27, %v2669_v45  ;;  %v6772_v30 = vld [vmem:[%s5712_s29 + $0xb8] sm:$0xff] }
 0x2f5   : > { %v2558_v7 = vpop.permute.xlu0 %2557  ;;  %v6780_v57 = vsub.f32 0.0, %v6772_v30 }
 0x2f6   : > { %4988 = vmatmul.mubr.msk.bf16.gmra.mrb[4].mxu1 %vm737_vm11, %v6710_v28  ;;  %v2601_v63 = vsel %vm712_vm9, %v2361_v0, %v2558_v7  ;;  %v2526_v2 = vpop.permute.xlu1 %2525  ;;  %v2671_v46 = vld [vmem:[#allocation3 + $0x67] sm:$0xff] }
 0x2f7   : > { %4991 = vmatprep.mubr.msk.bf16.mxu1 %vm5654_vm12, %v5653_v37  ;;  %5012 = vmatpush3.bf16.msra.mxu1 %v5381_v9  ;;  %2621 = vst.msk [vmem:[#allocation3 + $0x88] sm:$0xff] %vm737_vm11, %v2601_v63  ;;  %v2585_v11 = vsel %vm712_vm9, %v2345_v51, %v2526_v2  ;;  %v2672_v56 = vld [vmem:[#allocation3 + $0x6f] sm:$0xff]  ;;  %v519_v22 = vmin.f32 %v6780_v57, 0.0  ;;  %v5387_v63 = vld [vmem:[%s7573_s5 + $0x40] sm:$0xff]   ;;  %vm495_vm15 = vcmp.gt.f32.partialorder %v6780_v57, 0.0 }
 0x2f8   : > { %5013 = vmatprep.subr.bf16.mxu1 %v5653_v37  ;;  %2605 = vst.msk [vmem:[#allocation3 + $0x8] sm:$0xff] %vm737_vm11, %v2585_v11  ;;  %v6755_v15 = vpack.c.bf16 %v2672_v56, %v2671_v46  ;;  %v5388_v2 = vld [vmem:[%s7573_s5 + $0x48] sm:$0xff]   ;;  %v4080_v56 = vld [vmem:[%s7570_s2 + $0x18] sm:$0xff] }
 0x2f9   : > { %v2528_v8 = vpop.permute.xlu0 %2527  ;;  %v2632_v46 = vld [vmem:[#allocation3 + $0x3e] sm:$0xff] }
 0x2fa   : > { %v2586_v40 = vsel %vm712_vm9, %v2346_v14, %v2528_v8  ;;  %v2530_v61 = vpop.permute.xlu1 %2529  ;;  %v2673_v50 = vld [vmem:[#allocation3 + $0x77] sm:$0xff] }
 0x2fb   : > { %5014 = vmatpush3.bf16.msra.mxu1 %v5384_v33  ;;  %2606 = vst.msk [vmem:[#allocation3 + $0x10] sm:$0xff] %vm737_vm11, %v2586_v40  ;;  %v2587_v42 = vsel %vm712_vm9, %v2347_v16, %v2530_v61  ;;  %v2674_v62 = vld [vmem:[#allocation3 + $0x7f] sm:$0xff]  ;;  %v5389_v16 = vld [vmem:[%s7573_s5 + $0x50] sm:$0xff]  }
 0x2fc   : > { %5051 = vmatprep.subr.bf16.mxu1 %v5653_v37  ;;  %2607 = vst.msk [vmem:[#allocation3 + $0x18] sm:$0xff] %vm737_vm11, %v2587_v42  ;;  %v6774_v5 = vpack.c.bf16 %v2674_v62, %v2673_v50  ;;  %v2123_v42 = vld [vmem:[%s7569_s1 + $0x98] sm:$0xff] }
 0x2fd   : > { %v2532_v3 = vpop.permute.xlu0 %2531  ;;  %v2636_v50 = vld [vmem:[#allocation3 + $0x5e] sm:$0xff] }
 0x2fe   : > { %4992 = vmatmul.mubr.msk.bf16.gmra.mrb[8].mxu1 %vm737_vm11, %v6737_v24  ;;  %v2588_v1 = vsel %vm712_vm9, %v2348_v18, %v2532_v3  ;;  %v2534_v25 = vpop.permute.xlu1 %2533  ;;  %v6797_v9 = vld [vmem:[#allocation3 + $0x87] sm:$0xff] }
 0x2ff   : > { %4995 = vmatprep.mubr.msk.bf16.mxu1 %vm5654_vm12, %v5653_v37  ;;  %2608 = vst.msk [vmem:[#allocation3 + $0x20] sm:$0xff] %vm737_vm11, %v2588_v1  ;;  %v2589_v59 = vsel %vm712_vm9, %v2349_v31, %v2534_v25  ;;  %v2659_v55 = vld [vmem:[#allocation3 + $0x7] sm:$0xff]  ;;  %v2684_v35 = vpack.c.bf16 %v6797_v9, %v6797_v9  ;;  %v5390_v31 = vld [vmem:[%s7573_s5 + $0x58] sm:$0xff]  }
 0x300   : > { %2609 = vst.msk [vmem:[#allocation3 + $0x28] sm:$0xff] %vm737_vm11, %v2589_v59  ;;  %v2625_v17 = vld [vmem:[#allocation3 + $0x6] sm:$0xff] }
 0x301   : > { %v4078_v59 = vld [vmem:[%s7570_s2 + $0x8] sm:$0xff] }
 0x302   : > { %v2660_v36 = vld [vmem:[#allocation3 + $0xf] sm:$0xff] }
 0x303   : > { %v2676_v39 = vpack.c.bf16 %v2660_v36, %v2659_v55  ;;  %v2661_v26 = vld [vmem:[#allocation3 + $0x17] sm:$0xff]  ;;  %v2626_v33 = vld [vmem:[#allocation3 + $0xe] sm:$0xff] }
 0x304   : > { %v2642_v51 = vpack.c.bf16 %v2626_v33, %v2625_v17  ;;  %v2627_v27 = vld [vmem:[#allocation3 + $0x16] sm:$0xff] }
 0x305   : > { %4972 = vmatmul.mubr.msk.bf16.vlgmr.msra.gmra.mrb[20].mxu0 %vm737_vm11, %v2676_v39  ;;  %v2631_v55 = vld [vmem:[#allocation3 + $0x36] sm:$0xff]  ;;  %v2634_v39 = vld [vmem:[#allocation3 + $0x4e] sm:$0xff] }
 0x306   : > { %4996 = vmatmul.mubr.msk.bf16.gmra.mrb[12].mxu1 %vm737_vm11, %v6755_v15  ;;  %4975 = vmatprep.mubr.msk.bf16.mxu0 %vm5654_vm12, %v5653_v37  ;;  %v2662_v19 = vld [vmem:[#allocation3 + $0x1f] sm:$0xff]  ;;  %v6868_v36 = vpack.c.bf16 %v2632_v46, %v2631_v55  ;;  %v3009_v33 = vld [vmem:[#allocation3 + $0x30] sm:$0xff] }
 0x307   : > { %4999 = vmatprep.mubr.msk.bf16.mxu1 %vm5654_vm12, %v5653_v37  ;;  %5140 = vmatpush3.bf16.msra.mxu0 %v5382_v23  ;;  %v2677_v12 = vpack.c.bf16 %v2662_v19, %v2661_v26  ;;  %v2663_v13 = vld [vmem:[#allocation3 + $0x27] sm:$0xff]  ;;  %v2664_v34 = vld [vmem:[#allocation3 + $0x2f] sm:$0xff]  ;;  %v2628_v47 = vld [vmem:[#allocation3 + $0x1e] sm:$0xff] }
 0x308   : > { %5141 = vmatprep.subr.bf16.mxu0 %v5653_v37  ;;  %v2678_v20 = vpack.c.bf16 %v2664_v34, %v2663_v13  ;;  %v6826_v38 = vpack.c.bf16 %v2628_v47, %v2627_v27  ;;  %v2629_v3 = vld [vmem:[#allocation3 + $0x26] sm:$0xff]  ;;  %v2630_v1 = vld [vmem:[#allocation3 + $0x2e] sm:$0xff]  ;;  %v4084_v23 = vld [vmem:[%s7570_s2 + $0x38] sm:$0xff] }
 0x309   : > { %v6851_v25 = vpack.c.bf16 %v2630_v1, %v2629_v3  ;;  %v4088_v19 = vld [vmem:[%s7570_s2 + $0x58] sm:$0xff]  ;;  %v3005_v13 = vld [vmem:[#allocation3 + $0x10] sm:$0xff]  ;;  %v3004_v34 = vld [vmem:[#allocation3 + $0x8] sm:$0xff] }
 0x30a   : > { %v2635_v26 = vld [vmem:[#allocation3 + $0x56] sm:$0xff]  ;;  %v3012_v27 = vld [vmem:[#allocation3 + $0x48] sm:$0xff] }
 0x30b   : > { %5142 = vmatpush3.bf16.msra.mxu0 %v5383_v49  ;;  %v2633_v49 = vld [vmem:[#allocation3 + $0x46] sm:$0xff] }
 0x30c   : > { %5143 = vmatprep.subr.bf16.mxu0 %v5653_v37  ;;  %v6884_v62 = vpack.c.bf16 %v2634_v39, %v2633_v49  ;;  %v3016_v1 = vld [vmem:[#allocation3 + $0x68] sm:$0xff] }
 0x30d   : > { %4976 = vmatmul.mubr.msk.bf16.gmra.mrb[24].mxu0 %vm737_vm11, %v2677_v12 }
 0x30e   : > { %5000 = vmatmul.mubr.msk.bf16.gmra.mrb[16].mxu1 %vm737_vm11, %v6774_v5  ;;  %v2212_v41 = vpop.permute.xlu0 %2211  ;;  %4979 = vmatprep.mubr.msk.bf16.mxu0 %vm5654_vm12, %v5653_v37 }
 0x30f   : > { %5003 = vmatprep.mubr.msk.bf16.mxu1 %vm5654_vm12, %v5653_v37  ;;  %5144 = vmatpush3.bf16.msra.mxu0 %v5385_v29  ;;  %v6795_v54 = vmul.f32 %v2212_v41, %v6527_v52  ;;  %v2217_v60 = vpop.permute.xlu1 %2216  ;;  %v566_v52 = vmul.f32 1.442695, %v519_v22  ;;  %v6900_v29 = vpack.c.bf16 %v2636_v50, %v2635_v26  ;;  %v3018_v50 = vld [vmem:[#allocation3 + $0x78] sm:$0xff] }
 0x310   : > { %5145 = vmatprep.subr.bf16.mxu0 %v5653_v37  ;;  %v6801_v53 = vmul.f32 %v2217_v60, %v6506_v44  ;;  %v6929_v60 = vld [vmem:[#allocation3 + $0x86] sm:$0xff] }
 0x311   : > { %v2382_v48 = vsub.f32 0.0, %v6795_v54  ;;  %5559 = vpow2.f32 %v566_v52  ;;  %v3007_v52 = vld [vmem:[#allocation3 + $0x20] sm:$0xff]  ;;  %v2282_v47 = vmin.f32 %v6795_v54, 0.0  ;;  %vm2262_vm0 = vcmp.gt.f32.partialorder %v6795_v54, 0.0 }
 0x312   : > { %v2383_v21 = vsub.f32 0.0, %v6801_v53  ;;  %vm2263_vm1 = vcmp.gt.f32.partialorder %v6801_v53, 0.0 }
 0x313   : > { %5146 = vmatpush3.bf16.msra.mxu0 %v5386_v43  ;;  %v2422_v7 = vmin.f32 %v2382_v48, 0.0  ;;  %vm2402_vm13 = vcmp.gt.f32.partialorder %v2382_v48, 0.0  ;;  %v2639_v43 = vld [vmem:[#allocation3 + $0x76] sm:$0xff] }
 0x314   : > { %v2423_v0 = vmin.f32 %v2383_v21, 0.0  ;;  %vm2403_vm14 = vcmp.gt.f32.partialorder %v2383_v21, 0.0 }
 0x315   : > { %4980 = vmatmul.mubr.msk.bf16.gmra.mrb[28].mxu0 %vm737_vm11, %v2678_v20  ;;  %v2459_v44 = vmul.f32 1.442695, %v2422_v7  ;;  %v5393_v7 = vld [vmem:[%s7573_s5 + $0x70] sm:$0xff]  }
 0x316   : > { %5004 = vmatmul.mubr.msk.bf16.gmra.mrb[20].mxu1 %vm737_vm11, %v2684_v35  ;;  %5147 = vmatprep.mubr.msk.bf16.mxu0 %vm5654_vm12, %v5653_v37  ;;  %v2461_v58 = vmul.f32 1.442695, %v2423_v0  ;;  %v3021_v35 = vpack.c.bf16 %v3005_v13, %v3004_v34 }
 0x317   : > { %5015 = vmatprep.mubr.msk.bf16.mxu1 %vm5654_vm12, %v5653_v37  ;;  %5561 = vpow2.f32 %v2459_v44  ;;  %v5394_v44 = vld [vmem:[%s7573_s5 + $0x78] sm:$0xff]  }
 0x318   : > { %5563 = vpow2.f32 %v2461_v58  ;;  %v3008_v58 = vld [vmem:[#allocation3 + $0x28] sm:$0xff] }
 0x319   : > { %v6960_v17 = vpack.c.bf16 %v3009_v33, %v3008_v58  ;;  %v4077_v58 = vld [vmem:[%s7570_s2] sm:$0xff] }
 0x31b   : > { %v5560_v6 = vpop.eup %5559 }
 0x31c   : > { %v4329_v40 = vadd.f32 -1.0, %v5560_v6  ;;  %v2283_v6 = vmin.f32 %v6801_v53, 0.0 }
 0x31d   : > { %5148 = vmatmul.mubr.msk.bf16.vlgmr.msra.gmra.mrb[32].mxu0 %vm737_vm11, %v2677_v12  ;;  %v2637_v12 = vld [vmem:[#allocation3 + $0x66] sm:$0xff] }
 0x31e   : > { %5016 = vmatmul.mubr.msk.bf16.vlgmr.msra.gmra.mrb[24].mxu1 %vm737_vm11, %v2642_v51  ;;  %5151 = vmatprep.mubr.msk.bf16.mxu0 %vm5654_vm12, %v5653_v37  ;;  %v615_v18 = vsel %vm495_vm15, %v6780_v57, %v4329_v40  ;;  %v2638_v57 = vld [vmem:[#allocation3 + $0x6e] sm:$0xff]  ;;  %v3010_v51 = vld [vmem:[#allocation3 + $0x38] sm:$0xff]  ;;  %v2321_v40 = vmul.f32 1.442695, %v2283_v6  ;;  %v4081_v6 = vld [vmem:[%s7570_s2 + $0x20] sm:$0xff] }
 0x31f   : > { %5052 = vmatpush3.bf16.msra.mxu1 %v5387_v63  ;;  %5019 = vmatprep.mubr.msk.bf16.mxu1 %vm5654_vm12, %v5653_v37  ;;  %v6913_v41 = vpack.c.bf16 %v2638_v57, %v2637_v12  ;;  %v3011_v63 = vld [vmem:[#allocation3 + $0x40] sm:$0xff] }
 0x320   : > { %5053 = vmatprep.subr.bf16.mxu1 %v5653_v37 }
 0x321   : > { %v5562_v11 = vpop.eup %5561 }
 0x322   : > { %v5564_v14 = vpop.eup %5563  ;;  %v4492_v8 = vadd.f32 -1.0, %v5562_v11  ;;  %v3013_v11 = vld [vmem:[#allocation3 + $0x50] sm:$0xff] }
 0x323   : > { %5054 = vmatpush3.bf16.msra.mxu1 %v5388_v2  ;;  %v4493_v45 = vadd.f32 -1.0, %v5564_v14  ;;  %v6967_v2 = vpack.c.bf16 %v3011_v63, %v3010_v51  ;;  %v351_v14 = vmin.f32 %v6772_v30, 0.0  ;;  %v3017_v30 = vld [vmem:[#allocation3 + $0x70] sm:$0xff] }
 0x324   : > { %5055 = vmatprep.subr.bf16.mxu1 %v5653_v37  ;;  %v2502_v61 = vsel %vm2402_vm13, %v2382_v48, %v4492_v8  ;;  %v5391_v48 = vld [vmem:[%s7573_s5 + $0x60] sm:$0xff]   ;;  %v2319_v8 = vmul.f32 1.442695, %v2282_v47 }
 0x325   : > { %5152 = vmatmul.mubr.msk.bf16.gmra.mrb[36].mxu0 %vm737_vm11, %v2678_v20  ;;  %2559 = vrot.lane.b32.xlu0 %v2502_v61, %s5651_s13  ;;  %v2503_v4 = vsel %vm2403_vm14, %v2383_v21, %v4493_v45  ;;  %v5392_v21 = vld [vmem:[%s7573_s5 + $0x68] sm:$0xff]   ;;  %v3006_v20 = vld [vmem:[#allocation3 + $0x18] sm:$0xff]  ;;  %v6976_v45 = vpack.c.bf16 %v3013_v11, %v3012_v27  ;;  %v3015_v61 = vld [vmem:[#allocation3 + $0x60] sm:$0xff] }
 0x326   : > { %5020 = vmatmul.mubr.msk.bf16.gmra.mrb[28].mxu1 %vm737_vm11, %v6826_v38  ;;  %2561 = vrot.lane.b32.xlu1 %v2503_v4, %s5651_s13  ;;  %v6949_v0 = vpack.c.bf16 %v3007_v52, %v3006_v20  ;;  %5565 = vpow2.f32 %v2319_v8  ;;  %v3014_v4 = vld [vmem:[#allocation3 + $0x58] sm:$0xff] }
 0x327   : > { %5155 = vmatprep.mubr.msk.bf16.mxu0 %vm5654_vm12, %v5653_v37  ;;  %5023 = vmatprep.mubr.msk.bf16.mxu1 %vm5654_vm12, %v5653_v37  ;;  %5567 = vpow2.f32 %v2321_v40  ;;  %v4085_v40 = vld [vmem:[%s7570_s2 + $0x40] sm:$0xff] }
 0x328   : > { %5056 = vmatpush3.bf16.msra.mxu1 %v5389_v16  ;;  %v398_v16 = vmul.f32 1.442695, %v351_v14 }
 0x329   : > { %5057 = vmatprep.subr.bf16.mxu1 %v5653_v37  ;;  %2221 = vperm.xlu0 %5350, %v2123_v42   ;;  %v6982_v42 = vpack.c.bf16 %v3015_v61, %v3014_v4 }
 0x32a   : > { %686 = vrot.lane.b32.xlu1 %v615_v18, %s5651_s13  ;;  %5569 = vpow2.f32 %v398_v16 }
 0x32c   : > { %5058 = vmatpush3.bf16.msra.mxu1 %v5390_v31  ;;  %v6988_v31 = vpack.c.bf16 %v3017_v30, %v3016_v1 }
 0x32d   : > { %5095 = vmatprep.subr.bf16.mxu1 %v5653_v37  ;;  %5156 = vmatmul.mubr.msk.bf16.gmra.mrb[40].mxu0 %vm737_vm11, %v6683_v10  ;;  %v4082_v10 = vld [vmem:[%s7570_s2 + $0x28] sm:$0xff] }
 0x32e   : > { %5024 = vmatmul.mubr.msk.bf16.gmra.mrb[32].mxu1 %vm737_vm11, %v6851_v25  ;;  %4101 = vperm.xlu1 %5349, %v4078_v59  }
 0x32f   : > { %5027 = vmatprep.mubr.msk.bf16.mxu1 %vm5654_vm12, %v5653_v37  ;;  %5159 = vmatprep.mubr.msk.bf16.mxu0 %vm5654_vm12, %v5653_v37 }
 0x330   : > { %v5566_v18 = vpop.eup %5565 }
 0x331   : > { %v5568_v3 = vpop.eup %5567 }
 0x332   : > { %4111 = vperm.xlu1 %5349, %v4080_v56   ;;  %v4472_v56 = vadd.f32 -1.0, %v5566_v18  ;;  %v4473_v46 = vadd.f32 -1.0, %v5568_v3  ;;  %v4089_v3 = vld [vmem:[%s7570_s2 + $0x60] sm:$0xff] }
 0x334   : > { %v5570_v59 = vpop.eup %5569 }
 0x335   : > { %5160 = vmatmul.mubr.msk.bf16.gmra.mrb[44].mxu0 %vm737_vm11, %v6710_v28  ;;  %v4086_v28 = vld [vmem:[%s7570_s2 + $0x48] sm:$0xff] }
 0x336   : > { %5028 = vmatmul.mubr.msk.bf16.gmra.mrb[36].mxu1 %vm737_vm11, %v6868_v36  ;;  %4121 = vperm.xlu1 %5349, %v4082_v10   ;;  %v2362_v10 = vsel %vm2262_vm0, %v6795_v54, %v4472_v56 }
 0x337   : > { %5031 = vmatprep.mubr.msk.bf16.mxu1 %vm5654_vm12, %v5653_v37  ;;  %5163 = vmatprep.mubr.msk.bf16.mxu0 %vm5654_vm12, %v5653_v37 }
 0x33a   : > { %4131 = vperm.xlu1 %5349, %v4084_v23   ;;  %v3019_v23 = vld [vmem:[#allocation3 + $0x80] sm:$0xff] }
 0x33b   : > { %v7002_v26 = vpack.c.bf16 %v3019_v23, %v3018_v50 }
 0x33d   : > { %5164 = vmatmul.mubr.msk.bf16.gmra.mrb[48].mxu0 %vm737_vm11, %v6737_v24  ;;  %v4090_v24 = vld [vmem:[%s7570_s2 + $0x68] sm:$0xff] }
 0x33e   : > { %5032 = vmatmul.mubr.msk.bf16.gmra.mrb[40].mxu1 %vm737_vm11, %v6884_v62  ;;  %4141 = vperm.xlu1 %5349, %v4086_v28   ;;  %v2363_v28 = vsel %vm2263_vm1, %v6801_v53, %v4473_v46 }
 0x33f   : > { %5035 = vmatprep.mubr.msk.bf16.mxu1 %vm5654_vm12, %v5653_v37  ;;  %5167 = vmatprep.mubr.msk.bf16.mxu0 %vm5654_vm12, %v5653_v37 }
 0x342   : > { %4151 = vperm.xlu1 %5349, %v4088_v19  }
 0x345   : > { %5168 = vmatmul.mubr.msk.bf16.gmra.mrb[52].mxu0 %vm737_vm11, %v6755_v15  ;;  %v2640_v15 = vld [vmem:[#allocation3 + $0x7e] sm:$0xff] }
 0x346   : > { %5036 = vmatmul.mubr.msk.bf16.gmra.mrb[44].mxu1 %vm737_vm11, %v6900_v29  ;;  %4161 = vperm.xlu1 %5349, %v4090_v24   ;;  %v6923_v22 = vpack.c.bf16 %v2640_v15, %v2639_v43  ;;  %v7008_v24 = vld [vmem:[#allocation3 + $0x88] sm:$0xff] }
 0x347   : > { %5039 = vmatprep.mubr.msk.bf16.mxu1 %vm5654_vm12, %v5653_v37  ;;  %5171 = vmatprep.mubr.msk.bf16.mxu0 %vm5654_vm12, %v5653_v37  ;;  %v3029_v12 = vpack.c.bf16 %v7008_v24, %v7008_v24 }
 0x34d   : > { %5172 = vmatmul.mubr.msk.bf16.gmra.mrb[56].mxu0 %vm737_vm11, %v6774_v5  ;;  %v2650_v5 = vpack.c.bf16 %v6929_v60, %v6929_v60 }
 0x34e   : > { %5040 = vmatmul.mubr.msk.bf16.gmra.mrb[48].mxu1 %vm737_vm11, %v6913_v41  ;;  %5175 = vmatprep.mubr.msk.bf16.mxu0 %vm5654_vm12, %v5653_v37 }
 0x34f   : > { %5043 = vmatprep.mubr.msk.bf16.mxu1 %vm5654_vm12, %v5653_v37 }
 0x356   : > { %5044 = vmatmul.mubr.msk.bf16.gmra.mrb[52].mxu1 %vm737_vm11, %v6923_v22 }
 0x357   : > { %5047 = vmatprep.mubr.msk.bf16.mxu1 %vm5654_vm12, %v5653_v37 }
 0x35e   : > { %5048 = vmatmul.mubr.msk.bf16.gmra.mrb[56].mxu1 %vm737_vm11, %v2650_v5 }
 0x35f   : > { %5059 = vmatprep.mubr.msk.bf16.mxu1 %vm5654_vm12, %v5653_v37 }
 0x366   : > { %5060 = vmatmul.mubr.msk.bf16.vlgmr.msra.gmra.mrb[60].mxu1 %vm737_vm11, %v3021_v35 }
 0x367   : > { %5096 = vmatpush3.bf16.msra.mxu1 %v5391_v48  ;;  %5063 = vmatprep.mubr.msk.bf16.mxu1 %vm5654_vm12, %v5653_v37 }
 0x368   : > { %5097 = vmatprep.subr.bf16.mxu1 %v5653_v37 }
 0x36b   : > { %5098 = vmatpush3.bf16.msra.mxu1 %v5392_v21  ;;  %v5397_v21 = vld [vmem:[%s7573_s5 + $0xb0] sm:$0xff]  }
 0x36c   : > { %5099 = vmatprep.subr.bf16.mxu1 %v5653_v37 }
 0x36e   : > { %5064 = vmatmul.mubr.msk.bf16.gmra.mrb[64].mxu1 %vm737_vm11, %v6949_v0 }
 0x36f   : > { %5067 = vmatprep.mubr.msk.bf16.mxu1 %vm5654_vm12, %v5653_v37  ;;  %5100 = vmatpush3.bf16.msra.mxu1 %v5393_v7 }
 0x370   : > { %5101 = vmatprep.subr.bf16.mxu1 %v5653_v37 }
 0x373   : > { %5102 = vmatpush3.bf16.msra.mxu1 %v5394_v44 }
 0x374   : > { %5183 = vmatprep.subr.bf16.mxu1 %v5653_v37 }
 0x376   : > { %5068 = vmatmul.mubr.msk.bf16.gmra.mrb[68].mxu1 %vm737_vm11, %v6960_v17 }
 0x377   : > { %5071 = vmatprep.mubr.msk.bf16.mxu1 %vm5654_vm12, %v5653_v37 }
 0x37e   : > { %5072 = vmatmul.mubr.msk.bf16.gmra.mrb[72].mxu1 %vm737_vm11, %v6967_v2 }
 0x37f   : > { %5075 = vmatprep.mubr.msk.bf16.mxu1 %vm5654_vm12, %v5653_v37 }
 0x386   : > { %5076 = vmatmul.mubr.msk.bf16.gmra.mrb[76].mxu1 %vm737_vm11, %v6976_v45 }
 0x387   : > { %5079 = vmatprep.mubr.msk.bf16.mxu1 %vm5654_vm12, %v5653_v37 }
 0x38e   : > { %5080 = vmatmul.mubr.msk.bf16.gmra.mrb[80].mxu1 %vm737_vm11, %v6982_v42 }
 0x38f   : > { %5083 = vmatprep.mubr.msk.bf16.mxu1 %vm5654_vm12, %v5653_v37 }
 0x396   : > { %5084 = vmatmul.mubr.msk.bf16.gmra.mrb[84].mxu1 %vm737_vm11, %v6988_v31 }
 0x397   : > { %5087 = vmatprep.mubr.msk.bf16.mxu1 %vm5654_vm12, %v5653_v37  ;;  %v2560_v55 = vpop.permute.xlu0 %2559 }
 0x398   : > { %v2602_v39 = vsel %vm712_vm9, %v2362_v10, %v2560_v55  ;;  %v2562_v49 = vpop.permute.xlu1 %2561  ;;  %v4091_v55 = vld [vmem:[%s7570_s2 + $0x70] sm:$0xff] }
 0x399   : > { %2622 = vst.msk [vmem:[#allocation3 + $0x90] sm:$0xff] %vm737_vm11, %v2602_v39  ;;  %v2603_v19 = vsel %vm712_vm9, %v2363_v28, %v2562_v49 }
 0x39a   : > { %2623 = vst.msk [vmem:[#allocation3 + $0x98] sm:$0xff] %vm737_vm11, %v2603_v19 }
 0x39c   : > { %v687_v54 = vpop.permute.xlu1 %686 }
 0x39e   : > { %5088 = vmatmul.mubr.msk.bf16.gmra.mrb[88].mxu1 %vm737_vm11, %v7002_v26 }
 0x39f   : > { %5091 = vmatprep.mubr.msk.bf16.mxu1 %vm5654_vm12, %v5653_v37 }
 0x3a0   : > { %v3433_v57 = vld [vmem:[#allocation3 + $0x8f] sm:$0xff] }
 0x3a1   : > { %v3442_v53 = vpack.c.bf16 %v3433_v57, %v6797_v9  ;;  %v3434_v15 = vld [vmem:[#allocation3 + $0x97] sm:$0xff]  ;;  %v5395_v9 = vld [vmem:[%s7573_s5 + $0xa0] sm:$0xff]   ;;  %v3226_v23 = vld [vmem:[#allocation3 + $0x8e] sm:$0xff] }
 0x3a2   : > { %v3443_v13 = vpack.c.bf16 %v3434_v15, %v3434_v15 }
 0x3a3   : > { %5176 = vmatmul.mubr.msk.bf16.gmra.mrb[60].mxu0 %vm737_vm11, %v3442_v53 }
 0x3a4   : > { %5179 = vmatprep.mubr.msk.bf16.mxu0 %vm5654_vm12, %v5653_v37 }
 0x3a6   : > { %5092 = vmatmul.mubr.msk.bf16.gmra.mrb[92].mxu1 %vm737_vm11, %v3029_v12  ;;  %v3227_v12 = vld [vmem:[#allocation3 + $0x96] sm:$0xff] }
 0x3a7   : > { %5103 = vmatprep.mubr.msk.bf16.mxu1 %vm5654_vm12, %v5653_v37 }
 0x3a8   : > { %v2222_v43 = vpop.permute.xlu0 %2221 }
 0x3a9   : > { %v7020_v5 = vmul.f32 %v2222_v43, %v6520_v32  ;;  %v5396_v32 = vld [vmem:[%s7573_s5 + $0xa8] sm:$0xff]  }
 0x3ab   : > { %5180 = vmatmul.mubr.msk.bf16.gmra.mrb[64].mxu0 %vm737_vm11, %v3443_v13  ;;  %v2384_v34 = vsub.f32 0.0, %v7020_v5 }
 0x3ad   : > { %v2424_v48 = vmin.f32 %v2384_v34, 0.0  ;;  %vm2404_vm2 = vcmp.gt.f32.partialorder %v2384_v34, 0.0 }
 0x3ae   : > { %5104 = vmatmul.mubr.msk.bf16.vlgmr.msra.gmra.mrb[96].mxu1 %vm737_vm11, %v6826_v38  ;;  %v5398_v38 = vld [vmem:[%s7573_s5 + $0xb8] sm:$0xff]  }
 0x3af   : > { %5184 = vmatpush3.bf16.msra.mxu1 %v5395_v9  ;;  %5107 = vmatprep.mubr.msk.bf16.mxu1 %vm5654_vm12, %v5653_v37  ;;  %v2463_v35 = vmul.f32 1.442695, %v2424_v48 }
 0x3b0   : > { %5185 = vmatprep.subr.bf16.mxu1 %v5653_v37 }
 0x3b1   : > { %5571 = vpow2.f32 %v2463_v35 }
 0x3b3   : > { %5186 = vmatpush3.bf16.msra.mxu1 %v5396_v32  ;;  %v3236_v32 = vpack.c.bf16 %v3227_v12, %v3227_v12 }
 0x3b4   : > { %5187 = vmatprep.subr.bf16.mxu1 %v5653_v37 }
 0x3b6   : > { %5108 = vmatmul.mubr.msk.bf16.gmra.mrb[100].mxu1 %vm737_vm11, %v6851_v25 }
 0x3b7   : > { %5111 = vmatprep.mubr.msk.bf16.mxu1 %vm5654_vm12, %v5653_v37  ;;  %5188 = vmatpush3.bf16.msra.mxu1 %v5397_v21 }
 0x3b8   : > { %5189 = vmatprep.subr.bf16.mxu1 %v5653_v37 }
 0x3bb   : > { %5190 = vmatpush3.bf16.msra.mxu1 %v5398_v38  ;;  %v5572_v52 = vpop.eup %5571 }
 0x3bc   : > { %v4494_v20 = vadd.f32 -1.0, %v5572_v52 }
 0x3be   : > { %5112 = vmatmul.mubr.msk.bf16.gmra.mrb[104].mxu1 %vm737_vm11, %v6868_v36  ;;  %v2504_v25 = vsel %vm2404_vm2, %v2384_v34, %v4494_v20  ;;  %v4079_v36 = vld [vmem:[%s7570_s2 + $0x10] sm:$0xff] }
 0x3bf   : > { %5115 = vmatprep.mubr.msk.bf16.mxu1 %vm5654_vm12, %v5653_v37  ;;  %2563 = vrot.lane.b32.xlu0 %v2504_v25, %s5651_s13 }
 0x3c1   : > { %v7052_v7 = vpop.f32.mrb[0].mxu1 }
 0x3c2   : > { %v4985_v44 = vpop.f32.mrb[1].mxu1 }
 0x3c3   : > { %v7057_v33 = vpop.f32.mrb[2].mxu1  ;;  %4096 = vperm.xlu0 %5350, %v4077_v58  }
 0x3c4   : > { %v4986_v63 = vpop.f32.mrb[3].mxu1 }
 0x3c6   : > { %5116 = vmatmul.mubr.msk.bf16.gmra.mrb[108].mxu1 %vm737_vm11, %v6884_v62  ;;  %v4083_v62 = vld [vmem:[%s7570_s2 + $0x30] sm:$0xff] }
 0x3c7   : > { %5119 = vmatprep.mubr.msk.bf16.mxu1 %vm5654_vm12, %v5653_v37  ;;  %4106 = vperm.xlu0 %5350, %v4079_v36  }
 0x3c9   : > { %v7066_v51 = vpop.f32.mrb[4].mxu1 }
 0x3ca   : > { %v4989_v47 = vpop.f32.mrb[5].mxu1 }
 0x3cb   : > { %v7071_v11 = vpop.f32.mrb[6].mxu1  ;;  %4116 = vperm.xlu0 %5350, %v4081_v6  }
 0x3cc   : > { %v4990_v27 = vpop.f32.mrb[7].mxu1 }
 0x3ce   : > { %5120 = vmatmul.mubr.msk.bf16.gmra.mrb[112].mxu1 %vm737_vm11, %v6900_v29  ;;  %v4087_v29 = vld [vmem:[%s7570_s2 + $0x50] sm:$0xff] }
 0x3cf   : > { %5123 = vmatprep.mubr.msk.bf16.mxu1 %vm5654_vm12, %v5653_v37  ;;  %4126 = vperm.xlu0 %5350, %v4083_v62  }
 0x3d1   : > { %v7080_v14 = vpop.f32.mrb[8].mxu1 }
 0x3d2   : > { %v4993_v8 = vpop.f32.mrb[9].mxu1 }
 0x3d3   : > { %v7085_v16 = vpop.f32.mrb[10].mxu1  ;;  %4136 = vperm.xlu0 %5350, %v4085_v40  }
 0x3d4   : > { %v4994_v61 = vpop.f32.mrb[11].mxu1 }
 0x3d6   : > { %5124 = vmatmul.mubr.msk.bf16.gmra.mrb[116].mxu1 %vm737_vm11, %v6913_v41 }
 0x3d7   : > { %5127 = vmatprep.mubr.msk.bf16.mxu1 %vm5654_vm12, %v5653_v37  ;;  %4146 = vperm.xlu0 %5350, %v4087_v29  }
 0x3d8   : > { %v2779_v30 = vpop.f32.mrb[20].mxu0 }
 0x3d9   : > { %v7094_v4 = vpop.f32.mrb[12].mxu1  ;;  %v4973_v1 = vpop.f32.mrb[21].mxu0 }
 0x3da   : > { %v4997_v18 = vpop.f32.mrb[13].mxu1  ;;  %v2782_v41 = vpop.f32.mrb[22].mxu0 }
 0x3db   : > { %v7099_v59 = vpop.f32.mrb[14].mxu1  ;;  %v4974_v46 = vpop.f32.mrb[23].mxu0  ;;  %4156 = vperm.xlu0 %5350, %v4089_v3  }
 0x3dc   : > { %v4998_v56 = vpop.f32.mrb[15].mxu1 }
 0x3de   : > { %5128 = vmatmul.mubr.msk.bf16.gmra.mrb[120].mxu1 %vm737_vm11, %v6923_v22  ;;  %v3235_v22 = vpack.c.bf16 %v3226_v23, %v6929_v60 }
 0x3df   : > { %5131 = vmatprep.mubr.msk.bf16.mxu1 %vm5654_vm12, %v5653_v37  ;;  %4166 = vperm.xlu0 %5350, %v4091_v55  }
 0x3e0   : > { %v2787_v39 = vpop.f32.mrb[24].mxu0 }
 0x3e1   : > { %v7108_v10 = vpop.f32.mrb[16].mxu1  ;;  %v4977_v28 = vpop.f32.mrb[25].mxu0 }
 0x3e2   : > { %v5001_v49 = vpop.f32.mrb[17].mxu1  ;;  %v2790_v50 = vpop.f32.mrb[26].mxu0 }
 0x3e3   : > { %v7110_v19 = vpop.f32.mrb[18].mxu1  ;;  %v4978_v57 = vpop.f32.mrb[27].mxu0 }
 0x3e4   : > { %v5002_v54 = vpop.f32.mrb[19].mxu1 }
 0x3e6   : > { %5132 = vmatmul.mubr.msk.bf16.gmra.mrb[124].mxu1 %vm737_vm11, %v3235_v22 }
 0x3e7   : > { %5135 = vmatprep.mubr.msk.bf16.mxu1 %vm5654_vm12, %v5653_v37 }
 0x3e8   : > { %v2795_v15 = vpop.f32.mrb[28].mxu0 }
 0x3e9   : > { %v7116_v53 = vpop.f32.mrb[20].mxu1  ;;  %v4981_v13 = vpop.f32.mrb[29].mxu0 }
 0x3ea   : > { %v5005_v43 = vpop.f32.mrb[21].mxu1  ;;  %v2798_v34 = vpop.f32.mrb[30].mxu0 }
 0x3eb   : > { %v2846_v9 = vpop.f32.mrb[22].mxu1  ;;  %v4982_v35 = vpop.f32.mrb[31].mxu0 }
 0x3ec   : > { %v5006_v48 = vpop.f32.mrb[23].mxu1 }
 0x3ee   : > { %5136 = vmatmul.mubr.msk.bf16.gmra.mrb[128].mxu1 %vm737_vm11, %v3236_v32 }
 0x3ef   : > { %5191 = vmatprep.mubr.msk.bf16.mxu1 %vm5654_vm12, %v5653_v37 }
 0x3f0   : > { %v7121_v21 = vpop.f32.mrb[32].mxu0 }
 0x3f1   : > { %v2934_v60 = vpop.f32.mrb[24].mxu1  ;;  %v5149_v20 = vpop.f32.mrb[33].mxu0 }
 0x3f2   : > { %v7123_v38 = vadd.f32 %v2934_v60, %v2779_v30  ;;  %v5017_v52 = vpop.f32.mrb[25].mxu1  ;;  %v7125_v44 = vpop.f32.mrb[34].mxu0 }
 0x3f3   : > { %v2937_v25 = vpop.f32.mrb[26].mxu1  ;;  %v5150_v36 = vpop.f32.mrb[35].mxu0 }
 0x3f4   : > { %v7127_v58 = vadd.f32 %v2937_v25, %v2782_v41  ;;  %v5018_v63 = vpop.f32.mrb[27].mxu1 }
 0x3f6   : > { %5192 = vmatmul.mubr.msk.bf16.vlgmr.msra.gmra.mrb[132].mxu1 %vm737_vm11, %v6949_v0 }
 0x3f7   : > { %5195 = vmatprep.mubr.msk.bf16.mxu1 %vm5654_vm12, %v5653_v37 }
 0x3f8   : > { %v7133_v6 = vpop.f32.mrb[36].mxu0 }
 0x3f9   : > { %v2942_v47 = vpop.f32.mrb[28].mxu1  ;;  %v5153_v8 = vpop.f32.mrb[37].mxu0 }
 0x3fa   : > { %v7135_v27 = vadd.f32 %v2942_v47, %v2787_v39  ;;  %v5021_v62 = vpop.f32.mrb[29].mxu1  ;;  %v7137_v61 = vpop.f32.mrb[38].mxu0 }
 0x3fb   : > { %v2945_v40 = vpop.f32.mrb[30].mxu1  ;;  %v5154_v18 = vpop.f32.mrb[39].mxu0 }
 0x3fc   : > { %v7139_v29 = vadd.f32 %v2945_v40, %v2790_v50  ;;  %v5022_v30 = vpop.f32.mrb[31].mxu1 }
 0x3fe   : > { %5196 = vmatmul.mubr.msk.bf16.gmra.mrb[136].mxu1 %vm737_vm11, %v6960_v17 }
 0x3ff   : > { %5199 = vmatprep.mubr.msk.bf16.mxu1 %vm5654_vm12, %v5653_v37 }
 0x400   : > { %v7145_v3 = vpop.f32.mrb[40].mxu0 }
 0x401   : > { %v2950_v0 = vpop.f32.mrb[32].mxu1  ;;  %v5157_v56 = vpop.f32.mrb[41].mxu0 }
 0x402   : > { %v7147_v1 = vadd.f32 %v2950_v0, %v2795_v15  ;;  %v5025_v41 = vpop.f32.mrb[33].mxu1  ;;  %v7149_v55 = vpop.f32.mrb[42].mxu0 }
 0x403   : > { %v2953_v46 = vpop.f32.mrb[34].mxu1  ;;  %v5158_v49 = vpop.f32.mrb[43].mxu0 }
 0x404   : > { %v7151_v23 = vadd.f32 %v2953_v46, %v2798_v34  ;;  %v5026_v39 = vpop.f32.mrb[35].mxu1  ;;  %v3640_v49 = vld [vmem:[#allocation3 + $0x90] sm:$0xff] }
 0x406   : > { %5200 = vmatmul.mubr.msk.bf16.gmra.mrb[140].mxu1 %vm737_vm11, %v6967_v2 }
 0x407   : > { %5203 = vmatprep.mubr.msk.bf16.mxu1 %vm5654_vm12, %v5653_v37 }
 0x408   : > { %v7157_v28 = vpop.f32.mrb[44].mxu0 }
 0x409   : > { %v2958_v17 = vpop.f32.mrb[36].mxu1  ;;  %v5161_v22 = vpop.f32.mrb[45].mxu0 }
 0x40a   : > { %v7160_v50 = vadd.f32 %v2958_v17, %v7052_v7  ;;  %v5029_v54 = vpop.f32.mrb[37].mxu1  ;;  %v7162_v12 = vpop.f32.mrb[46].mxu0 }
 0x40b   : > { %v2961_v57 = vpop.f32.mrb[38].mxu1  ;;  %v5162_v13 = vpop.f32.mrb[47].mxu0 }
 0x40c   : > { %v7165_v15 = vadd.f32 %v2961_v57, %v7057_v33  ;;  %v5030_v43 = vpop.f32.mrb[39].mxu1  ;;  %v3641_v13 = vld [vmem:[#allocation3 + $0x98] sm:$0xff] }
 0x40e   : > { %5204 = vmatmul.mubr.msk.bf16.gmra.mrb[144].mxu1 %vm737_vm11, %v6976_v45 }
 0x40f   : > { %5207 = vmatprep.mubr.msk.bf16.mxu1 %vm5654_vm12, %v5653_v37 }
 0x410   : > { %v7171_v9 = vpop.f32.mrb[48].mxu0 }
 0x411   : > { %v2966_v2 = vpop.f32.mrb[40].mxu1  ;;  %v5165_v48 = vpop.f32.mrb[49].mxu0 }
 0x412   : > { %v7174_v7 = vadd.f32 %v2966_v2, %v7066_v51  ;;  %v5033_v34 = vpop.f32.mrb[41].mxu1  ;;  %v7176_v35 = vpop.f32.mrb[50].mxu0  ;;  %v2284_v51 = vmin.f32 %v7020_v5, 0.0 }
 0x413   : > { %v2969_v32 = vpop.f32.mrb[42].mxu1  ;;  %v5166_v52 = vpop.f32.mrb[51].mxu0 }
 0x414   : > { %v7179_v33 = vadd.f32 %v2969_v32, %v7071_v11  ;;  %v5034_v60 = vpop.f32.mrb[43].mxu1  ;;  %v2323_v40 = vmul.f32 1.442695, %v2284_v51 }
 0x415   : > { %v3650_v60 = vpack.c.bf16 %v3641_v13, %v3641_v13 }
 0x416   : > { %5208 = vmatmul.mubr.msk.bf16.gmra.mrb[148].mxu1 %vm737_vm11, %v6982_v42  ;;  %5573 = vpow2.f32 %v2323_v40 }
 0x417   : > { %5211 = vmatprep.mubr.msk.bf16.mxu1 %vm5654_vm12, %v5653_v37 }
 0x418   : > { %v7186_v20 = vpop.f32.mrb[52].mxu0 }
 0x419   : > { %v2974_v45 = vpop.f32.mrb[44].mxu1  ;;  %v5169_v36 = vpop.f32.mrb[53].mxu0 }
 0x41a   : > { %v7189_v25 = vadd.f32 %v2974_v45, %v7080_v14  ;;  %v5037_v63 = vpop.f32.mrb[45].mxu1  ;;  %v7191_v47 = vpop.f32.mrb[54].mxu0 }
 0x41b   : > { %v2977_v11 = vpop.f32.mrb[46].mxu1  ;;  %v5170_v8 = vpop.f32.mrb[55].mxu0 }
 0x41c   : > { %v7194_v62 = vadd.f32 %v2977_v11, %v7085_v16  ;;  %v5038_v42 = vpop.f32.mrb[47].mxu1 }
 0x41e   : > { %5212 = vmatmul.mubr.msk.bf16.gmra.mrb[152].mxu1 %vm737_vm11, %v6988_v31 }
 0x41f   : > { %5215 = vmatprep.mubr.msk.bf16.mxu1 %vm5654_vm12, %v5653_v37 }
 0x420   : > { %v7200_v14 = vpop.f32.mrb[56].mxu0  ;;  %v5574_v22 = vpop.eup %5573 }
 0x421   : > { %v2982_v5 = vpop.f32.mrb[48].mxu1  ;;  %v5173_v0 = vpop.f32.mrb[57].mxu0 }
 0x422   : > { %v7203_v30 = vadd.f32 %v2982_v5, %v7094_v4  ;;  %v5041_v18 = vpop.f32.mrb[49].mxu1  ;;  %v7205_v41 = vpop.f32.mrb[58].mxu0 }
 0x423   : > { %v2985_v16 = vpop.f32.mrb[50].mxu1  ;;  %v5174_v31 = vpop.f32.mrb[59].mxu0 }
 0x424   : > { %v7208_v56 = vadd.f32 %v2985_v16, %v7099_v59  ;;  %v5042_v46 = vpop.f32.mrb[51].mxu1  ;;  %v3649_v59 = vpack.c.bf16 %v3640_v49, %v7008_v24 }
 0x426   : > { %5216 = vmatmul.mubr.msk.bf16.gmra.mrb[156].mxu1 %vm737_vm11, %v7002_v26 }
 0x427   : > { %5219 = vmatprep.mubr.msk.bf16.mxu1 %vm5654_vm12, %v5653_v37 }
 0x429   : > { %v2990_v39 = vpop.f32.mrb[52].mxu1 }
 0x42a   : > { %v2991_v4 = vadd.f32 %v2990_v39, %v7108_v10  ;;  %v5045_v17 = vpop.f32.mrb[53].mxu1 }
 0x42b   : > { %v2993_v54 = vpop.f32.mrb[54].mxu1 }
 0x42c   : > { %v2994_v57 = vadd.f32 %v2993_v54, %v7110_v19  ;;  %v5046_v43 = vpop.f32.mrb[55].mxu1 }
 0x42e   : > { %5220 = vmatmul.mubr.msk.bf16.gmra.mrb[160].mxu1 %vm737_vm11, %v3649_v59 }
 0x42f   : > { %5223 = vmatprep.mubr.msk.bf16.mxu1 %vm5654_vm12, %v5653_v37 }
 0x431   : > { %v2998_v26 = vpop.f32.mrb[56].mxu1  ;;  %v2564_v48 = vpop.permute.xlu0 %2563 }
 0x432   : > { %v2999_v2 = vadd.f32 %v2998_v26, %v7116_v53  ;;  %v5049_v34 = vpop.f32.mrb[57].mxu1 }
 0x433   : > { %v3001_v10 = vpop.f32.mrb[58].mxu1 }
 0x434   : > { %v5050_v32 = vpop.f32.mrb[59].mxu1 }
 0x436   : > { %5224 = vmatmul.mubr.msk.bf16.gmra.mrb[164].mxu1 %vm737_vm11, %v3650_v60 }
 0x439   : > { %v3124_v19 = vpop.f32.mrb[60].mxu1 }
 0x43a   : > { %v3194_v52 = vadd.f32 %v3124_v19, %v7123_v38  ;;  %v5061_v24 = vpop.f32.mrb[61].mxu1 }
 0x43b   : > { %v3127_v45 = vpop.f32.mrb[62].mxu1 }
 0x43c   : > { %v3195_v51 = vadd.f32 %v3127_v45, %v7127_v58  ;;  %v5062_v63 = vpop.f32.mrb[63].mxu1 }
 0x441   : > { %v3132_v36 = vpop.f32.mrb[64].mxu1 }
 0x442   : > { %v7225_v11 = vadd.f32 %v3132_v36, %v7135_v27  ;;  %v5065_v53 = vpop.f32.mrb[65].mxu1 }
 0x443   : > { %v3135_v42 = vpop.f32.mrb[66].mxu1 }
 0x444   : > { %v7228_v8 = vadd.f32 %v3135_v42, %v7139_v29  ;;  %v5066_v40 = vpop.f32.mrb[67].mxu1 }
 0x449   : > { %v3140_v5 = vpop.f32.mrb[68].mxu1 }
 0x44a   : > { %v7231_v18 = vadd.f32 %v3140_v5, %v7147_v1  ;;  %v5069_v38 = vpop.f32.mrb[69].mxu1 }
 0x44b   : > { %v3143_v0 = vpop.f32.mrb[70].mxu1 }
 0x44c   : > { %v7234_v16 = vadd.f32 %v3143_v0, %v7151_v23  ;;  %v5070_v58 = vpop.f32.mrb[71].mxu1 }
 0x451   : > { %v3148_v46 = vpop.f32.mrb[72].mxu1 }
 0x452   : > { %v7237_v27 = vadd.f32 %v3148_v46, %v7160_v50  ;;  %v5073_v31 = vpop.f32.mrb[73].mxu1 }
 0x453   : > { %v3151_v39 = vpop.f32.mrb[74].mxu1 }
 0x454   : > { %v7240_v29 = vadd.f32 %v3151_v39, %v7165_v15  ;;  %v5074_v49 = vpop.f32.mrb[75].mxu1 }
 0x459   : > { %v3156_v17 = vpop.f32.mrb[76].mxu1 }
 0x45a   : > { %v7243_v1 = vadd.f32 %v3156_v17, %v7174_v7  ;;  %v5077_v54 = vpop.f32.mrb[77].mxu1 }
 0x45b   : > { %v3159_v22 = vpop.f32.mrb[78].mxu1 }
 0x45c   : > { %v7246_v23 = vadd.f32 %v3159_v22, %v7179_v33  ;;  %v5078_v43 = vpop.f32.mrb[79].mxu1 }
 0x461   : > { %v3164_v59 = vpop.f32.mrb[80].mxu1 }
 0x462   : > { %v7249_v50 = vadd.f32 %v3164_v59, %v7189_v25  ;;  %v5081_v26 = vpop.f32.mrb[81].mxu1 }
 0x463   : > { %v3167_v13 = vpop.f32.mrb[82].mxu1 }
 0x464   : > { %v7252_v15 = vadd.f32 %v3167_v13, %v7194_v62  ;;  %v5082_v34 = vpop.f32.mrb[83].mxu1 }
 0x469   : > { %v3172_v48 = vpop.f32.mrb[84].mxu1 }
 0x46a   : > { %v7255_v7 = vadd.f32 %v3172_v48, %v7203_v30  ;;  %v5085_v10 = vpop.f32.mrb[85].mxu1 }
 0x46b   : > { %v3175_v32 = vpop.f32.mrb[86].mxu1 }
 0x46c   : > { %v7258_v33 = vadd.f32 %v3175_v32, %v7208_v56  ;;  %v5086_v60 = vpop.f32.mrb[87].mxu1 }
 0x471   : > { %v3180_v19 = vpop.f32.mrb[88].mxu1 }
 0x472   : > { %v7260_v24 = vadd.f32 %v3180_v19, %v2991_v4  ;;  %v5089_v25 = vpop.f32.mrb[89].mxu1 }
 0x473   : > { %v3183_v45 = vpop.f32.mrb[90].mxu1 }
 0x474   : > { %v7262_v63 = vadd.f32 %v3183_v45, %v2994_v57  ;;  %v5090_v62 = vpop.f32.mrb[91].mxu1 }
 0x476   : > { %v7264_v36 = vpop.f32.mrb[60].mxu0 }
 0x477   : > { %v5177_v53 = vpop.f32.mrb[61].mxu0 }
 0x478   : > { %v7266_v30 = vpop.f32.mrb[62].mxu0 }
 0x479   : > { %v3188_v42 = vpop.f32.mrb[92].mxu1  ;;  %v5178_v56 = vpop.f32.mrb[63].mxu0 }
 0x47a   : > { %v7268_v40 = vadd.f32 %v3188_v42, %v2999_v2  ;;  %v5093_v5 = vpop.f32.mrb[93].mxu1 }
 0x47b   : > { %v3191_v38 = vpop.f32.mrb[94].mxu1 }
 0x47c   : > { %v5094_v0 = vpop.f32.mrb[95].mxu1 }
 0x47e   : > { %v7270_v58 = vpop.f32.mrb[64].mxu0 }
 0x47f   : > { %v5181_v4 = vpop.f32.mrb[65].mxu0 }
 0x480   : > { %v3605_v31 = vpop.f32.mrb[66].mxu0 }
 0x481   : > { %v3331_v46 = vpop.f32.mrb[96].mxu1  ;;  %v5182_v49 = vpop.f32.mrb[67].mxu0 }
 0x482   : > { %v3401_v57 = vadd.f32 %v3331_v46, %v3194_v52  ;;  %v5105_v39 = vpop.f32.mrb[97].mxu1 }
 0x483   : > { %v3334_v17 = vpop.f32.mrb[98].mxu1 }
 0x484   : > { %v3402_v54 = vadd.f32 %v3334_v17, %v3195_v51  ;;  %v5106_v22 = vpop.f32.mrb[99].mxu1  ;;  %v7273_v43 = vadd.f32 %v7121_v21, %v3401_v57 }
 0x486   : > { %v7276_v2 = vadd.f32 %v7125_v44, %v3402_v54 }
 0x489   : > { %v3339_v59 = vpop.f32.mrb[100].mxu1 }
 0x48a   : > { %v3403_v26 = vadd.f32 %v3339_v59, %v7225_v11  ;;  %v5109_v13 = vpop.f32.mrb[101].mxu1 }
 0x48b   : > { %v3342_v34 = vpop.f32.mrb[102].mxu1 }
 0x48c   : > { %v3404_v48 = vadd.f32 %v3342_v34, %v7228_v8  ;;  %v5110_v10 = vpop.f32.mrb[103].mxu1  ;;  %v7281_v52 = vadd.f32 %v7133_v6, %v3403_v26 }
 0x48e   : > { %v7284_v51 = vadd.f32 %v7137_v61, %v3404_v48 }
 0x491   : > { %v3347_v32 = vpop.f32.mrb[104].mxu1 }
 0x492   : > { %v3405_v21 = vadd.f32 %v3347_v32, %v7231_v18  ;;  %v5113_v60 = vpop.f32.mrb[105].mxu1 }
 0x493   : > { %v3350_v44 = vpop.f32.mrb[106].mxu1 }
 0x494   : > { %v3406_v19 = vadd.f32 %v3350_v44, %v7234_v16  ;;  %v5114_v25 = vpop.f32.mrb[107].mxu1  ;;  %v7289_v11 = vadd.f32 %v7145_v3, %v3405_v21 }
 0x496   : > { %v7292_v8 = vadd.f32 %v7149_v55, %v3406_v19 }
 0x499   : > { %v3355_v45 = vpop.f32.mrb[108].mxu1 }
 0x49a   : > { %v3407_v6 = vadd.f32 %v3355_v45, %v7237_v27  ;;  %v5117_v62 = vpop.f32.mrb[109].mxu1 }
 0x49b   : > { %v3358_v61 = vpop.f32.mrb[110].mxu1 }
 0x49c   : > { %v3408_v53 = vadd.f32 %v3358_v61, %v7240_v29  ;;  %v5118_v42 = vpop.f32.mrb[111].mxu1  ;;  %v7297_v18 = vadd.f32 %v7157_v28, %v3407_v6 }
 0x49e   : > { %v7300_v16 = vadd.f32 %v7162_v12, %v3408_v53 }
 0x4a1   : > { %v3363_v3 = vpop.f32.mrb[112].mxu1 }
 0x4a2   : > { %v3409_v5 = vadd.f32 %v3363_v3, %v7243_v1  ;;  %v5121_v55 = vpop.f32.mrb[113].mxu1 }
 0x4a3   : > { %v3366_v56 = vpop.f32.mrb[114].mxu1 }
 0x4a4   : > { %v3410_v38 = vadd.f32 %v3366_v56, %v7246_v23  ;;  %v5122_v27 = vpop.f32.mrb[115].mxu1  ;;  %v7305_v0 = vadd.f32 %v7171_v9, %v3409_v5 }
 0x4a6   : > { %v7308_v29 = vadd.f32 %v7176_v35, %v3410_v38 }
 0x4a9   : > { %v3371_v28 = vpop.f32.mrb[116].mxu1 }
 0x4aa   : > { %v3411_v4 = vadd.f32 %v3371_v28, %v7249_v50  ;;  %v5125_v12 = vpop.f32.mrb[117].mxu1 }
 0x4ab   : > { %v3374_v46 = vpop.f32.mrb[118].mxu1 }
 0x4ac   : > { %v3412_v31 = vadd.f32 %v3374_v46, %v7252_v15  ;;  %v5126_v57 = vpop.f32.mrb[119].mxu1  ;;  %v7313_v1 = vadd.f32 %v7186_v20, %v3411_v4 }
 0x4ae   : > { %v7344_v9 = vadd.f32 %v7191_v47, %v3412_v31 }
 0x4b1   : > { %v3379_v35 = vpop.f32.mrb[120].mxu1 }
 0x4b2   : > { %v3413_v20 = vadd.f32 %v3379_v35, %v7255_v7  ;;  %v5129_v23 = vpop.f32.mrb[121].mxu1 }
 0x4b3   : > { %v3382_v50 = vpop.f32.mrb[122].mxu1 }
 0x4b4   : > { %v3414_v15 = vadd.f32 %v3382_v50, %v7258_v33  ;;  %v5130_v39 = vpop.f32.mrb[123].mxu1  ;;  %v7349_v49 = vadd.f32 %v7200_v14, %v3413_v20 }
 0x4b6   : > { %v7352_v17 = vadd.f32 %v7205_v41, %v3414_v15 }
 0x4b9   : > { %v3387_v54 = vpop.f32.mrb[124].mxu1 }
 0x4ba   : > { %v3415_v37 = vadd.f32 %v3387_v54, %v7260_v24  ;;  %v5133_v22 = vpop.f32.mrb[125].mxu1 }
 0x4bb   : > { %v3390_v47 = vpop.f32.mrb[126].mxu1 }
 0x4bc   : > { %v3416_v59 = vadd.f32 %v3390_v47, %v7262_v63  ;;  %v5134_v26 = vpop.f32.mrb[127].mxu1  ;;  %v7357_v7 = vadd.f32 %v7264_v36, %v3415_v37  ;;  %v7369_v63 = vld [vmem:[%s7574_s6] ss:$0 sm:$0xff] }
 0x4be   : > { %v7360_v33 = vadd.f32 %v7266_v30, %v3416_v59 }
 0x4c1   : > { %v3395_v13 = vpop.f32.mrb[128].mxu1 }
 0x4c2   : > { %v3417_v14 = vadd.f32 %v3395_v13, %v7268_v40  ;;  %v5137_v34 = vpop.f32.mrb[129].mxu1 }
 0x4c3   : > { %v3398_v41 = vpop.f32.mrb[130].mxu1 }
 0x4c4   : > { %v5138_v48 = vpop.f32.mrb[131].mxu1  ;;  %v7364_v10 = vadd.f32 %v7270_v58, %v3417_v14 }
 0x4c9   : > { %v3745_v24 = vpop.f32.mrb[132].mxu1 }
 0x4ca   : > { %v3815_v36 = vadd.f32 %v3745_v24, %v7273_v43  ;;  %v5193_v32 = vpop.f32.mrb[133].mxu1 }
 0x4cb   : > { %v3748_v30 = vpop.f32.mrb[134].mxu1 }
 0x4cc   : > { %v7373_v21 = vadd.f32 %v7369_v63, %v3815_v36  ;;  %v3816_v40 = vadd.f32 %v3748_v30, %v7276_v2  ;;  %v5194_v60 = vpop.f32.mrb[135].mxu1 }
 0x4ce   : > { %v4614_v44 = vmul.f32 -1.442695, %v7373_v21  ;;  %v7378_v58 = vadd.f32 %v7369_v63, %v3816_v40 }
 0x4d0   : > { %5575 = vpow2.f32 %v4614_v44  ;;  %v4615_v19 = vmul.f32 -1.442695, %v7378_v58 }
 0x4d1   : > { %v3753_v25 = vpop.f32.mrb[136].mxu1 }
 0x4d2   : > { %5577 = vpow2.f32 %v4615_v19  ;;  %v3817_v43 = vadd.f32 %v3753_v25, %v7281_v52  ;;  %v5197_v45 = vpop.f32.mrb[137].mxu1 }
 0x4d3   : > { %v3756_v6 = vpop.f32.mrb[138].mxu1 }
 0x4d4   : > { %v7383_v62 = vadd.f32 %v7369_v63, %v3817_v43  ;;  %v3818_v2 = vadd.f32 %v3756_v6, %v7284_v51  ;;  %v5198_v61 = vpop.f32.mrb[139].mxu1 }
 0x4d6   : > { %v4616_v53 = vmul.f32 -1.442695, %v7383_v62  ;;  %v7388_v42 = vadd.f32 %v7369_v63, %v3818_v2 }
 0x4d8   : > { %5579 = vpow2.f32 %v4616_v53  ;;  %v4617_v3 = vmul.f32 -1.442695, %v7388_v42 }
 0x4d9   : > { %v3761_v5 = vpop.f32.mrb[140].mxu1 }
 0x4da   : > { %v5576_v55 = vpop.eup %5575  ;;  %5581 = vpow2.f32 %v4617_v3  ;;  %v3819_v52 = vadd.f32 %v3761_v5, %v7289_v11  ;;  %v5201_v56 = vpop.f32.mrb[141].mxu1 }
 0x4db   : > { %v3924_v38 = vadd.f32 1.0, %v5576_v55  ;;  %v3764_v27 = vpop.f32.mrb[142].mxu1 }
 0x4dc   : > { %v5578_v28 = vpop.eup %5577  ;;  %v7393_v51 = vadd.f32 %v7369_v63, %v3819_v52  ;;  %v3820_v4 = vadd.f32 %v3764_v27, %v7292_v8  ;;  %v5202_v12 = vpop.f32.mrb[143].mxu1 }
 0x4dd   : > { %5583 = vrcp.f32 %v3924_v38  ;;  %v3925_v46 = vadd.f32 1.0, %v5578_v28 }
 0x4de   : > { %v4618_v31 = vmul.f32 -1.442695, %v7393_v51  ;;  %v7398_v57 = vadd.f32 %v7369_v63, %v3820_v4 }
 0x4df   : > { %5585 = vrcp.f32 %v3925_v46 }
 0x4e0   : > { %5587 = vpow2.f32 %v4618_v31  ;;  %v4619_v11 = vmul.f32 -1.442695, %v7398_v57 }
 0x4e1   : > { %v3769_v35 = vpop.f32.mrb[144].mxu1 }
 0x4e2   : > { %v5580_v20 = vpop.eup %5579  ;;  %5589 = vpow2.f32 %v4619_v11  ;;  %v3821_v23 = vadd.f32 %v3769_v35, %v7297_v18  ;;  %v5205_v50 = vpop.f32.mrb[145].mxu1 }
 0x4e3   : > { %v3926_v15 = vadd.f32 1.0, %v5580_v20  ;;  %v3772_v8 = vpop.f32.mrb[146].mxu1 }
 0x4e4   : > { %v5582_v39 = vpop.eup %5581  ;;  %v7403_v54 = vadd.f32 %v7369_v63, %v3821_v23  ;;  %v3822_v37 = vadd.f32 %v3772_v8, %v7300_v16  ;;  %v5206_v22 = vpop.f32.mrb[147].mxu1 }
 0x4e5   : > { %5591 = vrcp.f32 %v3926_v15  ;;  %v3927_v47 = vadd.f32 1.0, %v5582_v39 }
 0x4e6   : > { %v4620_v59 = vmul.f32 -1.442695, %v7403_v54  ;;  %v7408_v26 = vadd.f32 %v7369_v63, %v3822_v37 }
 0x4e7   : > { %v5584_v13 = vpop.eup %5583  ;;  %5593 = vrcp.f32 %v3927_v47 }
 0x4e8   : > { %5595 = vpow2.f32 %v4620_v59  ;;  %v4621_v18 = vmul.f32 -1.442695, %v7408_v26  ;;  %3992 = vrot.lane.b32.xlu1 %v5584_v13, %s5655_s16 }
 0x4e9   : > { %v5586_v14 = vpop.eup %5585  ;;  %v3777_v34 = vpop.f32.mrb[148].mxu1 }
 0x4ea   : > { %v5588_v41 = vpop.eup %5587  ;;  %5597 = vpow2.f32 %v4621_v18  ;;  %v3823_v16 = vadd.f32 %v3777_v34, %v7305_v0  ;;  %3994 = vrot.lane.b32.xlu0 %v5586_v14, %s5655_s16  ;;  %v5209_v48 = vpop.f32.mrb[149].mxu1 }
 0x4eb   : > { %v3928_v24 = vadd.f32 1.0, %v5588_v41  ;;  %v3780_v36 = vpop.f32.mrb[150].mxu1 }
 0x4ec   : > { %v5590_v32 = vpop.eup %5589  ;;  %v7415_v30 = vadd.f32 %v7369_v63, %v3823_v16  ;;  %v3824_v40 = vadd.f32 %v3780_v36, %v7308_v29  ;;  %v5210_v60 = vpop.f32.mrb[151].mxu1 }
 0x4ed   : > { %5599 = vrcp.f32 %v3928_v24  ;;  %v3929_v44 = vadd.f32 1.0, %v5590_v32 }
 0x4ee   : > { %v4622_v19 = vmul.f32 -1.442695, %v7415_v30  ;;  %v7420_v25 = vadd.f32 %v7369_v63, %v3824_v40 }
 0x4ef   : > { %v5592_v0 = vpop.eup %5591  ;;  %5601 = vrcp.f32 %v3929_v44 }
 0x4f0   : > { %5603 = vpow2.f32 %v4622_v19  ;;  %v4623_v43 = vmul.f32 -1.442695, %v7420_v25  ;;  %3996 = vrot.lane.b32.xlu1 %v5592_v0, %s5655_s16 }
 0x4f1   : > { %v5594_v45 = vpop.eup %5593  ;;  %v3785_v6 = vpop.f32.mrb[152].mxu1 }
 0x4f2   : > { %v5596_v2 = vpop.eup %5595  ;;  %5605 = vpow2.f32 %v4623_v43  ;;  %v3825_v29 = vadd.f32 %v3785_v6, %v7313_v1  ;;  %3998 = vrot.lane.b32.xlu0 %v5594_v45, %s5655_s16  ;;  %v5213_v61 = vpop.f32.mrb[153].mxu1 }
 0x4f3   : > { %v3930_v53 = vadd.f32 1.0, %v5596_v2  ;;  %v3788_v3 = vpop.f32.mrb[154].mxu1 }
 0x4f4   : > { %v5598_v5 = vpop.eup %5597  ;;  %v7427_v55 = vadd.f32 %v7369_v63, %v3825_v29  ;;  %v3826_v52 = vadd.f32 %v3788_v3, %v7344_v9  ;;  %v5214_v56 = vpop.f32.mrb[155].mxu1 }
 0x4f5   : > { %5607 = vrcp.f32 %v3930_v53  ;;  %v3931_v38 = vadd.f32 1.0, %v5598_v5 }
 0x4f6   : > { %v4624_v27 = vmul.f32 -1.442695, %v7427_v55  ;;  %v7432_v28 = vadd.f32 %v7369_v63, %v3826_v52 }
 0x4f7   : > { %v5600_v1 = vpop.eup %5599  ;;  %5609 = vrcp.f32 %v3931_v38 }
 0x4f8   : > { %5611 = vpow2.f32 %v4624_v27  ;;  %v4625_v4 = vmul.f32 -1.442695, %v7432_v28  ;;  %4000 = vrot.lane.b32.xlu1 %v5600_v1, %s5655_s16 }
 0x4f9   : > { %v5602_v12 = vpop.eup %5601  ;;  %v3793_v46 = vpop.f32.mrb[156].mxu1 }
 0x4fa   : > { %v5604_v31 = vpop.eup %5603  ;;  %5613 = vpow2.f32 %v4625_v4  ;;  %v3827_v9 = vadd.f32 %v3793_v46, %v7349_v49  ;;  %4002 = vrot.lane.b32.xlu0 %v5602_v12, %s5655_s16  ;;  %v5217_v11 = vpop.f32.mrb[157].mxu1 }
 0x4fb   : > { %v3932_v35 = vadd.f32 1.0, %v5604_v31  ;;  %v3796_v20 = vpop.f32.mrb[158].mxu1  ;;  %v4093_v11 = vld [vmem:[%s7570_s2 + $0x80] sm:$0xff] }
 0x4fc   : > { %v5606_v23 = vpop.eup %5605  ;;  %v7439_v50 = vadd.f32 %v7369_v63, %v3827_v9  ;;  %v3828_v15 = vadd.f32 %v3796_v20, %v7352_v17  ;;  %v5218_v8 = vpop.f32.mrb[159].mxu1  ;;  %v4092_v20 = vld [vmem:[%s7570_s2 + $0x78] sm:$0xff] }
 0x4fd   : > { %5615 = vrcp.f32 %v3932_v35  ;;  %v3933_v39 = vadd.f32 1.0, %v5606_v23  ;;  %v4097_v23 = vpop.permute.xlu0 %4096 }
 0x4fe   : > { %v4626_v37 = vmul.f32 -1.442695, %v7439_v50  ;;  %v7444_v22 = vadd.f32 %v7369_v63, %v3828_v15  ;;  %v4102_v15 = vpop.permute.xlu1 %4101 }
 0x4ff   : > { %v5608_v49 = vpop.eup %5607  ;;  %5617 = vrcp.f32 %v3933_v39 }
 0x500   : > { %5619 = vpow2.f32 %v4626_v37  ;;  %v4627_v47 = vmul.f32 -1.442695, %v7444_v22  ;;  %4004 = vrot.lane.b32.xlu1 %v5608_v49, %s5655_s16 }
 0x501   : > { %v5610_v59 = vpop.eup %5609  ;;  %v3801_v13 = vpop.f32.mrb[160].mxu1 }
 0x502   : > { %v5612_v18 = vpop.eup %5611  ;;  %5621 = vpow2.f32 %v4627_v47  ;;  %v3829_v17 = vadd.f32 %v3801_v13, %v7357_v7  ;;  %4006 = vrot.lane.b32.xlu0 %v5610_v59, %s5655_s16  ;;  %v5221_v14 = vpop.f32.mrb[161].mxu1 }
 0x503   : > { %v3934_v34 = vadd.f32 1.0, %v5612_v18  ;;  %v3804_v41 = vpop.f32.mrb[162].mxu1  ;;  %v4107_v8 = vpop.permute.xlu0 %4106 }
 0x504   : > { %v5614_v16 = vpop.eup %5613  ;;  %v7451_v48 = vadd.f32 %v7369_v63, %v3829_v17  ;;  %v3830_v24 = vadd.f32 %v3804_v41, %v7360_v33  ;;  %v5222_v36 = vpop.f32.mrb[163].mxu1 }
 0x505   : > { %5623 = vrcp.f32 %v3934_v34  ;;  %v3935_v32 = vadd.f32 1.0, %v5614_v16  ;;  %v4112_v39 = vpop.permute.xlu1 %4111 }
 0x506   : > { %v4628_v40 = vmul.f32 -1.442695, %v7451_v48  ;;  %v7456_v60 = vadd.f32 %v7369_v63, %v3830_v24  ;;  %v3856_v24 = vld [vmem:[%s5712_s29 + $0x20] sm:$0xff] }
 0x507   : > { %v5616_v7 = vpop.eup %5615  ;;  %5625 = vrcp.f32 %v3935_v32  ;;  %v4117_v37 = vpop.permute.xlu0 %4116 }
 0x508   : > { %5627 = vpow2.f32 %v4628_v40  ;;  %v4629_v44 = vmul.f32 -1.442695, %v7456_v60  ;;  %4008 = vrot.lane.b32.xlu1 %v5616_v7, %s5655_s16  ;;  %v3857_v40 = vld [vmem:[%s5712_s29 + $0x28] sm:$0xff] }
 0x509   : > { %v5618_v19 = vpop.eup %5617  ;;  %v3809_v0 = vpop.f32.mrb[164].mxu1 }
 0x50a   : > { %v5620_v43 = vpop.eup %5619  ;;  %5629 = vpow2.f32 %v4629_v44  ;;  %v3831_v33 = vadd.f32 %v3809_v0, %v7364_v10  ;;  %4010 = vrot.lane.b32.xlu0 %v5618_v19, %s5655_s16  ;;  %v5225_v45 = vpop.f32.mrb[165].mxu1 }
 0x50b   : > { %v3936_v6 = vadd.f32 1.0, %v5620_v43  ;;  %v3812_v2 = vpop.f32.mrb[166].mxu1  ;;  %v4122_v49 = vpop.permute.xlu1 %4121  ;;  %v3858_v45 = vld [vmem:[%s5712_s29 + $0x30] sm:$0xff] }
 0x50c   : > { %v5622_v29 = vpop.eup %5621  ;;  %v7463_v61 = vadd.f32 %v7369_v63, %v3831_v33  ;;  %v5226_v53 = vpop.f32.mrb[167].mxu1  ;;  %v3859_v2 = vld [vmem:[%s5712_s29 + $0x38] sm:$0xff] }
 0x50d   : > { %5631 = vrcp.f32 %v3936_v6  ;;  %v3937_v3 = vadd.f32 1.0, %v5622_v29  ;;  %v4127_v47 = vpop.permute.xlu0 %4126 }
 0x50e   : > { %v4630_v5 = vmul.f32 -1.442695, %v7463_v61 }
 0x50f   : > { %v5624_v52 = vpop.eup %5623  ;;  %5633 = vrcp.f32 %v3937_v3  ;;  %v4132_v59 = vpop.permute.xlu1 %4131 }
 0x510   : > { %5635 = vpow2.f32 %v4630_v5  ;;  %4012 = vrot.lane.b32.xlu1 %v5624_v52, %s5655_s16 }
 0x511   : > { %v5626_v10 = vpop.eup %5625  ;;  %v4137_v13 = vpop.permute.xlu0 %4136 }
 0x512   : > { %v5628_v56 = vpop.eup %5627  ;;  %4014 = vrot.lane.b32.xlu0 %v5626_v10, %s5655_s16  ;;  %v3860_v10 = vld [vmem:[%s5712_s29 + $0x40] sm:$0xff] }
 0x513   : > { %v3938_v38 = vadd.f32 1.0, %v5628_v56  ;;  %v7479_v18 = vpop.permute.xlu1 %4141 }
 0x514   : > { %v5630_v27 = vpop.eup %5629 }
 0x515   : > { %5637 = vrcp.f32 %v3938_v38  ;;  %v3939_v1 = vadd.f32 1.0, %v5630_v27  ;;  %v7481_v17 = vpop.permute.xlu0 %4146  ;;  %v3861_v38 = vld [vmem:[%s5712_s29 + $0x48] sm:$0xff] }
 0x517   : > { %v5632_v63 = vpop.eup %5631  ;;  %5639 = vrcp.f32 %v3939_v1  ;;  %v7483_v14 = vpop.permute.xlu1 %4151 }
 0x518   : > { %4016 = vrot.lane.b32.xlu1 %v5632_v63, %s5655_s16 }
 0x519   : > { %v5634_v4 = vpop.eup %5633  ;;  %v7485_v34 = vpop.permute.xlu0 %4156 }
 0x51a   : > { %v5636_v12 = vpop.eup %5635  ;;  %4018 = vrot.lane.b32.xlu0 %v5634_v4, %s5655_s16 }
 0x51b   : > { %v3940_v46 = vadd.f32 1.0, %v5636_v12  ;;  %v7487_v41 = vpop.permute.xlu1 %4161 }
 0x51d   : > { %5641 = vrcp.f32 %v3940_v46  ;;  %v7489_v16 = vpop.permute.xlu0 %4166  ;;  %v3862_v46 = vld [vmem:[%s5712_s29 + $0x50] sm:$0xff] }
 0x51f   : > { %v5638_v31 = vpop.eup %5637 }
 0x520   : > { %4020 = vrot.lane.b32.xlu1 %v5638_v31, %s5655_s16 }
 0x521   : > { %v5640_v9 = vpop.eup %5639 }
 0x522   : > { %4022 = vrot.lane.b32.xlu0 %v5640_v9, %s5655_s16  ;;  %v3863_v9 = vld [vmem:[%s5712_s29 + $0x58] sm:$0xff] }
 0x526   : > { %4176 = vperm.xlu0 %5350, %v4093_v11  }
 0x527   : > { %v5642_v35 = vpop.eup %5641 }
 0x528   : > { %4024 = vrot.lane.b32.xlu1 %v5642_v35, %s5655_s16 }
 0x52c   : > { %4171 = vperm.xlu1 %5349, %v4092_v20  }
 0x55a   : > { %v3993_v36 = vpop.permute.xlu1 %3992 }
 0x55b   : > { %v4043_v32 = vmul.f32 %v3993_v36, %v7373_v21 }
 0x55c   : > { %v3995_v7 = vpop.permute.xlu0 %3994 }
 0x55d   : > { %v4060_v44 = vadd.f32 %v4043_v32, %v3856_v24  ;;  %v4044_v19 = vmul.f32 %v3995_v7, %v7378_v58  ;;  %v3866_v32 = vld [vmem:[%s5712_s29 + $0x70] sm:$0xff]  ;;  %v3867_v7 = vld [vmem:[%s5712_s29 + $0x78] sm:$0xff] }
 0x55f   : > { %v4179_v0 = vmul.f32 %v4097_v23, %v4060_v44  ;;  %v4061_v43 = vadd.f32 %v4044_v19, %v3857_v40 }
 0x561   : > { %4200 = vst.msk [vmem:[%s7320_s15 + $0x20] sm:$0xff] %vm712_vm9, %v4179_v0  ;;  %v4180_v33 = vmul.f32 %v4102_v15, %v4061_v43  ;;  %v3868_v43 = vld [vmem:[%s5712_s29 + $0x80] sm:$0xff] }
 0x562   : > { %v3997_v6 = vpop.permute.xlu1 %3996 }
 0x563   : > { %4201 = vst.msk [vmem:[%s7320_s15 + $0x28] sm:$0xff] %vm712_vm9, %v4180_v33  ;;  %v4045_v21 = vmul.f32 %v3997_v6, %v7383_v62 }
 0x564   : > { %v3999_v29 = vpop.permute.xlu0 %3998 }
 0x565   : > { %v4062_v53 = vadd.f32 %v4045_v21, %v3858_v45  ;;  %v4046_v58 = vmul.f32 %v3999_v29, %v7388_v42  ;;  %v3869_v45 = vld [vmem:[%s5712_s29 + $0x88] sm:$0xff]  ;;  %v3870_v29 = vld [vmem:[%s5712_s29 + $0x90] sm:$0xff] }
 0x567   : > { %v4181_v3 = vmul.f32 %v4107_v8, %v4062_v53  ;;  %v4063_v5 = vadd.f32 %v4046_v58, %v3859_v2  ;;  %v3864_v8 = vld [vmem:[%s5712_s29 + $0x60] sm:$0xff] }
 0x569   : > { %4202 = vst.msk [vmem:[%s7320_s15 + $0x30] sm:$0xff] %vm712_vm9, %v4181_v3  ;;  %v4182_v52 = vmul.f32 %v4112_v39, %v4063_v5 }
 0x56a   : > { %v4001_v56 = vpop.permute.xlu1 %4000 }
 0x56b   : > { %4203 = vst.msk [vmem:[%s7320_s15 + $0x38] sm:$0xff] %vm712_vm9, %v4182_v52  ;;  %v4047_v62 = vmul.f32 %v4001_v56, %v7393_v51  ;;  %v3872_v52 = vld [vmem:[%s5712_s29 + $0xa0] sm:$0xff] }
 0x56c   : > { %v4003_v27 = vpop.permute.xlu0 %4002 }
 0x56d   : > { %v4064_v1 = vadd.f32 %v4047_v62, %v3860_v10  ;;  %v4048_v42 = vmul.f32 %v4003_v27, %v7398_v57 }
 0x56f   : > { %v4183_v63 = vmul.f32 %v4117_v37, %v4064_v1  ;;  %v4065_v4 = vadd.f32 %v4048_v42, %v3861_v38  ;;  %v3865_v37 = vld [vmem:[%s5712_s29 + $0x68] sm:$0xff]  ;;  %v3871_v38 = vld [vmem:[%s5712_s29 + $0x98] sm:$0xff] }
 0x571   : > { %4204 = vst.msk [vmem:[%s7320_s15 + $0x40] sm:$0xff] %vm712_vm9, %v4183_v63  ;;  %v4184_v12 = vmul.f32 %v4122_v49, %v4065_v4 }
 0x572   : > { %v4005_v31 = vpop.permute.xlu1 %4004 }
 0x573   : > { %4205 = vst.msk [vmem:[%s7320_s15 + $0x48] sm:$0xff] %vm712_vm9, %v4184_v12  ;;  %v4049_v51 = vmul.f32 %v4005_v31, %v7403_v54 }
 0x574   : > { %v4007_v11 = vpop.permute.xlu0 %4006 }
 0x575   : > { %v4066_v35 = vadd.f32 %v4049_v51, %v3862_v46  ;;  %v4050_v57 = vmul.f32 %v4007_v11, %v7408_v26 }
 0x577   : > { %v4185_v20 = vmul.f32 %v4127_v47, %v4066_v35  ;;  %v4067_v23 = vadd.f32 %v4050_v57, %v3863_v9 }
 0x579   : > { %4206 = vst.msk [vmem:[%s7320_s15 + $0x50] sm:$0xff] %vm712_vm9, %v4185_v20  ;;  %v4186_v15 = vmul.f32 %v4132_v59, %v4067_v23 }
 0x57a   : > { %v4009_v39 = vpop.permute.xlu1 %4008 }
 0x57b   : > { %4207 = vst.msk [vmem:[%s7320_s15 + $0x58] sm:$0xff] %vm712_vm9, %v4186_v15  ;;  %v4051_v54 = vmul.f32 %v4009_v39, %v7415_v30 }
 0x57c   : > { %v4011_v49 = vpop.permute.xlu0 %4010 }
 0x57d   : > { %v4068_v24 = vadd.f32 %v4051_v54, %v3864_v8  ;;  %v4052_v26 = vmul.f32 %v4011_v49, %v7420_v25 }
 0x57f   : > { %v4187_v47 = vmul.f32 %v4137_v13, %v4068_v24  ;;  %v4069_v36 = vadd.f32 %v4052_v26, %v3865_v37 }
 0x581   : > { %4208 = vst.msk [vmem:[%s7320_s15 + $0x60] sm:$0xff] %vm712_vm9, %v4187_v47  ;;  %v4188_v59 = vmul.f32 %v7479_v18, %v4069_v36 }
 0x582   : > { %v4013_v40 = vpop.permute.xlu1 %4012 }
 0x583   : > { %4209 = vst.msk [vmem:[%s7320_s15 + $0x68] sm:$0xff] %vm712_vm9, %v4188_v59  ;;  %v4053_v30 = vmul.f32 %v4013_v40, %v7427_v55 }
 0x584   : > { %v4015_v44 = vpop.permute.xlu0 %4014 }
 0x585   : > { %v4070_v19 = vadd.f32 %v4053_v30, %v3866_v32  ;;  %v4054_v25 = vmul.f32 %v4015_v44, %v7432_v28 }
 0x587   : > { %v4189_v13 = vmul.f32 %v7481_v17, %v4070_v19  ;;  %v4071_v0 = vadd.f32 %v4054_v25, %v3867_v7 }
 0x589   : > { %4210 = vst.msk [vmem:[%s7320_s15 + $0x70] sm:$0xff] %vm712_vm9, %v4189_v13  ;;  %v4190_v18 = vmul.f32 %v7483_v14, %v4071_v0 }
 0x58a   : > { %v4017_v33 = vpop.permute.xlu1 %4016 }
 0x58b   : > { %4211 = vst.msk [vmem:[%s7320_s15 + $0x78] sm:$0xff] %vm712_vm9, %v4190_v18  ;;  %v4055_v55 = vmul.f32 %v4017_v33, %v7439_v50 }
 0x58c   : > { %v4019_v6 = vpop.permute.xlu0 %4018 }
 0x58d   : > { %v4072_v21 = vadd.f32 %v4055_v55, %v3868_v43  ;;  %v4056_v28 = vmul.f32 %v4019_v6, %v7444_v22 }
 0x58f   : > { %v4191_v17 = vmul.f32 %v7485_v34, %v4072_v21  ;;  %v4073_v2 = vadd.f32 %v4056_v28, %v3869_v45 }
 0x591   : > { %4212 = vst.msk [vmem:[%s7320_s15 + $0x80] sm:$0xff] %vm712_vm9, %v4191_v17  ;;  %v4192_v14 = vmul.f32 %v7487_v41, %v4073_v2 }
 0x592   : > { %v4021_v53 = vpop.permute.xlu1 %4020 }
 0x593   : > { %4213 = vst.msk [vmem:[%s7320_s15 + $0x88] sm:$0xff] %vm712_vm9, %v4192_v14  ;;  %v4057_v50 = vmul.f32 %v4021_v53, %v7451_v48 }
 0x594   : > { %v4023_v5 = vpop.permute.xlu0 %4022 }
 0x595   : > { %v4074_v58 = vadd.f32 %v4057_v50, %v3870_v29  ;;  %v4058_v56 = vmul.f32 %v4023_v5, %v7456_v60 }
 0x597   : > { %v4193_v3 = vmul.f32 %v7489_v16, %v4074_v58  ;;  %v4075_v48 = vadd.f32 %v4058_v56, %v3871_v38 }
 0x599   : > { %4214 = vst.msk [vmem:[%s7320_s15 + $0x90] sm:$0xff] %vm712_vm9, %v4193_v3 }
 0x59a   : > { %v4025_v22 = vpop.permute.xlu1 %4024 }
 0x59b   : > { %v4059_v34 = vmul.f32 %v4025_v22, %v7463_v61 }
 0x59d   : > { %v4076_v41 = vadd.f32 %v4059_v34, %v3872_v52 }
 0x5a5   : > { %v4177_v10 = vpop.permute.xlu0 %4176 }
 0x5a6   : > { %v4195_v62 = vmul.f32 %v4177_v10, %v4076_v41 }
 0x5a8   : > { %4216 = vst.msk [vmem:[%s7320_s15 + $0xa0] sm:$0xff] %vm712_vm9, %v4195_v62 }
 0x5ab   : > { %v4172_v27 = vpop.permute.xlu1 %4171 }
 0x5ac   : > { %v4194_v1 = vmul.f32 %v4172_v27, %v4075_v48 }
 0x5ae   : > { %4215 = vst.msk [vmem:[%s7320_s15 + $0x98] sm:$0xff] %vm712_vm9, %v4194_v1 }
 0x5af PF: > { %s17_s24 = sadd.s32 1, %s5649_s24  }
 0x5b0   : > { %p14_p4 = scmp.ge.s32.totalorder %s17_s24, 4  }
 0x5b2   :  { %16 = sbr.rel (!%p14_p4) target bundleno = 1 (0x1), region = 88 }

</bundles_post_ra>
